<compile_context>
chip_gen: v7x
topology: tpu7x:2x2x1
jax: 0.10.0
libtpu: 0.0.40
codegen_flags: <defaults>
</compile_context>

<pallas_src>
import functools

import jax
import jax.numpy as jnp
from jax.experimental import pallas as pl
from jax.experimental.pallas import tpu as pltpu


def _cascade_attn_kernel(x_ref, t_ref, wq_ref, wk_ref, wv_ref, wp_ref, bp_ref,
                         o_ref, q_scr, m_scr, l_scr, acc_scr, *,
                         num_heads, matmul_dtype):
    # x_ref:  (Bb, tq, C)   query-side tokens (this batch block / query tile)
    # t_ref:  (Bb, tk, C)   key/value-side tokens (this kv tile)
    # wq/wk/wv_ref: (C, C)  input projections, (C_in, C_out); Wq pre-scaled
    # wp_ref: (C, C)        output Linear weight, (C_in, C_out)
    # bp_ref: (1, C)        output Linear bias
    # q_scr:  (G, tq, d)    per-head Q cached across the kv sweep (bf16)
    # m/l_scr:(G, tq, 1)    online-softmax running max / denominator (f32)
    # acc_scr:(G, tq, d)    online-softmax output accumulator (f32)
    Bb, tq, C = x_ref.shape
    _, tk, _ = t_ref.shape
    d = C // num_heads
    kv = pl.program_id(2)

    @pl.when(kv == 0)
    def _init():
        # Q projection: one full-width (Bb*tq, C) @ (C, C) MXU matmul (softmax
        # scale already folded into Wq); split heads with static lane slices
        # and cache per-head Q (head-major: g = h*Bb + b) across the kv sweep.
        xq = x_ref[...].reshape(Bb * tq, C).astype(matmul_dtype)
        qf = jnp.dot(xq, wq_ref[...], preferred_element_type=jnp.float32)
        qf3 = qf.reshape(Bb, tq, C)
        for h in range(num_heads):
            q_scr[h * Bb:(h + 1) * Bb] = (
                qf3[:, :, h * d:(h + 1) * d].astype(matmul_dtype))
        m_scr[...] = jnp.full_like(m_scr, -jnp.inf)
        l_scr[...] = jnp.zeros_like(l_scr)
        acc_scr[...] = jnp.zeros_like(acc_scr)

    # K/V projections for this kv tile only: full-width (Bb*tk, C) @ (C, C)
    # matmuls, then a per-head relayout to the (G, tk, d) batched layout.
    t2d = t_ref[...].reshape(Bb * tk, C).astype(matmul_dtype)
    kf = jnp.dot(t2d, wk_ref[...], preferred_element_type=jnp.float32)
    vf = jnp.dot(t2d, wv_ref[...], preferred_element_type=jnp.float32)
    kf3 = kf.reshape(Bb, tk, C)
    vf3 = vf.reshape(Bb, tk, C)
    kh = jnp.concatenate(
        [kf3[:, :, h * d:(h + 1) * d] for h in range(num_heads)],
        axis=0).astype(matmul_dtype)                       # (G, tk, d)
    vh = jnp.concatenate(
        [vf3[:, :, h * d:(h + 1) * d] for h in range(num_heads)],
        axis=0).astype(matmul_dtype)                       # (G, tk, d)

    # Scores for this kv tile, batched over (head, batch); online softmax.
    s = jnp.einsum('gnd,gmd->gnm', q_scr[...], kh,
                   preferred_element_type=jnp.float32)     # (G, tq, tk)
    m_prev = m_scr[...]
    m_new = jnp.maximum(m_prev, jnp.max(s, axis=-1, keepdims=True))
    alpha = jnp.exp(m_prev - m_new)
    p = jnp.exp(s - m_new)                 # reuse as the probability buffer
    l_scr[...] = alpha * l_scr[...] + jnp.sum(p, axis=-1, keepdims=True)
    acc_scr[...] = alpha * acc_scr[...] + jnp.einsum(
        'gnm,gmd->gnd', p.astype(matmul_dtype), vh,
        preferred_element_type=jnp.float32)
    m_scr[...] = m_new

    @pl.when(kv == pl.num_programs(2) - 1)
    def _finalize():
        o = acc_scr[...] * pl.reciprocal(l_scr[...], approx=True)  # (G, tq, d)
        # Head merge (h-major within C, matching the torch concat), then ONE
        # full-width output projection + bias instead of per-head matmuls+sum.
        om = jnp.concatenate(
            [o[h * Bb:(h + 1) * Bb] for h in range(num_heads)],
            axis=-1)                                       # (Bb, tq, C)
        om = om.reshape(Bb * tq, C).astype(matmul_dtype)
        out = jnp.dot(om, wp_ref[...], preferred_element_type=jnp.float32)
        out = out + bp_ref[...].astype(jnp.float32)
        o_ref[...] = out.reshape(Bb, tq, C).astype(o_ref.dtype)


def _largest_tile(n, cap, pref=128):
    """Largest divisor of n that is <= cap, preferring multiples of `pref`,
    then multiples of 8; falls back to the full extent (always legal)."""
    if n <= cap:
        return n
    for align in (pref, 8):
        start = cap - cap % align
        for t in range(start, 0, -align):
            if n % t == 0:
                return t
    return n


def _padded_bytes(shape, dtype):
    """Rough VMEM footprint of an array, padded to (8, 128) tiles."""
    s = list(shape)
    s[-1] = -(-s[-1] // 128) * 128
    if len(s) >= 2:
        s[-2] = -(-s[-2] // 8) * 8
    n = 1
    for v in s:
        n *= v
    return n * jnp.dtype(dtype).itemsize


def cascade_quadtree_attention(x, target, params, *, num_heads,
                               batch_block=None, q_tile=None, kv_tile=None,
                               matmul_dtype=jnp.bfloat16):
    """x: (B, N, C), target: (B, N1, C).  Returns ((B, N, C), None)."""
    B, N, C = x.shape
    _, N1, _ = target.shape
    assert C % num_heads == 0
    d = C // num_heads
    scale = d ** -0.5                    # qk_scale default (head_dim ** -0.5)

    # Tile choices: tq aims at the MXU M dim (256) and tk at a few hundred KV
    # rows per step; both fall back to the full extent at small sizes.
    # On single-TC v5e/v6e, pass larger tiles / batch_block=B explicitly
    # (128 MiB VMEM, grid parallelism buys nothing there).
    if q_tile is None:
        q_tile = _largest_tile(N, 256)
    if kv_tile is None:
        kv_tile = _largest_tile(N1, 512)
    assert N % q_tile == 0 and N1 % kv_tile == 0
    grid_q = N // q_tile
    grid_kv = N1 // kv_tile

    if batch_block is None:
        if B >= 2 and grid_q == 1:
            # Keep >= 2 "parallel" grid steps for dual-TC parts (v7x).
            batch_block = max(bb for bb in range(1, B) if B % bb == 0)
        else:
            batch_block = B
    assert B % batch_block == 0
    grid_b = B // batch_block
    G = batch_block * num_heads

    # Conv1x1 / Linear weights are (C_out, C_in): y = x @ W.T, so hand the
    # kernel W.T = (C_in, C_out).  Softmax scale is folded into Wq.
    wq_k = (params["wq"] * scale).T.astype(matmul_dtype)
    wk_k = params["wk"].T.astype(matmul_dtype)
    wv_k = params["wv"].T.astype(matmul_dtype)
    wp_k = params["wp"].T.astype(matmul_dtype)
    bp2d = params["bp"].reshape(1, C).astype(jnp.float32)

    in_bytes = jnp.dtype(x.dtype).itemsize
    w_itemsize = jnp.dtype(matmul_dtype).itemsize

    # Explicit scoped-VMEM limit derived from the live footprint (double
    # buffers for blocked I/O, scratch, and the per-step intermediates),
    # capped so it stays within every generation's physical VMEM.
    vmem_est = (
        2 * _padded_bytes((batch_block, q_tile, C), x.dtype)        # x
        + 2 * _padded_bytes((batch_block, kv_tile, C), target.dtype)  # target
        + 2 * _padded_bytes((batch_block, q_tile, C), x.dtype)      # out
        + 2 * 4 * _padded_bytes((C, C), matmul_dtype)               # weights
        + 2 * _padded_bytes((1, C), jnp.float32)                    # bias
        + _padded_bytes((G, q_tile, d), matmul_dtype)               # q scratch
        + _padded_bytes((G, q_tile, d), jnp.float32)                # acc
        + 2 * _padded_bytes((G, q_tile, 1), jnp.float32)            # m, l
        + 2 * _padded_bytes((G, q_tile, kv_tile), jnp.float32)      # s / p
        + 4 * _padded_bytes((batch_block, kv_tile, C), jnp.float32))  # k/v
    vmem_limit = int(min(max(2 * vmem_est, 32 * 2**20), 64 * 2**20))

    flops = int(2 * B * (N * C * C + 2 * N1 * C * C        # q / k / v proj
                         + 2 * N * N1 * C                  # QK^T + P@V
                         + N * C * C))                     # output Linear
    transcendentals = int(B * num_heads * N * (N1 + grid_kv + 1))
    bytes_accessed = int((B * N * C + grid_q * B * N1 * C + B * N * C)
                         * in_bytes + 4 * C * C * w_itemsize + 4 * C)

    kernel = functools.partial(_cascade_attn_kernel, num_heads=num_heads,
                               matmul_dtype=matmul_dtype)

    def _call(single_buffer_weights):
        wkw = {}
        if single_buffer_weights:
            # Constant-index weight/bias blocks: no re-fetch across the grid,
            # so a single VMEM buffer is enough.
            wkw = dict(pipeline_mode=pl.Buffered(1))
        grid_spec = pltpu.PrefetchScalarGridSpec(
            num_scalar_prefetch=0,
            grid=(grid_b, grid_q, grid_kv),
            in_specs=[
                pl.BlockSpec((batch_block, q_tile, C),
                             lambda b, q, k: (b, q, 0)),             # x
                pl.BlockSpec((batch_block, kv_tile, C),
                             lambda b, q, k: (b, k, 0)),             # target
                pl.BlockSpec((C, C), lambda b, q, k: (0, 0), **wkw),  # Wq
                pl.BlockSpec((C, C), lambda b, q, k: (0, 0), **wkw),  # Wk
                pl.BlockSpec((C, C), lambda b, q, k: (0, 0), **wkw),  # Wv
                pl.BlockSpec((C, C), lambda b, q, k: (0, 0), **wkw),  # Wp
                pl.BlockSpec((1, C), lambda b, q, k: (0, 0), **wkw),  # bias
            ],
            out_specs=pl.BlockSpec((batch_block, q_tile, C),
                                   lambda b, q, k: (b, q, 0)),
            scratch_shapes=[
                pltpu.VMEM((G, q_tile, d), matmul_dtype),   # cached per-head Q
                pltpu.VMEM((G, q_tile, 1), jnp.float32),    # running max
                pltpu.VMEM((G, q_tile, 1), jnp.float32),    # running denom
                pltpu.VMEM((G, q_tile, d), jnp.float32),    # output accum
            ],
        )
        return pl.pallas_call(
            kernel,
            out_shape=jax.ShapeDtypeStruct((B, N, C), x.dtype),
            grid_spec=grid_spec,
            compiler_params=pltpu.CompilerParams(
                dimension_semantics=("parallel", "parallel", "arbitrary"),
                vmem_limit_bytes=vmem_limit),
            cost_estimate=pl.CostEstimate(flops=flops,
                                          transcendentals=transcendentals,
                                          bytes_accessed=bytes_accessed),
        )(x, target, wq_k, wk_k, wv_k, wp_k, bp2d)

    try:
        out = _call(True)
    except Exception:
        # Compatibility fallback: jax build without pipeline_mode / Buffered(1)
        # support on pallas_call BlockSpecs -> default double-buffered weights.
        out = _call(False)

    upsampled_idx = None  # TODO(synk): quadtree top-K sparse path (CascadeQTAttB) not reproducible without its source.
    return out, upsampled_idx


def _reference(x, target, params, *, num_heads):
    """Pure-JAX f32 reference (dense multi-head cross attention)."""
    B, N, C = x.shape
    d = C // num_heads
    scale = d ** -0.5
    q = jnp.einsum("bnc,oc->bno", x, params["wq"])
    k = jnp.einsum("bnc,oc->bno", target, params["wk"])
    v = jnp.einsum("bnc,oc->bno", target, params["wv"])
    qh = q.reshape(B, N, num_heads, d).transpose(0, 2, 1, 3)
    kh = k.reshape(B, -1, num_heads, d).transpose(0, 2, 1, 3)
    vh = v.reshape(B, -1, num_heads, d).transpose(0, 2, 1, 3)
    s = jnp.einsum("bhqd,bhkd->bhqk", qh * scale, kh)
    p = jax.nn.softmax(s, axis=-1)
    o = jnp.einsum("bhqk,bhkd->bhqd", p, vh)
    msg = o.transpose(0, 2, 1, 3).reshape(B, N, C)
    return jnp.einsum("bnc,oc->bno", msg, params["wp"]) + params["bp"]


if __name__ == "__main__":
    # Small shapes consistent with the module: dim=32, num_heads=4, H=W=8 -> N=64.
    B, C, H, W = 2, 32, 8, 8
    num_heads = 4
    N = H * W

    key = jax.random.PRNGKey(0)
    kx, kt, k1, k2, k3, k4 = jax.random.split(key, 6)

    x = jax.random.normal(kx, (B, N, C), dtype=jnp.float32)
    target = jax.random.normal(kt, (B, N, C), dtype=jnp.float32)

    # Deterministic param init (trunc_normal std=0.02 ~ normal * 0.02;
    # qkv_bias=False so no q/k/v biases; Linear bias -> zeros).
    params = {
        "wq": 0.02 * jax.random.normal(k1, (C, C), dtype=jnp.float32),
        "wk": 0.02 * jax.random.normal(k2, (C, C), dtype=jnp.float32),
        "wv": 0.02 * jax.random.normal(k3, (C, C), dtype=jnp.float32),
        "wp": 0.02 * jax.random.normal(k4, (C, C), dtype=jnp.float32),
        "bp": jnp.zeros((C,), dtype=jnp.float32),
    }

    out, upsampled_idx = cascade_quadtree_attention(
        x, target, params, num_heads=num_heads)
    out = jax.block_until_ready(out)

    ref = _reference(x, target, params, num_heads=num_heads)
    assert out.shape == (B, N, C)
    # bf16 MXU operands with f32 accumulation / f32 online softmax: tolerance
    # well above expected rounding error, far below output scale.
    assert jnp.allclose(out, ref, atol=3e-4, rtol=1e-2), "mismatch vs reference"

    print("KERNEL_OK")
</pallas_src>

<mosaic_0001>
module attributes {stable_mosaic.version = 11 : i64} {
  func.func @_cascade_attn_kernel(%arg0: i32, %arg1: i32, %arg2: i32, %arg3: memref<1x64x32xf32, #tpu.memory_space<vmem>>, %arg4: memref<1x64x32xf32, #tpu.memory_space<vmem>>, %arg5: memref<32x32xbf16, #tpu.memory_space<vmem>>, %arg6: memref<32x32xbf16, #tpu.memory_space<vmem>>, %arg7: memref<32x32xbf16, #tpu.memory_space<vmem>>, %arg8: memref<32x32xbf16, #tpu.memory_space<vmem>>, %arg9: memref<1x32xf32, #tpu.memory_space<vmem>>, %arg10: memref<1x64x32xf32, #tpu.memory_space<vmem>>, %arg11: memref<4x64x8xbf16, #tpu.memory_space<vmem>>, %arg12: memref<4x64x1xf32, #tpu.memory_space<vmem>>, %arg13: memref<4x64x1xf32, #tpu.memory_space<vmem>>, %arg14: memref<4x64x8xf32, #tpu.memory_space<vmem>>) attributes {dimension_semantics = [#tpu.dimension_semantics<parallel>, #tpu.dimension_semantics<parallel>, #tpu.dimension_semantics<arbitrary>], iteration_bounds = array<i64: 2, 1, 1>, scalar_prefetch = 0 : i64, scratch_operands = 4 : i64, tpu.core_type = #tpu.core_type<tc>, window_params = [{transform_indices = @transform_0, window_bounds = array<i64: 1, 64, 32>}, {transform_indices = @transform_1, window_bounds = array<i64: 1, 64, 32>}, {pipeline_mode = #tpu.pipeline_mode<synchronous>, transform_indices = @transform_2, window_bounds = array<i64: 32, 32>}, {pipeline_mode = #tpu.pipeline_mode<synchronous>, transform_indices = @transform_3, window_bounds = array<i64: 32, 32>}, {pipeline_mode = #tpu.pipeline_mode<synchronous>, transform_indices = @transform_4, window_bounds = array<i64: 32, 32>}, {pipeline_mode = #tpu.pipeline_mode<synchronous>, transform_indices = @transform_5, window_bounds = array<i64: 32, 32>}, {pipeline_mode = #tpu.pipeline_mode<synchronous>, transform_indices = @transform_6, window_bounds = array<i64: 1, 32>}, {transform_indices = @transform_7, window_bounds = array<i64: 1, 64, 32>}]} {
    %c0_i32 = arith.constant 0 : i32
    %0 = arith.cmpi eq, %arg2, %c0_i32 : i32
    %1 = arith.extui %0 : i1 to i32
    %c0_i32_0 = arith.constant 0 : i32
    %2 = arith.cmpi ne, %1, %c0_i32_0 : i32
    scf.if %2 {
      %c0_35 = arith.constant 0 : index
      %c0_36 = arith.constant 0 : index
      %c0_37 = arith.constant 0 : index
      %52 = vector.load %arg3[%c0_35, %c0_36, %c0_37] : memref<1x64x32xf32, #tpu.memory_space<vmem>>, vector<1x64x32xf32>
      %53 = vector.shape_cast %52 : vector<1x64x32xf32> to vector<64x32xf32>
      %54 = arith.truncf %53 : vector<64x32xf32> to vector<64x32xbf16>
      %c0_38 = arith.constant 0 : index
      %c0_39 = arith.constant 0 : index
      %55 = vector.load %arg5[%c0_38, %c0_39] : memref<32x32xbf16, #tpu.memory_space<vmem>>, vector<32x32xbf16>
      %cst_40 = arith.constant dense<0.000000e+00> : vector<64x32xf32>
      %56 = tpu.matmul %54, %55, %cst_40 {dimension_numbers = #tpu.dot_dimension_numbers<[1], [0], [0], [1], [0, 0, 1, 1], [], []>} : vector<64x32xbf16>, vector<32x32xbf16>, vector<64x32xf32> -> vector<64x32xf32>
      %57 = vector.shape_cast %56 : vector<64x32xf32> to vector<1x64x32xf32>
      %58 = vector.extract_strided_slice %57 {offsets = [0, 0, 0], sizes = [1, 64, 8], strides = [1, 1, 1]} : vector<1x64x32xf32> to vector<1x64x8xf32>
      %59 = arith.truncf %58 : vector<1x64x8xf32> to vector<1x64x8xbf16>
      %c0_41 = arith.constant 0 : index
      %c0_42 = arith.constant 0 : index
      %c0_43 = arith.constant 0 : index
      %60 = vector.load %arg11[%c0_41, %c0_42, %c0_43] : memref<4x64x8xbf16, #tpu.memory_space<vmem>>, vector<1x64x8xbf16>
      tpu.vector_store %arg11[%c0_41, %c0_42, %c0_43], %59 {strides = array<i32>} : memref<4x64x8xbf16, #tpu.memory_space<vmem>>, vector<1x64x8xbf16>,
      %61 = vector.extract_strided_slice %57 {offsets = [0, 0, 8], sizes = [1, 64, 8], strides = [1, 1, 1]} : vector<1x64x32xf32> to vector<1x64x8xf32>
      %62 = arith.truncf %61 : vector<1x64x8xf32> to vector<1x64x8xbf16>
      %c1 = arith.constant 1 : index
      %c0_44 = arith.constant 0 : index
      %c0_45 = arith.constant 0 : index
      %63 = vector.load %arg11[%c1, %c0_44, %c0_45] : memref<4x64x8xbf16, #tpu.memory_space<vmem>>, vector<1x64x8xbf16>
      tpu.vector_store %arg11[%c1, %c0_44, %c0_45], %62 {strides = array<i32>} : memref<4x64x8xbf16, #tpu.memory_space<vmem>>, vector<1x64x8xbf16>,
      %64 = vector.extract_strided_slice %57 {offsets = [0, 0, 16], sizes = [1, 64, 8], strides = [1, 1, 1]} : vector<1x64x32xf32> to vector<1x64x8xf32>
      %65 = arith.truncf %64 : vector<1x64x8xf32> to vector<1x64x8xbf16>
      %c2 = arith.constant 2 : index
      %c0_46 = arith.constant 0 : index
      %c0_47 = arith.constant 0 : index
      %66 = vector.load %arg11[%c2, %c0_46, %c0_47] : memref<4x64x8xbf16, #tpu.memory_space<vmem>>, vector<1x64x8xbf16>
      tpu.vector_store %arg11[%c2, %c0_46, %c0_47], %65 {strides = array<i32>} : memref<4x64x8xbf16, #tpu.memory_space<vmem>>, vector<1x64x8xbf16>,
      %67 = vector.extract_strided_slice %57 {offsets = [0, 0, 24], sizes = [1, 64, 8], strides = [1, 1, 1]} : vector<1x64x32xf32> to vector<1x64x8xf32>
      %68 = arith.truncf %67 : vector<1x64x8xf32> to vector<1x64x8xbf16>
      %c3 = arith.constant 3 : index
      %c0_48 = arith.constant 0 : index
      %c0_49 = arith.constant 0 : index
      %69 = vector.load %arg11[%c3, %c0_48, %c0_49] : memref<4x64x8xbf16, #tpu.memory_space<vmem>>, vector<1x64x8xbf16>
      tpu.vector_store %arg11[%c3, %c0_48, %c0_49], %68 {strides = array<i32>} : memref<4x64x8xbf16, #tpu.memory_space<vmem>>, vector<1x64x8xbf16>,
      %cst_50 = arith.constant 0xFF800000 : f32
      %70 = vector.broadcast %cst_50 : f32 to vector<4x64x1xf32>
      %c0_51 = arith.constant 0 : index
      %c0_52 = arith.constant 0 : index
      %c0_53 = arith.constant 0 : index
      %71 = vector.load %arg12[%c0_51, %c0_52, %c0_53] : memref<4x64x1xf32, #tpu.memory_space<vmem>>, vector<4x64x1xf32>
      tpu.vector_store %arg12[%c0_51, %c0_52, %c0_53], %70 {strides = array<i32>} : memref<4x64x1xf32, #tpu.memory_space<vmem>>, vector<4x64x1xf32>,
      %cst_54 = arith.constant 0.000000e+00 : f32
      %72 = vector.broadcast %cst_54 : f32 to vector<4x64x1xf32>
      %c0_55 = arith.constant 0 : index
      %c0_56 = arith.constant 0 : index
      %c0_57 = arith.constant 0 : index
      %73 = vector.load %arg13[%c0_55, %c0_56, %c0_57] : memref<4x64x1xf32, #tpu.memory_space<vmem>>, vector<4x64x1xf32>
      tpu.vector_store %arg13[%c0_55, %c0_56, %c0_57], %72 {strides = array<i32>} : memref<4x64x1xf32, #tpu.memory_space<vmem>>, vector<4x64x1xf32>,
      %cst_58 = arith.constant 0.000000e+00 : f32
      %74 = vector.broadcast %cst_58 : f32 to vector<4x64x8xf32>
      %c0_59 = arith.constant 0 : index
      %c0_60 = arith.constant 0 : index
      %c0_61 = arith.constant 0 : index
      %75 = vector.load %arg14[%c0_59, %c0_60, %c0_61] : memref<4x64x8xf32, #tpu.memory_space<vmem>>, vector<4x64x8xf32>
      tpu.vector_store %arg14[%c0_59, %c0_60, %c0_61], %74 {strides = array<i32>} : memref<4x64x8xf32, #tpu.memory_space<vmem>>, vector<4x64x8xf32>,
    } else {
    }
    %c0 = arith.constant 0 : index
    %c0_1 = arith.constant 0 : index
    %c0_2 = arith.constant 0 : index
    %3 = vector.load %arg4[%c0, %c0_1, %c0_2] : memref<1x64x32xf32, #tpu.memory_space<vmem>>, vector<1x64x32xf32>
    %4 = vector.shape_cast %3 : vector<1x64x32xf32> to vector<64x32xf32>
    %5 = arith.truncf %4 : vector<64x32xf32> to vector<64x32xbf16>
    %c0_3 = arith.constant 0 : index
    %c0_4 = arith.constant 0 : index
    %6 = vector.load %arg6[%c0_3, %c0_4] : memref<32x32xbf16, #tpu.memory_space<vmem>>, vector<32x32xbf16>
    %cst = arith.constant dense<0.000000e+00> : vector<64x32xf32>
    %7 = tpu.matmul %5, %6, %cst {dimension_numbers = #tpu.dot_dimension_numbers<[1], [0], [0], [1], [0, 0, 1, 1], [], []>} : vector<64x32xbf16>, vector<32x32xbf16>, vector<64x32xf32> -> vector<64x32xf32>
    %c0_5 = arith.constant 0 : index
    %c0_6 = arith.constant 0 : index
    %8 = vector.load %arg7[%c0_5, %c0_6] : memref<32x32xbf16, #tpu.memory_space<vmem>>, vector<32x32xbf16>
    %cst_7 = arith.constant dense<0.000000e+00> : vector<64x32xf32>
    %9 = tpu.matmul %5, %8, %cst_7 {dimension_numbers = #tpu.dot_dimension_numbers<[1], [0], [0], [1], [0, 0, 1, 1], [], []>} : vector<64x32xbf16>, vector<32x32xbf16>, vector<64x32xf32> -> vector<64x32xf32>
    %10 = vector.shape_cast %7 : vector<64x32xf32> to vector<1x64x32xf32>
    %11 = vector.shape_cast %9 : vector<64x32xf32> to vector<1x64x32xf32>
    %12 = vector.extract_strided_slice %10 {offsets = [0, 0, 0], sizes = [1, 64, 8], strides = [1, 1, 1]} : vector<1x64x32xf32> to vector<1x64x8xf32>
    %13 = vector.extract_strided_slice %10 {offsets = [0, 0, 8], sizes = [1, 64, 8], strides = [1, 1, 1]} : vector<1x64x32xf32> to vector<1x64x8xf32>
    %14 = vector.extract_strided_slice %10 {offsets = [0, 0, 16], sizes = [1, 64, 8], strides = [1, 1, 1]} : vector<1x64x32xf32> to vector<1x64x8xf32>
    %15 = vector.extract_strided_slice %10 {offsets = [0, 0, 24], sizes = [1, 64, 8], strides = [1, 1, 1]} : vector<1x64x32xf32> to vector<1x64x8xf32>
    %16 = tpu.concatenate %12, %13, %14, %15 in 0 : vector<1x64x8xf32>, vector<1x64x8xf32>, vector<1x64x8xf32>, vector<1x64x8xf32> -> vector<4x64x8xf32>
    %17 = arith.truncf %16 : vector<4x64x8xf32> to vector<4x64x8xbf16>
    %18 = vector.extract_strided_slice %11 {offsets = [0, 0, 0], sizes = [1, 64, 8], strides = [1, 1, 1]} : vector<1x64x32xf32> to vector<1x64x8xf32>
    %19 = vector.extract_strided_slice %11 {offsets = [0, 0, 8], sizes = [1, 64, 8], strides = [1, 1, 1]} : vector<1x64x32xf32> to vector<1x64x8xf32>
    %20 = vector.extract_strided_slice %11 {offsets = [0, 0, 16], sizes = [1, 64, 8], strides = [1, 1, 1]} : vector<1x64x32xf32> to vector<1x64x8xf32>
    %21 = vector.extract_strided_slice %11 {offsets = [0, 0, 24], sizes = [1, 64, 8], strides = [1, 1, 1]} : vector<1x64x32xf32> to vector<1x64x8xf32>
    %22 = tpu.concatenate %18, %19, %20, %21 in 0 : vector<1x64x8xf32>, vector<1x64x8xf32>, vector<1x64x8xf32>, vector<1x64x8xf32> -> vector<4x64x8xf32>
    %23 = arith.truncf %22 : vector<4x64x8xf32> to vector<4x64x8xbf16>
    %c0_8 = arith.constant 0 : index
    %c0_9 = arith.constant 0 : index
    %c0_10 = arith.constant 0 : index
    %24 = vector.load %arg11[%c0_8, %c0_9, %c0_10] : memref<4x64x8xbf16, #tpu.memory_space<vmem>>, vector<4x64x8xbf16>
    "tpu.trace_start"() <{level = 10 : i32, message = "gnd,gmd->gnm"}> : () -> ()
    %cst_11 = arith.constant dense<0.000000e+00> : vector<4x64x64xf32>
    %25 = tpu.matmul %24, %17, %cst_11 {dimension_numbers = #tpu.dot_dimension_numbers<[2], [2], [1], [1], [0, 0, 0, 1, 1, 1], [0], [0]>} : vector<4x64x8xbf16>, vector<4x64x8xbf16>, vector<4x64x64xf32> -> vector<4x64x64xf32>
    "tpu.trace_stop"() : () -> ()
    %c0_12 = arith.constant 0 : index
    %c0_13 = arith.constant 0 : index
    %c0_14 = arith.constant 0 : index
    %26 = vector.load %arg12[%c0_12, %c0_13, %c0_14] : memref<4x64x1xf32, #tpu.memory_space<vmem>>, vector<4x64x1xf32>
    %cst_15 = arith.constant dense<0xFF800000> : vector<4x64xf32>
    %27 = vector.multi_reduction <maximumf>, %25, %cst_15 [2] : vector<4x64x64xf32> to vector<4x64xf32>
    %28 = vector.shape_cast %27 : vector<4x64xf32> to vector<4x64x1xf32>
    %29 = arith.maximumf %26, %28 : vector<4x64x1xf32>
    %30 = arith.subf %26, %29 : vector<4x64x1xf32>
    %31 = math.exp %30 : vector<4x64x1xf32>
    %32 = vector.broadcast %29 : vector<4x64x1xf32> to vector<4x64x64xf32>
    %33 = arith.subf %25, %32 : vector<4x64x64xf32>
    %34 = math.exp %33 : vector<4x64x64xf32>
    %c0_16 = arith.constant 0 : index
    %c0_17 = arith.constant 0 : index
    %c0_18 = arith.constant 0 : index
    %35 = vector.load %arg13[%c0_16, %c0_17, %c0_18] : memref<4x64x1xf32, #tpu.memory_space<vmem>>, vector<4x64x1xf32>
    %36 = arith.mulf %31, %35 : vector<4x64x1xf32>
    %cst_19 = arith.constant dense<0.000000e+00> : vector<4x64xf32>
    %37 = vector.multi_reduction <add>, %34, %cst_19 [2] : vector<4x64x64xf32> to vector<4x64xf32>
    %38 = vector.shape_cast %37 : vector<4x64xf32> to vector<4x64x1xf32>
    %39 = arith.addf %36, %38 : vector<4x64x1xf32>
    %c0_20 = arith.constant 0 : index
    %c0_21 = arith.constant 0 : index
    %c0_22 = arith.constant 0 : index
    %40 = vector.load %arg13[%c0_20, %c0_21, %c0_22] : memref<4x64x1xf32, #tpu.memory_space<vmem>>, vector<4x64x1xf32>
    tpu.vector_store %arg13[%c0_20, %c0_21, %c0_22], %39 {strides = array<i32>} : memref<4x64x1xf32, #tpu.memory_space<vmem>>, vector<4x64x1xf32>,
    %c0_23 = arith.constant 0 : index
    %c0_24 = arith.constant 0 : index
    %c0_25 = arith.constant 0 : index
    %41 = vector.load %arg14[%c0_23, %c0_24, %c0_25] : memref<4x64x8xf32, #tpu.memory_space<vmem>>, vector<4x64x8xf32>
    %42 = vector.broadcast %31 : vector<4x64x1xf32> to vector<4x64x8xf32>
    %43 = arith.mulf %42, %41 : vector<4x64x8xf32>
    %44 = arith.truncf %34 : vector<4x64x64xf32> to vector<4x64x64xbf16>
    "tpu.trace_start"() <{level = 10 : i32, message = "gnm,gmd->gnd"}> : () -> ()
    %cst_26 = arith.constant dense<0.000000e+00> : vector<4x64x8xf32>
    %45 = tpu.matmul %44, %23, %cst_26 {dimension_numbers = #tpu.dot_dimension_numbers<[2], [1], [1], [2], [0, 0, 0, 1, 1, 2], [0], [0]>} : vector<4x64x64xbf16>, vector<4x64x8xbf16>, vector<4x64x8xf32> -> vector<4x64x8xf32>
    "tpu.trace_stop"() : () -> ()
    %46 = arith.addf %43, %45 : vector<4x64x8xf32>
    %c0_27 = arith.constant 0 : index
    %c0_28 = arith.constant 0 : index
    %c0_29 = arith.constant 0 : index
    %47 = vector.load %arg14[%c0_27, %c0_28, %c0_29] : memref<4x64x8xf32, #tpu.memory_space<vmem>>, vector<4x64x8xf32>
    tpu.vector_store %arg14[%c0_27, %c0_28, %c0_29], %46 {strides = array<i32>} : memref<4x64x8xf32, #tpu.memory_space<vmem>>, vector<4x64x8xf32>,
    %c0_30 = arith.constant 0 : index
    %c0_31 = arith.constant 0 : index
    %c0_32 = arith.constant 0 : index
    %48 = vector.load %arg12[%c0_30, %c0_31, %c0_32] : memref<4x64x1xf32, #tpu.memory_space<vmem>>, vector<4x64x1xf32>
    tpu.vector_store %arg12[%c0_30, %c0_31, %c0_32], %29 {strides = array<i32>} : memref<4x64x1xf32, #tpu.memory_space<vmem>>, vector<4x64x1xf32>,
    %c0_i32_33 = arith.constant 0 : i32
    %49 = arith.cmpi eq, %arg2, %c0_i32_33 : i32
    %50 = arith.extui %49 : i1 to i32
    %c0_i32_34 = arith.constant 0 : i32
    %51 = arith.cmpi ne, %50, %c0_i32_34 : i32
    scf.if %51 {
      %c0_35 = arith.constant 0 : index
      %c0_36 = arith.constant 0 : index
      %c0_37 = arith.constant 0 : index
      %52 = vector.load %arg14[%c0_35, %c0_36, %c0_37] : memref<4x64x8xf32, #tpu.memory_space<vmem>>, vector<4x64x8xf32>
      %c0_38 = arith.constant 0 : index
      %c0_39 = arith.constant 0 : index
      %c0_40 = arith.constant 0 : index
      %53 = vector.load %arg13[%c0_38, %c0_39, %c0_40] : memref<4x64x1xf32, #tpu.memory_space<vmem>>, vector<4x64x1xf32>
      %54 = tpu.reciprocal %53 {approx = true} : vector<4x64x1xf32> -> vector<4x64x1xf32>
      %55 = vector.broadcast %54 : vector<4x64x1xf32> to vector<4x64x8xf32>
      %56 = arith.mulf %52, %55 : vector<4x64x8xf32>
      %57 = vector.extract_strided_slice %56 {offsets = [0, 0, 0], sizes = [1, 64, 8], strides = [1, 1, 1]} : vector<4x64x8xf32> to vector<1x64x8xf32>
      %58 = vector.extract_strided_slice %56 {offsets = [1, 0, 0], sizes = [1, 64, 8], strides = [1, 1, 1]} : vector<4x64x8xf32> to vector<1x64x8xf32>
      %59 = vector.extract_strided_slice %56 {offsets = [2, 0, 0], sizes = [1, 64, 8], strides = [1, 1, 1]} : vector<4x64x8xf32> to vector<1x64x8xf32>
      %60 = vector.extract_strided_slice %56 {offsets = [3, 0, 0], sizes = [1, 64, 8], strides = [1, 1, 1]} : vector<4x64x8xf32> to vector<1x64x8xf32>
      %61 = tpu.concatenate %57, %58, %59, %60 in 2 : vector<1x64x8xf32>, vector<1x64x8xf32>, vector<1x64x8xf32>, vector<1x64x8xf32> -> vector<1x64x32xf32>
      %62 = vector.shape_cast %61 : vector<1x64x32xf32> to vector<64x32xf32>
      %63 = arith.truncf %62 : vector<64x32xf32> to vector<64x32xbf16>
      %c0_41 = arith.constant 0 : index
      %c0_42 = arith.constant 0 : index
      %64 = vector.load %arg8[%c0_41, %c0_42] : memref<32x32xbf16, #tpu.memory_space<vmem>>, vector<32x32xbf16>
      %cst_43 = arith.constant dense<0.000000e+00> : vector<64x32xf32>
      %65 = tpu.matmul %63, %64, %cst_43 {dimension_numbers = #tpu.dot_dimension_numbers<[1], [0], [0], [1], [0, 0, 1, 1], [], []>} : vector<64x32xbf16>, vector<32x32xbf16>, vector<64x32xf32> -> vector<64x32xf32>
      %c0_44 = arith.constant 0 : index
      %c0_45 = arith.constant 0 : index
      %66 = vector.load %arg9[%c0_44, %c0_45] : memref<1x32xf32, #tpu.memory_space<vmem>>, vector<1x32xf32>
      %67 = vector.broadcast %66 : vector<1x32xf32> to vector<64x32xf32>
      %68 = arith.addf %65, %67 : vector<64x32xf32>
      %69 = vector.shape_cast %68 : vector<64x32xf32> to vector<1x64x32xf32>
      %c0_46 = arith.constant 0 : index
      %c0_47 = arith.constant 0 : index
      %c0_48 = arith.constant 0 : index
      %70 = vector.load %arg10[%c0_46, %c0_47, %c0_48] : memref<1x64x32xf32, #tpu.memory_space<vmem>>, vector<1x64x32xf32>
      tpu.vector_store %arg10[%c0_46, %c0_47, %c0_48], %69 {strides = array<i32>} : memref<1x64x32xf32, #tpu.memory_space<vmem>>, vector<1x64x32xf32>,
    } else {
    }
    return
  }
  func.func @transform_0(%arg0: i32, %arg1: i32, %arg2: i32) -> (i32, i32, i32) {
    %c0_i32 = arith.constant 0 : i32
    %c0_i32_0 = arith.constant 0 : i32
    return %arg0, %arg1, %c0_i32 : i32, i32, i32
  }
  func.func @transform_1(%arg0: i32, %arg1: i32, %arg2: i32) -> (i32, i32, i32) {
    %c0_i32 = arith.constant 0 : i32
    %c0_i32_0 = arith.constant 0 : i32
    return %arg0, %arg2, %c0_i32 : i32, i32, i32
  }
  func.func @transform_2(%arg0: i32, %arg1: i32, %arg2: i32) -> (i32, i32) {
    %c0_i32 = arith.constant 0 : i32
    %c0_i32_0 = arith.constant 0 : i32
    %c0_i32_1 = arith.constant 0 : i32
    return %c0_i32, %c0_i32_0 : i32, i32
  }
  func.func @transform_3(%arg0: i32, %arg1: i32, %arg2: i32) -> (i32, i32) {
    %c0_i32 = arith.constant 0 : i32
    %c0_i32_0 = arith.constant 0 : i32
    %c0_i32_1 = arith.constant 0 : i32
    return %c0_i32, %c0_i32_0 : i32, i32
  }
  func.func @transform_4(%arg0: i32, %arg1: i32, %arg2: i32) -> (i32, i32) {
    %c0_i32 = arith.constant 0 : i32
    %c0_i32_0 = arith.constant 0 : i32
    %c0_i32_1 = arith.constant 0 : i32
    return %c0_i32, %c0_i32_0 : i32, i32
  }
  func.func @transform_5(%arg0: i32, %arg1: i32, %arg2: i32) -> (i32, i32) {
    %c0_i32 = arith.constant 0 : i32
    %c0_i32_0 = arith.constant 0 : i32
    %c0_i32_1 = arith.constant 0 : i32
    return %c0_i32, %c0_i32_0 : i32, i32
  }
  func.func @transform_6(%arg0: i32, %arg1: i32, %arg2: i32) -> (i32, i32) {
    %c0_i32 = arith.constant 0 : i32
    %c0_i32_0 = arith.constant 0 : i32
    %c0_i32_1 = arith.constant 0 : i32
    return %c0_i32, %c0_i32_0 : i32, i32
  }
  func.func @transform_7(%arg0: i32, %arg1: i32, %arg2: i32) -> (i32, i32, i32) {
    %c0_i32 = arith.constant 0 : i32
    %c0_i32_0 = arith.constant 0 : i32
    return %arg0, %arg1, %c0_i32 : i32, i32, i32
  }
}

module attributes {stable_mosaic.version = 11 : i64} {
  func.func @_cascade_attn_kernel(%arg0: i32, %arg1: i32, %arg2: i32, %arg3: memref<1x64x32xf32, #tpu.memory_space<vmem>>, %arg4: memref<1x64x32xf32, #tpu.memory_space<vmem>>, %arg5: memref<32x32xbf16, #tpu.memory_space<vmem>>, %arg6: memref<32x32xbf16, #tpu.memory_space<vmem>>, %arg7: memref<32x32xbf16, #tpu.memory_space<vmem>>, %arg8: memref<32x32xbf16, #tpu.memory_space<vmem>>, %arg9: memref<1x32xf32, #tpu.memory_space<vmem>>, %arg10: memref<1x64x32xf32, #tpu.memory_space<vmem>>, %arg11: memref<4x64x8xbf16, #tpu.memory_space<vmem>>, %arg12: memref<4x64x1xf32, #tpu.memory_space<vmem>>, %arg13: memref<4x64x1xf32, #tpu.memory_space<vmem>>, %arg14: memref<4x64x8xf32, #tpu.memory_space<vmem>>) attributes {dimension_semantics = [#tpu.dimension_semantics<parallel>, #tpu.dimension_semantics<parallel>, #tpu.dimension_semantics<arbitrary>], iteration_bounds = array<i64: 2, 1, 1>, scalar_prefetch = 0 : i64, scratch_operands = 4 : i64, tpu.core_type = #tpu.core_type<tc>, window_params = [{transform_indices = @transform_0, window_bounds = array<i64: 1, 64, 32>}, {transform_indices = @transform_1, window_bounds = array<i64: 1, 64, 32>}, {pipeline_mode = #tpu.pipeline_mode<synchronous>, transform_indices = @transform_2, window_bounds = array<i64: 32, 32>}, {pipeline_mode = #tpu.pipeline_mode<synchronous>, transform_indices = @transform_3, window_bounds = array<i64: 32, 32>}, {pipeline_mode = #tpu.pipeline_mode<synchronous>, transform_indices = @transform_4, window_bounds = array<i64: 32, 32>}, {pipeline_mode = #tpu.pipeline_mode<synchronous>, transform_indices = @transform_5, window_bounds = array<i64: 32, 32>}, {pipeline_mode = #tpu.pipeline_mode<synchronous>, transform_indices = @transform_6, window_bounds = array<i64: 1, 32>}, {transform_indices = @transform_7, window_bounds = array<i64: 1, 64, 32>}]} {
    %c0_i32 = arith.constant 0 : i32
    %0 = arith.cmpi eq, %arg2, %c0_i32 : i32
    %1 = arith.extui %0 : i1 to i32
    %c0_i32_0 = arith.constant 0 : i32
    %2 = arith.cmpi ne, %1, %c0_i32_0 : i32
    scf.if %2 {
      %c0_35 = arith.constant 0 : index
      %c0_36 = arith.constant 0 : index
      %c0_37 = arith.constant 0 : index
      %52 = vector.load %arg3[%c0_35, %c0_36, %c0_37] : memref<1x64x32xf32, #tpu.memory_space<vmem>>, vector<1x64x32xf32>
      %53 = vector.shape_cast %52 : vector<1x64x32xf32> to vector<64x32xf32>
      %54 = arith.truncf %53 : vector<64x32xf32> to vector<64x32xbf16>
      %c0_38 = arith.constant 0 : index
      %c0_39 = arith.constant 0 : index
      %55 = vector.load %arg5[%c0_38, %c0_39] : memref<32x32xbf16, #tpu.memory_space<vmem>>, vector<32x32xbf16>
      %cst_40 = arith.constant dense<0.000000e+00> : vector<64x32xf32>
      %56 = tpu.matmul %54, %55, %cst_40 {dimension_numbers = #tpu.dot_dimension_numbers<[1], [0], [0], [1], [0, 0, 1, 1], [], []>} : vector<64x32xbf16>, vector<32x32xbf16>, vector<64x32xf32> -> vector<64x32xf32>
      %57 = vector.shape_cast %56 : vector<64x32xf32> to vector<1x64x32xf32>
      %58 = vector.extract_strided_slice %57 {offsets = [0, 0, 0], sizes = [1, 64, 8], strides = [1, 1, 1]} : vector<1x64x32xf32> to vector<1x64x8xf32>
      %59 = arith.truncf %58 : vector<1x64x8xf32> to vector<1x64x8xbf16>
      %c0_41 = arith.constant 0 : index
      %c0_42 = arith.constant 0 : index
      %c0_43 = arith.constant 0 : index
      %60 = vector.load %arg11[%c0_41, %c0_42, %c0_43] : memref<4x64x8xbf16, #tpu.memory_space<vmem>>, vector<1x64x8xbf16>
      tpu.vector_store %arg11[%c0_41, %c0_42, %c0_43], %59 {strides = array<i32>} : memref<4x64x8xbf16, #tpu.memory_space<vmem>>, vector<1x64x8xbf16>,
      %61 = vector.extract_strided_slice %57 {offsets = [0, 0, 8], sizes = [1, 64, 8], strides = [1, 1, 1]} : vector<1x64x32xf32> to vector<1x64x8xf32>
      %62 = arith.truncf %61 : vector<1x64x8xf32> to vector<1x64x8xbf16>
      %c1 = arith.constant 1 : index
      %c0_44 = arith.constant 0 : index
      %c0_45 = arith.constant 0 : index
      %63 = vector.load %arg11[%c1, %c0_44, %c0_45] : memref<4x64x8xbf16, #tpu.memory_space<vmem>>, vector<1x64x8xbf16>
      tpu.vector_store %arg11[%c1, %c0_44, %c0_45], %62 {strides = array<i32>} : memref<4x64x8xbf16, #tpu.memory_space<vmem>>, vector<1x64x8xbf16>,
      %64 = vector.extract_strided_slice %57 {offsets = [0, 0, 16], sizes = [1, 64, 8], strides = [1, 1, 1]} : vector<1x64x32xf32> to vector<1x64x8xf32>
      %65 = arith.truncf %64 : vector<1x64x8xf32> to vector<1x64x8xbf16>
      %c2 = arith.constant 2 : index
      %c0_46 = arith.constant 0 : index
      %c0_47 = arith.constant 0 : index
      %66 = vector.load %arg11[%c2, %c0_46, %c0_47] : memref<4x64x8xbf16, #tpu.memory_space<vmem>>, vector<1x64x8xbf16>
      tpu.vector_store %arg11[%c2, %c0_46, %c0_47], %65 {strides = array<i32>} : memref<4x64x8xbf16, #tpu.memory_space<vmem>>, vector<1x64x8xbf16>,
      %67 = vector.extract_strided_slice %57 {offsets = [0, 0, 24], sizes = [1, 64, 8], strides = [1, 1, 1]} : vector<1x64x32xf32> to vector<1x64x8xf32>
      %68 = arith.truncf %67 : vector<1x64x8xf32> to vector<1x64x8xbf16>
      %c3 = arith.constant 3 : index
      %c0_48 = arith.constant 0 : index
      %c0_49 = arith.constant 0 : index
      %69 = vector.load %arg11[%c3, %c0_48, %c0_49] : memref<4x64x8xbf16, #tpu.memory_space<vmem>>, vector<1x64x8xbf16>
      tpu.vector_store %arg11[%c3, %c0_48, %c0_49], %68 {strides = array<i32>} : memref<4x64x8xbf16, #tpu.memory_space<vmem>>, vector<1x64x8xbf16>,
      %cst_50 = arith.constant 0xFF800000 : f32
      %70 = vector.broadcast %cst_50 : f32 to vector<4x64x1xf32>
      %c0_51 = arith.constant 0 : index
      %c0_52 = arith.constant 0 : index
      %c0_53 = arith.constant 0 : index
      %71 = vector.load %arg12[%c0_51, %c0_52, %c0_53] : memref<4x64x1xf32, #tpu.memory_space<vmem>>, vector<4x64x1xf32>
      tpu.vector_store %arg12[%c0_51, %c0_52, %c0_53], %70 {strides = array<i32>} : memref<4x64x1xf32, #tpu.memory_space<vmem>>, vector<4x64x1xf32>,
      %cst_54 = arith.constant 0.000000e+00 : f32
      %72 = vector.broadcast %cst_54 : f32 to vector<4x64x1xf32>
      %c0_55 = arith.constant 0 : index
      %c0_56 = arith.constant 0 : index
      %c0_57 = arith.constant 0 : index
      %73 = vector.load %arg13[%c0_55, %c0_56, %c0_57] : memref<4x64x1xf32, #tpu.memory_space<vmem>>, vector<4x64x1xf32>
      tpu.vector_store %arg13[%c0_55, %c0_56, %c0_57], %72 {strides = array<i32>} : memref<4x64x1xf32, #tpu.memory_space<vmem>>, vector<4x64x1xf32>,
      %cst_58 = arith.constant 0.000000e+00 : f32
      %74 = vector.broadcast %cst_58 : f32 to vector<4x64x8xf32>
      %c0_59 = arith.constant 0 : index
      %c0_60 = arith.constant 0 : index
      %c0_61 = arith.constant 0 : index
      %75 = vector.load %arg14[%c0_59, %c0_60, %c0_61] : memref<4x64x8xf32, #tpu.memory_space<vmem>>, vector<4x64x8xf32>
      tpu.vector_store %arg14[%c0_59, %c0_60, %c0_61], %74 {strides = array<i32>} : memref<4x64x8xf32, #tpu.memory_space<vmem>>, vector<4x64x8xf32>,
    } else {
    }
    %c0 = arith.constant 0 : index
    %c0_1 = arith.constant 0 : index
    %c0_2 = arith.constant 0 : index
    %3 = vector.load %arg4[%c0, %c0_1, %c0_2] : memref<1x64x32xf32, #tpu.memory_space<vmem>>, vector<1x64x32xf32>
    %4 = vector.shape_cast %3 : vector<1x64x32xf32> to vector<64x32xf32>
    %5 = arith.truncf %4 : vector<64x32xf32> to vector<64x32xbf16>
    %c0_3 = arith.constant 0 : index
    %c0_4 = arith.constant 0 : index
    %6 = vector.load %arg6[%c0_3, %c0_4] : memref<32x32xbf16, #tpu.memory_space<vmem>>, vector<32x32xbf16>
    %cst = arith.constant dense<0.000000e+00> : vector<64x32xf32>
    %7 = tpu.matmul %5, %6, %cst {dimension_numbers = #tpu.dot_dimension_numbers<[1], [0], [0], [1], [0, 0, 1, 1], [], []>} : vector<64x32xbf16>, vector<32x32xbf16>, vector<64x32xf32> -> vector<64x32xf32>
    %c0_5 = arith.constant 0 : index
    %c0_6 = arith.constant 0 : index
    %8 = vector.load %arg7[%c0_5, %c0_6] : memref<32x32xbf16, #tpu.memory_space<vmem>>, vector<32x32xbf16>
    %cst_7 = arith.constant dense<0.000000e+00> : vector<64x32xf32>
    %9 = tpu.matmul %5, %8, %cst_7 {dimension_numbers = #tpu.dot_dimension_numbers<[1], [0], [0], [1], [0, 0, 1, 1], [], []>} : vector<64x32xbf16>, vector<32x32xbf16>, vector<64x32xf32> -> vector<64x32xf32>
    %10 = vector.shape_cast %7 : vector<64x32xf32> to vector<1x64x32xf32>
    %11 = vector.shape_cast %9 : vector<64x32xf32> to vector<1x64x32xf32>
    %12 = vector.extract_strided_slice %10 {offsets = [0, 0, 0], sizes = [1, 64, 8], strides = [1, 1, 1]} : vector<1x64x32xf32> to vector<1x64x8xf32>
    %13 = vector.extract_strided_slice %10 {offsets = [0, 0, 8], sizes = [1, 64, 8], strides = [1, 1, 1]} : vector<1x64x32xf32> to vector<1x64x8xf32>
    %14 = vector.extract_strided_slice %10 {offsets = [0, 0, 16], sizes = [1, 64, 8], strides = [1, 1, 1]} : vector<1x64x32xf32> to vector<1x64x8xf32>
    %15 = vector.extract_strided_slice %10 {offsets = [0, 0, 24], sizes = [1, 64, 8], strides = [1, 1, 1]} : vector<1x64x32xf32> to vector<1x64x8xf32>
    %16 = tpu.concatenate %12, %13, %14, %15 in 0 : vector<1x64x8xf32>, vector<1x64x8xf32>, vector<1x64x8xf32>, vector<1x64x8xf32> -> vector<4x64x8xf32>
    %17 = arith.truncf %16 : vector<4x64x8xf32> to vector<4x64x8xbf16>
    %18 = vector.extract_strided_slice %11 {offsets = [0, 0, 0], sizes = [1, 64, 8], strides = [1, 1, 1]} : vector<1x64x32xf32> to vector<1x64x8xf32>
    %19 = vector.extract_strided_slice %11 {offsets = [0, 0, 8], sizes = [1, 64, 8], strides = [1, 1, 1]} : vector<1x64x32xf32> to vector<1x64x8xf32>
    %20 = vector.extract_strided_slice %11 {offsets = [0, 0, 16], sizes = [1, 64, 8], strides = [1, 1, 1]} : vector<1x64x32xf32> to vector<1x64x8xf32>
    %21 = vector.extract_strided_slice %11 {offsets = [0, 0, 24], sizes = [1, 64, 8], strides = [1, 1, 1]} : vector<1x64x32xf32> to vector<1x64x8xf32>
    %22 = tpu.concatenate %18, %19, %20, %21 in 0 : vector<1x64x8xf32>, vector<1x64x8xf32>, vector<1x64x8xf32>, vector<1x64x8xf32> -> vector<4x64x8xf32>
    %23 = arith.truncf %22 : vector<4x64x8xf32> to vector<4x64x8xbf16>
    %c0_8 = arith.constant 0 : index
    %c0_9 = arith.constant 0 : index
    %c0_10 = arith.constant 0 : index
    %24 = vector.load %arg11[%c0_8, %c0_9, %c0_10] : memref<4x64x8xbf16, #tpu.memory_space<vmem>>, vector<4x64x8xbf16>
    "tpu.trace_start"() <{level = 10 : i32, message = "gnd,gmd->gnm"}> : () -> ()
    %cst_11 = arith.constant dense<0.000000e+00> : vector<4x64x64xf32>
    %25 = tpu.matmul %24, %17, %cst_11 {dimension_numbers = #tpu.dot_dimension_numbers<[2], [2], [1], [1], [0, 0, 0, 1, 1, 1], [0], [0]>} : vector<4x64x8xbf16>, vector<4x64x8xbf16>, vector<4x64x64xf32> -> vector<4x64x64xf32>
    "tpu.trace_stop"() : () -> ()
    %c0_12 = arith.constant 0 : index
    %c0_13 = arith.constant 0 : index
    %c0_14 = arith.constant 0 : index
    %26 = vector.load %arg12[%c0_12, %c0_13, %c0_14] : memref<4x64x1xf32, #tpu.memory_space<vmem>>, vector<4x64x1xf32>
    %cst_15 = arith.constant dense<0xFF800000> : vector<4x64xf32>
    %27 = vector.multi_reduction <maximumf>, %25, %cst_15 [2] : vector<4x64x64xf32> to vector<4x64xf32>
    %28 = vector.shape_cast %27 : vector<4x64xf32> to vector<4x64x1xf32>
    %29 = arith.maximumf %26, %28 : vector<4x64x1xf32>
    %30 = arith.subf %26, %29 : vector<4x64x1xf32>
    %31 = math.exp %30 : vector<4x64x1xf32>
    %32 = vector.broadcast %29 : vector<4x64x1xf32> to vector<4x64x64xf32>
    %33 = arith.subf %25, %32 : vector<4x64x64xf32>
    %34 = math.exp %33 : vector<4x64x64xf32>
    %c0_16 = arith.constant 0 : index
    %c0_17 = arith.constant 0 : index
    %c0_18 = arith.constant 0 : index
    %35 = vector.load %arg13[%c0_16, %c0_17, %c0_18] : memref<4x64x1xf32, #tpu.memory_space<vmem>>, vector<4x64x1xf32>
    %36 = arith.mulf %31, %35 : vector<4x64x1xf32>
    %cst_19 = arith.constant dense<0.000000e+00> : vector<4x64xf32>
    %37 = vector.multi_reduction <add>, %34, %cst_19 [2] : vector<4x64x64xf32> to vector<4x64xf32>
    %38 = vector.shape_cast %37 : vector<4x64xf32> to vector<4x64x1xf32>
    %39 = arith.addf %36, %38 : vector<4x64x1xf32>
    %c0_20 = arith.constant 0 : index
    %c0_21 = arith.constant 0 : index
    %c0_22 = arith.constant 0 : index
    %40 = vector.load %arg13[%c0_20, %c0_21, %c0_22] : memref<4x64x1xf32, #tpu.memory_space<vmem>>, vector<4x64x1xf32>
    tpu.vector_store %arg13[%c0_20, %c0_21, %c0_22], %39 {strides = array<i32>} : memref<4x64x1xf32, #tpu.memory_space<vmem>>, vector<4x64x1xf32>,
    %c0_23 = arith.constant 0 : index
    %c0_24 = arith.constant 0 : index
    %c0_25 = arith.constant 0 : index
    %41 = vector.load %arg14[%c0_23, %c0_24, %c0_25] : memref<4x64x8xf32, #tpu.memory_space<vmem>>, vector<4x64x8xf32>
    %42 = vector.broadcast %31 : vector<4x64x1xf32> to vector<4x64x8xf32>
    %43 = arith.mulf %42, %41 : vector<4x64x8xf32>
    %44 = arith.truncf %34 : vector<4x64x64xf32> to vector<4x64x64xbf16>
    "tpu.trace_start"() <{level = 10 : i32, message = "gnm,gmd->gnd"}> : () -> ()
    %cst_26 = arith.constant dense<0.000000e+00> : vector<4x64x8xf32>
    %45 = tpu.matmul %44, %23, %cst_26 {dimension_numbers = #tpu.dot_dimension_numbers<[2], [1], [1], [2], [0, 0, 0, 1, 1, 2], [0], [0]>} : vector<4x64x64xbf16>, vector<4x64x8xbf16>, vector<4x64x8xf32> -> vector<4x64x8xf32>
    "tpu.trace_stop"() : () -> ()
    %46 = arith.addf %43, %45 : vector<4x64x8xf32>
    %c0_27 = arith.constant 0 : index
    %c0_28 = arith.constant 0 : index
    %c0_29 = arith.constant 0 : index
    %47 = vector.load %arg14[%c0_27, %c0_28, %c0_29] : memref<4x64x8xf32, #tpu.memory_space<vmem>>, vector<4x64x8xf32>
    tpu.vector_store %arg14[%c0_27, %c0_28, %c0_29], %46 {strides = array<i32>} : memref<4x64x8xf32, #tpu.memory_space<vmem>>, vector<4x64x8xf32>,
    %c0_30 = arith.constant 0 : index
    %c0_31 = arith.constant 0 : index
    %c0_32 = arith.constant 0 : index
    %48 = vector.load %arg12[%c0_30, %c0_31, %c0_32] : memref<4x64x1xf32, #tpu.memory_space<vmem>>, vector<4x64x1xf32>
    tpu.vector_store %arg12[%c0_30, %c0_31, %c0_32], %29 {strides = array<i32>} : memref<4x64x1xf32, #tpu.memory_space<vmem>>, vector<4x64x1xf32>,
    %c0_i32_33 = arith.constant 0 : i32
    %49 = arith.cmpi eq, %arg2, %c0_i32_33 : i32
    %50 = arith.extui %49 : i1 to i32
    %c0_i32_34 = arith.constant 0 : i32
    %51 = arith.cmpi ne, %50, %c0_i32_34 : i32
    scf.if %51 {
      %c0_35 = arith.constant 0 : index
      %c0_36 = arith.constant 0 : index
      %c0_37 = arith.constant 0 : index
      %52 = vector.load %arg14[%c0_35, %c0_36, %c0_37] : memref<4x64x8xf32, #tpu.memory_space<vmem>>, vector<4x64x8xf32>
      %c0_38 = arith.constant 0 : index
      %c0_39 = arith.constant 0 : index
      %c0_40 = arith.constant 0 : index
      %53 = vector.load %arg13[%c0_38, %c0_39, %c0_40] : memref<4x64x1xf32, #tpu.memory_space<vmem>>, vector<4x64x1xf32>
      %54 = tpu.reciprocal %53 {approx = true} : vector<4x64x1xf32> -> vector<4x64x1xf32>
      %55 = vector.broadcast %54 : vector<4x64x1xf32> to vector<4x64x8xf32>
      %56 = arith.mulf %52, %55 : vector<4x64x8xf32>
      %57 = vector.extract_strided_slice %56 {offsets = [0, 0, 0], sizes = [1, 64, 8], strides = [1, 1, 1]} : vector<4x64x8xf32> to vector<1x64x8xf32>
      %58 = vector.extract_strided_slice %56 {offsets = [1, 0, 0], sizes = [1, 64, 8], strides = [1, 1, 1]} : vector<4x64x8xf32> to vector<1x64x8xf32>
      %59 = vector.extract_strided_slice %56 {offsets = [2, 0, 0], sizes = [1, 64, 8], strides = [1, 1, 1]} : vector<4x64x8xf32> to vector<1x64x8xf32>
      %60 = vector.extract_strided_slice %56 {offsets = [3, 0, 0], sizes = [1, 64, 8], strides = [1, 1, 1]} : vector<4x64x8xf32> to vector<1x64x8xf32>
      %61 = tpu.concatenate %57, %58, %59, %60 in 2 : vector<1x64x8xf32>, vector<1x64x8xf32>, vector<1x64x8xf32>, vector<1x64x8xf32> -> vector<1x64x32xf32>
      %62 = vector.shape_cast %61 : vector<1x64x32xf32> to vector<64x32xf32>
      %63 = arith.truncf %62 : vector<64x32xf32> to vector<64x32xbf16>
      %c0_41 = arith.constant 0 : index
      %c0_42 = arith.constant 0 : index
      %64 = vector.load %arg8[%c0_41, %c0_42] : memref<32x32xbf16, #tpu.memory_space<vmem>>, vector<32x32xbf16>
      %cst_43 = arith.constant dense<0.000000e+00> : vector<64x32xf32>
      %65 = tpu.matmul %63, %64, %cst_43 {dimension_numbers = #tpu.dot_dimension_numbers<[1], [0], [0], [1], [0, 0, 1, 1], [], []>} : vector<64x32xbf16>, vector<32x32xbf16>, vector<64x32xf32> -> vector<64x32xf32>
      %c0_44 = arith.constant 0 : index
      %c0_45 = arith.constant 0 : index
      %66 = vector.load %arg9[%c0_44, %c0_45] : memref<1x32xf32, #tpu.memory_space<vmem>>, vector<1x32xf32>
      %67 = vector.broadcast %66 : vector<1x32xf32> to vector<64x32xf32>
      %68 = arith.addf %65, %67 : vector<64x32xf32>
      %69 = vector.shape_cast %68 : vector<64x32xf32> to vector<1x64x32xf32>
      %c0_46 = arith.constant 0 : index
      %c0_47 = arith.constant 0 : index
      %c0_48 = arith.constant 0 : index
      %70 = vector.load %arg10[%c0_46, %c0_47, %c0_48] : memref<1x64x32xf32, #tpu.memory_space<vmem>>, vector<1x64x32xf32>
      tpu.vector_store %arg10[%c0_46, %c0_47, %c0_48], %69 {strides = array<i32>} : memref<1x64x32xf32, #tpu.memory_space<vmem>>, vector<1x64x32xf32>,
    } else {
    }
    return
  }
  func.func @transform_0(%arg0: i32, %arg1: i32, %arg2: i32) -> (i32, i32, i32) {
    %c0_i32 = arith.constant 0 : i32
    %c0_i32_0 = arith.constant 0 : i32
    return %arg0, %arg1, %c0_i32 : i32, i32, i32
  }
  func.func @transform_1(%arg0: i32, %arg1: i32, %arg2: i32) -> (i32, i32, i32) {
    %c0_i32 = arith.constant 0 : i32
    %c0_i32_0 = arith.constant 0 : i32
    return %arg0, %arg2, %c0_i32 : i32, i32, i32
  }
  func.func @transform_2(%arg0: i32, %arg1: i32, %arg2: i32) -> (i32, i32) {
    %c0_i32 = arith.constant 0 : i32
    %c0_i32_0 = arith.constant 0 : i32
    %c0_i32_1 = arith.constant 0 : i32
    return %c0_i32, %c0_i32_0 : i32, i32
  }
  func.func @transform_3(%arg0: i32, %arg1: i32, %arg2: i32) -> (i32, i32) {
    %c0_i32 = arith.constant 0 : i32
    %c0_i32_0 = arith.constant 0 : i32
    %c0_i32_1 = arith.constant 0 : i32
    return %c0_i32, %c0_i32_0 : i32, i32
  }
  func.func @transform_4(%arg0: i32, %arg1: i32, %arg2: i32) -> (i32, i32) {
    %c0_i32 = arith.constant 0 : i32
    %c0_i32_0 = arith.constant 0 : i32
    %c0_i32_1 = arith.constant 0 : i32
    return %c0_i32, %c0_i32_0 : i32, i32
  }
  func.func @transform_5(%arg0: i32, %arg1: i32, %arg2: i32) -> (i32, i32) {
    %c0_i32 = arith.constant 0 : i32
    %c0_i32_0 = arith.constant 0 : i32
    %c0_i32_1 = arith.constant 0 : i32
    return %c0_i32, %c0_i32_0 : i32, i32
  }
  func.func @transform_6(%arg0: i32, %arg1: i32, %arg2: i32) -> (i32, i32) {
    %c0_i32 = arith.constant 0 : i32
    %c0_i32_0 = arith.constant 0 : i32
    %c0_i32_1 = arith.constant 0 : i32
    return %c0_i32, %c0_i32_0 : i32, i32
  }
  func.func @transform_7(%arg0: i32, %arg1: i32, %arg2: i32) -> (i32, i32, i32) {
    %c0_i32 = arith.constant 0 : i32
    %c0_i32_0 = arith.constant 0 : i32
    return %arg0, %arg1, %c0_i32 : i32, i32, i32
  }
}

</mosaic_0001>

<bundles_post_ra>
// kernel: tpu_custom_call.1
= control target key start
LH: loop header
LB: loop body
LE: loop exit
PB: predicated region body
PF: predicated region fallthrough
CT: control target
= control target key end

     0   :  { %s4241_s24 = smov 0   ;;  %s4243_s25 = smov 0   ;;  %s5668_s0 = inlined_call_operand.vmem [shape: f32[2,64,32], index: 0, kind: input, shape index: {}]   ;;  %s5669_s1 = inlined_call_operand.vmem [shape: f32[2,64,32], index: 1, kind: input, shape index: {}]   ;;  %s5670_s2 = inlined_call_operand.vmem [shape: bf16[32,32], index: 2, kind: input, shape index: {}]   ;;  %s5671_s3 = inlined_call_operand.vmem [shape: bf16[32,32], index: 3, kind: input, shape index: {}]   ;;  %s5672_s4 = inlined_call_operand.vmem [shape: bf16[32,32], index: 4, kind: input, shape index: {}]   ;;  %s5673_s5 = inlined_call_operand.vmem [shape: bf16[32,32], index: 5, kind: input, shape index: {}]   ;;  %s5674_s6 = inlined_call_operand.vmem [shape: f32[1,32], index: 6, kind: input, shape index: {}]   ;;  %s5675_s7 = inlined_call_operand.vmem [shape: f32[2,64,32], index: 7, kind: output, shape index: {}]  }
   0x1   :  { %s4245_s26 = smov 0  }
   0x2 LB: > { %s36_s27 = sadd.s32 1, %s4186_s25  ;;  %p3404_p0 = scmp.ge.s32.totalorder %s4190_s26, 1  ;;  %s4190_s26 = sphi %s4245_s26, %s17_s26   ;;  %s4186_s25 = sphi %s4243_s25, %s5863_s25   ;;  %s4182_s24 = sphi %s4241_s24, %s5862_s24  }
   0x3   : > { %p38_p1 = scmp.ge.s32.totalorder %s36_s27, 2  ;;  %p282_p2 = scmp.lt.s32.totalorder %s4190_s26, 3 }
   0x5   : > { %s5865_s27 = smov (%p38_p1, %s36_s27), 0  ;;  %p283_p3 = pnand %p3404_p0, %p282_p2 }
   0x7   : > { %286 = sbr.rel (%p283_p3) target bundleno = 1708 (0x6ac), region = 48 }
   0xe   : > { %v3968_v0 = vld [vmem:[%s5671_s3] sm:$0xff]   ;;  %p332_p4 = scmp.lt.s32.totalorder %s4182_s24, 1  ;;  %v3969_v1 = vld [vmem:[%s5671_s3 + $0x8] sm:$0xff]   ;;  %vm394_vm0 = vcmask 261120   ;;  %vm476_vm1 = vcmask 64512   ;;  %s4193_s28 = smov 112  }
   0xf   : > { %3573 = vmatprep.subr.bf16.mxu1 %v3968_v0  ;;  %v3970_v2 = vld [vmem:[%s5670_s2] sm:$0xff]   ;;  %v3971_v3 = vld [vmem:[%s5670_s2 + $0x8] sm:$0xff]   ;;  %s4194_s29 = smov 104   ;;  %vm1417_vm2 = vcmask 523264   ;;  %vm536_vm3 = vcmask 7168   ;;  %s4198_s30 = smov 8  }
  0x10   : > { %s5867_s24 = smov (!%p332_p4, %s4182_s24), 1  ;;  %3574 = vmatpush3.bf16.msra.mxu1 %v3968_v0  ;;  %3561 = vmatprep.subr.bf16.mxu0 %v3970_v2  ;;  %v3972_v4 = vld [vmem:[%s5672_s4] sm:$0xff]   ;;  %v3973_v19 = vld [vmem:[%s5672_s4 + $0x8] sm:$0xff]   ;;  %s4199_s8 = smov 16   ;;  %vm3162_vm4 = vcmask 130048   ;;  %vm3171_vm5 = vcmask 195584  }
  0x11   : > { %3575 = vmatprep.subr.bf16.mxu1 %v3969_v1  ;;  %s4271_s13 = sshll.u32 %s5867_s24, 6  ;;  %3562 = vmatpush3.bf16.msra.mxu0 %v3970_v2  ;;  %s4192_s24 = smov 120  }
  0x12   : > { %s349_s16 = scalar_lea.vmem %s5669_s1, %s4271_s13  ;;  %s4281_s19 = scalar_lea.vmem %s5668_s0, %s4271_s13  ;;  %3563 = vmatprep.subr.bf16.mxu0 %v3971_v3 }
  0x13   : > { %v633_v5 = vld [vmem:[%s349_s16] sm:$0xff]  ;;  %v634_v6 = vld [vmem:[%s349_s16 + $0x8] sm:$0xff]  ;;  %v635_v7 = vld [vmem:[%s349_s16 + $0x10] sm:$0xff]  ;;  %s4200_s14 = smov 24  }
  0x14   : > { %3576 = vmatpush3.bf16.msra.mxu1 %v3969_v1  ;;  %v641_v8 = vpack.c.bf16 %v634_v6, %v633_v5  ;;  %v636_v9 = vld [vmem:[%s349_s16 + $0x18] sm:$0xff]  ;;  %v366_v10 = vld [vmem:[%s4281_s19] sm:$0xff]  ;;  %v367_v11 = vld [vmem:[%s4281_s19 + $0x8] sm:$0xff] }
  0x15   : > { %v642_v12 = vpack.c.bf16 %v636_v9, %v635_v7  ;;  %v374_v13 = vpack.c.bf16 %v367_v11, %v366_v10  ;;  %v368_v14 = vld [vmem:[%s4281_s19 + $0x10] sm:$0xff]  ;;  %v369_v15 = vld [vmem:[%s4281_s19 + $0x18] sm:$0xff]  ;;  %v637_v16 = vld [vmem:[%s349_s16 + $0x20] sm:$0xff]  ;;  %3564 = vmatpush3.bf16.msra.mxu0 %v3971_v3 }
  0x16   : > { %3577 = vmatprep.mubr.msk.bf16.mxu1 %vm394_vm0, %v641_v8  ;;  %v375_v17 = vpack.c.bf16 %v369_v15, %v368_v14  ;;  %v638_v18 = vld [vmem:[%s349_s16 + $0x28] sm:$0xff]  ;;  %v639_v21 = vld [vmem:[%s349_s16 + $0x30] sm:$0xff]  ;;  %v370_v22 = vld [vmem:[%s4281_s19 + $0x20] sm:$0xff]  ;;  %3585 = vmatprep.subr.bf16.mxu0 %v3972_v4 }
  0x17   : > { %3578 = vmatmul.mubr.msk.bf16.vlgmr.msra.gmra.mrb[0].mxu1 %vm394_vm0, %v642_v12  ;;  %3565 = vmatprep.mubr.msk.bf16.mxu0 %vm394_vm0, %v374_v13  ;;  %v643_v20 = vpack.c.bf16 %v638_v18, %v637_v16  ;;  %v371_v23 = vld [vmem:[%s4281_s19 + $0x28] sm:$0xff]  ;;  %v640_v24 = vld [vmem:[%s349_s16 + $0x38] sm:$0xff]  ;;  %v372_v26 = vld [vmem:[%s4281_s19 + $0x30] sm:$0xff] }
  0x18   : > { %v376_v25 = vpack.c.bf16 %v371_v23, %v370_v22  ;;  %3566 = vmatmul.mubr.msk.bf16.vlgmr.msra.gmra.mrb[0].mxu0 %vm394_vm0, %v375_v17  ;;  %v373_v27 = vld [vmem:[%s4281_s19 + $0x38] sm:$0xff]  ;;  %v644_v28 = vpack.c.bf16 %v640_v24, %v639_v21  ;;  %s359_s19 = scalar_lea.vmem %s5675_s7, %s4271_s13 }
  0x19   : > { %3581 = vmatprep.mubr.msk.bf16.mxu1 %vm394_vm0, %v643_v20  ;;  %3586 = vmatpush3.bf16.msra.mxu0 %v3972_v4  ;;  %v377_v29 = vpack.c.bf16 %v373_v27, %v372_v26 }
  0x1a   : > { %3569 = vmatprep.mubr.msk.bf16.mxu0 %vm394_vm0, %v376_v25  ;;  %3587 = vmatprep.subr.bf16.mxu0 %v3973_v19 }
  0x1d   : > { %3588 = vmatpush3.bf16.msra.mxu0 %v3973_v19 }
  0x1f   : > { %3582 = vmatmul.mubr.msk.bf16.gmra.mrb[4].mxu1 %vm394_vm0, %v644_v28 }
  0x20   : > { %3570 = vmatmul.mubr.msk.bf16.gmra.mrb[4].mxu0 %vm394_vm0, %v377_v29 }
  0x21   : > { %3589 = vmatprep.mubr.msk.bf16.mxu0 %vm394_vm0, %v641_v8 }
  0x28   : > { %3590 = vmatmul.mubr.msk.bf16.vlgmr.msra.gmra.mrb[8].mxu0 %vm394_vm0, %v642_v12 }
  0x29   : > { %3593 = vmatprep.mubr.msk.bf16.mxu0 %vm394_vm0, %v643_v20 }
  0x30   : > { %3594 = vmatmul.mubr.msk.bf16.gmra.mrb[12].mxu0 %vm394_vm0, %v644_v28 }
  0xea   : > { %v3579_v30 = vpop.f32.mrb[0].mxu1 }
  0xeb   : > { %v708_v31 = vpop.f32.mrb[1].mxu1  ;;  %v3567_v33 = vpop.f32.mrb[0].mxu0 }
  0xec   : > { %v3580_v32 = vpop.f32.mrb[2].mxu1  ;;  %v441_v36 = vpop.f32.mrb[1].mxu0 }
  0xed   : > { %v901_v34 = vpack.c.bf16 %v3580_v32, %v3579_v30  ;;  %v711_v35 = vpop.f32.mrb[3].mxu1  ;;  %v3791_v37 = vpack.i.bf16 %v3580_v32, %v3579_v30  ;;  %v3568_v40 = vpop.f32.mrb[2].mxu0 }
  0xee   : > { %v900_v38 = vpack.c.bf16 %v711_v35, %v708_v31  ;;  %v3786_v39 = vpack.i.bf16 %v711_v35, %v708_v31  ;;  %v4309_v41 = vpack.c.bf16 %v3568_v40, %v3567_v33  ;;  %v444_v42 = vpop.f32.mrb[3].mxu0 }
  0xef   : > { %v472_v44 = vpack.c.bf16 %v444_v42, %v441_v36  ;;  %v1045_v58 = vsel %vm476_vm1, %v901_v34, 0 }
  0xf0   : > { %3787 = vrot.lane.b32.xlu0 %v3786_v39, %s4192_s24  ;;  %3737 = vmatprep.subr.msk.bf16.mxu1 %vm476_vm1, %v900_v38  ;;  %v1042_v43 = vsel %vm476_vm1, %v900_v38, 0  ;;  %478 = vst.msk [vmem:[#allocation2 + $0x8] sm:$0xff] %vm476_vm1, %v4309_v41 }
  0xf1   : > { %3598 = vmatpush3.bf16.xpose.msra.mxu1 %v1042_v43  ;;  %477 = vst.msk [vmem:[#allocation2] sm:$0xff] %vm476_vm1, %v472_v44 }
  0xf2   : > { %v3583_v45 = vpop.f32.mrb[4].mxu1  ;;  %3738 = vmatprep.subr.msk.bf16.mxu1 %vm476_vm1, %v901_v34 }
  0xf3   : > { %v724_v46 = vpop.f32.mrb[5].mxu1  ;;  %v3571_v48 = vpop.f32.mrb[4].mxu0 }
  0xf4   : > { %3792 = vrot.lane.b32.xlu0 %v3791_v37, %s4192_s24  ;;  %v3584_v47 = vpop.f32.mrb[6].mxu1  ;;  %v457_v52 = vpop.f32.mrb[5].mxu0 }
  0xf5   : > { %v903_v49 = vpack.c.bf16 %v3584_v47, %v3583_v45  ;;  %v727_v50 = vpop.f32.mrb[7].mxu1  ;;  %v3801_v51 = vpack.i.bf16 %v3584_v47, %v3583_v45  ;;  %v3572_v55 = vpop.f32.mrb[6].mxu0 }
  0xf6   : > { %v902_v53 = vpack.c.bf16 %v727_v50, %v724_v46  ;;  %v3796_v54 = vpack.i.bf16 %v727_v50, %v724_v46  ;;  %v475_v56 = vpack.c.bf16 %v3572_v55, %v3571_v48  ;;  %v460_v57 = vpop.f32.mrb[7].mxu0 }
  0xf7   : > { %v474_v59 = vpack.c.bf16 %v460_v57, %v457_v52  ;;  %v1051_v62 = vsel %vm476_vm1, %v903_v49, 0  ;;  %v1013_v0 = vld [vmem:[#allocation2 + $0x8] sm:$0xff] }
  0xf8   : > { %3797 = vrot.lane.b32.xlu1 %v3796_v54, %s4192_s24  ;;  %485 = vrot.lane.b32.xlu0 %v472_v44, %s4192_s24  ;;  %v1012_v60 = vld [vmem:[#allocation2] sm:$0xff]  ;;  %480 = vst.msk [vmem:[#allocation2 + $0x18] sm:$0xff] %vm476_vm1, %v475_v56  ;;  %v1048_v61 = vsel %vm476_vm1, %v902_v53, 0 }
  0xf9   : > { %3600 = vmatpush3.bf16.xpose.msra.mxu1 %v1045_v58  ;;  %3605 = vmatprep.mubr.msk.bf16.mxu1 %vm476_vm1, %v1012_v60  ;;  %479 = vst.msk [vmem:[#allocation2 + $0x10] sm:$0xff] %vm476_vm1, %v474_v59 }
  0xfa   : > { %3739 = vmatprep.subr.msk.bf16.mxu1 %vm476_vm1, %v902_v53 }
  0xfb   : > { %v3591_v2 = vpop.f32.mrb[8].mxu0 }
  0xfc   : > { %3802 = vrot.lane.b32.xlu1 %v3801_v51, %s4192_s24  ;;  %3807 = vrot.lane.b32.xlu0 %v3786_v39, %s4193_s28  ;;  %v789_v3 = vpop.f32.mrb[9].mxu0 }
  0xfd   : > { %v3592_v4 = vpop.f32.mrb[10].mxu0 }
  0xfe   : > { %v3846_v5 = vpack.i.bf16 %v3592_v4, %v3591_v2  ;;  %v792_v6 = vpop.f32.mrb[11].mxu0  ;;  %v4356_v7 = vpack.c.bf16 %v3592_v4, %v3591_v2 }
  0xff   : > { %v1015_v1 = vld [vmem:[#allocation2 + $0x18] sm:$0xff]  ;;  %v3861_v8 = vpack.i.bf16 %v792_v6, %v789_v3  ;;  %v4358_v10 = vpack.c.bf16 %v792_v6, %v789_v3 }
 0x100   : > { %487 = vrot.lane.b32.xlu1 %v4309_v41, %s4192_s24  ;;  %3817 = vrot.lane.b32.xlu0 %v3791_v37, %s4193_s28  ;;  %v1014_v63 = vld [vmem:[#allocation2 + $0x10] sm:$0xff] }
 0x101   : > { %3602 = vmatpush3.bf16.xpose.msra.mxu1 %v1048_v61 }
 0x102   : > { %3740 = vmatprep.subr.msk.bf16.mxu1 %vm476_vm1, %v903_v49 }
 0x103   : > { %v3595_v9 = vpop.f32.mrb[12].mxu0 }
 0x104   : > { %3812 = vrot.lane.b32.xlu1 %v3786_v39, %s4194_s29  ;;  %3827 = vrot.lane.b32.xlu0 %v3801_v51, %s4193_s28  ;;  %v805_v11 = vpop.f32.mrb[13].mxu0 }
 0x105   : > { %v3596_v12 = vpop.f32.mrb[14].mxu0 }
 0x106   : > { %v3876_v13 = vpack.i.bf16 %v3596_v12, %v3595_v9  ;;  %v808_v14 = vpop.f32.mrb[15].mxu0  ;;  %v4362_v15 = vpack.c.bf16 %v3596_v12, %v3595_v9 }
 0x107   : > { %v3891_v16 = vpack.i.bf16 %v808_v14, %v805_v11  ;;  %v4364_v17 = vpack.c.bf16 %v808_v14, %v805_v11 }
 0x108   : > { %3822 = vrot.lane.b32.xlu1 %v3791_v37, %s4194_s29  ;;  %3832 = vrot.lane.b32.xlu0 %v3796_v54, %s4193_s28 }
 0x109   : > { %3604 = vmatpush3.bf16.xpose.msra.mxu1 %v1051_v62 }
 0x10c   : > { %502 = vrot.lane.b32.xlu1 %v472_v44, %s4193_s28  ;;  %489 = vrot.lane.b32.xlu0 %v474_v59, %s4192_s24 }
 0x110   : > { %3837 = vrot.lane.b32.xlu1 %v3796_v54, %s4194_s29  ;;  %3606 = vmatmul.mubr.msk.bf16.vlgmr.msra.gmra.mrb[8].mxu1 %vm476_vm1, %v1013_v0 }
 0x111   : > { %3842 = vrot.lane.b32.xlu0 %v3801_v51, %s4194_s29  ;;  %3609 = vmatprep.mubr.msk.bf16.mxu1 %vm476_vm1, %v1014_v63 }
 0x114   : > { %491 = vrot.lane.b32.xlu1 %v475_v56, %s4192_s24 }
 0x115   : > { %519 = vrot.lane.b32.xlu0 %v472_v44, %s4194_s29 }
 0x118   : > { %504 = vrot.lane.b32.xlu1 %v4309_v41, %s4193_s28  ;;  %3610 = vmatmul.mubr.msk.bf16.gmra.mrb[12].mxu1 %vm476_vm1, %v1015_v1 }
 0x119   : > { %506 = vrot.lane.b32.xlu0 %v474_v59, %s4193_s28 }
 0x11c   : > { %521 = vrot.lane.b32.xlu1 %v4309_v41, %s4194_s29 }
 0x11d   : > { %523 = vrot.lane.b32.xlu0 %v474_v59, %s4194_s29 }
 0x120   : > { %508 = vrot.lane.b32.xlu1 %v475_v56, %s4193_s28 }
 0x121   : > { %3852 = vrot.lane.b32.xlu0 %v3846_v5, %s4193_s28 }
 0x124   : > { %525 = vrot.lane.b32.xlu1 %v475_v56, %s4194_s29 }
 0x125   : > { %3867 = vrot.lane.b32.xlu0 %v3861_v8, %s4193_s28 }
 0x128   : > { %3847 = vrot.lane.b32.xlu1 %v3846_v5, %s4192_s24 }
 0x129   : > { %3882 = vrot.lane.b32.xlu0 %v3876_v13, %s4193_s28 }
 0x12c   : > { %3857 = vrot.lane.b32.xlu1 %v3846_v5, %s4194_s29 }
 0x12d   : > { %3892 = vrot.lane.b32.xlu0 %v3891_v16, %s4192_s24 }
 0x130   : > { %3862 = vrot.lane.b32.xlu1 %v3861_v8, %s4192_s24 }
 0x131   : > { %3897 = vrot.lane.b32.xlu0 %v3891_v16, %s4193_s28 }
 0x134   : > { %3872 = vrot.lane.b32.xlu1 %v3861_v8, %s4194_s29 }
 0x138   : > { %3877 = vrot.lane.b32.xlu1 %v3876_v13, %s4192_s24 }
 0x13c   : > { %3887 = vrot.lane.b32.xlu1 %v3876_v13, %s4194_s29 }
 0x140   : > { %3902 = vrot.lane.b32.xlu1 %v3891_v16, %s4194_s29 }
 0x162   : > { %v3788_v18 = vpop.permute.xlu0 %3787 }
 0x163   : > { %v3790_v19 = vunpack.i.h.bf16 %v3788_v18  ;;  %v3789_v20 = vunpack.i.l.bf16 %v3788_v18 }
 0x165   : > { %v904_v21 = vpack.c.bf16 %v3790_v19, %v3789_v20 }
 0x166   : > { %v3793_v22 = vpop.permute.xlu0 %3792 }
 0x167   : > { %v3795_v23 = vunpack.i.h.bf16 %v3793_v22  ;;  %v3794_v24 = vunpack.i.l.bf16 %v3793_v22  ;;  %3741 = vmatprep.subr.msk.bf16.mxu0 %vm476_vm1, %v904_v21  ;;  %v1131_v25 = vsel %vm476_vm1, %v904_v21, 0 }
 0x168   : > { %3614 = vmatpush3.bf16.xpose.msra.mxu0 %v1131_v25 }
 0x169   : > { %v905_v26 = vpack.c.bf16 %v3795_v23, %v3794_v24 }
 0x16a   : > { %v3798_v27 = vpop.permute.xlu1 %3797  ;;  %v486_v28 = vpop.permute.xlu0 %485 }
 0x16b   : > { %v3800_v29 = vunpack.i.h.bf16 %v3798_v27  ;;  %v3799_v30 = vunpack.i.l.bf16 %v3798_v27  ;;  %498 = vst.msk [vmem:[#allocation2 + $0x20] sm:$0xff] %vm476_vm1, %v486_v28  ;;  %3742 = vmatprep.subr.msk.bf16.mxu0 %vm476_vm1, %v905_v26  ;;  %v1134_v36 = vsel %vm476_vm1, %v905_v26, 0 }
 0x16d   : > { %v906_v33 = vpack.c.bf16 %v3800_v29, %v3799_v30 }
 0x16e   : > { %v3803_v31 = vpop.permute.xlu1 %3802  ;;  %v3808_v32 = vpop.permute.xlu0 %3807 }
 0x16f   : > { %v3810_v34 = vunpack.i.h.bf16 %v3808_v32  ;;  %v3809_v35 = vunpack.i.l.bf16 %v3808_v32  ;;  %v3805_v38 = vunpack.i.h.bf16 %v3803_v31  ;;  %v3804_v42 = vunpack.i.l.bf16 %v3803_v31 }
 0x170   : > { %3616 = vmatpush3.bf16.xpose.msra.mxu0 %v1134_v36  ;;  %v1137_v50 = vsel %vm476_vm1, %v906_v33, 0 }
 0x171   : > { %v908_v37 = vpack.c.bf16 %v3810_v34, %v3809_v35  ;;  %3743 = vmatprep.subr.msk.bf16.mxu0 %vm476_vm1, %v906_v33  ;;  %v907_v49 = vpack.c.bf16 %v3805_v38, %v3804_v42 }
 0x172   : > { %v488_v39 = vpop.permute.xlu1 %487  ;;  %v3818_v40 = vpop.permute.xlu0 %3817  ;;  %v1016_v41 = vld [vmem:[#allocation2 + $0x20] sm:$0xff] }
 0x173   : > { %499 = vst.msk [vmem:[#allocation2 + $0x28] sm:$0xff] %vm476_vm1, %v488_v39  ;;  %v3820_v43 = vunpack.i.h.bf16 %v3818_v40  ;;  %v3819_v44 = vunpack.i.l.bf16 %v3818_v40  ;;  %3621 = vmatprep.mubr.msk.bf16.mxu0 %vm476_vm1, %v1016_v41  ;;  %3745 = vmatprep.subr.msk.bf16.mxu1 %vm476_vm1, %v908_v37  ;;  %v1220_v45 = vsel %vm476_vm1, %v908_v37, 0  ;;  %v1140_v0 = vsel %vm476_vm1, %v907_v49, 0 }
 0x174   : > { %3630 = vmatpush3.bf16.xpose.msra.mxu1 %v1220_v45 }
 0x175   : > { %v909_v46 = vpack.c.bf16 %v3820_v43, %v3819_v44 }
 0x176   : > { %v3813_v47 = vpop.permute.xlu1 %3812  ;;  %v3828_v48 = vpop.permute.xlu0 %3827 }
 0x177   : > { %3746 = vmatprep.subr.msk.bf16.mxu1 %vm476_vm1, %v909_v46  ;;  %v3815_v51 = vunpack.i.h.bf16 %v3813_v47  ;;  %v3814_v54 = vunpack.i.l.bf16 %v3813_v47  ;;  %v1223_v57 = vsel %vm476_vm1, %v909_v46, 0  ;;  %v3830_v62 = vunpack.i.h.bf16 %v3828_v48 }
 0x178   : > { %3618 = vmatpush3.bf16.xpose.msra.mxu0 %v1137_v50  ;;  %v3829_v63 = vunpack.i.l.bf16 %v3828_v48 }
 0x179   : > { %3744 = vmatprep.subr.msk.bf16.mxu0 %vm476_vm1, %v907_v49  ;;  %v912_v61 = vpack.c.bf16 %v3815_v51, %v3814_v54 }
 0x17a   : > { %v3823_v52 = vpop.permute.xlu1 %3822  ;;  %v3833_v53 = vpop.permute.xlu0 %3832  ;;  %v911_v2 = vpack.c.bf16 %v3830_v62, %v3829_v63  ;;  %v1017_v9 = vld [vmem:[#allocation2 + $0x28] sm:$0xff] }
 0x17b   : > { %v3835_v55 = vunpack.i.h.bf16 %v3833_v53  ;;  %v3834_v56 = vunpack.i.l.bf16 %v3833_v53  ;;  %v3825_v3 = vunpack.i.h.bf16 %v3823_v52  ;;  %v3824_v4 = vunpack.i.l.bf16 %v3823_v52 }
 0x17c   : > { %3632 = vmatpush3.bf16.xpose.msra.mxu1 %v1223_v57  ;;  %v1309_v16 = vsel %vm476_vm1, %v912_v61, 0  ;;  %v1229_v22 = vsel %vm476_vm1, %v911_v2, 0 }
 0x17d   : > { %v910_v58 = vpack.c.bf16 %v3835_v55, %v3834_v56  ;;  %v913_v13 = vpack.c.bf16 %v3825_v3, %v3824_v4 }
 0x17e   : > { %v503_v59 = vpop.permute.xlu1 %502  ;;  %v490_v60 = vpop.permute.xlu0 %489 }
 0x17f   : > { %515 = vst.msk [vmem:[#allocation2 + $0x40] sm:$0xff] %vm476_vm1, %v503_v59  ;;  %500 = vst.msk [vmem:[#allocation2 + $0x30] sm:$0xff] %vm476_vm1, %v490_v60  ;;  %3747 = vmatprep.subr.msk.bf16.mxu1 %vm476_vm1, %v910_v58  ;;  %v1226_v6 = vsel %vm476_vm1, %v910_v58, 0  ;;  %v1312_v27 = vsel %vm476_vm1, %v913_v13, 0 }
 0x180   : > { %3620 = vmatpush3.bf16.xpose.msra.mxu0 %v1140_v0 }
 0x181   : > { %3749 = vmatprep.subr.msk.bf16.mxu0 %vm476_vm1, %v912_v61 }
 0x182   : > { %v3838_v1 = vpop.permute.xlu1 %3837 }
 0x183   : > { %v3843_v5 = vpop.permute.xlu0 %3842  ;;  %v3840_v19 = vunpack.i.h.bf16 %v3838_v1  ;;  %v3839_v20 = vunpack.i.l.bf16 %v3838_v1 }
 0x184   : > { %3634 = vmatpush3.bf16.xpose.msra.mxu1 %v1226_v6  ;;  %v3845_v31 = vunpack.i.h.bf16 %v3843_v5  ;;  %v3844_v32 = vunpack.i.l.bf16 %v3843_v5 }
 0x185   : > { %3748 = vmatprep.subr.msk.bf16.mxu1 %vm476_vm1, %v911_v2  ;;  %v914_v25 = vpack.c.bf16 %v3840_v19, %v3839_v20 }
 0x186   : > { %v492_v8 = vpop.permute.xlu1 %491  ;;  %v1020_v11 = vld [vmem:[#allocation2 + $0x40] sm:$0xff]  ;;  %v1018_v12 = vld [vmem:[#allocation2 + $0x30] sm:$0xff]  ;;  %v915_v35 = vpack.c.bf16 %v3845_v31, %v3844_v32 }
 0x187   : > { %501 = vst.msk [vmem:[#allocation2 + $0x38] sm:$0xff] %vm476_vm1, %v492_v8  ;;  %v520_v14 = vpop.permute.xlu0 %519  ;;  %3622 = vmatmul.mubr.msk.bf16.vlgmr.msra.gmra.mrb[16].mxu0 %vm476_vm1, %v1017_v9  ;;  %3637 = vmatprep.mubr.msk.bf16.mxu1 %vm476_vm1, %v1020_v11  ;;  %v1315_v36 = vsel %vm476_vm1, %v914_v25, 0 }
 0x188   : > { %532 = vst.msk [vmem:[#allocation2 + $0x60] sm:$0xff] %vm476_vm1, %v520_v14  ;;  %3646 = vmatpush3.bf16.xpose.msra.mxu0 %v1309_v16  ;;  %3625 = vmatprep.mubr.msk.bf16.mxu0 %vm476_vm1, %v1018_v12  ;;  %v1318_v38 = vsel %vm476_vm1, %v915_v35, 0  ;;  %v4195_v14 = vmov -inf  }
 0x189   : > { %3750 = vmatprep.subr.msk.bf16.mxu0 %vm476_vm1, %v913_v13  ;;  %539 = vst.msk [vmem:[#allocation3 + $0x10] sm:$0xff] %vm536_vm3, %v4195_v14  ;;  %537 = vst.msk [vmem:[#allocation3] sm:$0xff] %vm536_vm3, %v4195_v14 }
 0x18a   : > { %v505_v18 = vpop.permute.xlu1 %504  ;;  %538 = vst.msk [vmem:[#allocation3 + $0x8] sm:$0xff] %vm536_vm3, %v4195_v14  ;;  %540 = vst.msk [vmem:[#allocation3 + $0x18] sm:$0xff] %vm536_vm3, %v4195_v14 }
 0x18b   : > { %516 = vst.msk [vmem:[#allocation2 + $0x48] sm:$0xff] %vm476_vm1, %v505_v18  ;;  %v507_v21 = vpop.permute.xlu0 %506 }
 0x18c   : > { %517 = vst.msk [vmem:[#allocation2 + $0x50] sm:$0xff] %vm476_vm1, %v507_v21  ;;  %3636 = vmatpush3.bf16.xpose.msra.mxu1 %v1229_v22  ;;  %v4196_v22 = vmov 0.0  }
 0x18d   : > { %3661 = vmatprep.subr.bf16.mxu1 %v4358_v10  ;;  %541 = vst.msk [vmem:[#allocation3 + $0x20] sm:$0xff] %vm536_vm3, %v4195_v14  ;;  %542 = vst.msk [vmem:[#allocation3 + $0x28] sm:$0xff] %vm536_vm3, %v4195_v14 }
 0x18e   : > { %v522_v23 = vpop.permute.xlu1 %521  ;;  %v1019_v24 = vld [vmem:[#allocation2 + $0x38] sm:$0xff]  ;;  %543 = vst.msk [vmem:[#allocation3 + $0x30] sm:$0xff] %vm536_vm3, %v4195_v14  ;;  %544 = vst.msk [vmem:[#allocation3 + $0x38] sm:$0xff] %vm536_vm3, %v4195_v14 }
 0x18f   : > { %533 = vst.msk [vmem:[#allocation2 + $0x68] sm:$0xff] %vm476_vm1, %v522_v23  ;;  %v524_v26 = vpop.permute.xlu0 %523  ;;  %3626 = vmatmul.mubr.msk.bf16.gmra.mrb[20].mxu0 %vm476_vm1, %v1019_v24  ;;  %v1024_v28 = vld [vmem:[#allocation2 + $0x60] sm:$0xff]  ;;  %601 = vst.msk [vmem:[#allocation5] sm:$0xff] %vm476_vm1, %v4196_v22  ;;  %v4197_v23 = vmov 0  }
 0x190   : > { %534 = vst.msk [vmem:[#allocation2 + $0x70] sm:$0xff] %vm476_vm1, %v524_v26  ;;  %3648 = vmatpush3.bf16.xpose.msra.mxu0 %v1312_v27  ;;  %3653 = vmatprep.mubr.msk.bf16.mxu0 %vm476_vm1, %v1024_v28  ;;  %602 = vst.msk [vmem:[#allocation5 + $0x8] sm:$0xff] %vm476_vm1, %v4196_v22 }
 0x191   : > { %3751 = vmatprep.subr.msk.bf16.mxu0 %vm476_vm1, %v914_v25  ;;  %545 = vst.msk [vmem:[#allocation3 + $0x40] sm:$0xff] %vm536_vm3, %v4195_v14  ;;  %546 = vst.msk [vmem:[#allocation3 + $0x48] sm:$0xff] %vm536_vm3, %v4195_v14  ;;  %3906 = vset.pattern.permute.xlu1 %v4197_v23 }
 0x192   : > { %v509_v29 = vpop.permute.xlu1 %508  ;;  %v1021_v30 = vld [vmem:[#allocation2 + $0x48] sm:$0xff]  ;;  %547 = vst.msk [vmem:[#allocation3 + $0x50] sm:$0xff] %vm536_vm3, %v4195_v14  ;;  %548 = vst.msk [vmem:[#allocation3 + $0x58] sm:$0xff] %vm536_vm3, %v4195_v14  ;;  %3907 = vset.pattern.permute.xlu0 %v4197_v23 }
 0x193   : > { %518 = vst.msk [vmem:[#allocation2 + $0x58] sm:$0xff] %vm476_vm1, %v509_v29  ;;  %3638 = vmatmul.mubr.msk.bf16.vlgmr.msra.gmra.mrb[16].mxu1 %vm476_vm1, %v1021_v30  ;;  %v1022_v33 = vld [vmem:[#allocation2 + $0x50] sm:$0xff]  ;;  %603 = vst.msk [vmem:[#allocation5 + $0x10] sm:$0xff] %vm476_vm1, %v4196_v22 }
 0x194   : > { %3641 = vmatprep.mubr.msk.bf16.mxu1 %vm476_vm1, %v1022_v33  ;;  %3662 = vmatpush3.bf16.msra.mxu1 %v4358_v10  ;;  %549 = vst.msk [vmem:[#allocation3 + $0x60] sm:$0xff] %vm536_vm3, %v4195_v14  ;;  %550 = vst.msk [vmem:[#allocation3 + $0x68] sm:$0xff] %vm536_vm3, %v4195_v14 }
 0x195   : > { %3663 = vmatprep.subr.bf16.mxu1 %v4356_v7  ;;  %551 = vst.msk [vmem:[#allocation3 + $0x70] sm:$0xff] %vm536_vm3, %v4195_v14  ;;  %552 = vst.msk [vmem:[#allocation3 + $0x78] sm:$0xff] %vm536_vm3, %v4195_v14 }
 0x196   : > { %v526_v34 = vpop.permute.xlu1 %525  ;;  %v1025_v40 = vld [vmem:[#allocation2 + $0x68] sm:$0xff]  ;;  %553 = vst.msk [vmem:[#allocation3 + $0x80] sm:$0xff] %vm536_vm3, %v4195_v14  ;;  %554 = vst.msk [vmem:[#allocation3 + $0x88] sm:$0xff] %vm536_vm3, %v4195_v14 }
 0x197   : > { %535 = vst.msk [vmem:[#allocation2 + $0x78] sm:$0xff] %vm476_vm1, %v526_v34  ;;  %v1026_v43 = vld [vmem:[#allocation2 + $0x70] sm:$0xff]  ;;  %604 = vst.msk [vmem:[#allocation5 + $0x18] sm:$0xff] %vm476_vm1, %v4196_v22 }
 0x198   : > { %3650 = vmatpush3.bf16.xpose.msra.mxu0 %v1315_v36  ;;  %3664 = vmatpush3.bf16.msra.mxu1 %v4356_v7  ;;  %v4430_v7 = vpop.permute.xlu0 %3852  ;;  %555 = vst.msk [vmem:[#allocation3 + $0x90] sm:$0xff] %vm536_vm3, %v4195_v14  ;;  %556 = vst.msk [vmem:[#allocation3 + $0x98] sm:$0xff] %vm536_vm3, %v4195_v14 }
 0x199   : > { %3752 = vmatprep.subr.msk.bf16.mxu0 %vm476_vm1, %v915_v35  ;;  %3665 = vmatprep.subr.bf16.mxu1 %v4364_v17  ;;  %557 = vst.msk [vmem:[#allocation3 + $0xa0] sm:$0xff] %vm536_vm3, %v4195_v14  ;;  %558 = vst.msk [vmem:[#allocation3 + $0xa8] sm:$0xff] %vm536_vm3, %v4195_v14 }
 0x19a   : > { %v1023_v37 = vld [vmem:[#allocation2 + $0x58] sm:$0xff]  ;;  %v3848_v10 = vpop.permute.xlu1 %3847  ;;  %559 = vst.msk [vmem:[#allocation3 + $0xb0] sm:$0xff] %vm536_vm3, %v4195_v14  ;;  %560 = vst.msk [vmem:[#allocation3 + $0xb8] sm:$0xff] %vm536_vm3, %v4195_v14 }
 0x19b   : > { %3642 = vmatmul.mubr.msk.bf16.gmra.mrb[20].mxu1 %vm476_vm1, %v1023_v37  ;;  %v3850_v41 = vunpack.i.h.bf16 %v3848_v10  ;;  %v3849_v42 = vunpack.i.l.bf16 %v3848_v10  ;;  %561 = vst.msk [vmem:[#allocation3 + $0xc0] sm:$0xff] %vm536_vm3, %v4195_v14  ;;  %562 = vst.msk [vmem:[#allocation3 + $0xc8] sm:$0xff] %vm536_vm3, %v4195_v14 }
 0x19c   : > { %3666 = vmatpush3.bf16.msra.mxu1 %v4364_v17  ;;  %v3868_v17 = vpop.permute.xlu0 %3867  ;;  %563 = vst.msk [vmem:[#allocation3 + $0xd0] sm:$0xff] %vm536_vm3, %v4195_v14  ;;  %564 = vst.msk [vmem:[#allocation3 + $0xd8] sm:$0xff] %vm536_vm3, %v4195_v14 }
 0x19d   : > { %3667 = vmatprep.subr.bf16.mxu1 %v4362_v15  ;;  %v3870_v47 = vunpack.i.h.bf16 %v3868_v17  ;;  %v3869_v48 = vunpack.i.l.bf16 %v3868_v17  ;;  %565 = vst.msk [vmem:[#allocation3 + $0xe0] sm:$0xff] %vm536_vm3, %v4195_v14  ;;  %566 = vst.msk [vmem:[#allocation3 + $0xe8] sm:$0xff] %vm536_vm3, %v4195_v14 }
 0x19e   : > { %v4428_v39 = vpop.permute.xlu1 %3857  ;;  %v1027_v53 = vld [vmem:[#allocation2 + $0x78] sm:$0xff]  ;;  %567 = vst.msk [vmem:[#allocation3 + $0xf0] sm:$0xff] %vm536_vm3, %v4195_v14  ;;  %568 = vst.msk [vmem:[#allocation3 + $0xf8] sm:$0xff] %vm536_vm3, %v4195_v14 }
 0x19f   : > { %v4434_v50 = vpack.c.bf16 %v3870_v47, %v3869_v48  ;;  %570 = vst.msk [vmem:[#allocation4 + $0x8] sm:$0xff] %vm536_vm3, %v4196_v22  ;;  %569 = vst.msk [vmem:[#allocation4] sm:$0xff] %vm536_vm3, %v4196_v22  ;;  %v4683_v47 = vld [vmem:[#allocation3 + $0x10] sm:$0xff] }
 0x1a0   : > { %3652 = vmatpush3.bf16.xpose.msra.mxu0 %v1318_v38  ;;  %3668 = vmatpush3.bf16.msra.mxu1 %v4362_v15  ;;  %v1001_v15 = vpack.c.bf16 %v3850_v41, %v3849_v42  ;;  %v4436_v51 = vpop.permute.xlu0 %3882  ;;  %571 = vst.msk [vmem:[#allocation4 + $0x10] sm:$0xff] %vm536_vm3, %v4196_v22  ;;  %572 = vst.msk [vmem:[#allocation4 + $0x18] sm:$0xff] %vm536_vm3, %v4196_v22 }
 0x1a1   : > { %3693 = vmatprep.subr.bf16.mxu1 %v4434_v50  ;;  %573 = vst.msk [vmem:[#allocation4 + $0x20] sm:$0xff] %vm536_vm3, %v4196_v22  ;;  %574 = vst.msk [vmem:[#allocation4 + $0x28] sm:$0xff] %vm536_vm3, %v4196_v22 }
 0x1a2   : > { %v3863_v44 = vpop.permute.xlu1 %3862  ;;  %575 = vst.msk [vmem:[#allocation4 + $0x30] sm:$0xff] %vm536_vm3, %v4196_v22  ;;  %576 = vst.msk [vmem:[#allocation4 + $0x38] sm:$0xff] %vm536_vm3, %v4196_v22 }
 0x1a3   : > { %v3865_v45 = vunpack.i.h.bf16 %v3863_v44  ;;  %v3864_v46 = vunpack.i.l.bf16 %v3863_v44  ;;  %577 = vst.msk [vmem:[#allocation4 + $0x40] sm:$0xff] %vm536_vm3, %v4196_v22  ;;  %578 = vst.msk [vmem:[#allocation4 + $0x48] sm:$0xff] %vm536_vm3, %v4196_v22 }
 0x1a4   : > { %v3893_v54 = vpop.permute.xlu0 %3892  ;;  %579 = vst.msk [vmem:[#allocation4 + $0x50] sm:$0xff] %vm536_vm3, %v4196_v22  ;;  %580 = vst.msk [vmem:[#allocation4 + $0x58] sm:$0xff] %vm536_vm3, %v4196_v22 }
 0x1a5   : > { %v1000_v49 = vpack.c.bf16 %v3865_v45, %v3864_v46  ;;  %v3895_v56 = vunpack.i.h.bf16 %v3893_v54  ;;  %v3894_v57 = vunpack.i.l.bf16 %v3893_v54  ;;  %581 = vst.msk [vmem:[#allocation4 + $0x60] sm:$0xff] %vm536_vm3, %v4196_v22  ;;  %582 = vst.msk [vmem:[#allocation4 + $0x68] sm:$0xff] %vm536_vm3, %v4196_v22 }
 0x1a6   : > { %v3873_v52 = vpop.permute.xlu1 %3872  ;;  %583 = vst.msk [vmem:[#allocation4 + $0x70] sm:$0xff] %vm536_vm3, %v4196_v22  ;;  %584 = vst.msk [vmem:[#allocation4 + $0x78] sm:$0xff] %vm536_vm3, %v4196_v22 }
 0x1a7   : > { %3654 = vmatmul.mubr.msk.bf16.vlgmr.msra.gmra.mrb[24].mxu0 %vm476_vm1, %v1025_v40  ;;  %3677 = vmatprep.subr.bf16.mxu0 %v1000_v49  ;;  %v3875_v60 = vunpack.i.h.bf16 %v3873_v52  ;;  %v3874_v61 = vunpack.i.l.bf16 %v3873_v52  ;;  %v1002_v62 = vpack.c.bf16 %v3895_v56, %v3894_v57  ;;  %585 = vst.msk [vmem:[#allocation4 + $0x80] sm:$0xff] %vm536_vm3, %v4196_v22  ;;  %586 = vst.msk [vmem:[#allocation4 + $0x88] sm:$0xff] %vm536_vm3, %v4196_v22  ;;  %v4698_v56 = vld [vmem:[#allocation3] sm:$0xff] }
 0x1a8   : > { %3657 = vmatprep.mubr.msk.bf16.mxu0 %vm476_vm1, %v1026_v43  ;;  %3678 = vmatpush3.bf16.msra.mxu0 %v1000_v49  ;;  %587 = vst.msk [vmem:[#allocation4 + $0x90] sm:$0xff] %vm536_vm3, %v4196_v22  ;;  %588 = vst.msk [vmem:[#allocation4 + $0x98] sm:$0xff] %vm536_vm3, %v4196_v22  ;;  %v4673_v43 = vpop.permute.xlu0 %3897 }
 0x1a9   : > { %3679 = vmatprep.subr.bf16.mxu0 %v1001_v15  ;;  %v4440_v0 = vpack.c.bf16 %v3875_v60, %v3874_v61  ;;  %589 = vst.msk [vmem:[#allocation4 + $0xa0] sm:$0xff] %vm536_vm3, %v4196_v22  ;;  %590 = vst.msk [vmem:[#allocation4 + $0xa8] sm:$0xff] %vm536_vm3, %v4196_v22 }
 0x1aa   : > { %v3878_v55 = vpop.permute.xlu1 %3877  ;;  %591 = vst.msk [vmem:[#allocation4 + $0xb0] sm:$0xff] %vm536_vm3, %v4196_v22  ;;  %592 = vst.msk [vmem:[#allocation4 + $0xb8] sm:$0xff] %vm536_vm3, %v4196_v22 }
 0x1ab   : > { %v3880_v58 = vunpack.i.h.bf16 %v3878_v55  ;;  %v3879_v59 = vunpack.i.l.bf16 %v3878_v55  ;;  %593 = vst.msk [vmem:[#allocation4 + $0xc0] sm:$0xff] %vm536_vm3, %v4196_v22  ;;  %594 = vst.msk [vmem:[#allocation4 + $0xc8] sm:$0xff] %vm536_vm3, %v4196_v22  ;;  %v4696_v55 = vld [vmem:[#allocation3 + $0x8] sm:$0xff] }
 0x1ac   : > { %3680 = vmatpush3.bf16.msra.mxu0 %v1001_v15  ;;  %595 = vst.msk [vmem:[#allocation4 + $0xd0] sm:$0xff] %vm536_vm3, %v4196_v22  ;;  %596 = vst.msk [vmem:[#allocation4 + $0xd8] sm:$0xff] %vm536_vm3, %v4196_v22 }
 0x1ad   : > { %v1003_v63 = vpack.c.bf16 %v3880_v58, %v3879_v59  ;;  %3681 = vmatprep.subr.bf16.mxu0 %v1002_v62  ;;  %597 = vst.msk [vmem:[#allocation4 + $0xe0] sm:$0xff] %vm536_vm3, %v4196_v22  ;;  %598 = vst.msk [vmem:[#allocation4 + $0xe8] sm:$0xff] %vm536_vm3, %v4196_v22 }
 0x1ae   : > { %599 = vst.msk [vmem:[#allocation4 + $0xf0] sm:$0xff] %vm536_vm3, %v4196_v22  ;;  %600 = vst.msk [vmem:[#allocation4 + $0xf8] sm:$0xff] %vm536_vm3, %v4196_v22  ;;  %v4667_v40 = vpop.permute.xlu1 %3887 }
 0x1af   : > { %3658 = vmatmul.mubr.msk.bf16.gmra.mrb[28].mxu0 %vm476_vm1, %v1027_v53  ;;  %605 = vst.msk [vmem:[#allocation5 + $0x20] sm:$0xff] %vm476_vm1, %v4196_v22  ;;  %606 = vst.msk [vmem:[#allocation5 + $0x28] sm:$0xff] %vm476_vm1, %v4196_v22 }
 0x1b0   : > { %3682 = vmatpush3.bf16.msra.mxu0 %v1002_v62  ;;  %607 = vst.msk [vmem:[#allocation5 + $0x30] sm:$0xff] %vm476_vm1, %v4196_v22  ;;  %608 = vst.msk [vmem:[#allocation5 + $0x38] sm:$0xff] %vm476_vm1, %v4196_v22 }
 0x1b1   : > { %3683 = vmatprep.subr.bf16.mxu0 %v1003_v63  ;;  %609 = vst.msk [vmem:[#allocation5 + $0x40] sm:$0xff] %vm476_vm1, %v4196_v22  ;;  %610 = vst.msk [vmem:[#allocation5 + $0x48] sm:$0xff] %vm476_vm1, %v4196_v22 }
 0x1b2   : > { %611 = vst.msk [vmem:[#allocation5 + $0x50] sm:$0xff] %vm476_vm1, %v4196_v22  ;;  %612 = vst.msk [vmem:[#allocation5 + $0x58] sm:$0xff] %vm476_vm1, %v4196_v22  ;;  %v4685_v48 = vpop.permute.xlu1 %3902 }
 0x1b3   : > { %613 = vst.msk [vmem:[#allocation5 + $0x60] sm:$0xff] %vm476_vm1, %v4196_v22  ;;  %614 = vst.msk [vmem:[#allocation5 + $0x68] sm:$0xff] %vm476_vm1, %v4196_v22 }
 0x1b4   : > { %3684 = vmatpush3.bf16.msra.mxu0 %v1003_v63  ;;  %615 = vst.msk [vmem:[#allocation5 + $0x70] sm:$0xff] %vm476_vm1, %v4196_v22  ;;  %616 = vst.msk [vmem:[#allocation5 + $0x78] sm:$0xff] %vm476_vm1, %v4196_v22 }
 0x1b5   : > { %3709 = vmatprep.subr.bf16.mxu0 %v4440_v0  ;;  %617 = vst.msk [vmem:[#allocation5 + $0x80] sm:$0xff] %vm476_vm1, %v4196_v22  ;;  %618 = vst.msk [vmem:[#allocation5 + $0x88] sm:$0xff] %vm476_vm1, %v4196_v22 }
 0x1b6   : > { %619 = vst.msk [vmem:[#allocation5 + $0x90] sm:$0xff] %vm476_vm1, %v4196_v22  ;;  %620 = vst.msk [vmem:[#allocation5 + $0x98] sm:$0xff] %vm476_vm1, %v4196_v22 }
 0x1b7   : > { %621 = vst.msk [vmem:[#allocation5 + $0xa0] sm:$0xff] %vm476_vm1, %v4196_v22  ;;  %622 = vst.msk [vmem:[#allocation5 + $0xa8] sm:$0xff] %vm476_vm1, %v4196_v22 }
 0x1b8   : > { %623 = vst.msk [vmem:[#allocation5 + $0xb0] sm:$0xff] %vm476_vm1, %v4196_v22  ;;  %624 = vst.msk [vmem:[#allocation5 + $0xb8] sm:$0xff] %vm476_vm1, %v4196_v22 }
 0x1b9   : > { %625 = vst.msk [vmem:[#allocation5 + $0xc0] sm:$0xff] %vm476_vm1, %v4196_v22  ;;  %626 = vst.msk [vmem:[#allocation5 + $0xc8] sm:$0xff] %vm476_vm1, %v4196_v22 }
 0x1ba   : > { %627 = vst.msk [vmem:[#allocation5 + $0xd0] sm:$0xff] %vm476_vm1, %v4196_v22  ;;  %628 = vst.msk [vmem:[#allocation5 + $0xd8] sm:$0xff] %vm476_vm1, %v4196_v22 }
 0x1bb   : > { %629 = vst.msk [vmem:[#allocation5 + $0xe0] sm:$0xff] %vm476_vm1, %v4196_v22  ;;  %630 = vst.msk [vmem:[#allocation5 + $0xe8] sm:$0xff] %vm476_vm1, %v4196_v22 }
 0x1bc   : > { %631 = vst.msk [vmem:[#allocation5 + $0xf0] sm:$0xff] %vm476_vm1, %v4196_v22  ;;  %632 = vst.msk [vmem:[#allocation5 + $0xf8] sm:$0xff] %vm476_vm1, %v4196_v22 }
 0x1bd   : > { %5726 = vst [vmem:[#allocation6_spill] sm:$0xff] %v4683_v47  ;;  %5728 = vst [vmem:[#allocation8_spill] sm:$0xff] %v4698_v56 }
 0x1e3   : > { %v4443_v1 = vpop.f32.mrb[8].mxu1 }
 0x1e4   : > { %v4445_v2 = vpop.f32.mrb[9].mxu1  ;;  %v1424_v3 = vsel %vm1417_vm2, %v4443_v1, -inf }
 0x1e5   : > { %v4449_v4 = vpop.f32.mrb[10].mxu1  ;;  %1425 = vmax.xlane.f32.xlu0 %v1424_v3  ;;  %v1418_v8 = vsel %vm1417_vm2, %v4445_v2, -inf  ;;  %v4830_v3 = vld [vmem:[#allocation3 + $0x40] sm:$0xff] }
 0x1e6   : > { %v4451_v5 = vpop.f32.mrb[11].mxu1  ;;  %v1427_v12 = vsel %vm1417_vm2, %v4449_v4, -inf }
 0x1e7   : > { %v1421_v6 = vsel %vm1417_vm2, %v4451_v5, -inf }
 0x1e8   : > { %1422 = vmax.xlane.f32.xlu1 %v1421_v6  ;;  %v4718_v6 = vld [vmem:[#allocation3 + $0x18] sm:$0xff] }
 0x1e9   : > { %1419 = vmax.xlane.f32.xlu0 %v1418_v8  ;;  %5730 = vst [vmem:[#allocation10_spill] sm:$0xff] %v4718_v6 }
 0x1eb   : > { %v4457_v9 = vpop.f32.mrb[12].mxu1 }
 0x1ec   : > { %v4459_v11 = vpop.f32.mrb[13].mxu1  ;;  %v1436_v13 = vsel %vm1417_vm2, %v4457_v9, -inf }
 0x1ed   : > { %1428 = vmax.xlane.f32.xlu0 %v1427_v12  ;;  %1437 = vmax.xlane.f32.xlu1 %v1436_v13  ;;  %v4497_v16 = vpop.f32.mrb[14].mxu1  ;;  %v1430_v19 = vsel %vm1417_vm2, %v4459_v11, -inf  ;;  %v4724_v12 = vld [vmem:[#allocation3 + $0x30] sm:$0xff] }
 0x1ee   : > { %v4499_v18 = vpop.f32.mrb[15].mxu1  ;;  %v1439_v20 = vsel %vm1417_vm2, %v4497_v16, -inf  ;;  %5731 = vst [vmem:[#allocation11_spill] sm:$0xff] %v4724_v12 }
 0x1ef   : > { %v1433_v21 = vsel %vm1417_vm2, %v4499_v18, -inf }
 0x1f1   : > { %1431 = vmax.xlane.f32.xlu1 %v1430_v19  ;;  %1440 = vmax.xlane.f32.xlu0 %v1439_v20 }
 0x1f5   : > { %1434 = vmax.xlane.f32.xlu0 %v1433_v21 }
 0x25a   : > { %v4635_v24 = vpop.f32.mrb[16].mxu0 }
 0x25b   : > { %v4637_v25 = vpop.f32.mrb[17].mxu0  ;;  %v1448_v26 = vsel %vm1417_vm2, %v4635_v24, -inf }
 0x25c   : > { %v4641_v27 = vpop.f32.mrb[18].mxu0  ;;  %1449 = vmax.xlane.f32.xlu1 %v1448_v26  ;;  %v1442_v41 = vsel %vm1417_vm2, %v4637_v25, -inf }
 0x25d   : > { %v4643_v28 = vpop.f32.mrb[19].mxu0  ;;  %v1451_v29 = vsel %vm1417_vm2, %v4641_v27, -inf }
 0x25e   : > { %1452 = vmax.xlane.f32.xlu0 %v1451_v29  ;;  %v1445_v42 = vsel %vm1417_vm2, %v4643_v28, -inf }
 0x262   : > { %v4647_v30 = vpop.f32.mrb[20].mxu0 }
 0x263   : > { %v4649_v31 = vpop.f32.mrb[21].mxu0  ;;  %v1460_v54 = vsel %vm1417_vm2, %v4647_v30, -inf }
 0x264   : > { %v4651_v32 = vpop.f32.mrb[22].mxu0  ;;  %v1454_v23 = vsel %vm1417_vm2, %v4649_v31, -inf }
 0x265   : > { %v4653_v33 = vpop.f32.mrb[23].mxu0  ;;  %v1463_v59 = vsel %vm1417_vm2, %v4651_v32, -inf }
 0x266   : > { %v4655_v34 = vpop.f32.mrb[16].mxu1 }
 0x267   : > { %v4657_v35 = vpop.f32.mrb[17].mxu1  ;;  %v1472_v36 = vsel %vm1417_vm2, %v4655_v34, -inf }
 0x268   : > { %1473 = vmax.xlane.f32.xlu1 %v1472_v36  ;;  %v4661_v37 = vpop.f32.mrb[18].mxu1  ;;  %v1466_v45 = vsel %vm1417_vm2, %v4657_v35, -inf  ;;  %v4742_v36 = vld [vmem:[#allocation3 + $0x38] sm:$0xff] }
 0x269   : > { %v4663_v10 = vpop.f32.mrb[19].mxu1  ;;  %v1475_v38 = vsel %vm1417_vm2, %v4661_v37, -inf  ;;  %5737 = vst [vmem:[#allocation17_spill] sm:$0xff] %v4742_v36 }
 0x26a   : > { %1476 = vmax.xlane.f32.xlu0 %v1475_v38  ;;  %v1469_v15 = vsel %vm1417_vm2, %v4663_v10, -inf }
 0x26c   : > { %1443 = vmax.xlane.f32.xlu1 %v1442_v41 }
 0x26e   : > { %1446 = vmax.xlane.f32.xlu0 %v1445_v42  ;;  %v4675_v44 = vpop.f32.mrb[20].mxu1  ;;  %v4750_v42 = vld [vmem:[#allocation3 + $0x20] sm:$0xff] }
 0x26f   : > { %v4677_v17 = vpop.f32.mrb[21].mxu1  ;;  %v1484_v63 = vsel %vm1417_vm2, %v4675_v44, -inf  ;;  %5739 = vst [vmem:[#allocation19_spill] sm:$0xff] %v4750_v42 }
 0x270   : > { %1467 = vmax.xlane.f32.xlu1 %v1466_v45  ;;  %v4681_v46 = vpop.f32.mrb[22].mxu1  ;;  %v1457_v45 = vsel %vm1417_vm2, %v4653_v33, -inf }
 0x271   : > { %v4687_v49 = vpop.f32.mrb[23].mxu1  ;;  %v1487_v13 = vsel %vm1417_vm2, %v4681_v46, -inf }
 0x272   : > { %v1426_v52 = vpop.xlane.xlu0 %1425  ;;  %1470 = vmax.xlane.f32.xlu0 %v1469_v15 }
 0x273   : > { %v4692_v53 = vmax.f32 %v4683_v47, %v1426_v52  ;;  %v4861_v47 = vld [vmem:[#allocation3 + $0x88] sm:$0xff] }
 0x274   : > { %1461 = vmax.xlane.f32.xlu1 %v1460_v54  ;;  %5751 = vst [vmem:[#allocation31_spill] sm:$0xff] %v4861_v47 }
 0x275   : > { %5727 = vst [vmem:[#allocation7_spill] sm:$0xff] %v4692_v53  ;;  %2737 = vst.msk [vmem:[#allocation3 + $0x10] sm:$0xff] %vm536_vm3, %v4692_v53  ;;  %v1423_v58 = vpop.xlane.xlu1 %1422 }
 0x276   : > { %v4707_v60 = vmax.f32 %v4696_v55, %v1423_v58  ;;  %v1420_v61 = vpop.xlane.xlu0 %1419  ;;  %1464 = vmax.xlane.f32.xlu0 %v1463_v59  ;;  %v1478_v58 = vsel %vm1417_vm2, %v4677_v17, -inf }
 0x277   : > { %v4710_v62 = vmax.f32 %v4698_v56, %v1420_v61  ;;  %v4764_v61 = vld [vmem:[#allocation3 + $0x28] sm:$0xff] }
 0x278   : > { %2736 = vst.msk [vmem:[#allocation3 + $0x8] sm:$0xff] %vm536_vm3, %v4707_v60  ;;  %1485 = vmax.xlane.f32.xlu1 %v1484_v63  ;;  %5742 = vst [vmem:[#allocation22_spill] sm:$0xff] %v4764_v61  ;;  %v1481_v63 = vsel %vm1417_vm2, %v4687_v49, -inf }
 0x279   : > { %5729 = vst [vmem:[#allocation9_spill] sm:$0xff] %v4710_v62  ;;  %2735 = vst.msk [vmem:[#allocation3] sm:$0xff] %vm536_vm3, %v4710_v62 }
 0x27a   : > { %v1429_v14 = vpop.xlane.xlu0 %1428  ;;  %v4728_v19 = vpop.f32.mrb[24].mxu0  ;;  %1488 = vmax.xlane.f32.xlu0 %v1487_v13 }
 0x27b   : > { %5732 = vst [vmem:[#allocation12_spill] sm:$0xff] %v4728_v19  ;;  %v4731_v20 = vmax.f32 %v4718_v6, %v1429_v14  ;;  %v1438_v21 = vpop.xlane.xlu1 %1437  ;;  %v4733_v22 = vpop.f32.mrb[25].mxu0 }
 0x27c   : > { %5734 = vst [vmem:[#allocation14_spill] sm:$0xff] %v4733_v22  ;;  %v4738_v26 = vmax.f32 %v4724_v12, %v1438_v21  ;;  %v4740_v29 = vpop.f32.mrb[26].mxu0  ;;  %1455 = vmax.xlane.f32.xlu1 %v1454_v23 }
 0x27d   : > { %5733 = vst [vmem:[#allocation13_spill] sm:$0xff] %v4731_v20  ;;  %5736 = vst [vmem:[#allocation16_spill] sm:$0xff] %v4740_v29  ;;  %v4748_v41 = vpop.f32.mrb[27].mxu0 }
 0x27e   : > { %5735 = vst [vmem:[#allocation15_spill] sm:$0xff] %v4738_v26  ;;  %2738 = vst.msk [vmem:[#allocation3 + $0x18] sm:$0xff] %vm536_vm3, %v4731_v20  ;;  %v1441_v15 = vpop.xlane.xlu0 %1440  ;;  %1458 = vmax.xlane.f32.xlu0 %v1457_v45 }
 0x27f   : > { %5738 = vst [vmem:[#allocation18_spill] sm:$0xff] %v4748_v41  ;;  %2741 = vst.msk [vmem:[#allocation3 + $0x30] sm:$0xff] %vm536_vm3, %v4738_v26  ;;  %v1432_v52 = vpop.xlane.xlu1 %1431  ;;  %v4757_v54 = vmax.f32 %v4742_v36, %v1441_v15  ;;  %v4821_v36 = vld [vmem:[#allocation3 + $0x90] sm:$0xff] }
 0x280   : > { %v4762_v59 = vmax.f32 %v4750_v42, %v1432_v52  ;;  %1479 = vmax.xlane.f32.xlu1 %v1478_v58  ;;  %v1499_v52 = vsel %vm1417_vm2, %v4740_v29, -inf  ;;  %v1493_v58 = vsel %vm1417_vm2, %v4748_v41, -inf  ;;  %5748 = vst [vmem:[#allocation28_spill] sm:$0xff] %v4821_v36  ;;  %v4915_v41 = vld [vmem:[#allocation3 + $0x68] sm:$0xff] }
 0x281   : > { %5740 = vst [vmem:[#allocation20_spill] sm:$0xff] %v4757_v54  ;;  %2742 = vst.msk [vmem:[#allocation3 + $0x38] sm:$0xff] %vm536_vm3, %v4757_v54 }
 0x282   : > { %5741 = vst [vmem:[#allocation21_spill] sm:$0xff] %v4762_v59  ;;  %2739 = vst.msk [vmem:[#allocation3 + $0x20] sm:$0xff] %vm536_vm3, %v4762_v59  ;;  %v4772_v13 = vpop.f32.mrb[28].mxu0  ;;  %v1435_v14 = vpop.xlane.xlu0 %1434  ;;  %1482 = vmax.xlane.f32.xlu0 %v1481_v63  ;;  %v1496_v63 = vsel %vm1417_vm2, %v4728_v19, -inf }
 0x283   : > { %5743 = vst [vmem:[#allocation23_spill] sm:$0xff] %v4772_v13  ;;  %v4775_v21 = vmax.f32 %v4764_v61, %v1435_v14  ;;  %v4777_v23 = vpop.f32.mrb[29].mxu0  ;;  %v1490_v14 = vsel %vm1417_vm2, %v4733_v22, -inf  ;;  %v4906_v22 = vld [vmem:[#allocation3 + $0x60] sm:$0xff]  ;;  %5762 = vst [vmem:[#allocation42_spill] sm:$0xff] %v4915_v41 }
 0x284   : > { %5745 = vst [vmem:[#allocation25_spill] sm:$0xff] %v4777_v23  ;;  %v4779_v45 = vpop.f32.mrb[30].mxu0  ;;  %5760 = vst [vmem:[#allocation40_spill] sm:$0xff] %v4906_v22 }
 0x285   : > { %5744 = vst [vmem:[#allocation24_spill] sm:$0xff] %v4775_v21  ;;  %5746 = vst [vmem:[#allocation26_spill] sm:$0xff] %v4779_v45  ;;  %v4783_v15 = vpop.f32.mrb[31].mxu0 }
 0x286   : > { %2740 = vst.msk [vmem:[#allocation3 + $0x28] sm:$0xff] %vm536_vm3, %v4775_v21  ;;  %5747 = vst [vmem:[#allocation27_spill] sm:$0xff] %v4783_v15 }
 0x291   : > { %1654 = vperm.xlu1 %3906, %v4692_v53   ;;  %v1502_v53 = vsel %vm1417_vm2, %v4777_v23, -inf }
 0x295   : > { %1644 = vperm.xlu1 %3906, %v4710_v62  }
 0x298   : > { %1649 = vperm.xlu0 %3907, %v4707_v60  }
 0x299   : > { %1659 = vperm.xlu1 %3906, %v4731_v20   ;;  %v4841_v20 = vld [vmem:[#allocation3 + $0x48] sm:$0xff] }
 0x2b7   : > { %1500 = vmax.xlane.f32.xlu0 %v1499_v52  ;;  %v4801_v52 = vld [vmem:[#allocation3 + $0x50] sm:$0xff] }
 0x2bb   : > { %1494 = vmax.xlane.f32.xlu0 %v1493_v58  ;;  %v4803_v58 = vld [vmem:[#allocation3 + $0x58] sm:$0xff] }
 0x2bd   : > { %1497 = vmax.xlane.f32.xlu1 %v1496_v63 }
 0x2c1   : > { %1491 = vmax.xlane.f32.xlu1 %v1490_v14  ;;  %v4823_v14 = vld [vmem:[#allocation3 + $0x98] sm:$0xff] }
 0x2c2   : > { %5749 = vst [vmem:[#allocation29_spill] sm:$0xff] %v4823_v14 }
 0x2d1   : > { %1679 = vperm.xlu0 %3907, %v4757_v54  }
 0x2d2   : > { %1674 = vperm.xlu1 %3906, %v4738_v26   ;;  %v1505_v26 = vsel %vm1417_vm2, %v4783_v15, -inf  ;;  %v4879_v15 = vld [vmem:[#allocation3 + $0x78] sm:$0xff] }
 0x2d3   : > { %5754 = vst [vmem:[#allocation34_spill] sm:$0xff] %v4879_v15 }
 0x2d5   : > { %1669 = vperm.xlu0 %3907, %v4775_v21  }
 0x2d6   : > { %1664 = vperm.xlu1 %3906, %v4762_v59  }
 0x2e9   : > { %v1450_v38 = vpop.xlane.xlu1 %1449 }
 0x2ea   : > { %v4806_v57 = vmax.f32 %v4801_v52, %v1450_v38  ;;  %v1511_v38 = vsel %vm1417_vm2, %v4779_v45, -inf }
 0x2eb   : > { %v1453_v63 = vpop.xlane.xlu0 %1452 }
 0x2ec   : > { %2745 = vst.msk [vmem:[#allocation3 + $0x50] sm:$0xff] %vm536_vm3, %v4806_v57  ;;  %v4813_v8 = vmax.f32 %v4803_v58, %v1453_v63 }
 0x2ee   : > { %2746 = vst.msk [vmem:[#allocation3 + $0x58] sm:$0xff] %vm536_vm3, %v4813_v8 }
 0x2f4   : > { %1512 = vmax.xlane.f32.xlu0 %v1511_v38 }
 0x2f5   : > { %v1474_v54 = vpop.xlane.xlu1 %1473 }
 0x2f6   : > { %v4826_v12 = vmax.f32 %v4821_v36, %v1474_v54  ;;  %v1508_v54 = vsel %vm1417_vm2, %v4772_v13, -inf  ;;  %v4870_v13 = vld [vmem:[#allocation3 + $0x70] sm:$0xff] }
 0x2f7   : > { %v1477_v63 = vpop.xlane.xlu0 %1476  ;;  %5752 = vst [vmem:[#allocation32_spill] sm:$0xff] %v4870_v13 }
 0x2f8   : > { %2753 = vst.msk [vmem:[#allocation3 + $0x90] sm:$0xff] %vm536_vm3, %v4826_v12  ;;  %v4837_v38 = vmax.f32 %v4823_v14, %v1477_v63  ;;  %1506 = vmax.xlane.f32.xlu0 %v1505_v26  ;;  %v4850_v63 = vld [vmem:[#allocation3 + $0x80] sm:$0xff] }
 0x2f9   : > { %v1444_v21 = vpop.xlane.xlu1 %1443 }
 0x2fa   : > { %5750 = vst [vmem:[#allocation30_spill] sm:$0xff] %v4837_v38  ;;  %2754 = vst.msk [vmem:[#allocation3 + $0x98] sm:$0xff] %vm536_vm3, %v4837_v38  ;;  %v4848_v61 = vmax.f32 %v4830_v3, %v1444_v21  ;;  %1509 = vmax.xlane.f32.xlu1 %v1508_v54 }
 0x2fb   : > { %v1447_v42 = vpop.xlane.xlu0 %1446 }
 0x2fc   : > { %2743 = vst.msk [vmem:[#allocation3 + $0x40] sm:$0xff] %vm536_vm3, %v4848_v61  ;;  %v4857_v59 = vmax.f32 %v4841_v20, %v1447_v42  ;;  %v4888_v42 = vld [vmem:[#allocation3 + $0xb0] sm:$0xff] }
 0x2fd   : > { %v1468_v6 = vpop.xlane.xlu1 %1467  ;;  %5756 = vst [vmem:[#allocation36_spill] sm:$0xff] %v4888_v42 }
 0x2fe   : > { %2744 = vst.msk [vmem:[#allocation3 + $0x48] sm:$0xff] %vm536_vm3, %v4857_v59  ;;  %v4868_v54 = vmax.f32 %v4850_v63, %v1468_v6  ;;  %1503 = vmax.xlane.f32.xlu1 %v1502_v53  ;;  %v4897_v6 = vld [vmem:[#allocation3 + $0xb8] sm:$0xff] }
 0x2ff   : > { %v1471_v26 = vpop.xlane.xlu0 %1470  ;;  %5758 = vst [vmem:[#allocation38_spill] sm:$0xff] %v4897_v6 }
 0x300   : > { %2751 = vst.msk [vmem:[#allocation3 + $0x80] sm:$0xff] %vm536_vm3, %v4868_v54  ;;  %v4877_v23 = vmax.f32 %v4861_v47, %v1471_v26 }
 0x301   : > { %v1462_v21 = vpop.xlane.xlu1 %1461 }
 0x302   : > { %5753 = vst [vmem:[#allocation33_spill] sm:$0xff] %v4877_v23  ;;  %2752 = vst.msk [vmem:[#allocation3 + $0x88] sm:$0xff] %vm536_vm3, %v4877_v23  ;;  %v4886_v53 = vmax.f32 %v4870_v13, %v1462_v21  ;;  %v4924_v13 = vld [vmem:[#allocation3 + $0xa0] sm:$0xff] }
 0x303   : > { %v1465_v45 = vpop.xlane.xlu0 %1464  ;;  %5763 = vst [vmem:[#allocation43_spill] sm:$0xff] %v4924_v13 }
 0x304   : > { %5755 = vst [vmem:[#allocation35_spill] sm:$0xff] %v4886_v53  ;;  %2749 = vst.msk [vmem:[#allocation3 + $0x70] sm:$0xff] %vm536_vm3, %v4886_v53  ;;  %v4895_v26 = vmax.f32 %v4879_v15, %v1465_v45  ;;  %v4933_v15 = vld [vmem:[#allocation3 + $0xa8] sm:$0xff] }
 0x305   : > { %v1486_v19 = vpop.xlane.xlu1 %1485  ;;  %5764 = vst [vmem:[#allocation44_spill] sm:$0xff] %v4933_v15 }
 0x306   : > { %5757 = vst [vmem:[#allocation37_spill] sm:$0xff] %v4895_v26  ;;  %2750 = vst.msk [vmem:[#allocation3 + $0x78] sm:$0xff] %vm536_vm3, %v4895_v26  ;;  %v4904_v21 = vmax.f32 %v4888_v42, %v1486_v19 }
 0x307   : > { %v1489_v29 = vpop.xlane.xlu0 %1488 }
 0x308   : > { %5759 = vst [vmem:[#allocation39_spill] sm:$0xff] %v4904_v21  ;;  %2757 = vst.msk [vmem:[#allocation3 + $0xb0] sm:$0xff] %vm536_vm3, %v4904_v21  ;;  %v4913_v45 = vmax.f32 %v4897_v6, %v1489_v29 }
 0x309   : > { %v1456_v62 = vpop.xlane.xlu1 %1455 }
 0x30a   : > { %5761 = vst [vmem:[#allocation41_spill] sm:$0xff] %v4913_v45  ;;  %2758 = vst.msk [vmem:[#allocation3 + $0xb8] sm:$0xff] %vm536_vm3, %v4913_v45  ;;  %v4922_v19 = vmax.f32 %v4906_v22, %v1456_v62 }
 0x30b   : > { %v1459_v56 = vpop.xlane.xlu0 %1458 }
 0x30c   : > { %2747 = vst.msk [vmem:[#allocation3 + $0x60] sm:$0xff] %vm536_vm3, %v4922_v19  ;;  %v4931_v29 = vmax.f32 %v4915_v41, %v1459_v56 }
 0x30d   : > { %v1480_v14 = vpop.xlane.xlu1 %1479 }
 0x30e   : > { %2748 = vst.msk [vmem:[#allocation3 + $0x68] sm:$0xff] %vm536_vm3, %v4931_v29  ;;  %v4940_v62 = vmax.f32 %v4924_v13, %v1480_v14  ;;  %1739 = vperm.xlu0 %3907, %v4837_v38  }
 0x30f   : > { %1694 = vperm.xlu1 %3906, %v4806_v57   ;;  %v1483_v42 = vpop.xlane.xlu0 %1482 }
 0x310   : > { %5765 = vst [vmem:[#allocation45_spill] sm:$0xff] %v4940_v62  ;;  %2755 = vst.msk [vmem:[#allocation3 + $0xa0] sm:$0xff] %vm536_vm3, %v4940_v62  ;;  %v4949_v22 = vmax.f32 %v4933_v15, %v1483_v42 }
 0x311   : > { %v1655_v6 = vpop.permute.xlu1 %1654 }
 0x312   : > { %5766 = vst [vmem:[#allocation46_spill] sm:$0xff] %v4949_v22  ;;  %2756 = vst.msk [vmem:[#allocation3 + $0xa8] sm:$0xff] %vm536_vm3, %v4949_v22  ;;  %1729 = vperm.xlu0 %3907, %v4877_v23   ;;  %v1804_v14 = vsub.f32 %v4443_v1, %v1655_v6 }
 0x313   : > { %1734 = vperm.xlu1 %3906, %v4826_v12  }
 0x314   : > { %v1838_v15 = vmul.f32 1.442695, %v1804_v14 }
 0x315   : > { %v1645_v56 = vpop.permute.xlu1 %1644 }
 0x316   : > { %v1802_v13 = vsub.f32 %v4445_v2, %v1645_v56  ;;  %1754 = vperm.xlu0 %3907, %v4904_v21   ;;  %v3884_v56 = vunpack.i.l.bf16 %v4436_v51 }
 0x317   : > { %1684 = vperm.xlu1 %3906, %v4848_v61   ;;  %v1650_v42 = vpop.permute.xlu0 %1649 }
 0x318   : > { %v1834_v38 = vmul.f32 1.442695, %v1802_v13  ;;  %v1803_v41 = vsub.f32 %v4451_v5, %v1650_v42 }
 0x319   : > { %v1660_v36 = vpop.permute.xlu1 %1659 }
 0x31a   : > { %v1836_v47 = vmul.f32 1.442695, %v1803_v41  ;;  %v1805_v23 = vsub.f32 %v4449_v4, %v1660_v36  ;;  %1744 = vperm.xlu0 %3907, %v4940_v62   ;;  %3976 = vpow2.f32 %v1834_v38  ;;  %v3855_v36 = vunpack.i.h.bf16 %v4430_v7 }
 0x31b   : > { %1724 = vperm.xlu1 %3906, %v4868_v54   ;;  %v3854_v41 = vunpack.i.l.bf16 %v4430_v7  ;;  %v3899_v38 = vunpack.i.l.bf16 %v4673_v43  ;;  %v3885_v7 = vunpack.i.h.bf16 %v4436_v51  ;;  %v4994_v51 = vld [vmem:[#allocation3 + $0xc8] sm:$0xff] }
 0x31c   : > { %3978 = vpow2.f32 %v1836_v47  ;;  %v1840_v1 = vmul.f32 1.442695, %v1805_v23 }
 0x31d   : > { %3980 = vpow2.f32 %v1838_v15  ;;  %v3900_v15 = vunpack.i.h.bf16 %v4673_v43  ;;  %v1005_v6 = vpack.c.bf16 %v3855_v36, %v3854_v41  ;;  %v1007_v43 = vpack.c.bf16 %v3885_v7, %v3884_v56  ;;  %v5012_v7 = vld [vmem:[#allocation3 + $0xc0] sm:$0xff] }
 0x31e   : > { %3982 = vpow2.f32 %v1840_v1  ;;  %1719 = vperm.xlu0 %3907, %v4895_v26  }
 0x31f   : > { %1699 = vperm.xlu1 %3906, %v4813_v8   ;;  %v1006_v14 = vpack.c.bf16 %v3900_v15, %v3899_v38 }
 0x322   : > { %1709 = vperm.xlu0 %3907, %v4931_v29  }
 0x323   : > { %1689 = vperm.xlu1 %3906, %v4857_v59  }
 0x324   : > { %v3977_v2 = vpop.eup %3976 }
 0x326   : > { %v3979_v5 = vpop.eup %3978 }
 0x327   : > { %v4969_v4 = vpop.eup %3980  ;;  %1714 = vperm.xlu1 %3906, %v4886_v53   ;;  %v2347_v47 = vpack.c.bf16 %v3979_v5, %v3977_v2  ;;  %v1965_v42 = vsel %vm1417_vm2, %v3979_v5, 0.0 }
 0x328   : > { %v4974_v13 = vpop.eup %3982 }
 0x329   : > { %v2348_v23 = vpack.c.bf16 %v4974_v13, %v4969_v4  ;;  %3669 = vmatprep.mubr.msk.bf16.mxu1 %vm1417_vm2, %v2347_v47 }
 0x32b   : > { %1704 = vperm.xlu1 %3906, %v4922_v19   ;;  %3670 = vmatmul.mubr.msk.bf16.vlgmr.msra.gmra.mrb[24].mxu1 %vm1417_vm2, %v2348_v23  ;;  %v5000_v23 = vld [vmem:[#allocation3 + $0xd0] sm:$0xff] }
 0x32c   : > { %3694 = vmatpush3.bf16.msra.mxu1 %v4434_v50  ;;  %v4989_v50 = vld [vmem:[#allocation3 + $0xd8] sm:$0xff] }
 0x32d   : > { %3695 = vmatprep.subr.bf16.mxu1 %v1005_v6 }
 0x32f   : > { %1759 = vperm.xlu1 %3906, %v4913_v45   ;;  %v1962_v45 = vsel %vm1417_vm2, %v3977_v2, 0.0 }
 0x330   : > { %3696 = vmatpush3.bf16.msra.mxu1 %v1005_v6 }
 0x331   : > { %3697 = vmatprep.subr.bf16.mxu1 %v1006_v14 }
 0x333   : > { %1749 = vperm.xlu1 %3906, %v4949_v22  }
 0x334   : > { %3698 = vmatpush3.bf16.msra.mxu1 %v1006_v14 }
 0x335   : > { %3699 = vmatprep.subr.bf16.mxu1 %v1007_v43 }
 0x338   : > { %3700 = vmatpush3.bf16.msra.mxu1 %v1007_v43 }
 0x341   : > { %1966 = vadd.xlane.f32.xlu0 %v1965_v42 }
 0x344   : > { %v1501_v1 = vpop.xlane.xlu0 %1500 }
 0x345   : > { %v4992_v36 = vmax.f32 %v4989_v50, %v1501_v1 }
 0x347   : > { %2762 = vst.msk [vmem:[#allocation3 + $0xd8] sm:$0xff] %vm536_vm3, %v4992_v36 }
 0x348   : > { %v1495_v47 = vpop.xlane.xlu0 %1494 }
 0x349   : > { %v5003_v5 = vmax.f32 %v4994_v51, %v1495_v47 }
 0x34a   : > { %v1498_v15 = vpop.xlane.xlu1 %1497 }
 0x34b   : > { %5767 = vst [vmem:[#allocation47_spill] sm:$0xff] %v5003_v5  ;;  %2760 = vst.msk [vmem:[#allocation3 + $0xc8] sm:$0xff] %vm536_vm3, %v5003_v5  ;;  %v5010_v6 = vmax.f32 %v5000_v23, %v1498_v15 }
 0x34d   : > { %2761 = vst.msk [vmem:[#allocation3 + $0xd0] sm:$0xff] %vm536_vm3, %v5010_v6 }
 0x34e   : > { %v1492_v14 = vpop.xlane.xlu1 %1491 }
 0x34f   : > { %v5019_v43 = vmax.f32 %v5012_v7, %v1492_v14 }
 0x350   : > { %v1680_v42 = vpop.permute.xlu0 %1679 }
 0x351   : > { %2759 = vst.msk [vmem:[#allocation3 + $0xc0] sm:$0xff] %vm536_vm3, %v5019_v43  ;;  %v1809_v47 = vsub.f32 %v4497_v16, %v1680_v42 }
 0x352   : > { %v1675_v15 = vpop.permute.xlu1 %1674 }
 0x353   : > { %v1848_v38 = vmul.f32 1.442695, %v1809_v47  ;;  %v1808_v41 = vsub.f32 %v4457_v9, %v1675_v15 }
 0x354   : > { %v1670_v56 = vpop.permute.xlu0 %1669 }
 0x355   : > { %v1846_v21 = vmul.f32 1.442695, %v1808_v41  ;;  %v1807_v62 = vsub.f32 %v4499_v18, %v1670_v56  ;;  %3984 = vpow2.f32 %v1848_v38  ;;  %v5053_v38 = vld [vmem:[#allocation3 + $0xe8] sm:$0xff] }
 0x356   : > { %v1665_v14 = vpop.permute.xlu1 %1664  ;;  %5770 = vst [vmem:[#allocation50_spill] sm:$0xff] %v5053_v38 }
 0x357   : > { %3986 = vpow2.f32 %v1846_v21  ;;  %v1844_v53 = vmul.f32 1.442695, %v1807_v62  ;;  %v1806_v1 = vsub.f32 %v4459_v11, %v1665_v14  ;;  %1963 = vadd.xlane.f32.xlu1 %v1962_v45  ;;  %1779 = vperm.xlu0 %3907, %v4992_v36  }
 0x359   : > { %v1842_v16 = vmul.f32 1.442695, %v1806_v1  ;;  %3988 = vpow2.f32 %v1844_v53  ;;  %v5048_v53 = vld [vmem:[#allocation3 + $0xf8] sm:$0xff]  ;;  %v5060_v1 = vld [vmem:[#allocation3 + $0xf0] sm:$0xff] }
 0x35a   : > { %5768 = vst [vmem:[#allocation48_spill] sm:$0xff] %v5048_v53  ;;  %5771 = vst [vmem:[#allocation51_spill] sm:$0xff] %v5060_v1 }
 0x35b   : > { %3990 = vpow2.f32 %v1842_v16  ;;  %1769 = vperm.xlu0 %3907, %v5003_v5  }
 0x35f   : > { %v5032_v9 = vpop.eup %3984 }
 0x361   : > { %v5034_v41 = vpop.eup %3986 }
 0x362   : > { %v2350_v18 = vpack.c.bf16 %v5032_v9, %v5034_v41 }
 0x363   : > { %v5038_v2 = vpop.eup %3988 }
 0x365   : > { %v5040_v21 = vpop.eup %3990 }
 0x366   : > { %v2349_v11 = vpack.c.bf16 %v5038_v2, %v5040_v21 }
 0x368   : > { %1774 = vperm.xlu1 %3906, %v5010_v6   ;;  %3673 = vmatprep.mubr.msk.bf16.mxu1 %vm1417_vm2, %v2349_v11 }
 0x369   : > { %3674 = vmatmul.mubr.msk.bf16.gmra.mrb[28].mxu1 %vm1417_vm2, %v2350_v18  ;;  %v5073_v18 = vld [vmem:[#allocation3 + $0xe0] sm:$0xff] }
 0x36a   : > { %5774 = vst [vmem:[#allocation54_spill] sm:$0xff] %v5073_v18 }
 0x36c   : > { %1764 = vperm.xlu1 %3906, %v5019_v43  }
 0x381   : > { %v1513_v45 = vpop.xlane.xlu0 %1512 }
 0x382   : > { %v5051_v62 = vmax.f32 %v5048_v53, %v1513_v45 }
 0x384   : > { %5769 = vst [vmem:[#allocation49_spill] sm:$0xff] %v5051_v62  ;;  %2766 = vst.msk [vmem:[#allocation3 + $0xf8] sm:$0xff] %vm536_vm3, %v5051_v62  ;;  %1799 = vperm.xlu1 %3906, %v5051_v62  }
 0x385   : > { %v1507_v42 = vpop.xlane.xlu0 %1506 }
 0x386   : > { %v5063_v47 = vmax.f32 %v5053_v38, %v1507_v42 }
 0x387   : > { %v1510_v15 = vpop.xlane.xlu1 %1509 }
 0x388   : > { %5772 = vst [vmem:[#allocation52_spill] sm:$0xff] %v5063_v47  ;;  %2764 = vst.msk [vmem:[#allocation3 + $0xe8] sm:$0xff] %vm536_vm3, %v5063_v47  ;;  %v5070_v16 = vmax.f32 %v5060_v1, %v1510_v15  ;;  %1789 = vperm.xlu1 %3906, %v5063_v47  }
 0x38a   : > { %5773 = vst [vmem:[#allocation53_spill] sm:$0xff] %v5070_v16  ;;  %2765 = vst.msk [vmem:[#allocation3 + $0xf0] sm:$0xff] %vm536_vm3, %v5070_v16  ;;  %1794 = vperm.xlu0 %3907, %v5070_v16  }
 0x38b   : > { %v1504_v45 = vpop.xlane.xlu1 %1503 }
 0x38c   : > { %v5081_v42 = vmax.f32 %v5073_v18, %v1504_v45 }
 0x38d   : > { %v1740_v56 = vpop.permute.xlu0 %1739 }
 0x38e   : > { %5775 = vst [vmem:[#allocation55_spill] sm:$0xff] %v5081_v42  ;;  %2763 = vst.msk [vmem:[#allocation3 + $0xe0] sm:$0xff] %vm536_vm3, %v5081_v42  ;;  %1784 = vperm.xlu0 %3907, %v5081_v42   ;;  %v1821_v11 = vsub.f32 %v4661_v37, %v1740_v56 }
 0x38f   : > { %v1695_v14 = vpop.permute.xlu1 %1694 }
 0x390   : > { %v1872_v62 = vmul.f32 1.442695, %v1821_v11  ;;  %v1812_v18 = vsub.f32 %v4635_v24, %v1695_v14 }
 0x391   : > { %v1730_v1 = vpop.permute.xlu0 %1729 }
 0x392   : > { %3992 = vpow2.f32 %v1872_v62  ;;  %v1819_v38 = vsub.f32 %v4663_v10, %v1730_v1  ;;  %v1854_v5 = vmul.f32 1.442695, %v1812_v18 }
 0x393   : > { %v1735_v53 = vpop.permute.xlu1 %1734 }
 0x394   : > { %v1820_v16 = vsub.f32 %v4655_v34, %v1735_v53  ;;  %v1868_v42 = vmul.f32 1.442695, %v1819_v38 }
 0x395   : > { %v1755_v47 = vpop.permute.xlu0 %1754 }
 0x396   : > { %v1870_v45 = vmul.f32 1.442695, %v1820_v16 }
 0x397   : > { %v1685_v22 = vpop.permute.xlu1 %1684 }
 0x398   : > { %3994 = vpow2.f32 %v1870_v45  ;;  %v1810_v34 = vsub.f32 %v4637_v25, %v1685_v22 }
 0x399   : > { %v5091_v15 = vpop.permute.xlu0 %1744  ;;  %3996 = vpow2.f32 %v1868_v42 }
 0x39b   : > { %v1725_v26 = vpop.permute.xlu1 %1724 }
 0x39c   : > { %v1818_v37 = vsub.f32 %v4657_v35, %v1725_v26  ;;  %v5097_v62 = vpop.eup %3992  ;;  %v1850_v35 = vmul.f32 1.442695, %v1810_v34 }
 0x39d   : > { %v1720_v11 = vpop.permute.xlu0 %1719 }
 0x39e   : > { %v1866_v56 = vmul.f32 1.442695, %v1818_v37  ;;  %v1817_v26 = vsub.f32 %v4651_v32, %v1720_v11  ;;  %v1968_v32 = vsel %vm1417_vm2, %v4969_v4, 0.0  ;;  %v1824_v11 = vsub.f32 %v4675_v44, %v1755_v47 }
 0x39f   : > { %v1700_v53 = vpop.permute.xlu1 %1699  ;;  %v1974_v47 = vsel %vm1417_vm2, %v5040_v21, 0.0 }
 0x3a0   : > { %3998 = vpow2.f32 %v1866_v56  ;;  %v1813_v10 = vsub.f32 %v4641_v27, %v1700_v53  ;;  %v1864_v27 = vmul.f32 1.442695, %v1817_v26 }
 0x3a1   : > { %4000 = vpow2.f32 %v1854_v5  ;;  %v1710_v14 = vpop.permute.xlu0 %1709 }
 0x3a2   : > { %v5099_v1 = vpop.eup %3994  ;;  %v1856_v16 = vmul.f32 1.442695, %v1813_v10  ;;  %v1815_v18 = vsub.f32 %v4653_v33, %v1710_v14  ;;  %v3860_v14 = vunpack.i.h.bf16 %v4428_v39 }
 0x3a3   : > { %v2356_v24 = vpack.c.bf16 %v5097_v62, %v5099_v1  ;;  %v1690_v38 = vpop.permute.xlu1 %1689  ;;  %v5107_v45 = vpop.eup %3996 }
 0x3a4   : > { %4002 = vpow2.f32 %v1856_v16  ;;  %v1811_v25 = vsub.f32 %v4643_v28, %v1690_v38  ;;  %v1860_v28 = vmul.f32 1.442695, %v1815_v18  ;;  %v1878_v16 = vmul.f32 1.442695, %v1824_v11 }
 0x3a5   : > { %4004 = vpow2.f32 %v1850_v35  ;;  %v1977_v38 = vsel %vm1417_vm2, %v5038_v2, 0.0  ;;  %v1983_v18 = vsel %vm1417_vm2, %v5032_v9, 0.0 }
 0x3a6   : > { %v1852_v22 = vmul.f32 1.442695, %v1811_v25 }
 0x3a7   : > { %v1715_v42 = vpop.permute.xlu1 %1714 }
 0x3a8   : > { %4006 = vpow2.f32 %v1852_v22  ;;  %v1816_v5 = vsub.f32 %v4647_v30, %v1715_v42  ;;  %v1971_v30 = vsel %vm1417_vm2, %v4974_v13, 0.0 }
 0x3a9   : > { %4008 = vpow2.f32 %v1864_v27 }
 0x3aa   : > { %v5109_v37 = vpop.eup %3998  ;;  %v1862_v56 = vmul.f32 1.442695, %v1816_v5 }
 0x3ab   : > { %v1705_v34 = vpop.permute.xlu1 %1704  ;;  %v2355_v33 = vpack.c.bf16 %v5107_v45, %v5109_v37  ;;  %v5119_v10 = vpop.eup %4000 }
 0x3ac   : > { %4010 = vpow2.f32 %v1862_v56  ;;  %v1814_v53 = vsub.f32 %v4649_v31, %v1705_v34  ;;  %1969 = vadd.xlane.f32.xlu1 %v1968_v32  ;;  %v1822_v31 = vsub.f32 %v4677_v17, %v5091_v15  ;;  %v3859_v17 = vunpack.i.l.bf16 %v4428_v39 }
 0x3ad   : > { %1972 = vadd.xlane.f32.xlu0 %v1971_v30  ;;  %3701 = vmatprep.mubr.msk.bf16.mxu1 %vm1417_vm2, %v2355_v33  ;;  %4012 = vpow2.f32 %v1860_v28  ;;  %v3905_v39 = vunpack.i.h.bf16 %v4685_v48  ;;  %v5776_v56 = vsub.f32 %v4830_v3, %v4848_v61  ;;  %v3889_v3 = vunpack.i.l.bf16 %v4667_v40 }
 0x3ae   : > { %v5122_v4 = vpop.eup %4002  ;;  %v1858_v44 = vmul.f32 1.442695, %v1814_v53  ;;  %3702 = vmatmul.mubr.msk.bf16.vlgmr.msra.gmra.mrb[32].mxu1 %vm1417_vm2, %v2356_v24  ;;  %v1874_v25 = vmul.f32 1.442695, %v1822_v31  ;;  %v1009_v11 = vpack.c.bf16 %v3860_v14, %v3859_v17  ;;  %v5777_v61 = vsub.f32 %v4801_v52, %v4806_v57 }
 0x3af   : > { %v2352_v13 = vpack.c.bf16 %v5122_v4, %v5119_v10  ;;  %v1760_v35 = vpop.permute.xlu1 %1759  ;;  %v5134_v24 = vpop.eup %4004  ;;  %v1594_v32 = vmul.f32 1.442695, %v5776_v56 }
 0x3b0   : > { %4014 = vpow2.f32 %v1858_v44  ;;  %v1825_v26 = vsub.f32 %v4681_v46, %v1760_v35  ;;  %1975 = vadd.xlane.f32.xlu1 %v1974_v47  ;;  %v1980_v46 = vsel %vm1417_vm2, %v5034_v41, 0.0  ;;  %v3904_v41 = vunpack.i.l.bf16 %v4685_v48 }
 0x3b1   : > { %1978 = vadd.xlane.f32.xlu0 %v1977_v38  ;;  %4016 = vpow2.f32 %v1878_v16  ;;  %v3890_v48 = vunpack.i.h.bf16 %v4667_v40  ;;  %v1598_v33 = vmul.f32 1.442695, %v5777_v61  ;;  %v5779_v47 = vsub.f32 %v4841_v20, %v4857_v59 }
 0x3b2   : > { %v5136_v21 = vpop.eup %4006  ;;  %v1880_v15 = vmul.f32 1.442695, %v1825_v26  ;;  %v1010_v53 = vpack.c.bf16 %v3905_v39, %v3904_v41  ;;  %v5781_v59 = vsub.f32 %v4850_v63, %v4868_v54 }
 0x3b3   : > { %v1750_v22 = vpop.permute.xlu1 %1749  ;;  %v2351_v27 = vpack.c.bf16 %v5136_v21, %v5134_v24  ;;  %v5147_v42 = vpop.eup %4008  ;;  %v1596_v16 = vmul.f32 1.442695, %v5779_v47  ;;  %v1011_v52 = vpack.c.bf16 %v3890_v48, %v3889_v3  ;;  %v5797_v47 = vld [vmem:[#allocation8_spill] sm:$0xff] }
 0x3b4   : > { %4018 = vpow2.f32 %v1880_v15  ;;  %v1823_v2 = vsub.f32 %v4687_v49, %v1750_v22  ;;  %1981 = vadd.xlane.f32.xlu1 %v1980_v46  ;;  %v1610_v31 = vmul.f32 1.442695, %v5781_v59  ;;  %v5785_v15 = vld [vmem:[#allocation28_spill] sm:$0xff]  ;;  %v5788_v22 = vld [vmem:[#allocation30_spill] sm:$0xff] }
 0x3b5   : > { %3685 = vmatprep.mubr.msk.bf16.mxu0 %vm1417_vm2, %v2351_v27  ;;  %1984 = vadd.xlane.f32.xlu0 %v1983_v18  ;;  %4020 = vpow2.f32 %v1874_v25  ;;  %v5786_v63 = vsub.f32 %v5785_v15, %v4826_v12  ;;  %v5787_v25 = vld [vmem:[#allocation29_spill] sm:$0xff]  ;;  %v5790_v18 = vld [vmem:[#allocation40_spill] sm:$0xff] }
 0x3b6   : > { %v5151_v5 = vpop.eup %4010  ;;  %v1876_v49 = vmul.f32 1.442695, %v1823_v2  ;;  %3686 = vmatmul.mubr.msk.bf16.vlgmr.msra.gmra.mrb[32].mxu0 %vm1417_vm2, %v2352_v13  ;;  %v5789_v46 = vsub.f32 %v5787_v25, %v5788_v22  ;;  %v5791_v39 = vsub.f32 %v5790_v18, %v4922_v19  ;;  %v5794_v19 = vsub.f32 %v5000_v23, %v5010_v6  ;;  %v5803_v18 = vld [vmem:[#allocation18_spill] sm:$0xff] }
 0x3b7   : > { %3710 = vmatpush3.bf16.msra.mxu0 %v4440_v0  ;;  %v2354_v9 = vpack.c.bf16 %v5147_v42, %v5151_v5  ;;  %v5161_v28 = vpop.eup %4012  ;;  %v5778_v0 = vsub.f32 %v4696_v55, %v4707_v60  ;;  %v5780_v55 = vsub.f32 %v4803_v58, %v4813_v8  ;;  %v5782_v8 = vld [vmem:[#allocation31_spill] sm:$0xff]  ;;  %v5783_v58 = vld [vmem:[#allocation33_spill] sm:$0xff]  ;;  %v1614_v54 = vmul.f32 1.442695, %v5786_v63  ;;  %v5802_v63 = vld [vmem:[#allocation16_spill] sm:$0xff] }
 0x3b8   : > { %4022 = vpow2.f32 %v1876_v49  ;;  %3711 = vmatprep.subr.bf16.mxu0 %v1009_v11  ;;  %v5784_v26 = vsub.f32 %v5782_v8, %v5783_v58  ;;  %v1616_v27 = vmul.f32 1.442695, %v5789_v46  ;;  %v1602_v12 = vmul.f32 1.442695, %v5791_v39 }
 0x3b9   : > { %4024 = vpow2.f32 %v1594_v32  ;;  %v1580_v30 = vmul.f32 1.442695, %v5778_v0  ;;  %v1600_v60 = vmul.f32 1.442695, %v5780_v55  ;;  %v5792_v32 = vld [vmem:[#allocation42_spill] sm:$0xff]  ;;  %v5796_v23 = vsub.f32 %v5012_v7, %v5019_v43 }
 0x3ba   : > { %v5164_v34 = vpop.eup %4014  ;;  %4026 = vpow2.f32 %v1598_v33  ;;  %v1612_v38 = vmul.f32 1.442695, %v5784_v26  ;;  %v5793_v49 = vsub.f32 %v5792_v32, %v4931_v29  ;;  %v1630_v3 = vmul.f32 1.442695, %v5794_v19  ;;  %v5804_v32 = vld [vmem:[#allocation12_spill] sm:$0xff] }
 0x3bb   : > { %3712 = vmatpush3.bf16.msra.mxu0 %v1009_v11  ;;  %v2353_v44 = vpack.c.bf16 %v5161_v28, %v5164_v34  ;;  %v5178_v40 = vpop.eup %4016  ;;  %4028 = vpow2.f32 %v1580_v30  ;;  %v5795_v29 = vsub.f32 %v4989_v50, %v4992_v36  ;;  %v1626_v6 = vmul.f32 1.442695, %v5796_v23  ;;  %v5800_v36 = vld [vmem:[#allocation47_spill] sm:$0xff] }
 0x3bc   : > { %3713 = vmatprep.subr.bf16.mxu0 %v1010_v53  ;;  %4030 = vpow2.f32 %v1596_v16  ;;  %v1604_v11 = vmul.f32 1.442695, %v5793_v49  ;;  %v5798_v16 = vld [vmem:[#allocation9_spill] sm:$0xff] }
 0x3bd   : > { %3689 = vmatprep.mubr.msk.bf16.mxu0 %vm1417_vm2, %v2353_v44  ;;  %4032 = vpow2.f32 %v1600_v60  ;;  %v5799_v55 = vsub.f32 %v5797_v47, %v5798_v16  ;;  %v1992_v16 = vsel %vm1417_vm2, %v5119_v10, 0.0  ;;  %v2016_v10 = vsel %vm1417_vm2, %v5099_v1, 0.0  ;;  %v5808_v1 = vld [vmem:[#allocation23_spill] sm:$0xff] }
 0x3be   : > { %v5181_v57 = vpop.eup %4018  ;;  %3690 = vmatmul.mubr.msk.bf16.gmra.mrb[36].mxu0 %vm1417_vm2, %v2354_v9  ;;  %4034 = vpow2.f32 %v1610_v31  ;;  %v1899_v9 = vld [vmem:[#allocation4 + $0x8] sm:$0xff] }
 0x3bf   : > { %3714 = vmatpush3.bf16.msra.mxu0 %v1010_v53  ;;  %v2358_v20 = vpack.c.bf16 %v5181_v57, %v5178_v40  ;;  %v5192_v13 = vpop.eup %4020  ;;  %4036 = vpow2.f32 %v1612_v38  ;;  %v1632_v53 = vmul.f32 1.442695, %v5795_v29  ;;  %v1578_v60 = vmul.f32 1.442695, %v5799_v55 }
 0x3c0   : > { %3715 = vmatprep.subr.bf16.mxu0 %v1011_v52  ;;  %4038 = vpow2.f32 %v1614_v54 }
 0x3c1   : > { %4040 = vpow2.f32 %v1616_v27 }
 0x3c2   : > { %v5194_v35 = vpop.eup %4022  ;;  %4042 = vpow2.f32 %v1602_v12 }
 0x3c3   : > { %3716 = vmatpush3.bf16.msra.mxu0 %v1011_v52  ;;  %v2357_v14 = vpack.c.bf16 %v5194_v35, %v5192_v13  ;;  %v5201_v17 = vpop.eup %4024  ;;  %4044 = vpow2.f32 %v1604_v11  ;;  %v5801_v52 = vsub.f32 %v4994_v51, %v5800_v36 }
 0x3c4   : > { %v5212_v2 = vpop.eup %4026  ;;  %4046 = vpow2.f32 %v1630_v3  ;;  %v5805_v3 = vld [vmem:[#allocation14_spill] sm:$0xff] }
 0x3c5   : > { %2197 = vperm.xlu1 %3906, %v5201_v17   ;;  %3705 = vmatprep.mubr.msk.bf16.mxu1 %vm1417_vm2, %v2357_v14  ;;  %v5217_v41 = vpop.eup %4028  ;;  %4048 = vpow2.f32 %v1632_v53  ;;  %v1898_v14 = vld [vmem:[#allocation4] sm:$0xff] }
 0x3c6   : > { %3706 = vmatmul.mubr.msk.bf16.gmra.mrb[36].mxu1 %vm1417_vm2, %v2358_v20  ;;  %v5220_v56 = vpop.eup %4030  ;;  %v1931_v61 = vmul.f32 %v5217_v41, %v1899_v9  ;;  %v1628_v20 = vmul.f32 1.442695, %v5801_v52  ;;  %4050 = vpow2.f32 %v1626_v6 }
 0x3c7   : > { %v5226_v48 = vpop.eup %4032  ;;  %4052 = vpow2.f32 %v1578_v60 }
 0x3c8   : > { %v5233_v33 = vpop.eup %4034  ;;  %4054 = vpow2.f32 %v1628_v20  ;;  %v1986_v20 = vsel %vm1417_vm2, %v5134_v24, 0.0 }
 0x3c9   : > { %2207 = vperm.xlu1 %3906, %v5212_v2   ;;  %v5239_v44 = vpop.eup %4036 }
 0x3ca   : > { %v5249_v50 = vpop.eup %4038 }
 0x3cb   : > { %2202 = vperm.xlu0 %3907, %v5220_v56   ;;  %v5255_v59 = vpop.eup %4040 }
 0x3cc   : > { %v5258_v7 = vpop.eup %4042 }
 0x3cd   : > { %2212 = vperm.xlu1 %3906, %v5226_v48   ;;  %v5261_v43 = vpop.eup %4044 }
 0x3ce   : > { %v1967_v0 = vpop.xlane.xlu0 %1966  ;;  %v5264_v31 = vpop.eup %4046 }
 0x3cf   : > { %v2059_v30 = vadd.f32 %v1967_v0, %v1931_v61  ;;  %2237 = vperm.xlu0 %3907, %v5233_v33   ;;  %v5267_v51 = vpop.eup %4048 }
 0x3d0   : > { %v5270_v8 = vpop.eup %4050 }
 0x3d1   : > { %2092 = vst.msk [vmem:[#allocation4 + $0x8] sm:$0xff] %vm536_vm3, %v2059_v30  ;;  %2242 = vperm.xlu1 %3906, %v5239_v44   ;;  %v5272_v58 = vpop.eup %4052 }
 0x3d2   : > { %v5275_v38 = vpop.eup %4054  ;;  %v1930_v15 = vmul.f32 %v5272_v58, %v1898_v14  ;;  %v5806_v14 = vld [vmem:[#allocation26_spill] sm:$0xff] }
 0x3d3   : > { %2247 = vperm.xlu0 %3907, %v5249_v50  }
 0x3d5   : > { %2252 = vperm.xlu1 %3906, %v5255_v59  }
 0x3d6   : > { %v1780_v26 = vpop.permute.xlu0 %1779 }
 0x3d7   : > { %2217 = vperm.xlu0 %3907, %v5258_v7   ;;  %v1829_v54 = vsub.f32 %v5802_v63, %v1780_v26  ;;  %v1995_v63 = vsel %vm1417_vm2, %v5122_v4, 0.0  ;;  %v1989_v4 = vsel %vm1417_vm2, %v5136_v21, 0.0  ;;  %v2007_v21 = vsel %vm1417_vm2, %v5147_v42, 0.0 }
 0x3d9   : > { %2222 = vperm.xlu1 %3906, %v5261_v43   ;;  %v1888_v27 = vmul.f32 1.442695, %v1829_v54 }
 0x3da   : > { %v1770_v22 = vpop.permute.xlu0 %1769 }
 0x3db   : > { %2287 = vperm.xlu0 %3907, %v5264_v31   ;;  %v1827_v39 = vsub.f32 %v5803_v18, %v1770_v22  ;;  %4056 = vpow2.f32 %v1888_v27  ;;  %v2019_v18 = vsel %vm1417_vm2, %v5097_v62, 0.0  ;;  %v2004_v62 = vsel %vm1417_vm2, %v5151_v5, 0.0 }
 0x3dc   : > { %v1998_v5 = vsel %vm1417_vm2, %v5164_v34, 0.0 }
 0x3dd   : > { %2292 = vperm.xlu1 %3906, %v5267_v51   ;;  %v1884_v9 = vmul.f32 1.442695, %v1827_v39 }
 0x3df   : > { %2277 = vperm.xlu0 %3907, %v5270_v8  }
 0x3e1   : > { %2282 = vperm.xlu1 %3906, %v5275_v38  }
 0x3e4   : > { %v1964_v25 = vpop.xlane.xlu1 %1963 }
 0x3e5   : > { %v2058_v46 = vadd.f32 %v1964_v25, %v1930_v15  ;;  %v5284_v53 = vpop.eup %4056  ;;  %v2010_v25 = vsel %vm1417_vm2, %v5109_v37, 0.0  ;;  %v2013_v37 = vsel %vm1417_vm2, %v5107_v45, 0.0  ;;  %v2031_v45 = vsel %vm1417_vm2, %v5181_v57, 0.0 }
 0x3e6   : > { %v2025_v57 = vsel %vm1417_vm2, %v5194_v35, 0.0  ;;  %v2043_v34 = vsel %vm1417_vm2, %v5284_v53, 0.0 }
 0x3e7   : > { %2091 = vst.msk [vmem:[#allocation4] sm:$0xff] %vm536_vm3, %v2058_v46  ;;  %v5807_v46 = vld [vmem:[#allocation27_spill] sm:$0xff] }
 0x3e8   : > { %v1775_v12 = vpop.permute.xlu1 %1774 }
 0x3e9   : > { %v1828_v49 = vsub.f32 %v5804_v32, %v1775_v12 }
 0x3eb   : > { %v1886_v11 = vmul.f32 1.442695, %v1828_v49 }
 0x3ec   : > { %v1765_v19 = vpop.permute.xlu1 %1764 }
 0x3ed   : > { %4058 = vpow2.f32 %v1886_v11  ;;  %v1826_v61 = vsub.f32 %v5805_v3, %v1765_v19  ;;  %v5809_v11 = vld [vmem:[#allocation25_spill] sm:$0xff]  ;;  %v2028_v3 = vsel %vm1417_vm2, %v5178_v40, 0.0  ;;  %v2022_v40 = vsel %vm1417_vm2, %v5192_v13, 0.0 }
 0x3ee   : > { %4060 = vpow2.f32 %v1884_v9 }
 0x3ef   : > { %v1882_v29 = vmul.f32 1.442695, %v1826_v61 }
 0x3f1   : > { %4062 = vpow2.f32 %v1882_v29 }
 0x3f7   : > { %v5286_v0 = vpop.eup %4058 }
 0x3f8   : > { %v2360_v30 = vpack.c.bf16 %v5284_v53, %v5286_v0  ;;  %v5290_v23 = vpop.eup %4060 }
 0x3f9   : > { %v2037_v35 = vsel %vm1417_vm2, %v5290_v23, 0.0 }
 0x3fb   : > { %v5292_v6 = vpop.eup %4062 }
 0x3fc   : > { %v2359_v47 = vpack.c.bf16 %v5290_v23, %v5292_v6  ;;  %v2034_v13 = vsel %vm1417_vm2, %v5292_v6, 0.0 }
 0x3fe   : > { %v5298_v55 = vpop.f32.mrb[24].mxu1  ;;  %1993 = vadd.xlane.f32.xlu0 %v1992_v16  ;;  %3717 = vmatprep.mubr.msk.bf16.mxu0 %vm1417_vm2, %v2359_v47 }
 0x3ff   : > { %v5301_v60 = vpop.f32.mrb[25].mxu1  ;;  %3718 = vmatmul.mubr.msk.bf16.vlgmr.msra.gmra.mrb[40].mxu0 %vm1417_vm2, %v2360_v30  ;;  %v2001_v30 = vsel %vm1417_vm2, %v5161_v28, 0.0  ;;  %v2040_v28 = vsel %vm1417_vm2, %v5286_v0, 0.0 }
 0x400   : > { %v5304_v36 = vpop.f32.mrb[26].mxu1 }
 0x401   : > { %v5306_v52 = vpop.f32.mrb[27].mxu1 }
 0x402   : > { %1987 = vadd.xlane.f32.xlu0 %v1986_v20 }
 0x403   : > { %v1800_v26 = vpop.permute.xlu1 %1799 }
 0x404   : > { %v1833_v15 = vsub.f32 %v5806_v14, %v1800_v26  ;;  %v5810_v26 = vld [vmem:[#allocation6_spill] sm:$0xff] }
 0x405   : > { %2017 = vadd.xlane.f32.xlu1 %v2016_v10  ;;  %v5811_v10 = vld [vmem:[#allocation7_spill] sm:$0xff] }
 0x406   : > { %1996 = vadd.xlane.f32.xlu0 %v1995_v63  ;;  %v1896_v22 = vmul.f32 1.442695, %v1833_v15  ;;  %v5812_v14 = vsub.f32 %v5810_v26, %v5811_v10  ;;  %v5813_v63 = vld [vmem:[#allocation21_spill] sm:$0xff]  ;;  %v5833_v26 = vld [vmem:[#allocation38_spill] sm:$0xff] }
 0x407   : > { %v1790_v54 = vpop.permute.xlu1 %1789  ;;  %v5834_v10 = vld [vmem:[#allocation41_spill] sm:$0xff] }
 0x408   : > { %v1831_v27 = vsub.f32 %v5807_v46, %v1790_v54  ;;  %4064 = vpow2.f32 %v1896_v22  ;;  %v1582_v15 = vmul.f32 1.442695, %v5812_v14  ;;  %v5814_v54 = vld [vmem:[#allocation19_spill] sm:$0xff]  ;;  %v5816_v22 = vld [vmem:[#allocation13_spill] sm:$0xff]  ;;  %v5835_v14 = vsub.f32 %v5833_v26, %v5834_v10 }
 0x409   : > { %2011 = vadd.xlane.f32.xlu1 %v2010_v25  ;;  %v1795_v24 = vpop.permute.xlu0 %1794  ;;  %v1550_v0 = vsub.f32 %v5814_v54, %v5813_v63  ;;  %v5815_v25 = vld [vmem:[#allocation10_spill] sm:$0xff] }
 0x40a   : > { %v1832_v39 = vsub.f32 %v5808_v1, %v1795_v24  ;;  %2020 = vadd.xlane.f32.xlu0 %v2019_v18  ;;  %v1892_v32 = vmul.f32 1.442695, %v1831_v27  ;;  %v5817_v46 = vsub.f32 %v5815_v25, %v5816_v22  ;;  %v5818_v27 = vld [vmem:[#allocation24_spill] sm:$0xff]  ;;  %v5819_v24 = vld [vmem:[#allocation22_spill] sm:$0xff]  ;;  %v5820_v1 = vld [vmem:[#allocation15_spill] sm:$0xff] }
 0x40b   : > { %v1551_v18 = vsub.f32 %v5819_v24, %v5818_v27  ;;  %v5837_v25 = vld [vmem:[#allocation45_spill] sm:$0xff]  ;;  %v1902_v24 = vld [vmem:[#allocation4 + $0x20] sm:$0xff] }
 0x40c   : > { %v1894_v12 = vmul.f32 1.442695, %v1832_v39  ;;  %v1584_v53 = vmul.f32 1.442695, %v5817_v46  ;;  %v5821_v39 = vld [vmem:[#allocation11_spill] sm:$0xff] }
 0x40d   : > { %1990 = vadd.xlane.f32.xlu1 %v1989_v4  ;;  %v1785_v49 = vpop.permute.xlu0 %1784  ;;  %v1586_v4 = vmul.f32 1.442695, %v1550_v0  ;;  %v5836_v0 = vld [vmem:[#allocation43_spill] sm:$0xff] }
 0x40e   : > { %4066 = vpow2.f32 %v1894_v12  ;;  %v1830_v9 = vsub.f32 %v5809_v11, %v1785_v49  ;;  %2014 = vadd.xlane.f32.xlu0 %v2013_v37  ;;  %v1552_v12 = vsub.f32 %v5821_v39, %v5820_v1  ;;  %v5823_v49 = vld [vmem:[#allocation17_spill] sm:$0xff]  ;;  %v1588_v11 = vmul.f32 1.442695, %v1551_v18  ;;  %v1903_v1 = vld [vmem:[#allocation4 + $0x28] sm:$0xff]  ;;  %v5839_v39 = vld [vmem:[#allocation50_spill] sm:$0xff] }
 0x40f   : > { %4068 = vpow2.f32 %v1892_v32  ;;  %v5822_v32 = vld [vmem:[#allocation20_spill] sm:$0xff]  ;;  %v5838_v22 = vsub.f32 %v5836_v0, %v5837_v25  ;;  %v5852_v0 = vld [vmem:[#allocation54_spill] sm:$0xff]  ;;  %v5853_v25 = vld [vmem:[#allocation55_spill] sm:$0xff] }
 0x410   : > { %v1890_v19 = vmul.f32 1.442695, %v1830_v9  ;;  %v1553_v37 = vsub.f32 %v5823_v49, %v5822_v32 }
 0x411   : > { %2005 = vadd.xlane.f32.xlu1 %v2004_v62  ;;  %v1590_v62 = vmul.f32 1.442695, %v1552_v12  ;;  %v1618_v46 = vmul.f32 1.442695, %v5838_v22  ;;  %v5840_v12 = vld [vmem:[#allocation52_spill] sm:$0xff]  ;;  %v5854_v22 = vsub.f32 %v5852_v0, %v5853_v25  ;;  %v2142_v0 = vld [vmem:[#allocation5 + $0x98] sm:$0xff] }
 0x412   : > { %4070 = vpow2.f32 %v1890_v19  ;;  %2008 = vadd.xlane.f32.xlu0 %v2007_v21  ;;  %v4065_v61 = vpop.eup %4064  ;;  %v5824_v21 = vld [vmem:[#allocation34_spill] sm:$0xff]  ;;  %v2140_v25 = vld [vmem:[#allocation5 + $0x88] sm:$0xff] }
 0x413   : > { %v2055_v23 = vsel %vm1417_vm2, %v4065_v61, 0.0  ;;  %4072 = vpow2.f32 %v1582_v15  ;;  %v1624_v15 = vmul.f32 1.442695, %v5835_v14 }
 0x414   : > { %4074 = vpow2.f32 %v1584_v53 }
 0x415   : > { %2029 = vadd.xlane.f32.xlu1 %v2028_v3  ;;  %4076 = vpow2.f32 %v1586_v4  ;;  %v5825_v3 = vld [vmem:[#allocation37_spill] sm:$0xff]  ;;  %v5841_v4 = vsub.f32 %v5839_v39, %v5840_v12  ;;  %v5855_v12 = vld [vmem:[#allocation51_spill] sm:$0xff] }
 0x416   : > { %2032 = vadd.xlane.f32.xlu0 %v2031_v45  ;;  %v5826_v45 = vsub.f32 %v5824_v21, %v5825_v3  ;;  %4078 = vpow2.f32 %v1588_v11  ;;  %v5844_v21 = vld [vmem:[#allocation39_spill] sm:$0xff] }
 0x417   : > { %4080 = vpow2.f32 %v1590_v62  ;;  %v1636_v32 = vmul.f32 1.442695, %v5841_v4  ;;  %v5843_v62 = vld [vmem:[#allocation36_spill] sm:$0xff]  ;;  %v5856_v4 = vld [vmem:[#allocation53_spill] sm:$0xff] }
 0x418   : > { %v4067_v29 = vpop.eup %4066  ;;  %v5845_v3 = vsub.f32 %v5843_v62, %v5844_v21 }
 0x419   : > { %1999 = vadd.xlane.f32.xlu1 %v1998_v5  ;;  %v2362_v42 = vpack.c.bf16 %v4065_v61, %v4067_v29  ;;  %v4069_v47 = vpop.eup %4068  ;;  %v2052_v6 = vsel %vm1417_vm2, %v4067_v29, 0.0  ;;  %v1608_v61 = vmul.f32 1.442695, %v5826_v45  ;;  %v1592_v29 = vmul.f32 1.442695, %v1553_v37  ;;  %v5827_v5 = vld [vmem:[#allocation44_spill] sm:$0xff] }
 0x41a   : > { %2002 = vadd.xlane.f32.xlu0 %v2001_v30  ;;  %v2049_v19 = vsel %vm1417_vm2, %v4069_v47, 0.0  ;;  %v5828_v30 = vld [vmem:[#allocation46_spill] sm:$0xff]  ;;  %v1622_v45 = vmul.f32 1.442695, %v5845_v3 }
 0x41b   : > { %4082 = vpow2.f32 %v1608_v61 }
 0x41c   : > { %v4071_v16 = vpop.eup %4070  ;;  %4084 = vpow2.f32 %v1592_v29 }
 0x41d   : > { %2023 = vadd.xlane.f32.xlu1 %v2022_v40  ;;  %v2361_v20 = vpack.c.bf16 %v4069_v47, %v4071_v16  ;;  %v2046_v9 = vsel %vm1417_vm2, %v4071_v16, 0.0  ;;  %v5376_v16 = vpop.eup %4072  ;;  %v5831_v47 = vld [vmem:[#allocation35_spill] sm:$0xff] }
 0x41e   : > { %2026 = vadd.xlane.f32.xlu0 %v2025_v57  ;;  %v5830_v57 = vld [vmem:[#allocation32_spill] sm:$0xff] }
 0x41f   : > { %3721 = vmatprep.mubr.msk.bf16.mxu0 %vm1417_vm2, %v2361_v20  ;;  %v5832_v20 = vsub.f32 %v5830_v57, %v5831_v47 }
 0x420   : > { %3722 = vmatmul.mubr.msk.bf16.gmra.mrb[44].mxu0 %vm1417_vm2, %v2362_v42  ;;  %v5829_v42 = vsub.f32 %v5827_v5, %v5828_v30  ;;  %v1904_v30 = vld [vmem:[#allocation4 + $0x30] sm:$0xff] }
 0x421   : > { %2041 = vadd.xlane.f32.xlu1 %v2040_v28  ;;  %v1606_v28 = vmul.f32 1.442695, %v5832_v20  ;;  %v1905_v20 = vld [vmem:[#allocation4 + $0x38] sm:$0xff] }
 0x422   : > { %2044 = vadd.xlane.f32.xlu0 %v2043_v34  ;;  %v1620_v40 = vmul.f32 1.442695, %v5829_v42  ;;  %v1900_v34 = vld [vmem:[#allocation4 + $0x10] sm:$0xff] }
 0x423   : > { %v1932_v63 = vmul.f32 %v5376_v16, %v1900_v34  ;;  %v5849_v34 = vld [vmem:[#allocation49_spill] sm:$0xff] }
 0x424   : > { %4086 = vpow2.f32 %v1620_v40 }
 0x425   : > { %2035 = vadd.xlane.f32.xlu1 %v2034_v13  ;;  %v5381_v13 = vpop.eup %4074  ;;  %4088 = vpow2.f32 %v1606_v28  ;;  %v5848_v28 = vld [vmem:[#allocation48_spill] sm:$0xff] }
 0x426   : > { %2038 = vadd.xlane.f32.xlu0 %v2037_v35  ;;  %v1901_v35 = vld [vmem:[#allocation4 + $0x18] sm:$0xff]  ;;  %v5387_v54 = vpop.eup %4076  ;;  %4090 = vpow2.f32 %v1624_v15 }
 0x427   : > { %v1933_v27 = vmul.f32 %v5381_v13, %v1901_v35  ;;  %v5393_v18 = vpop.eup %4078  ;;  %4092 = vpow2.f32 %v1618_v46  ;;  %v5850_v35 = vsub.f32 %v5848_v28, %v5849_v34  ;;  %v1634_v46 = vmul.f32 1.442695, %v5854_v22 }
 0x428   : > { %v5398_v37 = vpop.eup %4080  ;;  %v1935_v5 = vmul.f32 %v5393_v18, %v1903_v1  ;;  %4094 = vpow2.f32 %v1636_v32  ;;  %v5857_v32 = vsub.f32 %v5855_v12, %v5856_v4 }
 0x429   : > { %2053 = vadd.xlane.f32.xlu1 %v2052_v6  ;;  %v1640_v26 = vmul.f32 1.442695, %v5850_v35  ;;  %v1936_v15 = vmul.f32 %v5398_v37, %v1904_v30  ;;  %4096 = vpow2.f32 %v1622_v45 }
 0x42a   : > { %2056 = vadd.xlane.f32.xlu0 %v2055_v23 }
 0x42b   : > { %4098 = vpow2.f32 %v1640_v26 }
 0x42c   : > { %4100 = vpow2.f32 %v1634_v46 }
 0x42d   : > { %2047 = vadd.xlane.f32.xlu1 %v2046_v9  ;;  %v1934_v9 = vmul.f32 %v5387_v54, %v1902_v24 }
 0x42e   : > { %2050 = vadd.xlane.f32.xlu0 %v2049_v19  ;;  %v5404_v19 = vpop.eup %4082 }
 0x42f   : > { %v5413_v42 = vpop.eup %4084 }
 0x439   : > { %v1970_v53 = vpop.xlane.xlu1 %1969 }
 0x43a   : > { %v2060_v6 = vadd.f32 %v1970_v53, %v1932_v63  ;;  %v1973_v23 = vpop.xlane.xlu0 %1972  ;;  %v5425_v63 = vpop.eup %4086 }
 0x43b   : > { %v2061_v49 = vadd.f32 %v1973_v23, %v1933_v27  ;;  %v1937_v27 = vmul.f32 %v5413_v42, %v1905_v20  ;;  %v5433_v23 = vpop.eup %4088 }
 0x43c   : > { %2093 = vst.msk [vmem:[#allocation4 + $0x10] sm:$0xff] %vm536_vm3, %v2060_v6  ;;  %v5401_v11 = vpop.f32.mrb[28].mxu1  ;;  %v5437_v39 = vpop.eup %4090 }
 0x43d   : > { %5842 = vst [vmem:[#allocation31_spill] sm:$0xff] %v5401_v11  ;;  %2094 = vst.msk [vmem:[#allocation4 + $0x18] sm:$0xff] %vm536_vm3, %v2061_v49  ;;  %v5410_v61 = vpop.f32.mrb[29].mxu1  ;;  %v1976_v29 = vpop.xlane.xlu1 %1975  ;;  %v1638_v49 = vmul.f32 1.442695, %v5857_v32 }
 0x43e   : > { %5846 = vst [vmem:[#allocation33_spill] sm:$0xff] %v5410_v61  ;;  %v2062_v40 = vadd.f32 %v1976_v29, %v1934_v9  ;;  %v5415_v57 = vpop.f32.mrb[30].mxu1  ;;  %2232 = vperm.xlu1 %3906, %v5404_v19   ;;  %v1979_v47 = vpop.xlane.xlu0 %1978 }
 0x43f   : > { %5847 = vst [vmem:[#allocation28_spill] sm:$0xff] %v5415_v57  ;;  %v2063_v10 = vadd.f32 %v1979_v47, %v1935_v5  ;;  %v5421_v14 = vpop.f32.mrb[31].mxu1  ;;  %v5444_v9 = vpop.eup %4092  ;;  %4102 = vpow2.f32 %v1638_v49 }
 0x440   : > { %5851 = vst [vmem:[#allocation29_spill] sm:$0xff] %v5421_v14  ;;  %2095 = vst.msk [vmem:[#allocation4 + $0x20] sm:$0xff] %vm536_vm3, %v2062_v40  ;;  %v5447_v62 = vpop.eup %4094  ;;  %v2133_v14 = vld [vmem:[#allocation5 + $0x50] sm:$0xff] }
 0x441   : > { %2096 = vst.msk [vmem:[#allocation4 + $0x28] sm:$0xff] %vm536_vm3, %v2063_v10  ;;  %v1982_v53 = vpop.xlane.xlu1 %1981  ;;  %v5450_v21 = vpop.eup %4096  ;;  %v2141_v10 = vld [vmem:[#allocation5 + $0x90] sm:$0xff] }
 0x442   : > { %v2064_v24 = vadd.f32 %v1982_v53, %v1936_v15  ;;  %2262 = vperm.xlu1 %3906, %v5425_v63   ;;  %v1985_v6 = vpop.xlane.xlu0 %1984  ;;  %v5453_v3 = vpop.eup %4098  ;;  %v2139_v15 = vld [vmem:[#allocation5 + $0x80] sm:$0xff] }
 0x443   : > { %v2065_v1 = vadd.f32 %v1985_v6, %v1937_v27  ;;  %v5456_v45 = vpop.eup %4100 }
 0x444   : > { %2097 = vst.msk [vmem:[#allocation4 + $0x30] sm:$0xff] %vm536_vm3, %v2064_v24  ;;  %2227 = vperm.xlu0 %3907, %v5433_v23  }
 0x445   : > { %2098 = vst.msk [vmem:[#allocation4 + $0x38] sm:$0xff] %vm536_vm3, %v2065_v1  ;;  %v2198_v5 = vpop.permute.xlu1 %2197 }
 0x446   : > { %2272 = vperm.xlu1 %3906, %v5437_v39  }
 0x448   : > { %2257 = vperm.xlu0 %3907, %v5444_v9  }
 0x449   : > { %v5459_v29 = vpop.eup %4102  ;;  %v2208_v40 = vpop.permute.xlu1 %2207 }
 0x44a   : > { %2302 = vperm.xlu1 %3906, %v5447_v62   ;;  %v2203_v30 = vpop.permute.xlu0 %2202 }
 0x44c   : > { %2267 = vperm.xlu0 %3907, %v5450_v21  }
 0x44d   : > { %v2213_v20 = vpop.permute.xlu1 %2212 }
 0x44e   : > { %2312 = vperm.xlu1 %3906, %v5453_v3   ;;  %v2238_v47 = vpop.permute.xlu0 %2237 }
 0x44f   : > { %v2331_v46 = vmul.f32 %v2238_v47, %v2139_v15  ;;  %v2134_v47 = vld [vmem:[#allocation5 + $0x58] sm:$0xff]  ;;  %v2132_v15 = vld [vmem:[#allocation5 + $0x48] sm:$0xff] }
 0x450   : > { %2297 = vperm.xlu0 %3907, %v5456_v45  }
 0x451   : > { %v2243_v34 = vpop.permute.xlu1 %2242 }
 0x452   : > { %v2248_v28 = vpop.permute.xlu0 %2247  ;;  %v2332_v4 = vmul.f32 %v2243_v34, %v2140_v25  ;;  %v2325_v34 = vmul.f32 %v2208_v40, %v2133_v14 }
 0x453   : > { %v2333_v22 = vmul.f32 %v2248_v28, %v2141_v10  ;;  %v2131_v28 = vld [vmem:[#allocation5 + $0x40] sm:$0xff] }
 0x454   : > { %2307 = vperm.xlu0 %3907, %v5459_v29   ;;  %v2323_v25 = vmul.f32 %v2198_v5, %v2131_v28  ;;  %v2135_v5 = vld [vmem:[#allocation5 + $0x60] sm:$0xff] }
 0x455   : > { %v2253_v26 = vpop.permute.xlu1 %2252 }
 0x456   : > { %v2218_v35 = vpop.permute.xlu0 %2217  ;;  %v2334_v24 = vmul.f32 %v2253_v26, %v2142_v0  ;;  %v1908_v26 = vld [vmem:[#allocation4 + $0x50] sm:$0xff] }
 0x459   : > { %v2223_v6 = vpop.permute.xlu1 %2222 }
 0x45a   : > { %v5462_v53 = vpop.permute.xlu0 %2287 }
 0x45d   : > { %v5470_v0 = vpop.permute.xlu1 %2292 }
 0x45e   : > { %v5467_v10 = vpop.permute.xlu0 %2277 }
 0x461   : > { %v5475_v28 = vpop.permute.xlu1 %2282 }
 0x481   : > { %v3703_v27 = vpop.f32.mrb[32].mxu1 }
 0x482   : > { %v2689_v1 = vadd.f32 %v3703_v27, %v2333_v22  ;;  %v2563_v12 = vpop.f32.mrb[33].mxu1 }
 0x483   : > { %v2687_v32 = vadd.f32 %v2563_v12, %v2331_v46  ;;  %v3704_v49 = vpop.f32.mrb[34].mxu1  ;;  %v2326_v46 = vmul.f32 %v2213_v20, %v2134_v47  ;;  %v1909_v47 = vld [vmem:[#allocation4 + $0x58] sm:$0xff] }
 0x484   : > { %2721 = vst.msk [vmem:[#allocation5 + $0x90] sm:$0xff] %vm476_vm1, %v2689_v1  ;;  %v2690_v57 = vadd.f32 %v3704_v49, %v2334_v24  ;;  %v2566_v11 = vpop.f32.mrb[35].mxu1  ;;  %v2324_v1 = vmul.f32 %v2203_v30, %v2132_v15  ;;  %v1916_v30 = vld [vmem:[#allocation4 + $0x90] sm:$0xff]  ;;  %v2327_v15 = vmul.f32 %v2218_v35, %v2135_v5 }
 0x485   : > { %2719 = vst.msk [vmem:[#allocation5 + $0x80] sm:$0xff] %vm476_vm1, %v2687_v32  ;;  %v2688_v61 = vadd.f32 %v2566_v11, %v2332_v4  ;;  %v1940_v11 = vmul.f32 %v5212_v2, %v1908_v26  ;;  %v1906_v32 = vld [vmem:[#allocation4 + $0x40] sm:$0xff]  ;;  %v2136_v26 = vld [vmem:[#allocation5 + $0x68] sm:$0xff] }
 0x486   : > { %2722 = vst.msk [vmem:[#allocation5 + $0x98] sm:$0xff] %vm476_vm1, %v2690_v57  ;;  %v1938_v2 = vmul.f32 %v5201_v17, %v1906_v32  ;;  %v2328_v17 = vmul.f32 %v2223_v6, %v2136_v26  ;;  %v1917_v32 = vld [vmem:[#allocation4 + $0x98] sm:$0xff] }
 0x487   : > { %2720 = vst.msk [vmem:[#allocation5 + $0x88] sm:$0xff] %vm476_vm1, %v2688_v61  ;;  %v1949_v6 = vmul.f32 %v5255_v59, %v1917_v32 }
 0x489   : > { %v3687_v22 = vpop.f32.mrb[32].mxu0 }
 0x48a   : > { %v2681_v27 = vadd.f32 %v3687_v22, %v2325_v34  ;;  %v2486_v24 = vpop.f32.mrb[33].mxu0  ;;  %v1948_v22 = vmul.f32 %v5249_v50, %v1916_v30  ;;  %v1915_v30 = vld [vmem:[#allocation4 + $0x88] sm:$0xff] }
 0x48b   : > { %v2679_v12 = vadd.f32 %v2486_v24, %v2323_v25  ;;  %v3688_v57 = vpop.f32.mrb[34].mxu0  ;;  %v1994_v4 = vpop.xlane.xlu0 %1993  ;;  %v1941_v24 = vmul.f32 %v5226_v48, %v1909_v47  ;;  %v1947_v59 = vmul.f32 %v5239_v44, %v1915_v30 }
 0x48c   : > { %2713 = vst.msk [vmem:[#allocation5 + $0x50] sm:$0xff] %vm476_vm1, %v2681_v27  ;;  %v2682_v61 = vadd.f32 %v3688_v57, %v2326_v46  ;;  %v2068_v49 = vadd.f32 %v1994_v4, %v1940_v11  ;;  %v2489_v14 = vpop.f32.mrb[35].mxu0  ;;  %v1914_v11 = vld [vmem:[#allocation4 + $0x80] sm:$0xff] }
 0x48d   : > { %2711 = vst.msk [vmem:[#allocation5 + $0x40] sm:$0xff] %vm476_vm1, %v2679_v12  ;;  %v2680_v40 = vadd.f32 %v2489_v14, %v2324_v1  ;;  %v1946_v14 = vmul.f32 %v5233_v33, %v1914_v11 }
 0x48e   : > { %2714 = vst.msk [vmem:[#allocation5 + $0x58] sm:$0xff] %vm476_vm1, %v2682_v61 }
 0x48f   : > { %2101 = vst.msk [vmem:[#allocation4 + $0x50] sm:$0xff] %vm536_vm3, %v2068_v49  ;;  %v1988_v20 = vpop.xlane.xlu0 %1987 }
 0x490   : > { %2712 = vst.msk [vmem:[#allocation5 + $0x48] sm:$0xff] %vm476_vm1, %v2680_v40  ;;  %v2066_v34 = vadd.f32 %v1988_v20, %v1938_v2  ;;  %v1907_v40 = vld [vmem:[#allocation4 + $0x48] sm:$0xff] }
 0x491   : > { %v5481_v25 = vpop.f32.mrb[36].mxu0  ;;  %v1939_v26 = vmul.f32 %v5220_v56, %v1907_v40 }
 0x492   : > { %2099 = vst.msk [vmem:[#allocation4 + $0x40] sm:$0xff] %vm536_vm3, %v2066_v34  ;;  %v2018_v46 = vpop.xlane.xlu1 %2017  ;;  %v2502_v27 = vpop.f32.mrb[37].mxu0 }
 0x493   : > { %v2076_v1 = vadd.f32 %v2018_v46, %v1948_v22  ;;  %v2683_v12 = vadd.f32 %v2502_v27, %v2327_v15  ;;  %v5486_v57 = vpop.f32.mrb[38].mxu0  ;;  %v1997_v4 = vpop.xlane.xlu0 %1996  ;;  %v1912_v15 = vld [vmem:[#allocation4 + $0x70] sm:$0xff] }
 0x494   : > { %v2069_v61 = vadd.f32 %v1997_v4, %v1941_v24  ;;  %v2505_v35 = vpop.f32.mrb[39].mxu0  ;;  %v1913_v24 = vld [vmem:[#allocation4 + $0x78] sm:$0xff]  ;;  %v1944_v56 = vmul.f32 %v5433_v23, %v1912_v15 }
 0x495   : > { %2109 = vst.msk [vmem:[#allocation4 + $0x90] sm:$0xff] %vm536_vm3, %v2076_v1  ;;  %v2684_v50 = vadd.f32 %v2505_v35, %v2328_v17  ;;  %v1945_v32 = vmul.f32 %v5404_v19, %v1913_v24 }
 0x496   : > { %v2812_v49 = vld [vmem:[#allocation4 + $0x50] sm:$0xff]  ;;  %2715 = vst.msk [vmem:[#allocation5 + $0x60] sm:$0xff] %vm476_vm1, %v2683_v12  ;;  %v2012_v48 = vpop.xlane.xlu1 %2011 }
 0x497   : > { %4104 = vrcp.f32 %v2812_v49  ;;  %2102 = vst.msk [vmem:[#allocation4 + $0x58] sm:$0xff] %vm536_vm3, %v2069_v61  ;;  %v2074_v5 = vadd.f32 %v2012_v48, %v1946_v14  ;;  %v2021_v2 = vpop.xlane.xlu0 %2020  ;;  %v1920_v61 = vld [vmem:[#allocation4 + $0xb0] sm:$0xff] }
 0x498   : > { %2716 = vst.msk [vmem:[#allocation5 + $0x68] sm:$0xff] %vm476_vm1, %v2684_v50  ;;  %v2077_v20 = vadd.f32 %v2021_v2, %v1949_v6  ;;  %v1921_v50 = vld [vmem:[#allocation4 + $0xb8] sm:$0xff]  ;;  %v1952_v23 = vmul.f32 %v5450_v21, %v1920_v61  ;;  %v1910_v2 = vld [vmem:[#allocation4 + $0x60] sm:$0xff]  ;;  %v1924_v61 = vld [vmem:[#allocation4 + $0xd0] sm:$0xff] }
 0x499   : > { %2107 = vst.msk [vmem:[#allocation4 + $0x80] sm:$0xff] %vm536_vm3, %v2074_v5  ;;  %v5495_v47 = vpop.f32.mrb[36].mxu1  ;;  %v2810_v4 = vld [vmem:[#allocation4 + $0x40] sm:$0xff]  ;;  %v1953_v19 = vmul.f32 %v5437_v39, %v1921_v50  ;;  %v1942_v15 = vmul.f32 %v5258_v7, %v1910_v2 }
 0x49a   : > { %2110 = vst.msk [vmem:[#allocation4 + $0x98] sm:$0xff] %vm536_vm3, %v2077_v20  ;;  %v1991_v33 = vpop.xlane.xlu1 %1990  ;;  %v5499_v34 = vpop.f32.mrb[37].mxu1 }
 0x49b   : > { %v2067_v22 = vadd.f32 %v1991_v33, %v1939_v26  ;;  %v5502_v46 = vpop.f32.mrb[38].mxu1  ;;  %v2015_v27 = vpop.xlane.xlu0 %2014  ;;  %v1911_v26 = vld [vmem:[#allocation4 + $0x68] sm:$0xff] }
 0x49c   : > { %v2820_v11 = vld [vmem:[#allocation4 + $0x90] sm:$0xff]  ;;  %v2075_v17 = vadd.f32 %v2015_v27, %v1947_v59  ;;  %v5504_v1 = vpop.f32.mrb[39].mxu1  ;;  %v1918_v27 = vld [vmem:[#allocation4 + $0xa0] sm:$0xff] }
 0x49d   : > { %4106 = vrcp.f32 %v2820_v11  ;;  %2100 = vst.msk [vmem:[#allocation4 + $0x48] sm:$0xff] %vm536_vm3, %v2067_v22  ;;  %v1943_v22 = vmul.f32 %v5261_v43, %v1911_v26  ;;  %v1950_v7 = vmul.f32 %v5444_v9, %v1918_v27  ;;  %v1956_v9 = vmul.f32 %v5264_v31, %v1924_v61  ;;  %v1923_v26 = vld [vmem:[#allocation4 + $0xc8] sm:$0xff] }
 0x49e   : > { %v2813_v12 = vld [vmem:[#allocation4 + $0x58] sm:$0xff]  ;;  %2108 = vst.msk [vmem:[#allocation4 + $0x88] sm:$0xff] %vm536_vm3, %v2075_v17  ;;  %v2006_v44 = vpop.xlane.xlu1 %2005  ;;  %v1927_v61 = vld [vmem:[#allocation4 + $0xe8] sm:$0xff] }
 0x49f   : > { %4108 = vrcp.f32 %v2813_v12  ;;  %v2072_v35 = vadd.f32 %v2006_v44, %v1944_v56  ;;  %v2009_v49 = vpop.xlane.xlu0 %2008  ;;  %v1919_v12 = vld [vmem:[#allocation4 + $0xa8] sm:$0xff] }
 0x4a0   : > { %v2073_v48 = vadd.f32 %v2009_v49, %v1945_v32  ;;  %4110 = vrcp.f32 %v2810_v4  ;;  %v2818_v6 = vld [vmem:[#allocation4 + $0x80] sm:$0xff]  ;;  %v1951_v32 = vmul.f32 %v5425_v63, %v1919_v12 }
 0x4a1   : > { %v4105_v14 = vpop.eup %4104  ;;  %v2821_v40 = vld [vmem:[#allocation4 + $0x98] sm:$0xff]  ;;  %2105 = vst.msk [vmem:[#allocation4 + $0x70] sm:$0xff] %vm536_vm3, %v2072_v35 }
 0x4a2   : > { %2918 = vperm.xlu0 %3907, %v4105_v14   ;;  %4112 = vrcp.f32 %v2821_v40  ;;  %2106 = vst.msk [vmem:[#allocation4 + $0x78] sm:$0xff] %vm536_vm3, %v2073_v48  ;;  %v2030_v5 = vpop.xlane.xlu1 %2029  ;;  %v1925_v48 = vld [vmem:[#allocation4 + $0xd8] sm:$0xff] }
 0x4a3   : > { %v2080_v30 = vadd.f32 %v2030_v5, %v1952_v23  ;;  %v2033_v20 = vpop.xlane.xlu0 %2032  ;;  %4114 = vrcp.f32 %v2818_v6  ;;  %v1957_v63 = vmul.f32 %v5267_v51, %v1925_v48  ;;  %v1955_v51 = vmul.f32 %v5275_v38, %v1923_v26 }
 0x4a4   : > { %v2811_v33 = vld [vmem:[#allocation4 + $0x48] sm:$0xff]  ;;  %v2081_v59 = vadd.f32 %v2033_v20, %v1953_v19  ;;  %v1922_v19 = vld [vmem:[#allocation4 + $0xc0] sm:$0xff] }
 0x4a5   : > { %4116 = vrcp.f32 %v2811_v33  ;;  %2113 = vst.msk [vmem:[#allocation4 + $0xb0] sm:$0xff] %vm536_vm3, %v2080_v30  ;;  %v2819_v39 = vld [vmem:[#allocation4 + $0x88] sm:$0xff]  ;;  %v1954_v31 = vmul.f32 %v5270_v8, %v1922_v19  ;;  %v2138_v19 = vld [vmem:[#allocation5 + $0x78] sm:$0xff] }
 0x4a6   : > { %2114 = vst.msk [vmem:[#allocation4 + $0xb8] sm:$0xff] %vm536_vm3, %v2081_v59  ;;  %v2000_v21 = vpop.xlane.xlu1 %1999 }
 0x4a7   : > { %v4107_v24 = vpop.eup %4106  ;;  %v2070_v11 = vadd.f32 %v2000_v21, %v1942_v15  ;;  %v2003_v17 = vpop.xlane.xlu0 %2002 }
 0x4a8   : > { %v2816_v4 = vld [vmem:[#allocation4 + $0x70] sm:$0xff]  ;;  %v2071_v44 = vadd.f32 %v2003_v17, %v1943_v22  ;;  %2958 = vperm.xlu0 %3907, %v4107_v24  }
 0x4a9   : > { %v4109_v56 = vpop.eup %4108  ;;  %4118 = vrcp.f32 %v2816_v4  ;;  %2103 = vst.msk [vmem:[#allocation4 + $0x60] sm:$0xff] %vm536_vm3, %v2070_v11  ;;  %v2817_v49 = vld [vmem:[#allocation4 + $0x78] sm:$0xff]  ;;  %v1928_v22 = vld [vmem:[#allocation4 + $0xf0] sm:$0xff] }
 0x4aa   : > { %2923 = vperm.xlu1 %3906, %v4109_v56   ;;  %4120 = vrcp.f32 %v2819_v39  ;;  %2104 = vst.msk [vmem:[#allocation4 + $0x68] sm:$0xff] %vm536_vm3, %v2071_v44  ;;  %v2024_v43 = vpop.xlane.xlu1 %2023  ;;  %v4111_v35 = vpop.eup %4110  ;;  %v1929_v11 = vld [vmem:[#allocation4 + $0xf8] sm:$0xff]  ;;  %v1960_v8 = vmul.f32 %v5459_v29, %v1928_v22 }
 0x4ab   : > { %v2078_v50 = vadd.f32 %v2024_v43, %v1950_v7  ;;  %v2027_v14 = vpop.xlane.xlu0 %2026  ;;  %4122 = vrcp.f32 %v2817_v49  ;;  %v1961_v44 = vmul.f32 %v5453_v3, %v1929_v11  ;;  %v1926_v7 = vld [vmem:[#allocation4 + $0xe0] sm:$0xff]  ;;  %v1959_v3 = vmul.f32 %v5447_v62, %v1927_v61 }
 0x4ac   : > { %v4113_v6 = vpop.eup %4112  ;;  %v2079_v40 = vadd.f32 %v2027_v14, %v1951_v32  ;;  %2908 = vperm.xlu0 %3907, %v4111_v35   ;;  %v1958_v29 = vmul.f32 %v5456_v45, %v1926_v7  ;;  %v2824_v45 = vld [vmem:[#allocation4 + $0xb0] sm:$0xff] }
 0x4ad   : > { %2111 = vst.msk [vmem:[#allocation4 + $0xa0] sm:$0xff] %vm536_vm3, %v2078_v50  ;;  %v4115_v23 = vpop.eup %4114  ;;  %v2825_v62 = vld [vmem:[#allocation4 + $0xb8] sm:$0xff] }
 0x4ae   : > { %2963 = vperm.xlu1 %3906, %v4113_v6   ;;  %2112 = vst.msk [vmem:[#allocation4 + $0xa8] sm:$0xff] %vm536_vm3, %v2079_v40  ;;  %v2042_v5 = vpop.xlane.xlu1 %2041 }
 0x4af   : > { %v4117_v2 = vpop.eup %4116  ;;  %v2084_v30 = vadd.f32 %v2042_v5, %v1956_v9  ;;  %v2045_v20 = vpop.xlane.xlu0 %2044 }
 0x4b0   : > { %v2814_v33 = vld [vmem:[#allocation4 + $0x60] sm:$0xff]  ;;  %v2085_v59 = vadd.f32 %v2045_v20, %v1957_v63  ;;  %2948 = vperm.xlu0 %3907, %v4115_v23  }
 0x4b1   : > { %4124 = vrcp.f32 %v2814_v33  ;;  %v2815_v15 = vld [vmem:[#allocation4 + $0x68] sm:$0xff]  ;;  %2117 = vst.msk [vmem:[#allocation4 + $0xd0] sm:$0xff] %vm536_vm3, %v2084_v30 }
 0x4b2   : > { %2913 = vperm.xlu1 %3906, %v4117_v2   ;;  %4126 = vrcp.f32 %v2815_v15  ;;  %2118 = vst.msk [vmem:[#allocation4 + $0xd8] sm:$0xff] %vm536_vm3, %v2085_v59  ;;  %v2036_v21 = vpop.xlane.xlu1 %2035  ;;  %v2144_v59 = vld [vmem:[#allocation5 + $0xa8] sm:$0xff] }
 0x4b3   : > { %v4119_v27 = vpop.eup %4118  ;;  %v2082_v24 = vadd.f32 %v2036_v21, %v1954_v31  ;;  %v2039_v39 = vpop.xlane.xlu0 %2038  ;;  %v2137_v31 = vld [vmem:[#allocation5 + $0x70] sm:$0xff] }
 0x4b4   : > { %v4121_v17 = vpop.eup %4120  ;;  %v2822_v12 = vld [vmem:[#allocation4 + $0xa0] sm:$0xff]  ;;  %v2083_v56 = vadd.f32 %v2039_v39, %v1955_v51  ;;  %2938 = vperm.xlu0 %3907, %v4119_v27  }
 0x4b5   : > { %4128 = vrcp.f32 %v2822_v12  ;;  %v2823_v4 = vld [vmem:[#allocation4 + $0xa8] sm:$0xff]  ;;  %2115 = vst.msk [vmem:[#allocation4 + $0xc0] sm:$0xff] %vm536_vm3, %v2082_v24  ;;  %v4123_v35 = vpop.eup %4122 }
 0x4b6   : > { %2953 = vperm.xlu1 %3906, %v4121_v17   ;;  %4130 = vrcp.f32 %v2823_v4  ;;  %2116 = vst.msk [vmem:[#allocation4 + $0xc8] sm:$0xff] %vm536_vm3, %v2083_v56  ;;  %v2054_v38 = vpop.xlane.xlu1 %2053  ;;  %v2146_v17 = vld [vmem:[#allocation5 + $0xb8] sm:$0xff] }
 0x4b7   : > { %v2088_v43 = vadd.f32 %v2054_v38, %v1960_v8  ;;  %v2057_v32 = vpop.xlane.xlu0 %2056 }
 0x4b8   : > { %v2828_v49 = vld [vmem:[#allocation4 + $0xd0] sm:$0xff]  ;;  %v2089_v50 = vadd.f32 %v2057_v32, %v1961_v44 }
 0x4b9   : > { %4132 = vrcp.f32 %v2828_v49  ;;  %v2829_v14 = vld [vmem:[#allocation4 + $0xd8] sm:$0xff]  ;;  %2121 = vst.msk [vmem:[#allocation4 + $0xf0] sm:$0xff] %vm536_vm3, %v2088_v43  ;;  %v2145_v49 = vld [vmem:[#allocation5 + $0xb0] sm:$0xff] }
 0x4ba   : > { %2943 = vperm.xlu1 %3906, %v4123_v35   ;;  %4134 = vrcp.f32 %v2829_v14  ;;  %2122 = vst.msk [vmem:[#allocation4 + $0xf8] sm:$0xff] %vm536_vm3, %v2089_v50  ;;  %v2048_v48 = vpop.xlane.xlu1 %2047 }
 0x4bb   : > { %v4125_v6 = vpop.eup %4124  ;;  %v2086_v40 = vadd.f32 %v2048_v48, %v1958_v29  ;;  %v2051_v9 = vpop.xlane.xlu0 %2050 }
 0x4bc   : > { %v4127_v23 = vpop.eup %4126  ;;  %v2826_v5 = vld [vmem:[#allocation4 + $0xc0] sm:$0xff]  ;;  %v2087_v63 = vadd.f32 %v2051_v9, %v1959_v3  ;;  %2928 = vperm.xlu0 %3907, %v4125_v6   ;;  %v2149_v3 = vld [vmem:[#allocation5 + $0xd0] sm:$0xff] }
 0x4bd   : > { %4136 = vrcp.f32 %v2826_v5  ;;  %v2827_v2 = vld [vmem:[#allocation4 + $0xc8] sm:$0xff]  ;;  %2119 = vst.msk [vmem:[#allocation4 + $0xe0] sm:$0xff] %vm536_vm3, %v2086_v40 }
 0x4be   : > { %2933 = vperm.xlu1 %3906, %v4127_v23   ;;  %4138 = vrcp.f32 %v2827_v2  ;;  %2120 = vst.msk [vmem:[#allocation4 + $0xe8] sm:$0xff] %vm536_vm3, %v2087_v63  ;;  %v2233_v30 = vpop.permute.xlu1 %2232  ;;  %v2150_v23 = vld [vmem:[#allocation5 + $0xd8] sm:$0xff]  ;;  %v2148_v5 = vld [vmem:[#allocation5 + $0xc8] sm:$0xff] }
 0x4bf   : > { %v4129_v20 = vpop.eup %4128  ;;  %v2330_v26 = vmul.f32 %v2233_v30, %v2138_v19  ;;  %4140 = vrcp.f32 %v2824_v45  ;;  %v2342_v45 = vmul.f32 %v5470_v0, %v2150_v23  ;;  %v2802_v0 = vld [vmem:[#allocation4] sm:$0xff] }
 0x4c0   : > { %v4131_v33 = vpop.eup %4130  ;;  %2968 = vperm.xlu0 %3907, %v4129_v20   ;;  %4142 = vrcp.f32 %v2825_v62  ;;  %v2832_v4 = vld [vmem:[#allocation4 + $0xf0] sm:$0xff]  ;;  %v2340_v62 = vmul.f32 %v5475_v28, %v2148_v5  ;;  %v2803_v28 = vld [vmem:[#allocation4 + $0x8] sm:$0xff]  ;;  %v2789_v5 = vld [vmem:[#allocation5 + $0x98] sm:$0xff] }
 0x4c1   : > { %v2686_v15 = vadd.f32 %v5486_v57, %v2330_v26  ;;  %v2143_v57 = vld [vmem:[#allocation5 + $0xa0] sm:$0xff]  ;;  %v2833_v7 = vld [vmem:[#allocation4 + $0xf8] sm:$0xff] }
 0x4c2   : > { %2973 = vperm.xlu1 %3906, %v4131_v33   ;;  %v2263_v21 = vpop.permute.xlu1 %2262 }
 0x4c3   : > { %v4133_v51 = vpop.eup %4132  ;;  %2718 = vst.msk [vmem:[#allocation5 + $0x78] sm:$0xff] %vm476_vm1, %v2686_v15  ;;  %v2336_v22 = vmul.f32 %v2263_v21, %v2144_v59  ;;  %v2228_v27 = vpop.permute.xlu0 %2227  ;;  %v2804_v15 = vld [vmem:[#allocation4 + $0x10] sm:$0xff]  ;;  %v2806_v21 = vld [vmem:[#allocation4 + $0x20] sm:$0xff] }
 0x4c4   : > { %v4135_v24 = vpop.eup %4134  ;;  %v2830_v39 = vld [vmem:[#allocation4 + $0xe0] sm:$0xff]  ;;  %v2329_v11 = vmul.f32 %v2228_v27, %v2137_v31  ;;  %2998 = vperm.xlu0 %3907, %v4133_v51   ;;  %v2805_v31 = vld [vmem:[#allocation4 + $0x18] sm:$0xff] }
 0x4c5   : > { %4144 = vrcp.f32 %v2830_v39  ;;  %v2831_v12 = vld [vmem:[#allocation4 + $0xe8] sm:$0xff]  ;;  %v2692_v56 = vadd.f32 %v5504_v1, %v2336_v22 }
 0x4c6   : > { %3003 = vperm.xlu1 %3906, %v4135_v24   ;;  %4146 = vrcp.f32 %v2831_v12  ;;  %v2685_v8 = vadd.f32 %v5481_v25, %v2329_v11  ;;  %v2273_v38 = vpop.permute.xlu1 %2272 }
 0x4c7   : > { %v4137_v44 = vpop.eup %4136  ;;  %2724 = vst.msk [vmem:[#allocation5 + $0xa8] sm:$0xff] %vm476_vm1, %v2692_v56  ;;  %v2338_v43 = vmul.f32 %v2273_v38, %v2146_v17  ;;  %v2258_v32 = vpop.permute.xlu0 %2257  ;;  %4148 = vrcp.f32 %v2832_v4  ;;  %v2154_v17 = vld [vmem:[#allocation5 + $0xf8] sm:$0xff]  ;;  %v2152_v56 = vld [vmem:[#allocation5 + $0xe8] sm:$0xff] }
 0x4c8   : > { %v4139_v61 = vpop.eup %4138  ;;  %2717 = vst.msk [vmem:[#allocation5 + $0x70] sm:$0xff] %vm476_vm1, %v2685_v8  ;;  %v2335_v35 = vmul.f32 %v2258_v32, %v2143_v57  ;;  %2988 = vperm.xlu0 %3907, %v4137_v44   ;;  %4150 = vrcp.f32 %v2833_v7 }
 0x4c9   : > { %v2694_v1 = vadd.f32 %v5502_v46, %v2338_v43  ;;  %v4141_v50 = vpop.eup %4140  ;;  %v2147_v46 = vld [vmem:[#allocation5 + $0xc0] sm:$0xff]  ;;  %4152 = vrcp.f32 %v2802_v0 }
 0x4ca   : > { %2993 = vperm.xlu1 %3906, %v4139_v61   ;;  %v2691_v25 = vadd.f32 %v5499_v34, %v2335_v35  ;;  %v4143_v29 = vpop.eup %4142  ;;  %v2341_v34 = vmul.f32 %v5462_v53, %v2149_v3  ;;  %v2339_v63 = vmul.f32 %v5467_v10, %v2147_v46  ;;  %4154 = vrcp.f32 %v2803_v28  ;;  %v2781_v3 = vld [vmem:[#allocation5 + $0x58] sm:$0xff] }
 0x4cb   : > { %2726 = vst.msk [vmem:[#allocation5 + $0xb8] sm:$0xff] %vm476_vm1, %v2694_v1  ;;  %v2268_v14 = vpop.permute.xlu0 %2267  ;;  %4156 = vrcp.f32 %v2804_v15 }
 0x4cc   : > { %2723 = vst.msk [vmem:[#allocation5 + $0xa0] sm:$0xff] %vm476_vm1, %v2691_v25  ;;  %v2337_v48 = vmul.f32 %v2268_v14, %v2145_v49  ;;  %2978 = vperm.xlu0 %3907, %v4141_v50   ;;  %4158 = vrcp.f32 %v2805_v31 }
 0x4cd   : > { %4160 = vrcp.f32 %v2806_v21  ;;  %v3974_v21 = vld [vmem:[%s5673_s5] sm:$0xff]  }
 0x4ce   : > { %2983 = vperm.xlu1 %3906, %v4143_v29   ;;  %v2693_v6 = vadd.f32 %v5495_v47, %v2337_v48  ;;  %v2780_v48 = vld [vmem:[#allocation5 + $0x50] sm:$0xff]  ;;  %3725 = vmatprep.subr.bf16.mxu1 %v3974_v21 }
 0x4cf   : > { %v4145_v40 = vpop.eup %4144  ;;  %v2298_v22 = vpop.permute.xlu0 %2297  ;;  %3726 = vmatpush3.bf16.msra.mxu1 %v3974_v21 }
 0x4d0   : > { %v4147_v9 = vpop.eup %4146  ;;  %2725 = vst.msk [vmem:[#allocation5 + $0xb0] sm:$0xff] %vm476_vm1, %v2693_v6  ;;  %3008 = vperm.xlu0 %3907, %v4145_v40  }
 0x4d1   : > { %v4149_v2 = vpop.eup %4148 }
 0x4d2   : > { %3013 = vperm.xlu1 %3906, %v4147_v9   ;;  %v3719_v19 = vpop.f32.mrb[40].mxu0  ;;  %v4151_v47 = vpop.eup %4150 }
 0x4d3   : > { %v2697_v30 = vadd.f32 %v3719_v19, %v2341_v34  ;;  %v2640_v20 = vpop.f32.mrb[41].mxu0  ;;  %v2308_v39 = vpop.permute.xlu0 %2307  ;;  %v2788_v34 = vld [vmem:[#allocation5 + $0x90] sm:$0xff] }
 0x4d4   : > { %v2695_v26 = vadd.f32 %v2640_v20, %v2339_v63  ;;  %v3720_v33 = vpop.f32.mrb[42].mxu0  ;;  %3018 = vperm.xlu0 %3907, %v4149_v2  }
 0x4d5   : > { %2729 = vst.msk [vmem:[#allocation5 + $0xd0] sm:$0xff] %vm476_vm1, %v2697_v30  ;;  %v2698_v59 = vadd.f32 %v3720_v33, %v2342_v45  ;;  %v2643_v53 = vpop.f32.mrb[43].mxu0  ;;  %v2778_v30 = vld [vmem:[#allocation5 + $0x40] sm:$0xff] }
 0x4d6   : > { %3023 = vperm.xlu1 %3906, %v4151_v47   ;;  %2727 = vst.msk [vmem:[#allocation5 + $0xc0] sm:$0xff] %vm476_vm1, %v2695_v26  ;;  %v2696_v10 = vadd.f32 %v2643_v53, %v2340_v62  ;;  %v2779_v47 = vld [vmem:[#allocation5 + $0x48] sm:$0xff]  ;;  %v2786_v53 = vld [vmem:[#allocation5 + $0x80] sm:$0xff] }
 0x4d7   : > { %2730 = vst.msk [vmem:[#allocation5 + $0xd8] sm:$0xff] %vm476_vm1, %v2698_v59 }
 0x4d8   : > { %2728 = vst.msk [vmem:[#allocation5 + $0xc8] sm:$0xff] %vm476_vm1, %v2696_v10  ;;  %2157 = vperm.xlu0 %3907, %v5272_v58   ;;  %v2807_v58 = vld [vmem:[#allocation4 + $0x28] sm:$0xff] }
 0x4d9   : > { %4162 = vrcp.f32 %v2807_v58  ;;  %v2787_v10 = vld [vmem:[#allocation5 + $0x88] sm:$0xff] }
 0x4da   : > { %2162 = vperm.xlu1 %3906, %v5217_v41   ;;  %v2808_v41 = vld [vmem:[#allocation4 + $0x30] sm:$0xff] }
 0x4db   : > { %4164 = vrcp.f32 %v2808_v41  ;;  %v2784_v41 = vld [vmem:[#allocation5 + $0x70] sm:$0xff] }
 0x4dc   : > { %2167 = vperm.xlu0 %3907, %v5376_v16   ;;  %v4153_v16 = vpop.eup %4152 }
 0x4dd   : > { %v4155_v51 = vpop.eup %4154 }
 0x4de   : > { %2172 = vperm.xlu1 %3906, %v5381_v13   ;;  %v2809_v13 = vld [vmem:[#allocation4 + $0x38] sm:$0xff] }
 0x4df   : > { %4166 = vrcp.f32 %v2809_v13 }
 0x4e0   : > { %2177 = vperm.xlu0 %3907, %v5387_v54   ;;  %v4157_v54 = vpop.eup %4156 }
 0x4e1   : > { %v4159_v27 = vpop.eup %4158 }
 0x4e2   : > { %2182 = vperm.xlu1 %3906, %v5393_v18   ;;  %v2303_v18 = vpop.permute.xlu1 %2302  ;;  %v4161_v24 = vpop.eup %4160 }
 0x4e3   : > { %v4163_v11 = vpop.eup %4162  ;;  %v2344_v61 = vmul.f32 %v2303_v18, %v2152_v56  ;;  %v2782_v18 = vld [vmem:[#allocation5 + $0x60] sm:$0xff]  ;;  %v3975_v56 = vld [vmem:[%s5673_s5 + $0x8] sm:$0xff]  }
 0x4e4   : > { %2187 = vperm.xlu0 %3907, %v5398_v37   ;;  %v2153_v37 = vld [vmem:[#allocation5 + $0xf0] sm:$0xff]  ;;  %3727 = vmatprep.subr.bf16.mxu1 %v3975_v56 }
 0x4e5   : > { %v2345_v57 = vmul.f32 %v2308_v39, %v2153_v37  ;;  %v4165_v4 = vpop.eup %4164  ;;  %v2783_v37 = vld [vmem:[#allocation5 + $0x68] sm:$0xff]  ;;  %3728 = vmatpush3.bf16.msra.mxu1 %v3975_v56 }
 0x4e6   : > { %2192 = vperm.xlu1 %3906, %v5413_v42   ;;  %v2151_v42 = vld [vmem:[#allocation5 + $0xe0] sm:$0xff]  ;;  %v2313_v12 = vpop.permute.xlu1 %2312 }
 0x4e7   : > { %v2343_v8 = vmul.f32 %v2298_v22, %v2151_v42  ;;  %v2346_v7 = vmul.f32 %v2313_v12, %v2154_v17 }
 0x4e8   : > { %2868 = vperm.xlu0 %3907, %v4153_v16   ;;  %v2785_v16 = vld [vmem:[#allocation5 + $0x78] sm:$0xff] }
 0x4e9   : > { %v4167_v44 = vpop.eup %4166 }
 0x4ea   : > { %2873 = vperm.xlu1 %3906, %v4155_v51  }
 0x4ec   : > { %2878 = vperm.xlu0 %3907, %v4157_v54  }
 0x4ee   : > { %2883 = vperm.xlu1 %3906, %v4159_v27  }
 0x4f0   : > { %2888 = vperm.xlu0 %3907, %v4161_v24  }
 0x4f2   : > { %2893 = vperm.xlu1 %3906, %v4163_v11  }
 0x4f3   : > { %v3723_v38 = vpop.f32.mrb[44].mxu0 }
 0x4f4   : > { %v2701_v43 = vadd.f32 %v3723_v38, %v2345_v57  ;;  %v2656_v32 = vpop.f32.mrb[45].mxu0  ;;  %2898 = vperm.xlu0 %3907, %v4165_v4   ;;  %v2796_v57 = vld [vmem:[#allocation5 + $0xd0] sm:$0xff]  ;;  %v2797_v38 = vld [vmem:[#allocation5 + $0xd8] sm:$0xff] }
 0x4f5   : > { %v2699_v35 = vadd.f32 %v2656_v32, %v2343_v8  ;;  %v3724_v1 = vpop.f32.mrb[46].mxu0  ;;  %v2794_v32 = vld [vmem:[#allocation5 + $0xc0] sm:$0xff] }
 0x4f6   : > { %2903 = vperm.xlu1 %3906, %v4167_v44   ;;  %2733 = vst.msk [vmem:[#allocation5 + $0xf0] sm:$0xff] %vm476_vm1, %v2701_v43  ;;  %v2702_v49 = vadd.f32 %v3724_v1, %v2346_v7  ;;  %v2659_v25 = vpop.f32.mrb[47].mxu0  ;;  %v2795_v1 = vld [vmem:[#allocation5 + $0xc8] sm:$0xff] }
 0x4f7   : > { %2731 = vst.msk [vmem:[#allocation5 + $0xe0] sm:$0xff] %vm476_vm1, %v2699_v35  ;;  %v2700_v50 = vadd.f32 %v2659_v25, %v2344_v61 }
 0x4f8   : > { %2734 = vst.msk [vmem:[#allocation5 + $0xf8] sm:$0xff] %vm476_vm1, %v2702_v49 }
 0x4f9   : > { %2732 = vst.msk [vmem:[#allocation5 + $0xe8] sm:$0xff] %vm476_vm1, %v2700_v50  ;;  %v2790_v50 = vld [vmem:[#allocation5 + $0xa0] sm:$0xff] }
 0x521   : > { %v2919_v14 = vpop.permute.xlu0 %2918 }
 0x522   : > { %v3036_v40 = vmul.f32 %v2919_v14, %v2780_v48  ;;  %v2791_v14 = vld [vmem:[#allocation5 + $0xa8] sm:$0xff] }
 0x527   : > { %v2959_v29 = vpop.permute.xlu0 %2958 }
 0x528   : > { %v3044_v19 = vmul.f32 %v2959_v29, %v2788_v34 }
 0x529   : > { %v2924_v6 = vpop.permute.xlu1 %2923 }
 0x52a   : > { %v3037_v46 = vmul.f32 %v2924_v6, %v2781_v3  ;;  %v2792_v6 = vld [vmem:[#allocation5 + $0xb0] sm:$0xff] }
 0x52b   : > { %v2909_v23 = vpop.permute.xlu0 %2908 }
 0x52c   : > { %v3908_v9 = vpack.i.bf16 %v3037_v46, %v3036_v40  ;;  %v3034_v26 = vmul.f32 %v2909_v23, %v2778_v30  ;;  %v2799_v30 = vld [vmem:[#allocation5 + $0xe8] sm:$0xff] }
 0x52d   : > { %v2964_v63 = vpop.permute.xlu1 %2963 }
 0x52e   : > { %v3045_v2 = vmul.f32 %v2964_v63, %v2789_v5  ;;  %3909 = vrot.lane.b32.xlu1 %v3908_v9, %s4198_s30  ;;  %v2793_v9 = vld [vmem:[#allocation5 + $0xb8] sm:$0xff] }
 0x52f   : > { %v2949_v20 = vpop.permute.xlu0 %2948 }
 0x530   : > { %v3913_v45 = vpack.i.bf16 %v3045_v2, %v3044_v19  ;;  %v3042_v28 = vmul.f32 %v2949_v20, %v2786_v53  ;;  %v2798_v19 = vld [vmem:[#allocation5 + $0xe0] sm:$0xff]  ;;  %v2801_v53 = vld [vmem:[#allocation5 + $0xf8] sm:$0xff] }
 0x531   : > { %v2914_v62 = vpop.permute.xlu1 %2913 }
 0x532   : > { %v3035_v33 = vmul.f32 %v2914_v62, %v2779_v47  ;;  %3914 = vrot.lane.b32.xlu1 %v3913_v45, %s4199_s8 }
 0x533   : > { %v2939_v31 = vpop.permute.xlu0 %2938 }
 0x534   : > { %v3918_v59 = vpack.i.bf16 %v3035_v33, %v3034_v26  ;;  %v3040_v51 = vmul.f32 %v2939_v31, %v2784_v41  ;;  %v2800_v26 = vld [vmem:[#allocation5 + $0xf0] sm:$0xff] }
 0x535   : > { %v2954_v0 = vpop.permute.xlu1 %2953 }
 0x536   : > { %v3043_v15 = vmul.f32 %v2954_v0, %v2787_v10  ;;  %3919 = vrot.lane.b32.xlu0 %v3918_v59, %s4198_s30 }
 0x538   : > { %v3923_v58 = vpack.i.bf16 %v3043_v15, %v3042_v28  ;;  %v2123_v28 = vld [vmem:[#allocation5] sm:$0xff]  ;;  %v2124_v15 = vld [vmem:[#allocation5 + $0x8] sm:$0xff] }
 0x539   : > { %v2944_v13 = vpop.permute.xlu1 %2943 }
 0x53a   : > { %v3041_v22 = vmul.f32 %v2944_v13, %v2785_v16  ;;  %3924 = vrot.lane.b32.xlu0 %v3923_v58, %s4199_s8  ;;  %v2125_v13 = vld [vmem:[#allocation5 + $0x10] sm:$0xff] }
 0x53b   : > { %v2929_v27 = vpop.permute.xlu0 %2928 }
 0x53c   : > { %v3928_v54 = vpack.i.bf16 %v3041_v22, %v3040_v51  ;;  %v3038_v24 = vmul.f32 %v2929_v27, %v2782_v18  ;;  %v2126_v22 = vld [vmem:[#allocation5 + $0x18] sm:$0xff] }
 0x53d   : > { %v2934_v39 = vpop.permute.xlu1 %2933 }
 0x53e   : > { %v3039_v11 = vmul.f32 %v2934_v39, %v2783_v37  ;;  %3929 = vrot.lane.b32.xlu1 %v3928_v54, %s4198_s30  ;;  %v2127_v39 = vld [vmem:[#allocation5 + $0x20] sm:$0xff] }
 0x53f   : > { %v2969_v17 = vpop.permute.xlu0 %2968 }
 0x540   : > { %v3933_v42 = vpack.i.bf16 %v3039_v11, %v3038_v24  ;;  %v3046_v29 = vmul.f32 %v2969_v17, %v2790_v50 }
 0x541   : > { %v2974_v12 = vpop.permute.xlu1 %2973 }
 0x542   : > { %3934 = vrot.lane.b32.xlu0 %v3933_v42, %s4198_s30  ;;  %v3047_v48 = vmul.f32 %v2974_v12, %v2791_v14  ;;  %v2128_v42 = vld [vmem:[#allocation5 + $0x28] sm:$0xff] }
 0x543   : > { %v2999_v4 = vpop.permute.xlu0 %2998 }
 0x544   : > { %v3052_v8 = vmul.f32 %v2999_v4, %v2796_v57  ;;  %v3948_v5 = vpack.i.bf16 %v3047_v48, %v3046_v29  ;;  %v2129_v57 = vld [vmem:[#allocation5 + $0x30] sm:$0xff]  ;;  %v5858_v4 = vld [vmem:[#allocation33_spill] sm:$0xff] }
 0x545   : > { %v3004_v44 = vpop.permute.xlu1 %3003 }
 0x546   : > { %v3053_v7 = vmul.f32 %v3004_v44, %v2797_v38  ;;  %v2130_v38 = vld [vmem:[#allocation5 + $0x38] sm:$0xff] }
 0x547   : > { %v2989_v61 = vpop.permute.xlu0 %2988  ;;  %v5859_v44 = vld [vmem:[#allocation29_spill] sm:$0xff] }
 0x548   : > { %v3938_v43 = vpack.i.bf16 %v3053_v7, %v3052_v8  ;;  %v3050_v35 = vmul.f32 %v2989_v61, %v2794_v32  ;;  %v5860_v61 = vld [vmem:[#allocation31_spill] sm:$0xff] }
 0x549   : > { %v2994_v49 = vpop.permute.xlu1 %2993 }
 0x54a   : > { %v3051_v25 = vmul.f32 %v2994_v49, %v2795_v1  ;;  %3939 = vrot.lane.b32.xlu1 %v3938_v43, %s4200_s14  ;;  %v5861_v1 = vld [vmem:[#allocation28_spill] sm:$0xff] }
 0x54b   : > { %v2979_v40 = vpop.permute.xlu0 %2978 }
 0x54c   : > { %v3943_v3 = vpack.i.bf16 %v3051_v25, %v3050_v35  ;;  %v3048_v46 = vmul.f32 %v2979_v40, %v2792_v6 }
 0x54d   : > { %v2984_v23 = vpop.permute.xlu1 %2983 }
 0x54e   : > { %v3049_v34 = vmul.f32 %v2984_v23, %v2793_v9  ;;  %3944 = vrot.lane.b32.xlu0 %v3943_v3, %s4200_s14 }
 0x54f   : > { %v3009_v2 = vpop.permute.xlu0 %3008 }
 0x550   : > { %v3953_v63 = vpack.i.bf16 %v3049_v34, %v3048_v46  ;;  %v3054_v45 = vmul.f32 %v3009_v2, %v2798_v19 }
 0x551   : > { %v3014_v20 = vpop.permute.xlu1 %3013 }
 0x552   : > { %v3055_v47 = vmul.f32 %v3014_v20, %v2799_v30  ;;  %3949 = vrot.lane.b32.xlu0 %v3948_v5, %s4199_s8  ;;  %3954 = vrot.lane.b32.xlu1 %v3953_v63, %s4199_s8 }
 0x553   : > { %v3019_v33 = vpop.permute.xlu0 %3018 }
 0x554   : > { %v3958_v62 = vpack.i.bf16 %v3055_v47, %v3054_v45  ;;  %v3056_v59 = vmul.f32 %v3019_v33, %v2800_v26 }
 0x555   : > { %v3024_v10 = vpop.permute.xlu1 %3023 }
 0x556   : > { %v3057_v0 = vmul.f32 %v3024_v10, %v2801_v53  ;;  %3959 = vrot.lane.b32.xlu0 %v3958_v62, %s4200_s14 }
 0x557   : > { %v2158_v21 = vpop.permute.xlu0 %2157 }
 0x558   : > { %v3963_v31 = vpack.i.bf16 %v3057_v0, %v3056_v59  ;;  %v2315_v58 = vmul.f32 %v2158_v21, %v2123_v28 }
 0x559   : > { %v2163_v41 = vpop.permute.xlu1 %2162 }
 0x55a   : > { %v2316_v16 = vmul.f32 %v2163_v41, %v2124_v15  ;;  %3964 = vrot.lane.b32.xlu1 %v3963_v31, %s4200_s14  ;;  %v2671_v51 = vadd.f32 %v5301_v60, %v2315_v58 }
 0x55b   : > { %v2168_v18 = vpop.permute.xlu0 %2167 }
 0x55c   : > { %v2672_v54 = vadd.f32 %v5306_v52, %v2316_v16  ;;  %2703 = vst.msk [vmem:[#allocation5] sm:$0xff] %vm476_vm1, %v2671_v51  ;;  %v2317_v27 = vmul.f32 %v2168_v18, %v2125_v13 }
 0x55d   : > { %v2173_v24 = vpop.permute.xlu1 %2172 }
 0x55e   : > { %2704 = vst.msk [vmem:[#allocation5 + $0x8] sm:$0xff] %vm476_vm1, %v2672_v54  ;;  %v2318_v37 = vmul.f32 %v2173_v24, %v2126_v22  ;;  %v2673_v11 = vadd.f32 %v5298_v55, %v2317_v27 }
 0x55f   : > { %v2178_v12 = vpop.permute.xlu0 %2177 }
 0x560   : > { %v2674_v17 = vadd.f32 %v5304_v36, %v2318_v37  ;;  %2705 = vst.msk [vmem:[#allocation5 + $0x10] sm:$0xff] %vm476_vm1, %v2673_v11  ;;  %v2319_v60 = vmul.f32 %v2178_v12, %v2127_v39 }
 0x561   : > { %v2183_v56 = vpop.permute.xlu1 %2182 }
 0x562   : > { %2706 = vst.msk [vmem:[#allocation5 + $0x18] sm:$0xff] %vm476_vm1, %v2674_v17  ;;  %v2320_v52 = vmul.f32 %v2183_v56, %v2128_v42  ;;  %v2675_v8 = vadd.f32 %v5858_v4, %v2319_v60 }
 0x563   : > { %v2188_v43 = vpop.permute.xlu0 %2187  ;;  %v2770_v10 = vld [vmem:[#allocation5] sm:$0xff] }
 0x564   : > { %v2676_v7 = vadd.f32 %v5859_v44, %v2320_v52  ;;  %2707 = vst.msk [vmem:[#allocation5 + $0x20] sm:$0xff] %vm476_vm1, %v2675_v8  ;;  %v2321_v55 = vmul.f32 %v2188_v43, %v2129_v57 }
 0x565   : > { %v2193_v32 = vpop.permute.xlu1 %2192  ;;  %v2771_v0 = vld [vmem:[#allocation5 + $0x8] sm:$0xff] }
 0x566   : > { %2708 = vst.msk [vmem:[#allocation5 + $0x28] sm:$0xff] %vm476_vm1, %v2676_v7  ;;  %v2322_v36 = vmul.f32 %v2193_v32, %v2130_v38  ;;  %v2677_v35 = vadd.f32 %v5860_v61, %v2321_v55 }
 0x567   : > { %v2869_v50 = vpop.permute.xlu0 %2868  ;;  %v2772_v2 = vld [vmem:[#allocation5 + $0x10] sm:$0xff] }
 0x568   : > { %v2678_v49 = vadd.f32 %v5861_v1, %v2322_v36  ;;  %2709 = vst.msk [vmem:[#allocation5 + $0x30] sm:$0xff] %vm476_vm1, %v2677_v35  ;;  %v3026_v58 = vmul.f32 %v2869_v50, %v2770_v10 }
 0x569   : > { %v2874_v25 = vpop.permute.xlu1 %2873  ;;  %v2773_v45 = vld [vmem:[#allocation5 + $0x18] sm:$0xff] }
 0x56a   : > { %2710 = vst.msk [vmem:[#allocation5 + $0x38] sm:$0xff] %vm476_vm1, %v2678_v49  ;;  %v3027_v41 = vmul.f32 %v2874_v25, %v2771_v0 }
 0x56b   : > { %v2879_v29 = vpop.permute.xlu0 %2878  ;;  %v2774_v38 = vld [vmem:[#allocation5 + $0x20] sm:$0xff] }
 0x56c   : > { %v3028_v26 = vmul.f32 %v2879_v29, %v2772_v2 }
 0x56d   : > { %v2884_v14 = vpop.permute.xlu1 %2883  ;;  %v2775_v44 = vld [vmem:[#allocation5 + $0x28] sm:$0xff] }
 0x56e   : > { %v3029_v33 = vmul.f32 %v2884_v14, %v2773_v45 }
 0x56f   : > { %v2889_v3 = vpop.permute.xlu0 %2888  ;;  %v2776_v29 = vld [vmem:[#allocation5 + $0x30] sm:$0xff] }
 0x570   : > { %v3030_v55 = vmul.f32 %v2889_v3, %v2774_v38 }
 0x571   : > { %v2894_v48 = vpop.permute.xlu1 %2893 }
 0x572   : > { %v3031_v32 = vmul.f32 %v2894_v48, %v2775_v44 }
 0x573   : > { %v5608_v40 = vpop.permute.xlu0 %2898 }
 0x575   : > { %v5606_v6 = vpop.permute.xlu1 %2903 }
 0x5a0   : > { %v3910_v46 = vpop.permute.xlu1 %3909 }
 0x5a1   : > { %v3912_v63 = vunpack.i.h.bf16 %v3910_v46  ;;  %v3911_v19 = vunpack.i.l.bf16 %v3910_v46  ;;  %v2777_v46 = vld [vmem:[#allocation5 + $0x38] sm:$0xff] }
 0x5a3   : > { %v3157_v16 = vsel %vm476_vm1, %v3029_v33, %v3912_v63  ;;  %v3156_v13 = vsel %vm476_vm1, %v3028_v26, %v3911_v19  ;;  %v3033_v63 = vmul.f32 %v5606_v6, %v2777_v46 }
 0x5a4   : > { %v3915_v23 = vpop.permute.xlu1 %3914 }
 0x5a5   : > { %v3917_v30 = vunpack.i.h.bf16 %v3915_v23  ;;  %v3916_v20 = vunpack.i.l.bf16 %v3915_v23 }
 0x5a7   : > { %v3166_v51 = vsel %vm3162_vm4, %v3157_v16, %v3917_v30  ;;  %v3165_v22 = vsel %vm3162_vm4, %v3156_v13, %v3916_v20 }
 0x5a8   : > { %v3920_v9 = vpop.permute.xlu0 %3919 }
 0x5a9   : > { %v3922_v59 = vunpack.i.h.bf16 %v3920_v9  ;;  %v3921_v53 = vunpack.i.l.bf16 %v3920_v9 }
 0x5ab   : > { %v3155_v18 = vsel %vm476_vm1, %v3027_v41, %v3922_v59  ;;  %v3154_v27 = vsel %vm476_vm1, %v3026_v58, %v3921_v53  ;;  %v3461_v53 = vld [vmem:[%s5674_s6] ss:$0 sm:$0xff] }
 0x5ac   : > { %v3925_v34 = vpop.permute.xlu0 %3924 }
 0x5ad   : > { %v3927_v28 = vunpack.i.h.bf16 %v3925_v34  ;;  %v3926_v15 = vunpack.i.l.bf16 %v3925_v34  ;;  %v3032_v34 = vmul.f32 %v5608_v40, %v2776_v29 }
 0x5af   : > { %v3163_v39 = vsel %vm3162_vm4, %v3154_v27, %v3926_v15  ;;  %v3164_v11 = vsel %vm3162_vm4, %v3155_v18, %v3927_v28 }
 0x5b0   : > { %v5610_v5 = vpop.permute.xlu1 %3929 }
 0x5b1   : > { %v3932_v61 = vunpack.i.h.bf16 %v5610_v5  ;;  %v3931_v35 = vunpack.i.l.bf16 %v5610_v5 }
 0x5b3   : > { %v3161_v30 = vsel %vm476_vm1, %v3033_v63, %v3932_v61  ;;  %v3160_v20 = vsel %vm476_vm1, %v3032_v34, %v3931_v35 }
 0x5b4   : > { %v3935_v47 = vpop.permute.xlu0 %3934 }
 0x5b5   : > { %v3937_v57 = vunpack.i.h.bf16 %v3935_v47  ;;  %v3936_v4 = vunpack.i.l.bf16 %v3935_v47 }
 0x5b7   : > { %v3159_v49 = vsel %vm476_vm1, %v3031_v32, %v3937_v57  ;;  %v3158_v25 = vsel %vm476_vm1, %v3030_v55, %v3936_v4 }
 0x5bc   : > { %v3940_v62 = vpop.permute.xlu1 %3939 }
 0x5bd   : > { %v3942_v31 = vunpack.i.h.bf16 %v3940_v62  ;;  %v3941_v21 = vunpack.i.l.bf16 %v3940_v62 }
 0x5bf   : > { %v3175_v42 = vsel %vm3171_vm5, %v3166_v51, %v3942_v31  ;;  %v3174_v17 = vsel %vm3171_vm5, %v3165_v22, %v3941_v21 }
 0x5c0   : > { %v3945_v54 = vpop.permute.xlu0 %3944  ;;  %v3181_v8 = vpack.c.bf16 %v3175_v42, %v3174_v17 }
 0x5c1   : > { %v3947_v24 = vunpack.i.h.bf16 %v3945_v54  ;;  %v3946_v37 = vunpack.i.l.bf16 %v3945_v54 }
 0x5c3   : > { %v3172_v12 = vsel %vm3171_vm5, %v3163_v39, %v3946_v37  ;;  %v3173_v60 = vsel %vm3171_vm5, %v3164_v11, %v3947_v24 }
 0x5c4   : > { %v3180_v56 = vpack.c.bf16 %v3173_v60, %v3172_v12  ;;  %v3950_v52 = vpop.permute.xlu0 %3949  ;;  %v3955_v36 = vpop.permute.xlu1 %3954 }
 0x5c5   : > { %v3952_v7 = vunpack.i.h.bf16 %v3950_v52  ;;  %v3951_v43 = vunpack.i.l.bf16 %v3950_v52  ;;  %v3957_v9 = vunpack.i.h.bf16 %v3955_v36  ;;  %v3956_v23 = vunpack.i.l.bf16 %v3955_v36 }
 0x5c6   : > { %3729 = vmatprep.mubr.msk.bf16.mxu1 %vm394_vm0, %v3180_v56 }
 0x5c7   : > { %3730 = vmatmul.mubr.msk.bf16.vlgmr.msra.gmra.mrb[40].mxu1 %vm394_vm0, %v3181_v8  ;;  %v3167_v48 = vsel %vm3162_vm4, %v3158_v25, %v3951_v43  ;;  %v3168_v3 = vsel %vm3162_vm4, %v3159_v49, %v3952_v7  ;;  %v3170_v26 = vsel %vm3162_vm4, %v3161_v30, %v3957_v9  ;;  %v3169_v33 = vsel %vm3162_vm4, %v3160_v20, %v3956_v23 }
 0x5c8   : > { %v3960_v1 = vpop.permute.xlu0 %3959 }
 0x5c9   : > { %v3962_v50 = vunpack.i.h.bf16 %v3960_v1  ;;  %v3961_v14 = vunpack.i.l.bf16 %v3960_v1 }
 0x5cb   : > { %v3176_v5 = vsel %vm3171_vm5, %v3167_v48, %v3961_v14  ;;  %v3177_v19 = vsel %vm3171_vm5, %v3168_v3, %v3962_v50 }
 0x5cc   : > { %v3182_v2 = vpack.c.bf16 %v3177_v19, %v3176_v5  ;;  %v3965_v45 = vpop.permute.xlu1 %3964 }
 0x5cd   : > { %v3967_v47 = vunpack.i.h.bf16 %v3965_v45  ;;  %v3966_v62 = vunpack.i.l.bf16 %v3965_v45 }
 0x5ce   : > { %3733 = vmatprep.mubr.msk.bf16.mxu1 %vm394_vm0, %v3182_v2 }
 0x5cf   : > { %v3179_v6 = vsel %vm3171_vm5, %v3170_v26, %v3967_v47  ;;  %v3178_v40 = vsel %vm3171_vm5, %v3169_v33, %v3966_v62 }
 0x5d0   : > { %v3183_v59 = vpack.c.bf16 %v3179_v6, %v3178_v40 }
 0x5d2   : > { %3734 = vmatmul.mubr.msk.bf16.gmra.mrb[44].mxu1 %vm394_vm0, %v3183_v59 }
 0x69a   : > { %v3731_v10 = vpop.f32.mrb[40].mxu1 }
 0x69b   : > { %v3262_v0 = vadd.f32 %v3731_v10, %v3461_v53  ;;  %v3253_v28 = vpop.f32.mrb[41].mxu1 }
 0x69c   : > { %v3254_v15 = vadd.f32 %v3461_v53, %v3253_v28  ;;  %v3732_v31 = vpop.f32.mrb[42].mxu1 }
 0x69d   : > { %3286 = vst.msk [vmem:[%s359_s19 + $0x10] sm:$0xff] %vm394_vm0, %v3262_v0  ;;  %v3265_v21 = vadd.f32 %v3732_v31, %v3461_v53  ;;  %v3256_v58 = vpop.f32.mrb[43].mxu1 }
 0x69e   : > { %3284 = vst.msk [vmem:[%s359_s19] sm:$0xff] %vm394_vm0, %v3254_v15  ;;  %v3257_v41 = vadd.f32 %v3461_v53, %v3256_v58 }
 0x69f   : > { %3287 = vst.msk [vmem:[%s359_s19 + $0x18] sm:$0xff] %vm394_vm0, %v3265_v21 }
 0x6a0   : > { %3285 = vst.msk [vmem:[%s359_s19 + $0x8] sm:$0xff] %vm394_vm0, %v3257_v41 }
 0x6a5   : > { %v3735_v16 = vpop.f32.mrb[44].mxu1 }
 0x6a6   : > { %v3278_v13 = vadd.f32 %v3735_v16, %v3461_v53  ;;  %v3269_v51 = vpop.f32.mrb[45].mxu1 }
 0x6a7   : > { %v3270_v22 = vadd.f32 %v3461_v53, %v3269_v51  ;;  %v3736_v54 = vpop.f32.mrb[46].mxu1 }
 0x6a8   : > { %3290 = vst.msk [vmem:[%s359_s19 + $0x30] sm:$0xff] %vm394_vm0, %v3278_v13  ;;  %v3281_v18 = vadd.f32 %v3736_v54, %v3461_v53  ;;  %v3272_v27 = vpop.f32.mrb[47].mxu1 }
 0x6a9   : > { %3288 = vst.msk [vmem:[%s359_s19 + $0x20] sm:$0xff] %vm394_vm0, %v3270_v22  ;;  %v3273_v24 = vadd.f32 %v3461_v53, %v3272_v27 }
 0x6aa   : > { %3291 = vst.msk [vmem:[%s359_s19 + $0x38] sm:$0xff] %vm394_vm0, %v3281_v18 }
 0x6ab   : > { %3289 = vst.msk [vmem:[%s359_s19 + $0x28] sm:$0xff] %vm394_vm0, %v3273_v24 }
 0x6ac PF: > { %s17_s26 = sadd.s32 1, %s4190_s26   ;;  %s5862_s24 = smov %s4186_s25 }
 0x6ad   : > { %p14_p5 = scmp.ge.s32.totalorder %s17_s26, 4   ;;  %s5863_s25 = smov %s5865_s27 }
 0x6af   :  { %16 = sbr.rel (!%p14_p5) target bundleno = 2 (0x2), region = 92 }

// kernel: tpu_custom_call.1
= control target key start
LH: loop header
LB: loop body
LE: loop exit
PB: predicated region body
PF: predicated region fallthrough
CT: control target
= control target key end

     0   :  { %s4241_s24 = smov 0   ;;  %s4243_s25 = smov 0   ;;  %s5668_s0 = inlined_call_operand.vmem [shape: f32[2,64,32], index: 0, kind: input, shape index: {}]   ;;  %s5669_s1 = inlined_call_operand.vmem [shape: f32[2,64,32], index: 1, kind: input, shape index: {}]   ;;  %s5670_s2 = inlined_call_operand.vmem [shape: bf16[32,32], index: 2, kind: input, shape index: {}]   ;;  %s5671_s3 = inlined_call_operand.vmem [shape: bf16[32,32], index: 3, kind: input, shape index: {}]   ;;  %s5672_s4 = inlined_call_operand.vmem [shape: bf16[32,32], index: 4, kind: input, shape index: {}]   ;;  %s5673_s5 = inlined_call_operand.vmem [shape: bf16[32,32], index: 5, kind: input, shape index: {}]   ;;  %s5674_s6 = inlined_call_operand.vmem [shape: f32[1,32], index: 6, kind: input, shape index: {}]   ;;  %s5675_s7 = inlined_call_operand.vmem [shape: f32[2,64,32], index: 7, kind: output, shape index: {}]  }
   0x1   :  { %s4245_s26 = smov 0  }
   0x2 LB: > { %s36_s27 = sadd.s32 1, %s4186_s25  ;;  %p3404_p0 = scmp.ge.s32.totalorder %s4190_s26, 1  ;;  %s4190_s26 = sphi %s4245_s26, %s17_s26   ;;  %s4186_s25 = sphi %s4243_s25, %s5863_s25   ;;  %s4182_s24 = sphi %s4241_s24, %s5862_s24  }
   0x3   : > { %p38_p1 = scmp.ge.s32.totalorder %s36_s27, 2  ;;  %p282_p2 = scmp.lt.s32.totalorder %s4190_s26, 3 }
   0x5   : > { %s5865_s27 = smov (%p38_p1, %s36_s27), 0  ;;  %p283_p3 = pnand %p3404_p0, %p282_p2 }
   0x7   : > { %286 = sbr.rel (%p283_p3) target bundleno = 1708 (0x6ac), region = 48 }
   0xe   : > { %v3968_v0 = vld [vmem:[%s5671_s3] sm:$0xff]   ;;  %p332_p4 = scmp.lt.s32.totalorder %s4182_s24, 1  ;;  %v3969_v1 = vld [vmem:[%s5671_s3 + $0x8] sm:$0xff]   ;;  %vm394_vm0 = vcmask 261120   ;;  %vm476_vm1 = vcmask 64512   ;;  %s4193_s28 = smov 112  }
   0xf   : > { %3573 = vmatprep.subr.bf16.mxu1 %v3968_v0  ;;  %v3970_v2 = vld [vmem:[%s5670_s2] sm:$0xff]   ;;  %v3971_v3 = vld [vmem:[%s5670_s2 + $0x8] sm:$0xff]   ;;  %s4194_s29 = smov 104   ;;  %vm1417_vm2 = vcmask 523264   ;;  %vm536_vm3 = vcmask 7168   ;;  %s4198_s30 = smov 8  }
  0x10   : > { %s5867_s24 = smov (!%p332_p4, %s4182_s24), 1  ;;  %3574 = vmatpush3.bf16.msra.mxu1 %v3968_v0  ;;  %3561 = vmatprep.subr.bf16.mxu0 %v3970_v2  ;;  %v3972_v4 = vld [vmem:[%s5672_s4] sm:$0xff]   ;;  %v3973_v19 = vld [vmem:[%s5672_s4 + $0x8] sm:$0xff]   ;;  %s4199_s8 = smov 16   ;;  %vm3162_vm4 = vcmask 130048   ;;  %vm3171_vm5 = vcmask 195584  }
  0x11   : > { %3575 = vmatprep.subr.bf16.mxu1 %v3969_v1  ;;  %s4271_s13 = sshll.u32 %s5867_s24, 6  ;;  %3562 = vmatpush3.bf16.msra.mxu0 %v3970_v2  ;;  %s4192_s24 = smov 120  }
  0x12   : > { %s349_s16 = scalar_lea.vmem %s5669_s1, %s4271_s13  ;;  %s4281_s19 = scalar_lea.vmem %s5668_s0, %s4271_s13  ;;  %3563 = vmatprep.subr.bf16.mxu0 %v3971_v3 }
  0x13   : > { %v633_v5 = vld [vmem:[%s349_s16] sm:$0xff]  ;;  %v634_v6 = vld [vmem:[%s349_s16 + $0x8] sm:$0xff]  ;;  %v635_v7 = vld [vmem:[%s349_s16 + $0x10] sm:$0xff]  ;;  %s4200_s14 = smov 24  }
  0x14   : > { %3576 = vmatpush3.bf16.msra.mxu1 %v3969_v1  ;;  %v641_v8 = vpack.c.bf16 %v634_v6, %v633_v5  ;;  %v636_v9 = vld [vmem:[%s349_s16 + $0x18] sm:$0xff]  ;;  %v366_v10 = vld [vmem:[%s4281_s19] sm:$0xff]  ;;  %v367_v11 = vld [vmem:[%s4281_s19 + $0x8] sm:$0xff] }
  0x15   : > { %v642_v12 = vpack.c.bf16 %v636_v9, %v635_v7  ;;  %v374_v13 = vpack.c.bf16 %v367_v11, %v366_v10  ;;  %v368_v14 = vld [vmem:[%s4281_s19 + $0x10] sm:$0xff]  ;;  %v369_v15 = vld [vmem:[%s4281_s19 + $0x18] sm:$0xff]  ;;  %v637_v16 = vld [vmem:[%s349_s16 + $0x20] sm:$0xff]  ;;  %3564 = vmatpush3.bf16.msra.mxu0 %v3971_v3 }
  0x16   : > { %3577 = vmatprep.mubr.msk.bf16.mxu1 %vm394_vm0, %v641_v8  ;;  %v375_v17 = vpack.c.bf16 %v369_v15, %v368_v14  ;;  %v638_v18 = vld [vmem:[%s349_s16 + $0x28] sm:$0xff]  ;;  %v639_v21 = vld [vmem:[%s349_s16 + $0x30] sm:$0xff]  ;;  %v370_v22 = vld [vmem:[%s4281_s19 + $0x20] sm:$0xff]  ;;  %3585 = vmatprep.subr.bf16.mxu0 %v3972_v4 }
  0x17   : > { %3578 = vmatmul.mubr.msk.bf16.vlgmr.msra.gmra.mrb[0].mxu1 %vm394_vm0, %v642_v12  ;;  %3565 = vmatprep.mubr.msk.bf16.mxu0 %vm394_vm0, %v374_v13  ;;  %v643_v20 = vpack.c.bf16 %v638_v18, %v637_v16  ;;  %v371_v23 = vld [vmem:[%s4281_s19 + $0x28] sm:$0xff]  ;;  %v640_v24 = vld [vmem:[%s349_s16 + $0x38] sm:$0xff]  ;;  %v372_v26 = vld [vmem:[%s4281_s19 + $0x30] sm:$0xff] }
  0x18   : > { %v376_v25 = vpack.c.bf16 %v371_v23, %v370_v22  ;;  %3566 = vmatmul.mubr.msk.bf16.vlgmr.msra.gmra.mrb[0].mxu0 %vm394_vm0, %v375_v17  ;;  %v373_v27 = vld [vmem:[%s4281_s19 + $0x38] sm:$0xff]  ;;  %v644_v28 = vpack.c.bf16 %v640_v24, %v639_v21  ;;  %s359_s19 = scalar_lea.vmem %s5675_s7, %s4271_s13 }
  0x19   : > { %3581 = vmatprep.mubr.msk.bf16.mxu1 %vm394_vm0, %v643_v20  ;;  %3586 = vmatpush3.bf16.msra.mxu0 %v3972_v4  ;;  %v377_v29 = vpack.c.bf16 %v373_v27, %v372_v26 }
  0x1a   : > { %3569 = vmatprep.mubr.msk.bf16.mxu0 %vm394_vm0, %v376_v25  ;;  %3587 = vmatprep.subr.bf16.mxu0 %v3973_v19 }
  0x1d   : > { %3588 = vmatpush3.bf16.msra.mxu0 %v3973_v19 }
  0x1f   : > { %3582 = vmatmul.mubr.msk.bf16.gmra.mrb[4].mxu1 %vm394_vm0, %v644_v28 }
  0x20   : > { %3570 = vmatmul.mubr.msk.bf16.gmra.mrb[4].mxu0 %vm394_vm0, %v377_v29 }
  0x21   : > { %3589 = vmatprep.mubr.msk.bf16.mxu0 %vm394_vm0, %v641_v8 }
  0x28   : > { %3590 = vmatmul.mubr.msk.bf16.vlgmr.msra.gmra.mrb[8].mxu0 %vm394_vm0, %v642_v12 }
  0x29   : > { %3593 = vmatprep.mubr.msk.bf16.mxu0 %vm394_vm0, %v643_v20 }
  0x30   : > { %3594 = vmatmul.mubr.msk.bf16.gmra.mrb[12].mxu0 %vm394_vm0, %v644_v28 }
  0xea   : > { %v3579_v30 = vpop.f32.mrb[0].mxu1 }
  0xeb   : > { %v708_v31 = vpop.f32.mrb[1].mxu1  ;;  %v3567_v33 = vpop.f32.mrb[0].mxu0 }
  0xec   : > { %v3580_v32 = vpop.f32.mrb[2].mxu1  ;;  %v441_v36 = vpop.f32.mrb[1].mxu0 }
  0xed   : > { %v901_v34 = vpack.c.bf16 %v3580_v32, %v3579_v30  ;;  %v711_v35 = vpop.f32.mrb[3].mxu1  ;;  %v3791_v37 = vpack.i.bf16 %v3580_v32, %v3579_v30  ;;  %v3568_v40 = vpop.f32.mrb[2].mxu0 }
  0xee   : > { %v900_v38 = vpack.c.bf16 %v711_v35, %v708_v31  ;;  %v3786_v39 = vpack.i.bf16 %v711_v35, %v708_v31  ;;  %v4309_v41 = vpack.c.bf16 %v3568_v40, %v3567_v33  ;;  %v444_v42 = vpop.f32.mrb[3].mxu0 }
  0xef   : > { %v472_v44 = vpack.c.bf16 %v444_v42, %v441_v36  ;;  %v1045_v58 = vsel %vm476_vm1, %v901_v34, 0 }
  0xf0   : > { %3787 = vrot.lane.b32.xlu0 %v3786_v39, %s4192_s24  ;;  %3737 = vmatprep.subr.msk.bf16.mxu1 %vm476_vm1, %v900_v38  ;;  %v1042_v43 = vsel %vm476_vm1, %v900_v38, 0  ;;  %478 = vst.msk [vmem:[#allocation2 + $0x8] sm:$0xff] %vm476_vm1, %v4309_v41 }
  0xf1   : > { %3598 = vmatpush3.bf16.xpose.msra.mxu1 %v1042_v43  ;;  %477 = vst.msk [vmem:[#allocation2] sm:$0xff] %vm476_vm1, %v472_v44 }
  0xf2   : > { %v3583_v45 = vpop.f32.mrb[4].mxu1  ;;  %3738 = vmatprep.subr.msk.bf16.mxu1 %vm476_vm1, %v901_v34 }
  0xf3   : > { %v724_v46 = vpop.f32.mrb[5].mxu1  ;;  %v3571_v48 = vpop.f32.mrb[4].mxu0 }
  0xf4   : > { %3792 = vrot.lane.b32.xlu0 %v3791_v37, %s4192_s24  ;;  %v3584_v47 = vpop.f32.mrb[6].mxu1  ;;  %v457_v52 = vpop.f32.mrb[5].mxu0 }
  0xf5   : > { %v903_v49 = vpack.c.bf16 %v3584_v47, %v3583_v45  ;;  %v727_v50 = vpop.f32.mrb[7].mxu1  ;;  %v3801_v51 = vpack.i.bf16 %v3584_v47, %v3583_v45  ;;  %v3572_v55 = vpop.f32.mrb[6].mxu0 }
  0xf6   : > { %v902_v53 = vpack.c.bf16 %v727_v50, %v724_v46  ;;  %v3796_v54 = vpack.i.bf16 %v727_v50, %v724_v46  ;;  %v475_v56 = vpack.c.bf16 %v3572_v55, %v3571_v48  ;;  %v460_v57 = vpop.f32.mrb[7].mxu0 }
  0xf7   : > { %v474_v59 = vpack.c.bf16 %v460_v57, %v457_v52  ;;  %v1051_v62 = vsel %vm476_vm1, %v903_v49, 0  ;;  %v1013_v0 = vld [vmem:[#allocation2 + $0x8] sm:$0xff] }
  0xf8   : > { %3797 = vrot.lane.b32.xlu1 %v3796_v54, %s4192_s24  ;;  %485 = vrot.lane.b32.xlu0 %v472_v44, %s4192_s24  ;;  %v1012_v60 = vld [vmem:[#allocation2] sm:$0xff]  ;;  %480 = vst.msk [vmem:[#allocation2 + $0x18] sm:$0xff] %vm476_vm1, %v475_v56  ;;  %v1048_v61 = vsel %vm476_vm1, %v902_v53, 0 }
  0xf9   : > { %3600 = vmatpush3.bf16.xpose.msra.mxu1 %v1045_v58  ;;  %3605 = vmatprep.mubr.msk.bf16.mxu1 %vm476_vm1, %v1012_v60  ;;  %479 = vst.msk [vmem:[#allocation2 + $0x10] sm:$0xff] %vm476_vm1, %v474_v59 }
  0xfa   : > { %3739 = vmatprep.subr.msk.bf16.mxu1 %vm476_vm1, %v902_v53 }
  0xfb   : > { %v3591_v2 = vpop.f32.mrb[8].mxu0 }
  0xfc   : > { %3802 = vrot.lane.b32.xlu1 %v3801_v51, %s4192_s24  ;;  %3807 = vrot.lane.b32.xlu0 %v3786_v39, %s4193_s28  ;;  %v789_v3 = vpop.f32.mrb[9].mxu0 }
  0xfd   : > { %v3592_v4 = vpop.f32.mrb[10].mxu0 }
  0xfe   : > { %v3846_v5 = vpack.i.bf16 %v3592_v4, %v3591_v2  ;;  %v792_v6 = vpop.f32.mrb[11].mxu0  ;;  %v4356_v7 = vpack.c.bf16 %v3592_v4, %v3591_v2 }
  0xff   : > { %v1015_v1 = vld [vmem:[#allocation2 + $0x18] sm:$0xff]  ;;  %v3861_v8 = vpack.i.bf16 %v792_v6, %v789_v3  ;;  %v4358_v10 = vpack.c.bf16 %v792_v6, %v789_v3 }
 0x100   : > { %487 = vrot.lane.b32.xlu1 %v4309_v41, %s4192_s24  ;;  %3817 = vrot.lane.b32.xlu0 %v3791_v37, %s4193_s28  ;;  %v1014_v63 = vld [vmem:[#allocation2 + $0x10] sm:$0xff] }
 0x101   : > { %3602 = vmatpush3.bf16.xpose.msra.mxu1 %v1048_v61 }
 0x102   : > { %3740 = vmatprep.subr.msk.bf16.mxu1 %vm476_vm1, %v903_v49 }
 0x103   : > { %v3595_v9 = vpop.f32.mrb[12].mxu0 }
 0x104   : > { %3812 = vrot.lane.b32.xlu1 %v3786_v39, %s4194_s29  ;;  %3827 = vrot.lane.b32.xlu0 %v3801_v51, %s4193_s28  ;;  %v805_v11 = vpop.f32.mrb[13].mxu0 }
 0x105   : > { %v3596_v12 = vpop.f32.mrb[14].mxu0 }
 0x106   : > { %v3876_v13 = vpack.i.bf16 %v3596_v12, %v3595_v9  ;;  %v808_v14 = vpop.f32.mrb[15].mxu0  ;;  %v4362_v15 = vpack.c.bf16 %v3596_v12, %v3595_v9 }
 0x107   : > { %v3891_v16 = vpack.i.bf16 %v808_v14, %v805_v11  ;;  %v4364_v17 = vpack.c.bf16 %v808_v14, %v805_v11 }
 0x108   : > { %3822 = vrot.lane.b32.xlu1 %v3791_v37, %s4194_s29  ;;  %3832 = vrot.lane.b32.xlu0 %v3796_v54, %s4193_s28 }
 0x109   : > { %3604 = vmatpush3.bf16.xpose.msra.mxu1 %v1051_v62 }
 0x10c   : > { %502 = vrot.lane.b32.xlu1 %v472_v44, %s4193_s28  ;;  %489 = vrot.lane.b32.xlu0 %v474_v59, %s4192_s24 }
 0x110   : > { %3837 = vrot.lane.b32.xlu1 %v3796_v54, %s4194_s29  ;;  %3606 = vmatmul.mubr.msk.bf16.vlgmr.msra.gmra.mrb[8].mxu1 %vm476_vm1, %v1013_v0 }
 0x111   : > { %3842 = vrot.lane.b32.xlu0 %v3801_v51, %s4194_s29  ;;  %3609 = vmatprep.mubr.msk.bf16.mxu1 %vm476_vm1, %v1014_v63 }
 0x114   : > { %491 = vrot.lane.b32.xlu1 %v475_v56, %s4192_s24 }
 0x115   : > { %519 = vrot.lane.b32.xlu0 %v472_v44, %s4194_s29 }
 0x118   : > { %504 = vrot.lane.b32.xlu1 %v4309_v41, %s4193_s28  ;;  %3610 = vmatmul.mubr.msk.bf16.gmra.mrb[12].mxu1 %vm476_vm1, %v1015_v1 }
 0x119   : > { %506 = vrot.lane.b32.xlu0 %v474_v59, %s4193_s28 }
 0x11c   : > { %521 = vrot.lane.b32.xlu1 %v4309_v41, %s4194_s29 }
 0x11d   : > { %523 = vrot.lane.b32.xlu0 %v474_v59, %s4194_s29 }
 0x120   : > { %508 = vrot.lane.b32.xlu1 %v475_v56, %s4193_s28 }
 0x121   : > { %3852 = vrot.lane.b32.xlu0 %v3846_v5, %s4193_s28 }
 0x124   : > { %525 = vrot.lane.b32.xlu1 %v475_v56, %s4194_s29 }
 0x125   : > { %3867 = vrot.lane.b32.xlu0 %v3861_v8, %s4193_s28 }
 0x128   : > { %3847 = vrot.lane.b32.xlu1 %v3846_v5, %s4192_s24 }
 0x129   : > { %3882 = vrot.lane.b32.xlu0 %v3876_v13, %s4193_s28 }
 0x12c   : > { %3857 = vrot.lane.b32.xlu1 %v3846_v5, %s4194_s29 }
 0x12d   : > { %3892 = vrot.lane.b32.xlu0 %v3891_v16, %s4192_s24 }
 0x130   : > { %3862 = vrot.lane.b32.xlu1 %v3861_v8, %s4192_s24 }
 0x131   : > { %3897 = vrot.lane.b32.xlu0 %v3891_v16, %s4193_s28 }
 0x134   : > { %3872 = vrot.lane.b32.xlu1 %v3861_v8, %s4194_s29 }
 0x138   : > { %3877 = vrot.lane.b32.xlu1 %v3876_v13, %s4192_s24 }
 0x13c   : > { %3887 = vrot.lane.b32.xlu1 %v3876_v13, %s4194_s29 }
 0x140   : > { %3902 = vrot.lane.b32.xlu1 %v3891_v16, %s4194_s29 }
 0x162   : > { %v3788_v18 = vpop.permute.xlu0 %3787 }
 0x163   : > { %v3790_v19 = vunpack.i.h.bf16 %v3788_v18  ;;  %v3789_v20 = vunpack.i.l.bf16 %v3788_v18 }
 0x165   : > { %v904_v21 = vpack.c.bf16 %v3790_v19, %v3789_v20 }
 0x166   : > { %v3793_v22 = vpop.permute.xlu0 %3792 }
 0x167   : > { %v3795_v23 = vunpack.i.h.bf16 %v3793_v22  ;;  %v3794_v24 = vunpack.i.l.bf16 %v3793_v22  ;;  %3741 = vmatprep.subr.msk.bf16.mxu0 %vm476_vm1, %v904_v21  ;;  %v1131_v25 = vsel %vm476_vm1, %v904_v21, 0 }
 0x168   : > { %3614 = vmatpush3.bf16.xpose.msra.mxu0 %v1131_v25 }
 0x169   : > { %v905_v26 = vpack.c.bf16 %v3795_v23, %v3794_v24 }
 0x16a   : > { %v3798_v27 = vpop.permute.xlu1 %3797  ;;  %v486_v28 = vpop.permute.xlu0 %485 }
 0x16b   : > { %v3800_v29 = vunpack.i.h.bf16 %v3798_v27  ;;  %v3799_v30 = vunpack.i.l.bf16 %v3798_v27  ;;  %498 = vst.msk [vmem:[#allocation2 + $0x20] sm:$0xff] %vm476_vm1, %v486_v28  ;;  %3742 = vmatprep.subr.msk.bf16.mxu0 %vm476_vm1, %v905_v26  ;;  %v1134_v36 = vsel %vm476_vm1, %v905_v26, 0 }
 0x16d   : > { %v906_v33 = vpack.c.bf16 %v3800_v29, %v3799_v30 }
 0x16e   : > { %v3803_v31 = vpop.permute.xlu1 %3802  ;;  %v3808_v32 = vpop.permute.xlu0 %3807 }
 0x16f   : > { %v3810_v34 = vunpack.i.h.bf16 %v3808_v32  ;;  %v3809_v35 = vunpack.i.l.bf16 %v3808_v32  ;;  %v3805_v38 = vunpack.i.h.bf16 %v3803_v31  ;;  %v3804_v42 = vunpack.i.l.bf16 %v3803_v31 }
 0x170   : > { %3616 = vmatpush3.bf16.xpose.msra.mxu0 %v1134_v36  ;;  %v1137_v50 = vsel %vm476_vm1, %v906_v33, 0 }
 0x171   : > { %v908_v37 = vpack.c.bf16 %v3810_v34, %v3809_v35  ;;  %3743 = vmatprep.subr.msk.bf16.mxu0 %vm476_vm1, %v906_v33  ;;  %v907_v49 = vpack.c.bf16 %v3805_v38, %v3804_v42 }
 0x172   : > { %v488_v39 = vpop.permute.xlu1 %487  ;;  %v3818_v40 = vpop.permute.xlu0 %3817  ;;  %v1016_v41 = vld [vmem:[#allocation2 + $0x20] sm:$0xff] }
 0x173   : > { %499 = vst.msk [vmem:[#allocation2 + $0x28] sm:$0xff] %vm476_vm1, %v488_v39  ;;  %v3820_v43 = vunpack.i.h.bf16 %v3818_v40  ;;  %v3819_v44 = vunpack.i.l.bf16 %v3818_v40  ;;  %3621 = vmatprep.mubr.msk.bf16.mxu0 %vm476_vm1, %v1016_v41  ;;  %3745 = vmatprep.subr.msk.bf16.mxu1 %vm476_vm1, %v908_v37  ;;  %v1220_v45 = vsel %vm476_vm1, %v908_v37, 0  ;;  %v1140_v0 = vsel %vm476_vm1, %v907_v49, 0 }
 0x174   : > { %3630 = vmatpush3.bf16.xpose.msra.mxu1 %v1220_v45 }
 0x175   : > { %v909_v46 = vpack.c.bf16 %v3820_v43, %v3819_v44 }
 0x176   : > { %v3813_v47 = vpop.permute.xlu1 %3812  ;;  %v3828_v48 = vpop.permute.xlu0 %3827 }
 0x177   : > { %3746 = vmatprep.subr.msk.bf16.mxu1 %vm476_vm1, %v909_v46  ;;  %v3815_v51 = vunpack.i.h.bf16 %v3813_v47  ;;  %v3814_v54 = vunpack.i.l.bf16 %v3813_v47  ;;  %v1223_v57 = vsel %vm476_vm1, %v909_v46, 0  ;;  %v3830_v62 = vunpack.i.h.bf16 %v3828_v48 }
 0x178   : > { %3618 = vmatpush3.bf16.xpose.msra.mxu0 %v1137_v50  ;;  %v3829_v63 = vunpack.i.l.bf16 %v3828_v48 }
 0x179   : > { %3744 = vmatprep.subr.msk.bf16.mxu0 %vm476_vm1, %v907_v49  ;;  %v912_v61 = vpack.c.bf16 %v3815_v51, %v3814_v54 }
 0x17a   : > { %v3823_v52 = vpop.permute.xlu1 %3822  ;;  %v3833_v53 = vpop.permute.xlu0 %3832  ;;  %v911_v2 = vpack.c.bf16 %v3830_v62, %v3829_v63  ;;  %v1017_v9 = vld [vmem:[#allocation2 + $0x28] sm:$0xff] }
 0x17b   : > { %v3835_v55 = vunpack.i.h.bf16 %v3833_v53  ;;  %v3834_v56 = vunpack.i.l.bf16 %v3833_v53  ;;  %v3825_v3 = vunpack.i.h.bf16 %v3823_v52  ;;  %v3824_v4 = vunpack.i.l.bf16 %v3823_v52 }
 0x17c   : > { %3632 = vmatpush3.bf16.xpose.msra.mxu1 %v1223_v57  ;;  %v1309_v16 = vsel %vm476_vm1, %v912_v61, 0  ;;  %v1229_v22 = vsel %vm476_vm1, %v911_v2, 0 }
 0x17d   : > { %v910_v58 = vpack.c.bf16 %v3835_v55, %v3834_v56  ;;  %v913_v13 = vpack.c.bf16 %v3825_v3, %v3824_v4 }
 0x17e   : > { %v503_v59 = vpop.permute.xlu1 %502  ;;  %v490_v60 = vpop.permute.xlu0 %489 }
 0x17f   : > { %515 = vst.msk [vmem:[#allocation2 + $0x40] sm:$0xff] %vm476_vm1, %v503_v59  ;;  %500 = vst.msk [vmem:[#allocation2 + $0x30] sm:$0xff] %vm476_vm1, %v490_v60  ;;  %3747 = vmatprep.subr.msk.bf16.mxu1 %vm476_vm1, %v910_v58  ;;  %v1226_v6 = vsel %vm476_vm1, %v910_v58, 0  ;;  %v1312_v27 = vsel %vm476_vm1, %v913_v13, 0 }
 0x180   : > { %3620 = vmatpush3.bf16.xpose.msra.mxu0 %v1140_v0 }
 0x181   : > { %3749 = vmatprep.subr.msk.bf16.mxu0 %vm476_vm1, %v912_v61 }
 0x182   : > { %v3838_v1 = vpop.permute.xlu1 %3837 }
 0x183   : > { %v3843_v5 = vpop.permute.xlu0 %3842  ;;  %v3840_v19 = vunpack.i.h.bf16 %v3838_v1  ;;  %v3839_v20 = vunpack.i.l.bf16 %v3838_v1 }
 0x184   : > { %3634 = vmatpush3.bf16.xpose.msra.mxu1 %v1226_v6  ;;  %v3845_v31 = vunpack.i.h.bf16 %v3843_v5  ;;  %v3844_v32 = vunpack.i.l.bf16 %v3843_v5 }
 0x185   : > { %3748 = vmatprep.subr.msk.bf16.mxu1 %vm476_vm1, %v911_v2  ;;  %v914_v25 = vpack.c.bf16 %v3840_v19, %v3839_v20 }
 0x186   : > { %v492_v8 = vpop.permute.xlu1 %491  ;;  %v1020_v11 = vld [vmem:[#allocation2 + $0x40] sm:$0xff]  ;;  %v1018_v12 = vld [vmem:[#allocation2 + $0x30] sm:$0xff]  ;;  %v915_v35 = vpack.c.bf16 %v3845_v31, %v3844_v32 }
 0x187   : > { %501 = vst.msk [vmem:[#allocation2 + $0x38] sm:$0xff] %vm476_vm1, %v492_v8  ;;  %v520_v14 = vpop.permute.xlu0 %519  ;;  %3622 = vmatmul.mubr.msk.bf16.vlgmr.msra.gmra.mrb[16].mxu0 %vm476_vm1, %v1017_v9  ;;  %3637 = vmatprep.mubr.msk.bf16.mxu1 %vm476_vm1, %v1020_v11  ;;  %v1315_v36 = vsel %vm476_vm1, %v914_v25, 0 }
 0x188   : > { %532 = vst.msk [vmem:[#allocation2 + $0x60] sm:$0xff] %vm476_vm1, %v520_v14  ;;  %3646 = vmatpush3.bf16.xpose.msra.mxu0 %v1309_v16  ;;  %3625 = vmatprep.mubr.msk.bf16.mxu0 %vm476_vm1, %v1018_v12  ;;  %v1318_v38 = vsel %vm476_vm1, %v915_v35, 0  ;;  %v4195_v14 = vmov -inf  }
 0x189   : > { %3750 = vmatprep.subr.msk.bf16.mxu0 %vm476_vm1, %v913_v13  ;;  %539 = vst.msk [vmem:[#allocation3 + $0x10] sm:$0xff] %vm536_vm3, %v4195_v14  ;;  %537 = vst.msk [vmem:[#allocation3] sm:$0xff] %vm536_vm3, %v4195_v14 }
 0x18a   : > { %v505_v18 = vpop.permute.xlu1 %504  ;;  %538 = vst.msk [vmem:[#allocation3 + $0x8] sm:$0xff] %vm536_vm3, %v4195_v14  ;;  %540 = vst.msk [vmem:[#allocation3 + $0x18] sm:$0xff] %vm536_vm3, %v4195_v14 }
 0x18b   : > { %516 = vst.msk [vmem:[#allocation2 + $0x48] sm:$0xff] %vm476_vm1, %v505_v18  ;;  %v507_v21 = vpop.permute.xlu0 %506 }
 0x18c   : > { %517 = vst.msk [vmem:[#allocation2 + $0x50] sm:$0xff] %vm476_vm1, %v507_v21  ;;  %3636 = vmatpush3.bf16.xpose.msra.mxu1 %v1229_v22  ;;  %v4196_v22 = vmov 0.0  }
 0x18d   : > { %3661 = vmatprep.subr.bf16.mxu1 %v4358_v10  ;;  %541 = vst.msk [vmem:[#allocation3 + $0x20] sm:$0xff] %vm536_vm3, %v4195_v14  ;;  %542 = vst.msk [vmem:[#allocation3 + $0x28] sm:$0xff] %vm536_vm3, %v4195_v14 }
 0x18e   : > { %v522_v23 = vpop.permute.xlu1 %521  ;;  %v1019_v24 = vld [vmem:[#allocation2 + $0x38] sm:$0xff]  ;;  %543 = vst.msk [vmem:[#allocation3 + $0x30] sm:$0xff] %vm536_vm3, %v4195_v14  ;;  %544 = vst.msk [vmem:[#allocation3 + $0x38] sm:$0xff] %vm536_vm3, %v4195_v14 }
 0x18f   : > { %533 = vst.msk [vmem:[#allocation2 + $0x68] sm:$0xff] %vm476_vm1, %v522_v23  ;;  %v524_v26 = vpop.permute.xlu0 %523  ;;  %3626 = vmatmul.mubr.msk.bf16.gmra.mrb[20].mxu0 %vm476_vm1, %v1019_v24  ;;  %v1024_v28 = vld [vmem:[#allocation2 + $0x60] sm:$0xff]  ;;  %601 = vst.msk [vmem:[#allocation5] sm:$0xff] %vm476_vm1, %v4196_v22  ;;  %v4197_v23 = vmov 0  }
 0x190   : > { %534 = vst.msk [vmem:[#allocation2 + $0x70] sm:$0xff] %vm476_vm1, %v524_v26  ;;  %3648 = vmatpush3.bf16.xpose.msra.mxu0 %v1312_v27  ;;  %3653 = vmatprep.mubr.msk.bf16.mxu0 %vm476_vm1, %v1024_v28  ;;  %602 = vst.msk [vmem:[#allocation5 + $0x8] sm:$0xff] %vm476_vm1, %v4196_v22 }
 0x191   : > { %3751 = vmatprep.subr.msk.bf16.mxu0 %vm476_vm1, %v914_v25  ;;  %545 = vst.msk [vmem:[#allocation3 + $0x40] sm:$0xff] %vm536_vm3, %v4195_v14  ;;  %546 = vst.msk [vmem:[#allocation3 + $0x48] sm:$0xff] %vm536_vm3, %v4195_v14  ;;  %3906 = vset.pattern.permute.xlu1 %v4197_v23 }
 0x192   : > { %v509_v29 = vpop.permute.xlu1 %508  ;;  %v1021_v30 = vld [vmem:[#allocation2 + $0x48] sm:$0xff]  ;;  %547 = vst.msk [vmem:[#allocation3 + $0x50] sm:$0xff] %vm536_vm3, %v4195_v14  ;;  %548 = vst.msk [vmem:[#allocation3 + $0x58] sm:$0xff] %vm536_vm3, %v4195_v14  ;;  %3907 = vset.pattern.permute.xlu0 %v4197_v23 }
 0x193   : > { %518 = vst.msk [vmem:[#allocation2 + $0x58] sm:$0xff] %vm476_vm1, %v509_v29  ;;  %3638 = vmatmul.mubr.msk.bf16.vlgmr.msra.gmra.mrb[16].mxu1 %vm476_vm1, %v1021_v30  ;;  %v1022_v33 = vld [vmem:[#allocation2 + $0x50] sm:$0xff]  ;;  %603 = vst.msk [vmem:[#allocation5 + $0x10] sm:$0xff] %vm476_vm1, %v4196_v22 }
 0x194   : > { %3641 = vmatprep.mubr.msk.bf16.mxu1 %vm476_vm1, %v1022_v33  ;;  %3662 = vmatpush3.bf16.msra.mxu1 %v4358_v10  ;;  %549 = vst.msk [vmem:[#allocation3 + $0x60] sm:$0xff] %vm536_vm3, %v4195_v14  ;;  %550 = vst.msk [vmem:[#allocation3 + $0x68] sm:$0xff] %vm536_vm3, %v4195_v14 }
 0x195   : > { %3663 = vmatprep.subr.bf16.mxu1 %v4356_v7  ;;  %551 = vst.msk [vmem:[#allocation3 + $0x70] sm:$0xff] %vm536_vm3, %v4195_v14  ;;  %552 = vst.msk [vmem:[#allocation3 + $0x78] sm:$0xff] %vm536_vm3, %v4195_v14 }
 0x196   : > { %v526_v34 = vpop.permute.xlu1 %525  ;;  %v1025_v40 = vld [vmem:[#allocation2 + $0x68] sm:$0xff]  ;;  %553 = vst.msk [vmem:[#allocation3 + $0x80] sm:$0xff] %vm536_vm3, %v4195_v14  ;;  %554 = vst.msk [vmem:[#allocation3 + $0x88] sm:$0xff] %vm536_vm3, %v4195_v14 }
 0x197   : > { %535 = vst.msk [vmem:[#allocation2 + $0x78] sm:$0xff] %vm476_vm1, %v526_v34  ;;  %v1026_v43 = vld [vmem:[#allocation2 + $0x70] sm:$0xff]  ;;  %604 = vst.msk [vmem:[#allocation5 + $0x18] sm:$0xff] %vm476_vm1, %v4196_v22 }
 0x198   : > { %3650 = vmatpush3.bf16.xpose.msra.mxu0 %v1315_v36  ;;  %3664 = vmatpush3.bf16.msra.mxu1 %v4356_v7  ;;  %v4430_v7 = vpop.permute.xlu0 %3852  ;;  %555 = vst.msk [vmem:[#allocation3 + $0x90] sm:$0xff] %vm536_vm3, %v4195_v14  ;;  %556 = vst.msk [vmem:[#allocation3 + $0x98] sm:$0xff] %vm536_vm3, %v4195_v14 }
 0x199   : > { %3752 = vmatprep.subr.msk.bf16.mxu0 %vm476_vm1, %v915_v35  ;;  %3665 = vmatprep.subr.bf16.mxu1 %v4364_v17  ;;  %557 = vst.msk [vmem:[#allocation3 + $0xa0] sm:$0xff] %vm536_vm3, %v4195_v14  ;;  %558 = vst.msk [vmem:[#allocation3 + $0xa8] sm:$0xff] %vm536_vm3, %v4195_v14 }
 0x19a   : > { %v1023_v37 = vld [vmem:[#allocation2 + $0x58] sm:$0xff]  ;;  %v3848_v10 = vpop.permute.xlu1 %3847  ;;  %559 = vst.msk [vmem:[#allocation3 + $0xb0] sm:$0xff] %vm536_vm3, %v4195_v14  ;;  %560 = vst.msk [vmem:[#allocation3 + $0xb8] sm:$0xff] %vm536_vm3, %v4195_v14 }
 0x19b   : > { %3642 = vmatmul.mubr.msk.bf16.gmra.mrb[20].mxu1 %vm476_vm1, %v1023_v37  ;;  %v3850_v41 = vunpack.i.h.bf16 %v3848_v10  ;;  %v3849_v42 = vunpack.i.l.bf16 %v3848_v10  ;;  %561 = vst.msk [vmem:[#allocation3 + $0xc0] sm:$0xff] %vm536_vm3, %v4195_v14  ;;  %562 = vst.msk [vmem:[#allocation3 + $0xc8] sm:$0xff] %vm536_vm3, %v4195_v14 }
 0x19c   : > { %3666 = vmatpush3.bf16.msra.mxu1 %v4364_v17  ;;  %v3868_v17 = vpop.permute.xlu0 %3867  ;;  %563 = vst.msk [vmem:[#allocation3 + $0xd0] sm:$0xff] %vm536_vm3, %v4195_v14  ;;  %564 = vst.msk [vmem:[#allocation3 + $0xd8] sm:$0xff] %vm536_vm3, %v4195_v14 }
 0x19d   : > { %3667 = vmatprep.subr.bf16.mxu1 %v4362_v15  ;;  %v3870_v47 = vunpack.i.h.bf16 %v3868_v17  ;;  %v3869_v48 = vunpack.i.l.bf16 %v3868_v17  ;;  %565 = vst.msk [vmem:[#allocation3 + $0xe0] sm:$0xff] %vm536_vm3, %v4195_v14  ;;  %566 = vst.msk [vmem:[#allocation3 + $0xe8] sm:$0xff] %vm536_vm3, %v4195_v14 }
 0x19e   : > { %v4428_v39 = vpop.permute.xlu1 %3857  ;;  %v1027_v53 = vld [vmem:[#allocation2 + $0x78] sm:$0xff]  ;;  %567 = vst.msk [vmem:[#allocation3 + $0xf0] sm:$0xff] %vm536_vm3, %v4195_v14  ;;  %568 = vst.msk [vmem:[#allocation3 + $0xf8] sm:$0xff] %vm536_vm3, %v4195_v14 }
 0x19f   : > { %v4434_v50 = vpack.c.bf16 %v3870_v47, %v3869_v48  ;;  %570 = vst.msk [vmem:[#allocation4 + $0x8] sm:$0xff] %vm536_vm3, %v4196_v22  ;;  %569 = vst.msk [vmem:[#allocation4] sm:$0xff] %vm536_vm3, %v4196_v22  ;;  %v4683_v47 = vld [vmem:[#allocation3 + $0x10] sm:$0xff] }
 0x1a0   : > { %3652 = vmatpush3.bf16.xpose.msra.mxu0 %v1318_v38  ;;  %3668 = vmatpush3.bf16.msra.mxu1 %v4362_v15  ;;  %v1001_v15 = vpack.c.bf16 %v3850_v41, %v3849_v42  ;;  %v4436_v51 = vpop.permute.xlu0 %3882  ;;  %571 = vst.msk [vmem:[#allocation4 + $0x10] sm:$0xff] %vm536_vm3, %v4196_v22  ;;  %572 = vst.msk [vmem:[#allocation4 + $0x18] sm:$0xff] %vm536_vm3, %v4196_v22 }
 0x1a1   : > { %3693 = vmatprep.subr.bf16.mxu1 %v4434_v50  ;;  %573 = vst.msk [vmem:[#allocation4 + $0x20] sm:$0xff] %vm536_vm3, %v4196_v22  ;;  %574 = vst.msk [vmem:[#allocation4 + $0x28] sm:$0xff] %vm536_vm3, %v4196_v22 }
 0x1a2   : > { %v3863_v44 = vpop.permute.xlu1 %3862  ;;  %575 = vst.msk [vmem:[#allocation4 + $0x30] sm:$0xff] %vm536_vm3, %v4196_v22  ;;  %576 = vst.msk [vmem:[#allocation4 + $0x38] sm:$0xff] %vm536_vm3, %v4196_v22 }
 0x1a3   : > { %v3865_v45 = vunpack.i.h.bf16 %v3863_v44  ;;  %v3864_v46 = vunpack.i.l.bf16 %v3863_v44  ;;  %577 = vst.msk [vmem:[#allocation4 + $0x40] sm:$0xff] %vm536_vm3, %v4196_v22  ;;  %578 = vst.msk [vmem:[#allocation4 + $0x48] sm:$0xff] %vm536_vm3, %v4196_v22 }
 0x1a4   : > { %v3893_v54 = vpop.permute.xlu0 %3892  ;;  %579 = vst.msk [vmem:[#allocation4 + $0x50] sm:$0xff] %vm536_vm3, %v4196_v22  ;;  %580 = vst.msk [vmem:[#allocation4 + $0x58] sm:$0xff] %vm536_vm3, %v4196_v22 }
 0x1a5   : > { %v1000_v49 = vpack.c.bf16 %v3865_v45, %v3864_v46  ;;  %v3895_v56 = vunpack.i.h.bf16 %v3893_v54  ;;  %v3894_v57 = vunpack.i.l.bf16 %v3893_v54  ;;  %581 = vst.msk [vmem:[#allocation4 + $0x60] sm:$0xff] %vm536_vm3, %v4196_v22  ;;  %582 = vst.msk [vmem:[#allocation4 + $0x68] sm:$0xff] %vm536_vm3, %v4196_v22 }
 0x1a6   : > { %v3873_v52 = vpop.permute.xlu1 %3872  ;;  %583 = vst.msk [vmem:[#allocation4 + $0x70] sm:$0xff] %vm536_vm3, %v4196_v22  ;;  %584 = vst.msk [vmem:[#allocation4 + $0x78] sm:$0xff] %vm536_vm3, %v4196_v22 }
 0x1a7   : > { %3654 = vmatmul.mubr.msk.bf16.vlgmr.msra.gmra.mrb[24].mxu0 %vm476_vm1, %v1025_v40  ;;  %3677 = vmatprep.subr.bf16.mxu0 %v1000_v49  ;;  %v3875_v60 = vunpack.i.h.bf16 %v3873_v52  ;;  %v3874_v61 = vunpack.i.l.bf16 %v3873_v52  ;;  %v1002_v62 = vpack.c.bf16 %v3895_v56, %v3894_v57  ;;  %585 = vst.msk [vmem:[#allocation4 + $0x80] sm:$0xff] %vm536_vm3, %v4196_v22  ;;  %586 = vst.msk [vmem:[#allocation4 + $0x88] sm:$0xff] %vm536_vm3, %v4196_v22  ;;  %v4698_v56 = vld [vmem:[#allocation3] sm:$0xff] }
 0x1a8   : > { %3657 = vmatprep.mubr.msk.bf16.mxu0 %vm476_vm1, %v1026_v43  ;;  %3678 = vmatpush3.bf16.msra.mxu0 %v1000_v49  ;;  %587 = vst.msk [vmem:[#allocation4 + $0x90] sm:$0xff] %vm536_vm3, %v4196_v22  ;;  %588 = vst.msk [vmem:[#allocation4 + $0x98] sm:$0xff] %vm536_vm3, %v4196_v22  ;;  %v4673_v43 = vpop.permute.xlu0 %3897 }
 0x1a9   : > { %3679 = vmatprep.subr.bf16.mxu0 %v1001_v15  ;;  %v4440_v0 = vpack.c.bf16 %v3875_v60, %v3874_v61  ;;  %589 = vst.msk [vmem:[#allocation4 + $0xa0] sm:$0xff] %vm536_vm3, %v4196_v22  ;;  %590 = vst.msk [vmem:[#allocation4 + $0xa8] sm:$0xff] %vm536_vm3, %v4196_v22 }
 0x1aa   : > { %v3878_v55 = vpop.permute.xlu1 %3877  ;;  %591 = vst.msk [vmem:[#allocation4 + $0xb0] sm:$0xff] %vm536_vm3, %v4196_v22  ;;  %592 = vst.msk [vmem:[#allocation4 + $0xb8] sm:$0xff] %vm536_vm3, %v4196_v22 }
 0x1ab   : > { %v3880_v58 = vunpack.i.h.bf16 %v3878_v55  ;;  %v3879_v59 = vunpack.i.l.bf16 %v3878_v55  ;;  %593 = vst.msk [vmem:[#allocation4 + $0xc0] sm:$0xff] %vm536_vm3, %v4196_v22  ;;  %594 = vst.msk [vmem:[#allocation4 + $0xc8] sm:$0xff] %vm536_vm3, %v4196_v22  ;;  %v4696_v55 = vld [vmem:[#allocation3 + $0x8] sm:$0xff] }
 0x1ac   : > { %3680 = vmatpush3.bf16.msra.mxu0 %v1001_v15  ;;  %595 = vst.msk [vmem:[#allocation4 + $0xd0] sm:$0xff] %vm536_vm3, %v4196_v22  ;;  %596 = vst.msk [vmem:[#allocation4 + $0xd8] sm:$0xff] %vm536_vm3, %v4196_v22 }
 0x1ad   : > { %v1003_v63 = vpack.c.bf16 %v3880_v58, %v3879_v59  ;;  %3681 = vmatprep.subr.bf16.mxu0 %v1002_v62  ;;  %597 = vst.msk [vmem:[#allocation4 + $0xe0] sm:$0xff] %vm536_vm3, %v4196_v22  ;;  %598 = vst.msk [vmem:[#allocation4 + $0xe8] sm:$0xff] %vm536_vm3, %v4196_v22 }
 0x1ae   : > { %599 = vst.msk [vmem:[#allocation4 + $0xf0] sm:$0xff] %vm536_vm3, %v4196_v22  ;;  %600 = vst.msk [vmem:[#allocation4 + $0xf8] sm:$0xff] %vm536_vm3, %v4196_v22  ;;  %v4667_v40 = vpop.permute.xlu1 %3887 }
 0x1af   : > { %3658 = vmatmul.mubr.msk.bf16.gmra.mrb[28].mxu0 %vm476_vm1, %v1027_v53  ;;  %605 = vst.msk [vmem:[#allocation5 + $0x20] sm:$0xff] %vm476_vm1, %v4196_v22  ;;  %606 = vst.msk [vmem:[#allocation5 + $0x28] sm:$0xff] %vm476_vm1, %v4196_v22 }
 0x1b0   : > { %3682 = vmatpush3.bf16.msra.mxu0 %v1002_v62  ;;  %607 = vst.msk [vmem:[#allocation5 + $0x30] sm:$0xff] %vm476_vm1, %v4196_v22  ;;  %608 = vst.msk [vmem:[#allocation5 + $0x38] sm:$0xff] %vm476_vm1, %v4196_v22 }
 0x1b1   : > { %3683 = vmatprep.subr.bf16.mxu0 %v1003_v63  ;;  %609 = vst.msk [vmem:[#allocation5 + $0x40] sm:$0xff] %vm476_vm1, %v4196_v22  ;;  %610 = vst.msk [vmem:[#allocation5 + $0x48] sm:$0xff] %vm476_vm1, %v4196_v22 }
 0x1b2   : > { %611 = vst.msk [vmem:[#allocation5 + $0x50] sm:$0xff] %vm476_vm1, %v4196_v22  ;;  %612 = vst.msk [vmem:[#allocation5 + $0x58] sm:$0xff] %vm476_vm1, %v4196_v22  ;;  %v4685_v48 = vpop.permute.xlu1 %3902 }
 0x1b3   : > { %613 = vst.msk [vmem:[#allocation5 + $0x60] sm:$0xff] %vm476_vm1, %v4196_v22  ;;  %614 = vst.msk [vmem:[#allocation5 + $0x68] sm:$0xff] %vm476_vm1, %v4196_v22 }
 0x1b4   : > { %3684 = vmatpush3.bf16.msra.mxu0 %v1003_v63  ;;  %615 = vst.msk [vmem:[#allocation5 + $0x70] sm:$0xff] %vm476_vm1, %v4196_v22  ;;  %616 = vst.msk [vmem:[#allocation5 + $0x78] sm:$0xff] %vm476_vm1, %v4196_v22 }
 0x1b5   : > { %3709 = vmatprep.subr.bf16.mxu0 %v4440_v0  ;;  %617 = vst.msk [vmem:[#allocation5 + $0x80] sm:$0xff] %vm476_vm1, %v4196_v22  ;;  %618 = vst.msk [vmem:[#allocation5 + $0x88] sm:$0xff] %vm476_vm1, %v4196_v22 }
 0x1b6   : > { %619 = vst.msk [vmem:[#allocation5 + $0x90] sm:$0xff] %vm476_vm1, %v4196_v22  ;;  %620 = vst.msk [vmem:[#allocation5 + $0x98] sm:$0xff] %vm476_vm1, %v4196_v22 }
 0x1b7   : > { %621 = vst.msk [vmem:[#allocation5 + $0xa0] sm:$0xff] %vm476_vm1, %v4196_v22  ;;  %622 = vst.msk [vmem:[#allocation5 + $0xa8] sm:$0xff] %vm476_vm1, %v4196_v22 }
 0x1b8   : > { %623 = vst.msk [vmem:[#allocation5 + $0xb0] sm:$0xff] %vm476_vm1, %v4196_v22  ;;  %624 = vst.msk [vmem:[#allocation5 + $0xb8] sm:$0xff] %vm476_vm1, %v4196_v22 }
 0x1b9   : > { %625 = vst.msk [vmem:[#allocation5 + $0xc0] sm:$0xff] %vm476_vm1, %v4196_v22  ;;  %626 = vst.msk [vmem:[#allocation5 + $0xc8] sm:$0xff] %vm476_vm1, %v4196_v22 }
 0x1ba   : > { %627 = vst.msk [vmem:[#allocation5 + $0xd0] sm:$0xff] %vm476_vm1, %v4196_v22  ;;  %628 = vst.msk [vmem:[#allocation5 + $0xd8] sm:$0xff] %vm476_vm1, %v4196_v22 }
 0x1bb   : > { %629 = vst.msk [vmem:[#allocation5 + $0xe0] sm:$0xff] %vm476_vm1, %v4196_v22  ;;  %630 = vst.msk [vmem:[#allocation5 + $0xe8] sm:$0xff] %vm476_vm1, %v4196_v22 }
 0x1bc   : > { %631 = vst.msk [vmem:[#allocation5 + $0xf0] sm:$0xff] %vm476_vm1, %v4196_v22  ;;  %632 = vst.msk [vmem:[#allocation5 + $0xf8] sm:$0xff] %vm476_vm1, %v4196_v22 }
 0x1bd   : > { %5726 = vst [vmem:[#allocation6_spill] sm:$0xff] %v4683_v47  ;;  %5728 = vst [vmem:[#allocation8_spill] sm:$0xff] %v4698_v56 }
 0x1e3   : > { %v4443_v1 = vpop.f32.mrb[8].mxu1 }
 0x1e4   : > { %v4445_v2 = vpop.f32.mrb[9].mxu1  ;;  %v1424_v3 = vsel %vm1417_vm2, %v4443_v1, -inf }
 0x1e5   : > { %v4449_v4 = vpop.f32.mrb[10].mxu1  ;;  %1425 = vmax.xlane.f32.xlu0 %v1424_v3  ;;  %v1418_v8 = vsel %vm1417_vm2, %v4445_v2, -inf  ;;  %v4830_v3 = vld [vmem:[#allocation3 + $0x40] sm:$0xff] }
 0x1e6   : > { %v4451_v5 = vpop.f32.mrb[11].mxu1  ;;  %v1427_v12 = vsel %vm1417_vm2, %v4449_v4, -inf }
 0x1e7   : > { %v1421_v6 = vsel %vm1417_vm2, %v4451_v5, -inf }
 0x1e8   : > { %1422 = vmax.xlane.f32.xlu1 %v1421_v6  ;;  %v4718_v6 = vld [vmem:[#allocation3 + $0x18] sm:$0xff] }
 0x1e9   : > { %1419 = vmax.xlane.f32.xlu0 %v1418_v8  ;;  %5730 = vst [vmem:[#allocation10_spill] sm:$0xff] %v4718_v6 }
 0x1eb   : > { %v4457_v9 = vpop.f32.mrb[12].mxu1 }
 0x1ec   : > { %v4459_v11 = vpop.f32.mrb[13].mxu1  ;;  %v1436_v13 = vsel %vm1417_vm2, %v4457_v9, -inf }
 0x1ed   : > { %1428 = vmax.xlane.f32.xlu0 %v1427_v12  ;;  %1437 = vmax.xlane.f32.xlu1 %v1436_v13  ;;  %v4497_v16 = vpop.f32.mrb[14].mxu1  ;;  %v1430_v19 = vsel %vm1417_vm2, %v4459_v11, -inf  ;;  %v4724_v12 = vld [vmem:[#allocation3 + $0x30] sm:$0xff] }
 0x1ee   : > { %v4499_v18 = vpop.f32.mrb[15].mxu1  ;;  %v1439_v20 = vsel %vm1417_vm2, %v4497_v16, -inf  ;;  %5731 = vst [vmem:[#allocation11_spill] sm:$0xff] %v4724_v12 }
 0x1ef   : > { %v1433_v21 = vsel %vm1417_vm2, %v4499_v18, -inf }
 0x1f1   : > { %1431 = vmax.xlane.f32.xlu1 %v1430_v19  ;;  %1440 = vmax.xlane.f32.xlu0 %v1439_v20 }
 0x1f5   : > { %1434 = vmax.xlane.f32.xlu0 %v1433_v21 }
 0x25a   : > { %v4635_v24 = vpop.f32.mrb[16].mxu0 }
 0x25b   : > { %v4637_v25 = vpop.f32.mrb[17].mxu0  ;;  %v1448_v26 = vsel %vm1417_vm2, %v4635_v24, -inf }
 0x25c   : > { %v4641_v27 = vpop.f32.mrb[18].mxu0  ;;  %1449 = vmax.xlane.f32.xlu1 %v1448_v26  ;;  %v1442_v41 = vsel %vm1417_vm2, %v4637_v25, -inf }
 0x25d   : > { %v4643_v28 = vpop.f32.mrb[19].mxu0  ;;  %v1451_v29 = vsel %vm1417_vm2, %v4641_v27, -inf }
 0x25e   : > { %1452 = vmax.xlane.f32.xlu0 %v1451_v29  ;;  %v1445_v42 = vsel %vm1417_vm2, %v4643_v28, -inf }
 0x262   : > { %v4647_v30 = vpop.f32.mrb[20].mxu0 }
 0x263   : > { %v4649_v31 = vpop.f32.mrb[21].mxu0  ;;  %v1460_v54 = vsel %vm1417_vm2, %v4647_v30, -inf }
 0x264   : > { %v4651_v32 = vpop.f32.mrb[22].mxu0  ;;  %v1454_v23 = vsel %vm1417_vm2, %v4649_v31, -inf }
 0x265   : > { %v4653_v33 = vpop.f32.mrb[23].mxu0  ;;  %v1463_v59 = vsel %vm1417_vm2, %v4651_v32, -inf }
 0x266   : > { %v4655_v34 = vpop.f32.mrb[16].mxu1 }
 0x267   : > { %v4657_v35 = vpop.f32.mrb[17].mxu1  ;;  %v1472_v36 = vsel %vm1417_vm2, %v4655_v34, -inf }
 0x268   : > { %1473 = vmax.xlane.f32.xlu1 %v1472_v36  ;;  %v4661_v37 = vpop.f32.mrb[18].mxu1  ;;  %v1466_v45 = vsel %vm1417_vm2, %v4657_v35, -inf  ;;  %v4742_v36 = vld [vmem:[#allocation3 + $0x38] sm:$0xff] }
 0x269   : > { %v4663_v10 = vpop.f32.mrb[19].mxu1  ;;  %v1475_v38 = vsel %vm1417_vm2, %v4661_v37, -inf  ;;  %5737 = vst [vmem:[#allocation17_spill] sm:$0xff] %v4742_v36 }
 0x26a   : > { %1476 = vmax.xlane.f32.xlu0 %v1475_v38  ;;  %v1469_v15 = vsel %vm1417_vm2, %v4663_v10, -inf }
 0x26c   : > { %1443 = vmax.xlane.f32.xlu1 %v1442_v41 }
 0x26e   : > { %1446 = vmax.xlane.f32.xlu0 %v1445_v42  ;;  %v4675_v44 = vpop.f32.mrb[20].mxu1  ;;  %v4750_v42 = vld [vmem:[#allocation3 + $0x20] sm:$0xff] }
 0x26f   : > { %v4677_v17 = vpop.f32.mrb[21].mxu1  ;;  %v1484_v63 = vsel %vm1417_vm2, %v4675_v44, -inf  ;;  %5739 = vst [vmem:[#allocation19_spill] sm:$0xff] %v4750_v42 }
 0x270   : > { %1467 = vmax.xlane.f32.xlu1 %v1466_v45  ;;  %v4681_v46 = vpop.f32.mrb[22].mxu1  ;;  %v1457_v45 = vsel %vm1417_vm2, %v4653_v33, -inf }
 0x271   : > { %v4687_v49 = vpop.f32.mrb[23].mxu1  ;;  %v1487_v13 = vsel %vm1417_vm2, %v4681_v46, -inf }
 0x272   : > { %v1426_v52 = vpop.xlane.xlu0 %1425  ;;  %1470 = vmax.xlane.f32.xlu0 %v1469_v15 }
 0x273   : > { %v4692_v53 = vmax.f32 %v4683_v47, %v1426_v52  ;;  %v4861_v47 = vld [vmem:[#allocation3 + $0x88] sm:$0xff] }
 0x274   : > { %1461 = vmax.xlane.f32.xlu1 %v1460_v54  ;;  %5751 = vst [vmem:[#allocation31_spill] sm:$0xff] %v4861_v47 }
 0x275   : > { %5727 = vst [vmem:[#allocation7_spill] sm:$0xff] %v4692_v53  ;;  %2737 = vst.msk [vmem:[#allocation3 + $0x10] sm:$0xff] %vm536_vm3, %v4692_v53  ;;  %v1423_v58 = vpop.xlane.xlu1 %1422 }
 0x276   : > { %v4707_v60 = vmax.f32 %v4696_v55, %v1423_v58  ;;  %v1420_v61 = vpop.xlane.xlu0 %1419  ;;  %1464 = vmax.xlane.f32.xlu0 %v1463_v59  ;;  %v1478_v58 = vsel %vm1417_vm2, %v4677_v17, -inf }
 0x277   : > { %v4710_v62 = vmax.f32 %v4698_v56, %v1420_v61  ;;  %v4764_v61 = vld [vmem:[#allocation3 + $0x28] sm:$0xff] }
 0x278   : > { %2736 = vst.msk [vmem:[#allocation3 + $0x8] sm:$0xff] %vm536_vm3, %v4707_v60  ;;  %1485 = vmax.xlane.f32.xlu1 %v1484_v63  ;;  %5742 = vst [vmem:[#allocation22_spill] sm:$0xff] %v4764_v61  ;;  %v1481_v63 = vsel %vm1417_vm2, %v4687_v49, -inf }
 0x279   : > { %5729 = vst [vmem:[#allocation9_spill] sm:$0xff] %v4710_v62  ;;  %2735 = vst.msk [vmem:[#allocation3] sm:$0xff] %vm536_vm3, %v4710_v62 }
 0x27a   : > { %v1429_v14 = vpop.xlane.xlu0 %1428  ;;  %v4728_v19 = vpop.f32.mrb[24].mxu0  ;;  %1488 = vmax.xlane.f32.xlu0 %v1487_v13 }
 0x27b   : > { %5732 = vst [vmem:[#allocation12_spill] sm:$0xff] %v4728_v19  ;;  %v4731_v20 = vmax.f32 %v4718_v6, %v1429_v14  ;;  %v1438_v21 = vpop.xlane.xlu1 %1437  ;;  %v4733_v22 = vpop.f32.mrb[25].mxu0 }
 0x27c   : > { %5734 = vst [vmem:[#allocation14_spill] sm:$0xff] %v4733_v22  ;;  %v4738_v26 = vmax.f32 %v4724_v12, %v1438_v21  ;;  %v4740_v29 = vpop.f32.mrb[26].mxu0  ;;  %1455 = vmax.xlane.f32.xlu1 %v1454_v23 }
 0x27d   : > { %5733 = vst [vmem:[#allocation13_spill] sm:$0xff] %v4731_v20  ;;  %5736 = vst [vmem:[#allocation16_spill] sm:$0xff] %v4740_v29  ;;  %v4748_v41 = vpop.f32.mrb[27].mxu0 }
 0x27e   : > { %5735 = vst [vmem:[#allocation15_spill] sm:$0xff] %v4738_v26  ;;  %2738 = vst.msk [vmem:[#allocation3 + $0x18] sm:$0xff] %vm536_vm3, %v4731_v20  ;;  %v1441_v15 = vpop.xlane.xlu0 %1440  ;;  %1458 = vmax.xlane.f32.xlu0 %v1457_v45 }
 0x27f   : > { %5738 = vst [vmem:[#allocation18_spill] sm:$0xff] %v4748_v41  ;;  %2741 = vst.msk [vmem:[#allocation3 + $0x30] sm:$0xff] %vm536_vm3, %v4738_v26  ;;  %v1432_v52 = vpop.xlane.xlu1 %1431  ;;  %v4757_v54 = vmax.f32 %v4742_v36, %v1441_v15  ;;  %v4821_v36 = vld [vmem:[#allocation3 + $0x90] sm:$0xff] }
 0x280   : > { %v4762_v59 = vmax.f32 %v4750_v42, %v1432_v52  ;;  %1479 = vmax.xlane.f32.xlu1 %v1478_v58  ;;  %v1499_v52 = vsel %vm1417_vm2, %v4740_v29, -inf  ;;  %v1493_v58 = vsel %vm1417_vm2, %v4748_v41, -inf  ;;  %5748 = vst [vmem:[#allocation28_spill] sm:$0xff] %v4821_v36  ;;  %v4915_v41 = vld [vmem:[#allocation3 + $0x68] sm:$0xff] }
 0x281   : > { %5740 = vst [vmem:[#allocation20_spill] sm:$0xff] %v4757_v54  ;;  %2742 = vst.msk [vmem:[#allocation3 + $0x38] sm:$0xff] %vm536_vm3, %v4757_v54 }
 0x282   : > { %5741 = vst [vmem:[#allocation21_spill] sm:$0xff] %v4762_v59  ;;  %2739 = vst.msk [vmem:[#allocation3 + $0x20] sm:$0xff] %vm536_vm3, %v4762_v59  ;;  %v4772_v13 = vpop.f32.mrb[28].mxu0  ;;  %v1435_v14 = vpop.xlane.xlu0 %1434  ;;  %1482 = vmax.xlane.f32.xlu0 %v1481_v63  ;;  %v1496_v63 = vsel %vm1417_vm2, %v4728_v19, -inf }
 0x283   : > { %5743 = vst [vmem:[#allocation23_spill] sm:$0xff] %v4772_v13  ;;  %v4775_v21 = vmax.f32 %v4764_v61, %v1435_v14  ;;  %v4777_v23 = vpop.f32.mrb[29].mxu0  ;;  %v1490_v14 = vsel %vm1417_vm2, %v4733_v22, -inf  ;;  %v4906_v22 = vld [vmem:[#allocation3 + $0x60] sm:$0xff]  ;;  %5762 = vst [vmem:[#allocation42_spill] sm:$0xff] %v4915_v41 }
 0x284   : > { %5745 = vst [vmem:[#allocation25_spill] sm:$0xff] %v4777_v23  ;;  %v4779_v45 = vpop.f32.mrb[30].mxu0  ;;  %5760 = vst [vmem:[#allocation40_spill] sm:$0xff] %v4906_v22 }
 0x285   : > { %5744 = vst [vmem:[#allocation24_spill] sm:$0xff] %v4775_v21  ;;  %5746 = vst [vmem:[#allocation26_spill] sm:$0xff] %v4779_v45  ;;  %v4783_v15 = vpop.f32.mrb[31].mxu0 }
 0x286   : > { %2740 = vst.msk [vmem:[#allocation3 + $0x28] sm:$0xff] %vm536_vm3, %v4775_v21  ;;  %5747 = vst [vmem:[#allocation27_spill] sm:$0xff] %v4783_v15 }
 0x291   : > { %1654 = vperm.xlu1 %3906, %v4692_v53   ;;  %v1502_v53 = vsel %vm1417_vm2, %v4777_v23, -inf }
 0x295   : > { %1644 = vperm.xlu1 %3906, %v4710_v62  }
 0x298   : > { %1649 = vperm.xlu0 %3907, %v4707_v60  }
 0x299   : > { %1659 = vperm.xlu1 %3906, %v4731_v20   ;;  %v4841_v20 = vld [vmem:[#allocation3 + $0x48] sm:$0xff] }
 0x2b7   : > { %1500 = vmax.xlane.f32.xlu0 %v1499_v52  ;;  %v4801_v52 = vld [vmem:[#allocation3 + $0x50] sm:$0xff] }
 0x2bb   : > { %1494 = vmax.xlane.f32.xlu0 %v1493_v58  ;;  %v4803_v58 = vld [vmem:[#allocation3 + $0x58] sm:$0xff] }
 0x2bd   : > { %1497 = vmax.xlane.f32.xlu1 %v1496_v63 }
 0x2c1   : > { %1491 = vmax.xlane.f32.xlu1 %v1490_v14  ;;  %v4823_v14 = vld [vmem:[#allocation3 + $0x98] sm:$0xff] }
 0x2c2   : > { %5749 = vst [vmem:[#allocation29_spill] sm:$0xff] %v4823_v14 }
 0x2d1   : > { %1679 = vperm.xlu0 %3907, %v4757_v54  }
 0x2d2   : > { %1674 = vperm.xlu1 %3906, %v4738_v26   ;;  %v1505_v26 = vsel %vm1417_vm2, %v4783_v15, -inf  ;;  %v4879_v15 = vld [vmem:[#allocation3 + $0x78] sm:$0xff] }
 0x2d3   : > { %5754 = vst [vmem:[#allocation34_spill] sm:$0xff] %v4879_v15 }
 0x2d5   : > { %1669 = vperm.xlu0 %3907, %v4775_v21  }
 0x2d6   : > { %1664 = vperm.xlu1 %3906, %v4762_v59  }
 0x2e9   : > { %v1450_v38 = vpop.xlane.xlu1 %1449 }
 0x2ea   : > { %v4806_v57 = vmax.f32 %v4801_v52, %v1450_v38  ;;  %v1511_v38 = vsel %vm1417_vm2, %v4779_v45, -inf }
 0x2eb   : > { %v1453_v63 = vpop.xlane.xlu0 %1452 }
 0x2ec   : > { %2745 = vst.msk [vmem:[#allocation3 + $0x50] sm:$0xff] %vm536_vm3, %v4806_v57  ;;  %v4813_v8 = vmax.f32 %v4803_v58, %v1453_v63 }
 0x2ee   : > { %2746 = vst.msk [vmem:[#allocation3 + $0x58] sm:$0xff] %vm536_vm3, %v4813_v8 }
 0x2f4   : > { %1512 = vmax.xlane.f32.xlu0 %v1511_v38 }
 0x2f5   : > { %v1474_v54 = vpop.xlane.xlu1 %1473 }
 0x2f6   : > { %v4826_v12 = vmax.f32 %v4821_v36, %v1474_v54  ;;  %v1508_v54 = vsel %vm1417_vm2, %v4772_v13, -inf  ;;  %v4870_v13 = vld [vmem:[#allocation3 + $0x70] sm:$0xff] }
 0x2f7   : > { %v1477_v63 = vpop.xlane.xlu0 %1476  ;;  %5752 = vst [vmem:[#allocation32_spill] sm:$0xff] %v4870_v13 }
 0x2f8   : > { %2753 = vst.msk [vmem:[#allocation3 + $0x90] sm:$0xff] %vm536_vm3, %v4826_v12  ;;  %v4837_v38 = vmax.f32 %v4823_v14, %v1477_v63  ;;  %1506 = vmax.xlane.f32.xlu0 %v1505_v26  ;;  %v4850_v63 = vld [vmem:[#allocation3 + $0x80] sm:$0xff] }
 0x2f9   : > { %v1444_v21 = vpop.xlane.xlu1 %1443 }
 0x2fa   : > { %5750 = vst [vmem:[#allocation30_spill] sm:$0xff] %v4837_v38  ;;  %2754 = vst.msk [vmem:[#allocation3 + $0x98] sm:$0xff] %vm536_vm3, %v4837_v38  ;;  %v4848_v61 = vmax.f32 %v4830_v3, %v1444_v21  ;;  %1509 = vmax.xlane.f32.xlu1 %v1508_v54 }
 0x2fb   : > { %v1447_v42 = vpop.xlane.xlu0 %1446 }
 0x2fc   : > { %2743 = vst.msk [vmem:[#allocation3 + $0x40] sm:$0xff] %vm536_vm3, %v4848_v61  ;;  %v4857_v59 = vmax.f32 %v4841_v20, %v1447_v42  ;;  %v4888_v42 = vld [vmem:[#allocation3 + $0xb0] sm:$0xff] }
 0x2fd   : > { %v1468_v6 = vpop.xlane.xlu1 %1467  ;;  %5756 = vst [vmem:[#allocation36_spill] sm:$0xff] %v4888_v42 }
 0x2fe   : > { %2744 = vst.msk [vmem:[#allocation3 + $0x48] sm:$0xff] %vm536_vm3, %v4857_v59  ;;  %v4868_v54 = vmax.f32 %v4850_v63, %v1468_v6  ;;  %1503 = vmax.xlane.f32.xlu1 %v1502_v53  ;;  %v4897_v6 = vld [vmem:[#allocation3 + $0xb8] sm:$0xff] }
 0x2ff   : > { %v1471_v26 = vpop.xlane.xlu0 %1470  ;;  %5758 = vst [vmem:[#allocation38_spill] sm:$0xff] %v4897_v6 }
 0x300   : > { %2751 = vst.msk [vmem:[#allocation3 + $0x80] sm:$0xff] %vm536_vm3, %v4868_v54  ;;  %v4877_v23 = vmax.f32 %v4861_v47, %v1471_v26 }
 0x301   : > { %v1462_v21 = vpop.xlane.xlu1 %1461 }
 0x302   : > { %5753 = vst [vmem:[#allocation33_spill] sm:$0xff] %v4877_v23  ;;  %2752 = vst.msk [vmem:[#allocation3 + $0x88] sm:$0xff] %vm536_vm3, %v4877_v23  ;;  %v4886_v53 = vmax.f32 %v4870_v13, %v1462_v21  ;;  %v4924_v13 = vld [vmem:[#allocation3 + $0xa0] sm:$0xff] }
 0x303   : > { %v1465_v45 = vpop.xlane.xlu0 %1464  ;;  %5763 = vst [vmem:[#allocation43_spill] sm:$0xff] %v4924_v13 }
 0x304   : > { %5755 = vst [vmem:[#allocation35_spill] sm:$0xff] %v4886_v53  ;;  %2749 = vst.msk [vmem:[#allocation3 + $0x70] sm:$0xff] %vm536_vm3, %v4886_v53  ;;  %v4895_v26 = vmax.f32 %v4879_v15, %v1465_v45  ;;  %v4933_v15 = vld [vmem:[#allocation3 + $0xa8] sm:$0xff] }
 0x305   : > { %v1486_v19 = vpop.xlane.xlu1 %1485  ;;  %5764 = vst [vmem:[#allocation44_spill] sm:$0xff] %v4933_v15 }
 0x306   : > { %5757 = vst [vmem:[#allocation37_spill] sm:$0xff] %v4895_v26  ;;  %2750 = vst.msk [vmem:[#allocation3 + $0x78] sm:$0xff] %vm536_vm3, %v4895_v26  ;;  %v4904_v21 = vmax.f32 %v4888_v42, %v1486_v19 }
 0x307   : > { %v1489_v29 = vpop.xlane.xlu0 %1488 }
 0x308   : > { %5759 = vst [vmem:[#allocation39_spill] sm:$0xff] %v4904_v21  ;;  %2757 = vst.msk [vmem:[#allocation3 + $0xb0] sm:$0xff] %vm536_vm3, %v4904_v21  ;;  %v4913_v45 = vmax.f32 %v4897_v6, %v1489_v29 }
 0x309   : > { %v1456_v62 = vpop.xlane.xlu1 %1455 }
 0x30a   : > { %5761 = vst [vmem:[#allocation41_spill] sm:$0xff] %v4913_v45  ;;  %2758 = vst.msk [vmem:[#allocation3 + $0xb8] sm:$0xff] %vm536_vm3, %v4913_v45  ;;  %v4922_v19 = vmax.f32 %v4906_v22, %v1456_v62 }
 0x30b   : > { %v1459_v56 = vpop.xlane.xlu0 %1458 }
 0x30c   : > { %2747 = vst.msk [vmem:[#allocation3 + $0x60] sm:$0xff] %vm536_vm3, %v4922_v19  ;;  %v4931_v29 = vmax.f32 %v4915_v41, %v1459_v56 }
 0x30d   : > { %v1480_v14 = vpop.xlane.xlu1 %1479 }
 0x30e   : > { %2748 = vst.msk [vmem:[#allocation3 + $0x68] sm:$0xff] %vm536_vm3, %v4931_v29  ;;  %v4940_v62 = vmax.f32 %v4924_v13, %v1480_v14  ;;  %1739 = vperm.xlu0 %3907, %v4837_v38  }
 0x30f   : > { %1694 = vperm.xlu1 %3906, %v4806_v57   ;;  %v1483_v42 = vpop.xlane.xlu0 %1482 }
 0x310   : > { %5765 = vst [vmem:[#allocation45_spill] sm:$0xff] %v4940_v62  ;;  %2755 = vst.msk [vmem:[#allocation3 + $0xa0] sm:$0xff] %vm536_vm3, %v4940_v62  ;;  %v4949_v22 = vmax.f32 %v4933_v15, %v1483_v42 }
 0x311   : > { %v1655_v6 = vpop.permute.xlu1 %1654 }
 0x312   : > { %5766 = vst [vmem:[#allocation46_spill] sm:$0xff] %v4949_v22  ;;  %2756 = vst.msk [vmem:[#allocation3 + $0xa8] sm:$0xff] %vm536_vm3, %v4949_v22  ;;  %1729 = vperm.xlu0 %3907, %v4877_v23   ;;  %v1804_v14 = vsub.f32 %v4443_v1, %v1655_v6 }
 0x313   : > { %1734 = vperm.xlu1 %3906, %v4826_v12  }
 0x314   : > { %v1838_v15 = vmul.f32 1.442695, %v1804_v14 }
 0x315   : > { %v1645_v56 = vpop.permute.xlu1 %1644 }
 0x316   : > { %v1802_v13 = vsub.f32 %v4445_v2, %v1645_v56  ;;  %1754 = vperm.xlu0 %3907, %v4904_v21   ;;  %v3884_v56 = vunpack.i.l.bf16 %v4436_v51 }
 0x317   : > { %1684 = vperm.xlu1 %3906, %v4848_v61   ;;  %v1650_v42 = vpop.permute.xlu0 %1649 }
 0x318   : > { %v1834_v38 = vmul.f32 1.442695, %v1802_v13  ;;  %v1803_v41 = vsub.f32 %v4451_v5, %v1650_v42 }
 0x319   : > { %v1660_v36 = vpop.permute.xlu1 %1659 }
 0x31a   : > { %v1836_v47 = vmul.f32 1.442695, %v1803_v41  ;;  %v1805_v23 = vsub.f32 %v4449_v4, %v1660_v36  ;;  %1744 = vperm.xlu0 %3907, %v4940_v62   ;;  %3976 = vpow2.f32 %v1834_v38  ;;  %v3855_v36 = vunpack.i.h.bf16 %v4430_v7 }
 0x31b   : > { %1724 = vperm.xlu1 %3906, %v4868_v54   ;;  %v3854_v41 = vunpack.i.l.bf16 %v4430_v7  ;;  %v3899_v38 = vunpack.i.l.bf16 %v4673_v43  ;;  %v3885_v7 = vunpack.i.h.bf16 %v4436_v51  ;;  %v4994_v51 = vld [vmem:[#allocation3 + $0xc8] sm:$0xff] }
 0x31c   : > { %3978 = vpow2.f32 %v1836_v47  ;;  %v1840_v1 = vmul.f32 1.442695, %v1805_v23 }
 0x31d   : > { %3980 = vpow2.f32 %v1838_v15  ;;  %v3900_v15 = vunpack.i.h.bf16 %v4673_v43  ;;  %v1005_v6 = vpack.c.bf16 %v3855_v36, %v3854_v41  ;;  %v1007_v43 = vpack.c.bf16 %v3885_v7, %v3884_v56  ;;  %v5012_v7 = vld [vmem:[#allocation3 + $0xc0] sm:$0xff] }
 0x31e   : > { %3982 = vpow2.f32 %v1840_v1  ;;  %1719 = vperm.xlu0 %3907, %v4895_v26  }
 0x31f   : > { %1699 = vperm.xlu1 %3906, %v4813_v8   ;;  %v1006_v14 = vpack.c.bf16 %v3900_v15, %v3899_v38 }
 0x322   : > { %1709 = vperm.xlu0 %3907, %v4931_v29  }
 0x323   : > { %1689 = vperm.xlu1 %3906, %v4857_v59  }
 0x324   : > { %v3977_v2 = vpop.eup %3976 }
 0x326   : > { %v3979_v5 = vpop.eup %3978 }
 0x327   : > { %v4969_v4 = vpop.eup %3980  ;;  %1714 = vperm.xlu1 %3906, %v4886_v53   ;;  %v2347_v47 = vpack.c.bf16 %v3979_v5, %v3977_v2  ;;  %v1965_v42 = vsel %vm1417_vm2, %v3979_v5, 0.0 }
 0x328   : > { %v4974_v13 = vpop.eup %3982 }
 0x329   : > { %v2348_v23 = vpack.c.bf16 %v4974_v13, %v4969_v4  ;;  %3669 = vmatprep.mubr.msk.bf16.mxu1 %vm1417_vm2, %v2347_v47 }
 0x32b   : > { %1704 = vperm.xlu1 %3906, %v4922_v19   ;;  %3670 = vmatmul.mubr.msk.bf16.vlgmr.msra.gmra.mrb[24].mxu1 %vm1417_vm2, %v2348_v23  ;;  %v5000_v23 = vld [vmem:[#allocation3 + $0xd0] sm:$0xff] }
 0x32c   : > { %3694 = vmatpush3.bf16.msra.mxu1 %v4434_v50  ;;  %v4989_v50 = vld [vmem:[#allocation3 + $0xd8] sm:$0xff] }
 0x32d   : > { %3695 = vmatprep.subr.bf16.mxu1 %v1005_v6 }
 0x32f   : > { %1759 = vperm.xlu1 %3906, %v4913_v45   ;;  %v1962_v45 = vsel %vm1417_vm2, %v3977_v2, 0.0 }
 0x330   : > { %3696 = vmatpush3.bf16.msra.mxu1 %v1005_v6 }
 0x331   : > { %3697 = vmatprep.subr.bf16.mxu1 %v1006_v14 }
 0x333   : > { %1749 = vperm.xlu1 %3906, %v4949_v22  }
 0x334   : > { %3698 = vmatpush3.bf16.msra.mxu1 %v1006_v14 }
 0x335   : > { %3699 = vmatprep.subr.bf16.mxu1 %v1007_v43 }
 0x338   : > { %3700 = vmatpush3.bf16.msra.mxu1 %v1007_v43 }
 0x341   : > { %1966 = vadd.xlane.f32.xlu0 %v1965_v42 }
 0x344   : > { %v1501_v1 = vpop.xlane.xlu0 %1500 }
 0x345   : > { %v4992_v36 = vmax.f32 %v4989_v50, %v1501_v1 }
 0x347   : > { %2762 = vst.msk [vmem:[#allocation3 + $0xd8] sm:$0xff] %vm536_vm3, %v4992_v36 }
 0x348   : > { %v1495_v47 = vpop.xlane.xlu0 %1494 }
 0x349   : > { %v5003_v5 = vmax.f32 %v4994_v51, %v1495_v47 }
 0x34a   : > { %v1498_v15 = vpop.xlane.xlu1 %1497 }
 0x34b   : > { %5767 = vst [vmem:[#allocation47_spill] sm:$0xff] %v5003_v5  ;;  %2760 = vst.msk [vmem:[#allocation3 + $0xc8] sm:$0xff] %vm536_vm3, %v5003_v5  ;;  %v5010_v6 = vmax.f32 %v5000_v23, %v1498_v15 }
 0x34d   : > { %2761 = vst.msk [vmem:[#allocation3 + $0xd0] sm:$0xff] %vm536_vm3, %v5010_v6 }
 0x34e   : > { %v1492_v14 = vpop.xlane.xlu1 %1491 }
 0x34f   : > { %v5019_v43 = vmax.f32 %v5012_v7, %v1492_v14 }
 0x350   : > { %v1680_v42 = vpop.permute.xlu0 %1679 }
 0x351   : > { %2759 = vst.msk [vmem:[#allocation3 + $0xc0] sm:$0xff] %vm536_vm3, %v5019_v43  ;;  %v1809_v47 = vsub.f32 %v4497_v16, %v1680_v42 }
 0x352   : > { %v1675_v15 = vpop.permute.xlu1 %1674 }
 0x353   : > { %v1848_v38 = vmul.f32 1.442695, %v1809_v47  ;;  %v1808_v41 = vsub.f32 %v4457_v9, %v1675_v15 }
 0x354   : > { %v1670_v56 = vpop.permute.xlu0 %1669 }
 0x355   : > { %v1846_v21 = vmul.f32 1.442695, %v1808_v41  ;;  %v1807_v62 = vsub.f32 %v4499_v18, %v1670_v56  ;;  %3984 = vpow2.f32 %v1848_v38  ;;  %v5053_v38 = vld [vmem:[#allocation3 + $0xe8] sm:$0xff] }
 0x356   : > { %v1665_v14 = vpop.permute.xlu1 %1664  ;;  %5770 = vst [vmem:[#allocation50_spill] sm:$0xff] %v5053_v38 }
 0x357   : > { %3986 = vpow2.f32 %v1846_v21  ;;  %v1844_v53 = vmul.f32 1.442695, %v1807_v62  ;;  %v1806_v1 = vsub.f32 %v4459_v11, %v1665_v14  ;;  %1963 = vadd.xlane.f32.xlu1 %v1962_v45  ;;  %1779 = vperm.xlu0 %3907, %v4992_v36  }
 0x359   : > { %v1842_v16 = vmul.f32 1.442695, %v1806_v1  ;;  %3988 = vpow2.f32 %v1844_v53  ;;  %v5048_v53 = vld [vmem:[#allocation3 + $0xf8] sm:$0xff]  ;;  %v5060_v1 = vld [vmem:[#allocation3 + $0xf0] sm:$0xff] }
 0x35a   : > { %5768 = vst [vmem:[#allocation48_spill] sm:$0xff] %v5048_v53  ;;  %5771 = vst [vmem:[#allocation51_spill] sm:$0xff] %v5060_v1 }
 0x35b   : > { %3990 = vpow2.f32 %v1842_v16  ;;  %1769 = vperm.xlu0 %3907, %v5003_v5  }
 0x35f   : > { %v5032_v9 = vpop.eup %3984 }
 0x361   : > { %v5034_v41 = vpop.eup %3986 }
 0x362   : > { %v2350_v18 = vpack.c.bf16 %v5032_v9, %v5034_v41 }
 0x363   : > { %v5038_v2 = vpop.eup %3988 }
 0x365   : > { %v5040_v21 = vpop.eup %3990 }
 0x366   : > { %v2349_v11 = vpack.c.bf16 %v5038_v2, %v5040_v21 }
 0x368   : > { %1774 = vperm.xlu1 %3906, %v5010_v6   ;;  %3673 = vmatprep.mubr.msk.bf16.mxu1 %vm1417_vm2, %v2349_v11 }
 0x369   : > { %3674 = vmatmul.mubr.msk.bf16.gmra.mrb[28].mxu1 %vm1417_vm2, %v2350_v18  ;;  %v5073_v18 = vld [vmem:[#allocation3 + $0xe0] sm:$0xff] }
 0x36a   : > { %5774 = vst [vmem:[#allocation54_spill] sm:$0xff] %v5073_v18 }
 0x36c   : > { %1764 = vperm.xlu1 %3906, %v5019_v43  }
 0x381   : > { %v1513_v45 = vpop.xlane.xlu0 %1512 }
 0x382   : > { %v5051_v62 = vmax.f32 %v5048_v53, %v1513_v45 }
 0x384   : > { %5769 = vst [vmem:[#allocation49_spill] sm:$0xff] %v5051_v62  ;;  %2766 = vst.msk [vmem:[#allocation3 + $0xf8] sm:$0xff] %vm536_vm3, %v5051_v62  ;;  %1799 = vperm.xlu1 %3906, %v5051_v62  }
 0x385   : > { %v1507_v42 = vpop.xlane.xlu0 %1506 }
 0x386   : > { %v5063_v47 = vmax.f32 %v5053_v38, %v1507_v42 }
 0x387   : > { %v1510_v15 = vpop.xlane.xlu1 %1509 }
 0x388   : > { %5772 = vst [vmem:[#allocation52_spill] sm:$0xff] %v5063_v47  ;;  %2764 = vst.msk [vmem:[#allocation3 + $0xe8] sm:$0xff] %vm536_vm3, %v5063_v47  ;;  %v5070_v16 = vmax.f32 %v5060_v1, %v1510_v15  ;;  %1789 = vperm.xlu1 %3906, %v5063_v47  }
 0x38a   : > { %5773 = vst [vmem:[#allocation53_spill] sm:$0xff] %v5070_v16  ;;  %2765 = vst.msk [vmem:[#allocation3 + $0xf0] sm:$0xff] %vm536_vm3, %v5070_v16  ;;  %1794 = vperm.xlu0 %3907, %v5070_v16  }
 0x38b   : > { %v1504_v45 = vpop.xlane.xlu1 %1503 }
 0x38c   : > { %v5081_v42 = vmax.f32 %v5073_v18, %v1504_v45 }
 0x38d   : > { %v1740_v56 = vpop.permute.xlu0 %1739 }
 0x38e   : > { %5775 = vst [vmem:[#allocation55_spill] sm:$0xff] %v5081_v42  ;;  %2763 = vst.msk [vmem:[#allocation3 + $0xe0] sm:$0xff] %vm536_vm3, %v5081_v42  ;;  %1784 = vperm.xlu0 %3907, %v5081_v42   ;;  %v1821_v11 = vsub.f32 %v4661_v37, %v1740_v56 }
 0x38f   : > { %v1695_v14 = vpop.permute.xlu1 %1694 }
 0x390   : > { %v1872_v62 = vmul.f32 1.442695, %v1821_v11  ;;  %v1812_v18 = vsub.f32 %v4635_v24, %v1695_v14 }
 0x391   : > { %v1730_v1 = vpop.permute.xlu0 %1729 }
 0x392   : > { %3992 = vpow2.f32 %v1872_v62  ;;  %v1819_v38 = vsub.f32 %v4663_v10, %v1730_v1  ;;  %v1854_v5 = vmul.f32 1.442695, %v1812_v18 }
 0x393   : > { %v1735_v53 = vpop.permute.xlu1 %1734 }
 0x394   : > { %v1820_v16 = vsub.f32 %v4655_v34, %v1735_v53  ;;  %v1868_v42 = vmul.f32 1.442695, %v1819_v38 }
 0x395   : > { %v1755_v47 = vpop.permute.xlu0 %1754 }
 0x396   : > { %v1870_v45 = vmul.f32 1.442695, %v1820_v16 }
 0x397   : > { %v1685_v22 = vpop.permute.xlu1 %1684 }
 0x398   : > { %3994 = vpow2.f32 %v1870_v45  ;;  %v1810_v34 = vsub.f32 %v4637_v25, %v1685_v22 }
 0x399   : > { %v5091_v15 = vpop.permute.xlu0 %1744  ;;  %3996 = vpow2.f32 %v1868_v42 }
 0x39b   : > { %v1725_v26 = vpop.permute.xlu1 %1724 }
 0x39c   : > { %v1818_v37 = vsub.f32 %v4657_v35, %v1725_v26  ;;  %v5097_v62 = vpop.eup %3992  ;;  %v1850_v35 = vmul.f32 1.442695, %v1810_v34 }
 0x39d   : > { %v1720_v11 = vpop.permute.xlu0 %1719 }
 0x39e   : > { %v1866_v56 = vmul.f32 1.442695, %v1818_v37  ;;  %v1817_v26 = vsub.f32 %v4651_v32, %v1720_v11  ;;  %v1968_v32 = vsel %vm1417_vm2, %v4969_v4, 0.0  ;;  %v1824_v11 = vsub.f32 %v4675_v44, %v1755_v47 }
 0x39f   : > { %v1700_v53 = vpop.permute.xlu1 %1699  ;;  %v1974_v47 = vsel %vm1417_vm2, %v5040_v21, 0.0 }
 0x3a0   : > { %3998 = vpow2.f32 %v1866_v56  ;;  %v1813_v10 = vsub.f32 %v4641_v27, %v1700_v53  ;;  %v1864_v27 = vmul.f32 1.442695, %v1817_v26 }
 0x3a1   : > { %4000 = vpow2.f32 %v1854_v5  ;;  %v1710_v14 = vpop.permute.xlu0 %1709 }
 0x3a2   : > { %v5099_v1 = vpop.eup %3994  ;;  %v1856_v16 = vmul.f32 1.442695, %v1813_v10  ;;  %v1815_v18 = vsub.f32 %v4653_v33, %v1710_v14  ;;  %v3860_v14 = vunpack.i.h.bf16 %v4428_v39 }
 0x3a3   : > { %v2356_v24 = vpack.c.bf16 %v5097_v62, %v5099_v1  ;;  %v1690_v38 = vpop.permute.xlu1 %1689  ;;  %v5107_v45 = vpop.eup %3996 }
 0x3a4   : > { %4002 = vpow2.f32 %v1856_v16  ;;  %v1811_v25 = vsub.f32 %v4643_v28, %v1690_v38  ;;  %v1860_v28 = vmul.f32 1.442695, %v1815_v18  ;;  %v1878_v16 = vmul.f32 1.442695, %v1824_v11 }
 0x3a5   : > { %4004 = vpow2.f32 %v1850_v35  ;;  %v1977_v38 = vsel %vm1417_vm2, %v5038_v2, 0.0  ;;  %v1983_v18 = vsel %vm1417_vm2, %v5032_v9, 0.0 }
 0x3a6   : > { %v1852_v22 = vmul.f32 1.442695, %v1811_v25 }
 0x3a7   : > { %v1715_v42 = vpop.permute.xlu1 %1714 }
 0x3a8   : > { %4006 = vpow2.f32 %v1852_v22  ;;  %v1816_v5 = vsub.f32 %v4647_v30, %v1715_v42  ;;  %v1971_v30 = vsel %vm1417_vm2, %v4974_v13, 0.0 }
 0x3a9   : > { %4008 = vpow2.f32 %v1864_v27 }
 0x3aa   : > { %v5109_v37 = vpop.eup %3998  ;;  %v1862_v56 = vmul.f32 1.442695, %v1816_v5 }
 0x3ab   : > { %v1705_v34 = vpop.permute.xlu1 %1704  ;;  %v2355_v33 = vpack.c.bf16 %v5107_v45, %v5109_v37  ;;  %v5119_v10 = vpop.eup %4000 }
 0x3ac   : > { %4010 = vpow2.f32 %v1862_v56  ;;  %v1814_v53 = vsub.f32 %v4649_v31, %v1705_v34  ;;  %1969 = vadd.xlane.f32.xlu1 %v1968_v32  ;;  %v1822_v31 = vsub.f32 %v4677_v17, %v5091_v15  ;;  %v3859_v17 = vunpack.i.l.bf16 %v4428_v39 }
 0x3ad   : > { %1972 = vadd.xlane.f32.xlu0 %v1971_v30  ;;  %3701 = vmatprep.mubr.msk.bf16.mxu1 %vm1417_vm2, %v2355_v33  ;;  %4012 = vpow2.f32 %v1860_v28  ;;  %v3905_v39 = vunpack.i.h.bf16 %v4685_v48  ;;  %v5776_v56 = vsub.f32 %v4830_v3, %v4848_v61  ;;  %v3889_v3 = vunpack.i.l.bf16 %v4667_v40 }
 0x3ae   : > { %v5122_v4 = vpop.eup %4002  ;;  %v1858_v44 = vmul.f32 1.442695, %v1814_v53  ;;  %3702 = vmatmul.mubr.msk.bf16.vlgmr.msra.gmra.mrb[32].mxu1 %vm1417_vm2, %v2356_v24  ;;  %v1874_v25 = vmul.f32 1.442695, %v1822_v31  ;;  %v1009_v11 = vpack.c.bf16 %v3860_v14, %v3859_v17  ;;  %v5777_v61 = vsub.f32 %v4801_v52, %v4806_v57 }
 0x3af   : > { %v2352_v13 = vpack.c.bf16 %v5122_v4, %v5119_v10  ;;  %v1760_v35 = vpop.permute.xlu1 %1759  ;;  %v5134_v24 = vpop.eup %4004  ;;  %v1594_v32 = vmul.f32 1.442695, %v5776_v56 }
 0x3b0   : > { %4014 = vpow2.f32 %v1858_v44  ;;  %v1825_v26 = vsub.f32 %v4681_v46, %v1760_v35  ;;  %1975 = vadd.xlane.f32.xlu1 %v1974_v47  ;;  %v1980_v46 = vsel %vm1417_vm2, %v5034_v41, 0.0  ;;  %v3904_v41 = vunpack.i.l.bf16 %v4685_v48 }
 0x3b1   : > { %1978 = vadd.xlane.f32.xlu0 %v1977_v38  ;;  %4016 = vpow2.f32 %v1878_v16  ;;  %v3890_v48 = vunpack.i.h.bf16 %v4667_v40  ;;  %v1598_v33 = vmul.f32 1.442695, %v5777_v61  ;;  %v5779_v47 = vsub.f32 %v4841_v20, %v4857_v59 }
 0x3b2   : > { %v5136_v21 = vpop.eup %4006  ;;  %v1880_v15 = vmul.f32 1.442695, %v1825_v26  ;;  %v1010_v53 = vpack.c.bf16 %v3905_v39, %v3904_v41  ;;  %v5781_v59 = vsub.f32 %v4850_v63, %v4868_v54 }
 0x3b3   : > { %v1750_v22 = vpop.permute.xlu1 %1749  ;;  %v2351_v27 = vpack.c.bf16 %v5136_v21, %v5134_v24  ;;  %v5147_v42 = vpop.eup %4008  ;;  %v1596_v16 = vmul.f32 1.442695, %v5779_v47  ;;  %v1011_v52 = vpack.c.bf16 %v3890_v48, %v3889_v3  ;;  %v5797_v47 = vld [vmem:[#allocation8_spill] sm:$0xff] }
 0x3b4   : > { %4018 = vpow2.f32 %v1880_v15  ;;  %v1823_v2 = vsub.f32 %v4687_v49, %v1750_v22  ;;  %1981 = vadd.xlane.f32.xlu1 %v1980_v46  ;;  %v1610_v31 = vmul.f32 1.442695, %v5781_v59  ;;  %v5785_v15 = vld [vmem:[#allocation28_spill] sm:$0xff]  ;;  %v5788_v22 = vld [vmem:[#allocation30_spill] sm:$0xff] }
 0x3b5   : > { %3685 = vmatprep.mubr.msk.bf16.mxu0 %vm1417_vm2, %v2351_v27  ;;  %1984 = vadd.xlane.f32.xlu0 %v1983_v18  ;;  %4020 = vpow2.f32 %v1874_v25  ;;  %v5786_v63 = vsub.f32 %v5785_v15, %v4826_v12  ;;  %v5787_v25 = vld [vmem:[#allocation29_spill] sm:$0xff]  ;;  %v5790_v18 = vld [vmem:[#allocation40_spill] sm:$0xff] }
 0x3b6   : > { %v5151_v5 = vpop.eup %4010  ;;  %v1876_v49 = vmul.f32 1.442695, %v1823_v2  ;;  %3686 = vmatmul.mubr.msk.bf16.vlgmr.msra.gmra.mrb[32].mxu0 %vm1417_vm2, %v2352_v13  ;;  %v5789_v46 = vsub.f32 %v5787_v25, %v5788_v22  ;;  %v5791_v39 = vsub.f32 %v5790_v18, %v4922_v19  ;;  %v5794_v19 = vsub.f32 %v5000_v23, %v5010_v6  ;;  %v5803_v18 = vld [vmem:[#allocation18_spill] sm:$0xff] }
 0x3b7   : > { %3710 = vmatpush3.bf16.msra.mxu0 %v4440_v0  ;;  %v2354_v9 = vpack.c.bf16 %v5147_v42, %v5151_v5  ;;  %v5161_v28 = vpop.eup %4012  ;;  %v5778_v0 = vsub.f32 %v4696_v55, %v4707_v60  ;;  %v5780_v55 = vsub.f32 %v4803_v58, %v4813_v8  ;;  %v5782_v8 = vld [vmem:[#allocation31_spill] sm:$0xff]  ;;  %v5783_v58 = vld [vmem:[#allocation33_spill] sm:$0xff]  ;;  %v1614_v54 = vmul.f32 1.442695, %v5786_v63  ;;  %v5802_v63 = vld [vmem:[#allocation16_spill] sm:$0xff] }
 0x3b8   : > { %4022 = vpow2.f32 %v1876_v49  ;;  %3711 = vmatprep.subr.bf16.mxu0 %v1009_v11  ;;  %v5784_v26 = vsub.f32 %v5782_v8, %v5783_v58  ;;  %v1616_v27 = vmul.f32 1.442695, %v5789_v46  ;;  %v1602_v12 = vmul.f32 1.442695, %v5791_v39 }
 0x3b9   : > { %4024 = vpow2.f32 %v1594_v32  ;;  %v1580_v30 = vmul.f32 1.442695, %v5778_v0  ;;  %v1600_v60 = vmul.f32 1.442695, %v5780_v55  ;;  %v5792_v32 = vld [vmem:[#allocation42_spill] sm:$0xff]  ;;  %v5796_v23 = vsub.f32 %v5012_v7, %v5019_v43 }
 0x3ba   : > { %v5164_v34 = vpop.eup %4014  ;;  %4026 = vpow2.f32 %v1598_v33  ;;  %v1612_v38 = vmul.f32 1.442695, %v5784_v26  ;;  %v5793_v49 = vsub.f32 %v5792_v32, %v4931_v29  ;;  %v1630_v3 = vmul.f32 1.442695, %v5794_v19  ;;  %v5804_v32 = vld [vmem:[#allocation12_spill] sm:$0xff] }
 0x3bb   : > { %3712 = vmatpush3.bf16.msra.mxu0 %v1009_v11  ;;  %v2353_v44 = vpack.c.bf16 %v5161_v28, %v5164_v34  ;;  %v5178_v40 = vpop.eup %4016  ;;  %4028 = vpow2.f32 %v1580_v30  ;;  %v5795_v29 = vsub.f32 %v4989_v50, %v4992_v36  ;;  %v1626_v6 = vmul.f32 1.442695, %v5796_v23  ;;  %v5800_v36 = vld [vmem:[#allocation47_spill] sm:$0xff] }
 0x3bc   : > { %3713 = vmatprep.subr.bf16.mxu0 %v1010_v53  ;;  %4030 = vpow2.f32 %v1596_v16  ;;  %v1604_v11 = vmul.f32 1.442695, %v5793_v49  ;;  %v5798_v16 = vld [vmem:[#allocation9_spill] sm:$0xff] }
 0x3bd   : > { %3689 = vmatprep.mubr.msk.bf16.mxu0 %vm1417_vm2, %v2353_v44  ;;  %4032 = vpow2.f32 %v1600_v60  ;;  %v5799_v55 = vsub.f32 %v5797_v47, %v5798_v16  ;;  %v1992_v16 = vsel %vm1417_vm2, %v5119_v10, 0.0  ;;  %v2016_v10 = vsel %vm1417_vm2, %v5099_v1, 0.0  ;;  %v5808_v1 = vld [vmem:[#allocation23_spill] sm:$0xff] }
 0x3be   : > { %v5181_v57 = vpop.eup %4018  ;;  %3690 = vmatmul.mubr.msk.bf16.gmra.mrb[36].mxu0 %vm1417_vm2, %v2354_v9  ;;  %4034 = vpow2.f32 %v1610_v31  ;;  %v1899_v9 = vld [vmem:[#allocation4 + $0x8] sm:$0xff] }
 0x3bf   : > { %3714 = vmatpush3.bf16.msra.mxu0 %v1010_v53  ;;  %v2358_v20 = vpack.c.bf16 %v5181_v57, %v5178_v40  ;;  %v5192_v13 = vpop.eup %4020  ;;  %4036 = vpow2.f32 %v1612_v38  ;;  %v1632_v53 = vmul.f32 1.442695, %v5795_v29  ;;  %v1578_v60 = vmul.f32 1.442695, %v5799_v55 }
 0x3c0   : > { %3715 = vmatprep.subr.bf16.mxu0 %v1011_v52  ;;  %4038 = vpow2.f32 %v1614_v54 }
 0x3c1   : > { %4040 = vpow2.f32 %v1616_v27 }
 0x3c2   : > { %v5194_v35 = vpop.eup %4022  ;;  %4042 = vpow2.f32 %v1602_v12 }
 0x3c3   : > { %3716 = vmatpush3.bf16.msra.mxu0 %v1011_v52  ;;  %v2357_v14 = vpack.c.bf16 %v5194_v35, %v5192_v13  ;;  %v5201_v17 = vpop.eup %4024  ;;  %4044 = vpow2.f32 %v1604_v11  ;;  %v5801_v52 = vsub.f32 %v4994_v51, %v5800_v36 }
 0x3c4   : > { %v5212_v2 = vpop.eup %4026  ;;  %4046 = vpow2.f32 %v1630_v3  ;;  %v5805_v3 = vld [vmem:[#allocation14_spill] sm:$0xff] }
 0x3c5   : > { %2197 = vperm.xlu1 %3906, %v5201_v17   ;;  %3705 = vmatprep.mubr.msk.bf16.mxu1 %vm1417_vm2, %v2357_v14  ;;  %v5217_v41 = vpop.eup %4028  ;;  %4048 = vpow2.f32 %v1632_v53  ;;  %v1898_v14 = vld [vmem:[#allocation4] sm:$0xff] }
 0x3c6   : > { %3706 = vmatmul.mubr.msk.bf16.gmra.mrb[36].mxu1 %vm1417_vm2, %v2358_v20  ;;  %v5220_v56 = vpop.eup %4030  ;;  %v1931_v61 = vmul.f32 %v5217_v41, %v1899_v9  ;;  %v1628_v20 = vmul.f32 1.442695, %v5801_v52  ;;  %4050 = vpow2.f32 %v1626_v6 }
 0x3c7   : > { %v5226_v48 = vpop.eup %4032  ;;  %4052 = vpow2.f32 %v1578_v60 }
 0x3c8   : > { %v5233_v33 = vpop.eup %4034  ;;  %4054 = vpow2.f32 %v1628_v20  ;;  %v1986_v20 = vsel %vm1417_vm2, %v5134_v24, 0.0 }
 0x3c9   : > { %2207 = vperm.xlu1 %3906, %v5212_v2   ;;  %v5239_v44 = vpop.eup %4036 }
 0x3ca   : > { %v5249_v50 = vpop.eup %4038 }
 0x3cb   : > { %2202 = vperm.xlu0 %3907, %v5220_v56   ;;  %v5255_v59 = vpop.eup %4040 }
 0x3cc   : > { %v5258_v7 = vpop.eup %4042 }
 0x3cd   : > { %2212 = vperm.xlu1 %3906, %v5226_v48   ;;  %v5261_v43 = vpop.eup %4044 }
 0x3ce   : > { %v1967_v0 = vpop.xlane.xlu0 %1966  ;;  %v5264_v31 = vpop.eup %4046 }
 0x3cf   : > { %v2059_v30 = vadd.f32 %v1967_v0, %v1931_v61  ;;  %2237 = vperm.xlu0 %3907, %v5233_v33   ;;  %v5267_v51 = vpop.eup %4048 }
 0x3d0   : > { %v5270_v8 = vpop.eup %4050 }
 0x3d1   : > { %2092 = vst.msk [vmem:[#allocation4 + $0x8] sm:$0xff] %vm536_vm3, %v2059_v30  ;;  %2242 = vperm.xlu1 %3906, %v5239_v44   ;;  %v5272_v58 = vpop.eup %4052 }
 0x3d2   : > { %v5275_v38 = vpop.eup %4054  ;;  %v1930_v15 = vmul.f32 %v5272_v58, %v1898_v14  ;;  %v5806_v14 = vld [vmem:[#allocation26_spill] sm:$0xff] }
 0x3d3   : > { %2247 = vperm.xlu0 %3907, %v5249_v50  }
 0x3d5   : > { %2252 = vperm.xlu1 %3906, %v5255_v59  }
 0x3d6   : > { %v1780_v26 = vpop.permute.xlu0 %1779 }
 0x3d7   : > { %2217 = vperm.xlu0 %3907, %v5258_v7   ;;  %v1829_v54 = vsub.f32 %v5802_v63, %v1780_v26  ;;  %v1995_v63 = vsel %vm1417_vm2, %v5122_v4, 0.0  ;;  %v1989_v4 = vsel %vm1417_vm2, %v5136_v21, 0.0  ;;  %v2007_v21 = vsel %vm1417_vm2, %v5147_v42, 0.0 }
 0x3d9   : > { %2222 = vperm.xlu1 %3906, %v5261_v43   ;;  %v1888_v27 = vmul.f32 1.442695, %v1829_v54 }
 0x3da   : > { %v1770_v22 = vpop.permute.xlu0 %1769 }
 0x3db   : > { %2287 = vperm.xlu0 %3907, %v5264_v31   ;;  %v1827_v39 = vsub.f32 %v5803_v18, %v1770_v22  ;;  %4056 = vpow2.f32 %v1888_v27  ;;  %v2019_v18 = vsel %vm1417_vm2, %v5097_v62, 0.0  ;;  %v2004_v62 = vsel %vm1417_vm2, %v5151_v5, 0.0 }
 0x3dc   : > { %v1998_v5 = vsel %vm1417_vm2, %v5164_v34, 0.0 }
 0x3dd   : > { %2292 = vperm.xlu1 %3906, %v5267_v51   ;;  %v1884_v9 = vmul.f32 1.442695, %v1827_v39 }
 0x3df   : > { %2277 = vperm.xlu0 %3907, %v5270_v8  }
 0x3e1   : > { %2282 = vperm.xlu1 %3906, %v5275_v38  }
 0x3e4   : > { %v1964_v25 = vpop.xlane.xlu1 %1963 }
 0x3e5   : > { %v2058_v46 = vadd.f32 %v1964_v25, %v1930_v15  ;;  %v5284_v53 = vpop.eup %4056  ;;  %v2010_v25 = vsel %vm1417_vm2, %v5109_v37, 0.0  ;;  %v2013_v37 = vsel %vm1417_vm2, %v5107_v45, 0.0  ;;  %v2031_v45 = vsel %vm1417_vm2, %v5181_v57, 0.0 }
 0x3e6   : > { %v2025_v57 = vsel %vm1417_vm2, %v5194_v35, 0.0  ;;  %v2043_v34 = vsel %vm1417_vm2, %v5284_v53, 0.0 }
 0x3e7   : > { %2091 = vst.msk [vmem:[#allocation4] sm:$0xff] %vm536_vm3, %v2058_v46  ;;  %v5807_v46 = vld [vmem:[#allocation27_spill] sm:$0xff] }
 0x3e8   : > { %v1775_v12 = vpop.permute.xlu1 %1774 }
 0x3e9   : > { %v1828_v49 = vsub.f32 %v5804_v32, %v1775_v12 }
 0x3eb   : > { %v1886_v11 = vmul.f32 1.442695, %v1828_v49 }
 0x3ec   : > { %v1765_v19 = vpop.permute.xlu1 %1764 }
 0x3ed   : > { %4058 = vpow2.f32 %v1886_v11  ;;  %v1826_v61 = vsub.f32 %v5805_v3, %v1765_v19  ;;  %v5809_v11 = vld [vmem:[#allocation25_spill] sm:$0xff]  ;;  %v2028_v3 = vsel %vm1417_vm2, %v5178_v40, 0.0  ;;  %v2022_v40 = vsel %vm1417_vm2, %v5192_v13, 0.0 }
 0x3ee   : > { %4060 = vpow2.f32 %v1884_v9 }
 0x3ef   : > { %v1882_v29 = vmul.f32 1.442695, %v1826_v61 }
 0x3f1   : > { %4062 = vpow2.f32 %v1882_v29 }
 0x3f7   : > { %v5286_v0 = vpop.eup %4058 }
 0x3f8   : > { %v2360_v30 = vpack.c.bf16 %v5284_v53, %v5286_v0  ;;  %v5290_v23 = vpop.eup %4060 }
 0x3f9   : > { %v2037_v35 = vsel %vm1417_vm2, %v5290_v23, 0.0 }
 0x3fb   : > { %v5292_v6 = vpop.eup %4062 }
 0x3fc   : > { %v2359_v47 = vpack.c.bf16 %v5290_v23, %v5292_v6  ;;  %v2034_v13 = vsel %vm1417_vm2, %v5292_v6, 0.0 }
 0x3fe   : > { %v5298_v55 = vpop.f32.mrb[24].mxu1  ;;  %1993 = vadd.xlane.f32.xlu0 %v1992_v16  ;;  %3717 = vmatprep.mubr.msk.bf16.mxu0 %vm1417_vm2, %v2359_v47 }
 0x3ff   : > { %v5301_v60 = vpop.f32.mrb[25].mxu1  ;;  %3718 = vmatmul.mubr.msk.bf16.vlgmr.msra.gmra.mrb[40].mxu0 %vm1417_vm2, %v2360_v30  ;;  %v2001_v30 = vsel %vm1417_vm2, %v5161_v28, 0.0  ;;  %v2040_v28 = vsel %vm1417_vm2, %v5286_v0, 0.0 }
 0x400   : > { %v5304_v36 = vpop.f32.mrb[26].mxu1 }
 0x401   : > { %v5306_v52 = vpop.f32.mrb[27].mxu1 }
 0x402   : > { %1987 = vadd.xlane.f32.xlu0 %v1986_v20 }
 0x403   : > { %v1800_v26 = vpop.permute.xlu1 %1799 }
 0x404   : > { %v1833_v15 = vsub.f32 %v5806_v14, %v1800_v26  ;;  %v5810_v26 = vld [vmem:[#allocation6_spill] sm:$0xff] }
 0x405   : > { %2017 = vadd.xlane.f32.xlu1 %v2016_v10  ;;  %v5811_v10 = vld [vmem:[#allocation7_spill] sm:$0xff] }
 0x406   : > { %1996 = vadd.xlane.f32.xlu0 %v1995_v63  ;;  %v1896_v22 = vmul.f32 1.442695, %v1833_v15  ;;  %v5812_v14 = vsub.f32 %v5810_v26, %v5811_v10  ;;  %v5813_v63 = vld [vmem:[#allocation21_spill] sm:$0xff]  ;;  %v5833_v26 = vld [vmem:[#allocation38_spill] sm:$0xff] }
 0x407   : > { %v1790_v54 = vpop.permute.xlu1 %1789  ;;  %v5834_v10 = vld [vmem:[#allocation41_spill] sm:$0xff] }
 0x408   : > { %v1831_v27 = vsub.f32 %v5807_v46, %v1790_v54  ;;  %4064 = vpow2.f32 %v1896_v22  ;;  %v1582_v15 = vmul.f32 1.442695, %v5812_v14  ;;  %v5814_v54 = vld [vmem:[#allocation19_spill] sm:$0xff]  ;;  %v5816_v22 = vld [vmem:[#allocation13_spill] sm:$0xff]  ;;  %v5835_v14 = vsub.f32 %v5833_v26, %v5834_v10 }
 0x409   : > { %2011 = vadd.xlane.f32.xlu1 %v2010_v25  ;;  %v1795_v24 = vpop.permute.xlu0 %1794  ;;  %v1550_v0 = vsub.f32 %v5814_v54, %v5813_v63  ;;  %v5815_v25 = vld [vmem:[#allocation10_spill] sm:$0xff] }
 0x40a   : > { %v1832_v39 = vsub.f32 %v5808_v1, %v1795_v24  ;;  %2020 = vadd.xlane.f32.xlu0 %v2019_v18  ;;  %v1892_v32 = vmul.f32 1.442695, %v1831_v27  ;;  %v5817_v46 = vsub.f32 %v5815_v25, %v5816_v22  ;;  %v5818_v27 = vld [vmem:[#allocation24_spill] sm:$0xff]  ;;  %v5819_v24 = vld [vmem:[#allocation22_spill] sm:$0xff]  ;;  %v5820_v1 = vld [vmem:[#allocation15_spill] sm:$0xff] }
 0x40b   : > { %v1551_v18 = vsub.f32 %v5819_v24, %v5818_v27  ;;  %v5837_v25 = vld [vmem:[#allocation45_spill] sm:$0xff]  ;;  %v1902_v24 = vld [vmem:[#allocation4 + $0x20] sm:$0xff] }
 0x40c   : > { %v1894_v12 = vmul.f32 1.442695, %v1832_v39  ;;  %v1584_v53 = vmul.f32 1.442695, %v5817_v46  ;;  %v5821_v39 = vld [vmem:[#allocation11_spill] sm:$0xff] }
 0x40d   : > { %1990 = vadd.xlane.f32.xlu1 %v1989_v4  ;;  %v1785_v49 = vpop.permute.xlu0 %1784  ;;  %v1586_v4 = vmul.f32 1.442695, %v1550_v0  ;;  %v5836_v0 = vld [vmem:[#allocation43_spill] sm:$0xff] }
 0x40e   : > { %4066 = vpow2.f32 %v1894_v12  ;;  %v1830_v9 = vsub.f32 %v5809_v11, %v1785_v49  ;;  %2014 = vadd.xlane.f32.xlu0 %v2013_v37  ;;  %v1552_v12 = vsub.f32 %v5821_v39, %v5820_v1  ;;  %v5823_v49 = vld [vmem:[#allocation17_spill] sm:$0xff]  ;;  %v1588_v11 = vmul.f32 1.442695, %v1551_v18  ;;  %v1903_v1 = vld [vmem:[#allocation4 + $0x28] sm:$0xff]  ;;  %v5839_v39 = vld [vmem:[#allocation50_spill] sm:$0xff] }
 0x40f   : > { %4068 = vpow2.f32 %v1892_v32  ;;  %v5822_v32 = vld [vmem:[#allocation20_spill] sm:$0xff]  ;;  %v5838_v22 = vsub.f32 %v5836_v0, %v5837_v25  ;;  %v5852_v0 = vld [vmem:[#allocation54_spill] sm:$0xff]  ;;  %v5853_v25 = vld [vmem:[#allocation55_spill] sm:$0xff] }
 0x410   : > { %v1890_v19 = vmul.f32 1.442695, %v1830_v9  ;;  %v1553_v37 = vsub.f32 %v5823_v49, %v5822_v32 }
 0x411   : > { %2005 = vadd.xlane.f32.xlu1 %v2004_v62  ;;  %v1590_v62 = vmul.f32 1.442695, %v1552_v12  ;;  %v1618_v46 = vmul.f32 1.442695, %v5838_v22  ;;  %v5840_v12 = vld [vmem:[#allocation52_spill] sm:$0xff]  ;;  %v5854_v22 = vsub.f32 %v5852_v0, %v5853_v25  ;;  %v2142_v0 = vld [vmem:[#allocation5 + $0x98] sm:$0xff] }
 0x412   : > { %4070 = vpow2.f32 %v1890_v19  ;;  %2008 = vadd.xlane.f32.xlu0 %v2007_v21  ;;  %v4065_v61 = vpop.eup %4064  ;;  %v5824_v21 = vld [vmem:[#allocation34_spill] sm:$0xff]  ;;  %v2140_v25 = vld [vmem:[#allocation5 + $0x88] sm:$0xff] }
 0x413   : > { %v2055_v23 = vsel %vm1417_vm2, %v4065_v61, 0.0  ;;  %4072 = vpow2.f32 %v1582_v15  ;;  %v1624_v15 = vmul.f32 1.442695, %v5835_v14 }
 0x414   : > { %4074 = vpow2.f32 %v1584_v53 }
 0x415   : > { %2029 = vadd.xlane.f32.xlu1 %v2028_v3  ;;  %4076 = vpow2.f32 %v1586_v4  ;;  %v5825_v3 = vld [vmem:[#allocation37_spill] sm:$0xff]  ;;  %v5841_v4 = vsub.f32 %v5839_v39, %v5840_v12  ;;  %v5855_v12 = vld [vmem:[#allocation51_spill] sm:$0xff] }
 0x416   : > { %2032 = vadd.xlane.f32.xlu0 %v2031_v45  ;;  %v5826_v45 = vsub.f32 %v5824_v21, %v5825_v3  ;;  %4078 = vpow2.f32 %v1588_v11  ;;  %v5844_v21 = vld [vmem:[#allocation39_spill] sm:$0xff] }
 0x417   : > { %4080 = vpow2.f32 %v1590_v62  ;;  %v1636_v32 = vmul.f32 1.442695, %v5841_v4  ;;  %v5843_v62 = vld [vmem:[#allocation36_spill] sm:$0xff]  ;;  %v5856_v4 = vld [vmem:[#allocation53_spill] sm:$0xff] }
 0x418   : > { %v4067_v29 = vpop.eup %4066  ;;  %v5845_v3 = vsub.f32 %v5843_v62, %v5844_v21 }
 0x419   : > { %1999 = vadd.xlane.f32.xlu1 %v1998_v5  ;;  %v2362_v42 = vpack.c.bf16 %v4065_v61, %v4067_v29  ;;  %v4069_v47 = vpop.eup %4068  ;;  %v2052_v6 = vsel %vm1417_vm2, %v4067_v29, 0.0  ;;  %v1608_v61 = vmul.f32 1.442695, %v5826_v45  ;;  %v1592_v29 = vmul.f32 1.442695, %v1553_v37  ;;  %v5827_v5 = vld [vmem:[#allocation44_spill] sm:$0xff] }
 0x41a   : > { %2002 = vadd.xlane.f32.xlu0 %v2001_v30  ;;  %v2049_v19 = vsel %vm1417_vm2, %v4069_v47, 0.0  ;;  %v5828_v30 = vld [vmem:[#allocation46_spill] sm:$0xff]  ;;  %v1622_v45 = vmul.f32 1.442695, %v5845_v3 }
 0x41b   : > { %4082 = vpow2.f32 %v1608_v61 }
 0x41c   : > { %v4071_v16 = vpop.eup %4070  ;;  %4084 = vpow2.f32 %v1592_v29 }
 0x41d   : > { %2023 = vadd.xlane.f32.xlu1 %v2022_v40  ;;  %v2361_v20 = vpack.c.bf16 %v4069_v47, %v4071_v16  ;;  %v2046_v9 = vsel %vm1417_vm2, %v4071_v16, 0.0  ;;  %v5376_v16 = vpop.eup %4072  ;;  %v5831_v47 = vld [vmem:[#allocation35_spill] sm:$0xff] }
 0x41e   : > { %2026 = vadd.xlane.f32.xlu0 %v2025_v57  ;;  %v5830_v57 = vld [vmem:[#allocation32_spill] sm:$0xff] }
 0x41f   : > { %3721 = vmatprep.mubr.msk.bf16.mxu0 %vm1417_vm2, %v2361_v20  ;;  %v5832_v20 = vsub.f32 %v5830_v57, %v5831_v47 }
 0x420   : > { %3722 = vmatmul.mubr.msk.bf16.gmra.mrb[44].mxu0 %vm1417_vm2, %v2362_v42  ;;  %v5829_v42 = vsub.f32 %v5827_v5, %v5828_v30  ;;  %v1904_v30 = vld [vmem:[#allocation4 + $0x30] sm:$0xff] }
 0x421   : > { %2041 = vadd.xlane.f32.xlu1 %v2040_v28  ;;  %v1606_v28 = vmul.f32 1.442695, %v5832_v20  ;;  %v1905_v20 = vld [vmem:[#allocation4 + $0x38] sm:$0xff] }
 0x422   : > { %2044 = vadd.xlane.f32.xlu0 %v2043_v34  ;;  %v1620_v40 = vmul.f32 1.442695, %v5829_v42  ;;  %v1900_v34 = vld [vmem:[#allocation4 + $0x10] sm:$0xff] }
 0x423   : > { %v1932_v63 = vmul.f32 %v5376_v16, %v1900_v34  ;;  %v5849_v34 = vld [vmem:[#allocation49_spill] sm:$0xff] }
 0x424   : > { %4086 = vpow2.f32 %v1620_v40 }
 0x425   : > { %2035 = vadd.xlane.f32.xlu1 %v2034_v13  ;;  %v5381_v13 = vpop.eup %4074  ;;  %4088 = vpow2.f32 %v1606_v28  ;;  %v5848_v28 = vld [vmem:[#allocation48_spill] sm:$0xff] }
 0x426   : > { %2038 = vadd.xlane.f32.xlu0 %v2037_v35  ;;  %v1901_v35 = vld [vmem:[#allocation4 + $0x18] sm:$0xff]  ;;  %v5387_v54 = vpop.eup %4076  ;;  %4090 = vpow2.f32 %v1624_v15 }
 0x427   : > { %v1933_v27 = vmul.f32 %v5381_v13, %v1901_v35  ;;  %v5393_v18 = vpop.eup %4078  ;;  %4092 = vpow2.f32 %v1618_v46  ;;  %v5850_v35 = vsub.f32 %v5848_v28, %v5849_v34  ;;  %v1634_v46 = vmul.f32 1.442695, %v5854_v22 }
 0x428   : > { %v5398_v37 = vpop.eup %4080  ;;  %v1935_v5 = vmul.f32 %v5393_v18, %v1903_v1  ;;  %4094 = vpow2.f32 %v1636_v32  ;;  %v5857_v32 = vsub.f32 %v5855_v12, %v5856_v4 }
 0x429   : > { %2053 = vadd.xlane.f32.xlu1 %v2052_v6  ;;  %v1640_v26 = vmul.f32 1.442695, %v5850_v35  ;;  %v1936_v15 = vmul.f32 %v5398_v37, %v1904_v30  ;;  %4096 = vpow2.f32 %v1622_v45 }
 0x42a   : > { %2056 = vadd.xlane.f32.xlu0 %v2055_v23 }
 0x42b   : > { %4098 = vpow2.f32 %v1640_v26 }
 0x42c   : > { %4100 = vpow2.f32 %v1634_v46 }
 0x42d   : > { %2047 = vadd.xlane.f32.xlu1 %v2046_v9  ;;  %v1934_v9 = vmul.f32 %v5387_v54, %v1902_v24 }
 0x42e   : > { %2050 = vadd.xlane.f32.xlu0 %v2049_v19  ;;  %v5404_v19 = vpop.eup %4082 }
 0x42f   : > { %v5413_v42 = vpop.eup %4084 }
 0x439   : > { %v1970_v53 = vpop.xlane.xlu1 %1969 }
 0x43a   : > { %v2060_v6 = vadd.f32 %v1970_v53, %v1932_v63  ;;  %v1973_v23 = vpop.xlane.xlu0 %1972  ;;  %v5425_v63 = vpop.eup %4086 }
 0x43b   : > { %v2061_v49 = vadd.f32 %v1973_v23, %v1933_v27  ;;  %v1937_v27 = vmul.f32 %v5413_v42, %v1905_v20  ;;  %v5433_v23 = vpop.eup %4088 }
 0x43c   : > { %2093 = vst.msk [vmem:[#allocation4 + $0x10] sm:$0xff] %vm536_vm3, %v2060_v6  ;;  %v5401_v11 = vpop.f32.mrb[28].mxu1  ;;  %v5437_v39 = vpop.eup %4090 }
 0x43d   : > { %5842 = vst [vmem:[#allocation31_spill] sm:$0xff] %v5401_v11  ;;  %2094 = vst.msk [vmem:[#allocation4 + $0x18] sm:$0xff] %vm536_vm3, %v2061_v49  ;;  %v5410_v61 = vpop.f32.mrb[29].mxu1  ;;  %v1976_v29 = vpop.xlane.xlu1 %1975  ;;  %v1638_v49 = vmul.f32 1.442695, %v5857_v32 }
 0x43e   : > { %5846 = vst [vmem:[#allocation33_spill] sm:$0xff] %v5410_v61  ;;  %v2062_v40 = vadd.f32 %v1976_v29, %v1934_v9  ;;  %v5415_v57 = vpop.f32.mrb[30].mxu1  ;;  %2232 = vperm.xlu1 %3906, %v5404_v19   ;;  %v1979_v47 = vpop.xlane.xlu0 %1978 }
 0x43f   : > { %5847 = vst [vmem:[#allocation28_spill] sm:$0xff] %v5415_v57  ;;  %v2063_v10 = vadd.f32 %v1979_v47, %v1935_v5  ;;  %v5421_v14 = vpop.f32.mrb[31].mxu1  ;;  %v5444_v9 = vpop.eup %4092  ;;  %4102 = vpow2.f32 %v1638_v49 }
 0x440   : > { %5851 = vst [vmem:[#allocation29_spill] sm:$0xff] %v5421_v14  ;;  %2095 = vst.msk [vmem:[#allocation4 + $0x20] sm:$0xff] %vm536_vm3, %v2062_v40  ;;  %v5447_v62 = vpop.eup %4094  ;;  %v2133_v14 = vld [vmem:[#allocation5 + $0x50] sm:$0xff] }
 0x441   : > { %2096 = vst.msk [vmem:[#allocation4 + $0x28] sm:$0xff] %vm536_vm3, %v2063_v10  ;;  %v1982_v53 = vpop.xlane.xlu1 %1981  ;;  %v5450_v21 = vpop.eup %4096  ;;  %v2141_v10 = vld [vmem:[#allocation5 + $0x90] sm:$0xff] }
 0x442   : > { %v2064_v24 = vadd.f32 %v1982_v53, %v1936_v15  ;;  %2262 = vperm.xlu1 %3906, %v5425_v63   ;;  %v1985_v6 = vpop.xlane.xlu0 %1984  ;;  %v5453_v3 = vpop.eup %4098  ;;  %v2139_v15 = vld [vmem:[#allocation5 + $0x80] sm:$0xff] }
 0x443   : > { %v2065_v1 = vadd.f32 %v1985_v6, %v1937_v27  ;;  %v5456_v45 = vpop.eup %4100 }
 0x444   : > { %2097 = vst.msk [vmem:[#allocation4 + $0x30] sm:$0xff] %vm536_vm3, %v2064_v24  ;;  %2227 = vperm.xlu0 %3907, %v5433_v23  }
 0x445   : > { %2098 = vst.msk [vmem:[#allocation4 + $0x38] sm:$0xff] %vm536_vm3, %v2065_v1  ;;  %v2198_v5 = vpop.permute.xlu1 %2197 }
 0x446   : > { %2272 = vperm.xlu1 %3906, %v5437_v39  }
 0x448   : > { %2257 = vperm.xlu0 %3907, %v5444_v9  }
 0x449   : > { %v5459_v29 = vpop.eup %4102  ;;  %v2208_v40 = vpop.permute.xlu1 %2207 }
 0x44a   : > { %2302 = vperm.xlu1 %3906, %v5447_v62   ;;  %v2203_v30 = vpop.permute.xlu0 %2202 }
 0x44c   : > { %2267 = vperm.xlu0 %3907, %v5450_v21  }
 0x44d   : > { %v2213_v20 = vpop.permute.xlu1 %2212 }
 0x44e   : > { %2312 = vperm.xlu1 %3906, %v5453_v3   ;;  %v2238_v47 = vpop.permute.xlu0 %2237 }
 0x44f   : > { %v2331_v46 = vmul.f32 %v2238_v47, %v2139_v15  ;;  %v2134_v47 = vld [vmem:[#allocation5 + $0x58] sm:$0xff]  ;;  %v2132_v15 = vld [vmem:[#allocation5 + $0x48] sm:$0xff] }
 0x450   : > { %2297 = vperm.xlu0 %3907, %v5456_v45  }
 0x451   : > { %v2243_v34 = vpop.permute.xlu1 %2242 }
 0x452   : > { %v2248_v28 = vpop.permute.xlu0 %2247  ;;  %v2332_v4 = vmul.f32 %v2243_v34, %v2140_v25  ;;  %v2325_v34 = vmul.f32 %v2208_v40, %v2133_v14 }
 0x453   : > { %v2333_v22 = vmul.f32 %v2248_v28, %v2141_v10  ;;  %v2131_v28 = vld [vmem:[#allocation5 + $0x40] sm:$0xff] }
 0x454   : > { %2307 = vperm.xlu0 %3907, %v5459_v29   ;;  %v2323_v25 = vmul.f32 %v2198_v5, %v2131_v28  ;;  %v2135_v5 = vld [vmem:[#allocation5 + $0x60] sm:$0xff] }
 0x455   : > { %v2253_v26 = vpop.permute.xlu1 %2252 }
 0x456   : > { %v2218_v35 = vpop.permute.xlu0 %2217  ;;  %v2334_v24 = vmul.f32 %v2253_v26, %v2142_v0  ;;  %v1908_v26 = vld [vmem:[#allocation4 + $0x50] sm:$0xff] }
 0x459   : > { %v2223_v6 = vpop.permute.xlu1 %2222 }
 0x45a   : > { %v5462_v53 = vpop.permute.xlu0 %2287 }
 0x45d   : > { %v5470_v0 = vpop.permute.xlu1 %2292 }
 0x45e   : > { %v5467_v10 = vpop.permute.xlu0 %2277 }
 0x461   : > { %v5475_v28 = vpop.permute.xlu1 %2282 }
 0x481   : > { %v3703_v27 = vpop.f32.mrb[32].mxu1 }
 0x482   : > { %v2689_v1 = vadd.f32 %v3703_v27, %v2333_v22  ;;  %v2563_v12 = vpop.f32.mrb[33].mxu1 }
 0x483   : > { %v2687_v32 = vadd.f32 %v2563_v12, %v2331_v46  ;;  %v3704_v49 = vpop.f32.mrb[34].mxu1  ;;  %v2326_v46 = vmul.f32 %v2213_v20, %v2134_v47  ;;  %v1909_v47 = vld [vmem:[#allocation4 + $0x58] sm:$0xff] }
 0x484   : > { %2721 = vst.msk [vmem:[#allocation5 + $0x90] sm:$0xff] %vm476_vm1, %v2689_v1  ;;  %v2690_v57 = vadd.f32 %v3704_v49, %v2334_v24  ;;  %v2566_v11 = vpop.f32.mrb[35].mxu1  ;;  %v2324_v1 = vmul.f32 %v2203_v30, %v2132_v15  ;;  %v1916_v30 = vld [vmem:[#allocation4 + $0x90] sm:$0xff]  ;;  %v2327_v15 = vmul.f32 %v2218_v35, %v2135_v5 }
 0x485   : > { %2719 = vst.msk [vmem:[#allocation5 + $0x80] sm:$0xff] %vm476_vm1, %v2687_v32  ;;  %v2688_v61 = vadd.f32 %v2566_v11, %v2332_v4  ;;  %v1940_v11 = vmul.f32 %v5212_v2, %v1908_v26  ;;  %v1906_v32 = vld [vmem:[#allocation4 + $0x40] sm:$0xff]  ;;  %v2136_v26 = vld [vmem:[#allocation5 + $0x68] sm:$0xff] }
 0x486   : > { %2722 = vst.msk [vmem:[#allocation5 + $0x98] sm:$0xff] %vm476_vm1, %v2690_v57  ;;  %v1938_v2 = vmul.f32 %v5201_v17, %v1906_v32  ;;  %v2328_v17 = vmul.f32 %v2223_v6, %v2136_v26  ;;  %v1917_v32 = vld [vmem:[#allocation4 + $0x98] sm:$0xff] }
 0x487   : > { %2720 = vst.msk [vmem:[#allocation5 + $0x88] sm:$0xff] %vm476_vm1, %v2688_v61  ;;  %v1949_v6 = vmul.f32 %v5255_v59, %v1917_v32 }
 0x489   : > { %v3687_v22 = vpop.f32.mrb[32].mxu0 }
 0x48a   : > { %v2681_v27 = vadd.f32 %v3687_v22, %v2325_v34  ;;  %v2486_v24 = vpop.f32.mrb[33].mxu0  ;;  %v1948_v22 = vmul.f32 %v5249_v50, %v1916_v30  ;;  %v1915_v30 = vld [vmem:[#allocation4 + $0x88] sm:$0xff] }
 0x48b   : > { %v2679_v12 = vadd.f32 %v2486_v24, %v2323_v25  ;;  %v3688_v57 = vpop.f32.mrb[34].mxu0  ;;  %v1994_v4 = vpop.xlane.xlu0 %1993  ;;  %v1941_v24 = vmul.f32 %v5226_v48, %v1909_v47  ;;  %v1947_v59 = vmul.f32 %v5239_v44, %v1915_v30 }
 0x48c   : > { %2713 = vst.msk [vmem:[#allocation5 + $0x50] sm:$0xff] %vm476_vm1, %v2681_v27  ;;  %v2682_v61 = vadd.f32 %v3688_v57, %v2326_v46  ;;  %v2068_v49 = vadd.f32 %v1994_v4, %v1940_v11  ;;  %v2489_v14 = vpop.f32.mrb[35].mxu0  ;;  %v1914_v11 = vld [vmem:[#allocation4 + $0x80] sm:$0xff] }
 0x48d   : > { %2711 = vst.msk [vmem:[#allocation5 + $0x40] sm:$0xff] %vm476_vm1, %v2679_v12  ;;  %v2680_v40 = vadd.f32 %v2489_v14, %v2324_v1  ;;  %v1946_v14 = vmul.f32 %v5233_v33, %v1914_v11 }
 0x48e   : > { %2714 = vst.msk [vmem:[#allocation5 + $0x58] sm:$0xff] %vm476_vm1, %v2682_v61 }
 0x48f   : > { %2101 = vst.msk [vmem:[#allocation4 + $0x50] sm:$0xff] %vm536_vm3, %v2068_v49  ;;  %v1988_v20 = vpop.xlane.xlu0 %1987 }
 0x490   : > { %2712 = vst.msk [vmem:[#allocation5 + $0x48] sm:$0xff] %vm476_vm1, %v2680_v40  ;;  %v2066_v34 = vadd.f32 %v1988_v20, %v1938_v2  ;;  %v1907_v40 = vld [vmem:[#allocation4 + $0x48] sm:$0xff] }
 0x491   : > { %v5481_v25 = vpop.f32.mrb[36].mxu0  ;;  %v1939_v26 = vmul.f32 %v5220_v56, %v1907_v40 }
 0x492   : > { %2099 = vst.msk [vmem:[#allocation4 + $0x40] sm:$0xff] %vm536_vm3, %v2066_v34  ;;  %v2018_v46 = vpop.xlane.xlu1 %2017  ;;  %v2502_v27 = vpop.f32.mrb[37].mxu0 }
 0x493   : > { %v2076_v1 = vadd.f32 %v2018_v46, %v1948_v22  ;;  %v2683_v12 = vadd.f32 %v2502_v27, %v2327_v15  ;;  %v5486_v57 = vpop.f32.mrb[38].mxu0  ;;  %v1997_v4 = vpop.xlane.xlu0 %1996  ;;  %v1912_v15 = vld [vmem:[#allocation4 + $0x70] sm:$0xff] }
 0x494   : > { %v2069_v61 = vadd.f32 %v1997_v4, %v1941_v24  ;;  %v2505_v35 = vpop.f32.mrb[39].mxu0  ;;  %v1913_v24 = vld [vmem:[#allocation4 + $0x78] sm:$0xff]  ;;  %v1944_v56 = vmul.f32 %v5433_v23, %v1912_v15 }
 0x495   : > { %2109 = vst.msk [vmem:[#allocation4 + $0x90] sm:$0xff] %vm536_vm3, %v2076_v1  ;;  %v2684_v50 = vadd.f32 %v2505_v35, %v2328_v17  ;;  %v1945_v32 = vmul.f32 %v5404_v19, %v1913_v24 }
 0x496   : > { %v2812_v49 = vld [vmem:[#allocation4 + $0x50] sm:$0xff]  ;;  %2715 = vst.msk [vmem:[#allocation5 + $0x60] sm:$0xff] %vm476_vm1, %v2683_v12  ;;  %v2012_v48 = vpop.xlane.xlu1 %2011 }
 0x497   : > { %4104 = vrcp.f32 %v2812_v49  ;;  %2102 = vst.msk [vmem:[#allocation4 + $0x58] sm:$0xff] %vm536_vm3, %v2069_v61  ;;  %v2074_v5 = vadd.f32 %v2012_v48, %v1946_v14  ;;  %v2021_v2 = vpop.xlane.xlu0 %2020  ;;  %v1920_v61 = vld [vmem:[#allocation4 + $0xb0] sm:$0xff] }
 0x498   : > { %2716 = vst.msk [vmem:[#allocation5 + $0x68] sm:$0xff] %vm476_vm1, %v2684_v50  ;;  %v2077_v20 = vadd.f32 %v2021_v2, %v1949_v6  ;;  %v1921_v50 = vld [vmem:[#allocation4 + $0xb8] sm:$0xff]  ;;  %v1952_v23 = vmul.f32 %v5450_v21, %v1920_v61  ;;  %v1910_v2 = vld [vmem:[#allocation4 + $0x60] sm:$0xff]  ;;  %v1924_v61 = vld [vmem:[#allocation4 + $0xd0] sm:$0xff] }
 0x499   : > { %2107 = vst.msk [vmem:[#allocation4 + $0x80] sm:$0xff] %vm536_vm3, %v2074_v5  ;;  %v5495_v47 = vpop.f32.mrb[36].mxu1  ;;  %v2810_v4 = vld [vmem:[#allocation4 + $0x40] sm:$0xff]  ;;  %v1953_v19 = vmul.f32 %v5437_v39, %v1921_v50  ;;  %v1942_v15 = vmul.f32 %v5258_v7, %v1910_v2 }
 0x49a   : > { %2110 = vst.msk [vmem:[#allocation4 + $0x98] sm:$0xff] %vm536_vm3, %v2077_v20  ;;  %v1991_v33 = vpop.xlane.xlu1 %1990  ;;  %v5499_v34 = vpop.f32.mrb[37].mxu1 }
 0x49b   : > { %v2067_v22 = vadd.f32 %v1991_v33, %v1939_v26  ;;  %v5502_v46 = vpop.f32.mrb[38].mxu1  ;;  %v2015_v27 = vpop.xlane.xlu0 %2014  ;;  %v1911_v26 = vld [vmem:[#allocation4 + $0x68] sm:$0xff] }
 0x49c   : > { %v2820_v11 = vld [vmem:[#allocation4 + $0x90] sm:$0xff]  ;;  %v2075_v17 = vadd.f32 %v2015_v27, %v1947_v59  ;;  %v5504_v1 = vpop.f32.mrb[39].mxu1  ;;  %v1918_v27 = vld [vmem:[#allocation4 + $0xa0] sm:$0xff] }
 0x49d   : > { %4106 = vrcp.f32 %v2820_v11  ;;  %2100 = vst.msk [vmem:[#allocation4 + $0x48] sm:$0xff] %vm536_vm3, %v2067_v22  ;;  %v1943_v22 = vmul.f32 %v5261_v43, %v1911_v26  ;;  %v1950_v7 = vmul.f32 %v5444_v9, %v1918_v27  ;;  %v1956_v9 = vmul.f32 %v5264_v31, %v1924_v61  ;;  %v1923_v26 = vld [vmem:[#allocation4 + $0xc8] sm:$0xff] }
 0x49e   : > { %v2813_v12 = vld [vmem:[#allocation4 + $0x58] sm:$0xff]  ;;  %2108 = vst.msk [vmem:[#allocation4 + $0x88] sm:$0xff] %vm536_vm3, %v2075_v17  ;;  %v2006_v44 = vpop.xlane.xlu1 %2005  ;;  %v1927_v61 = vld [vmem:[#allocation4 + $0xe8] sm:$0xff] }
 0x49f   : > { %4108 = vrcp.f32 %v2813_v12  ;;  %v2072_v35 = vadd.f32 %v2006_v44, %v1944_v56  ;;  %v2009_v49 = vpop.xlane.xlu0 %2008  ;;  %v1919_v12 = vld [vmem:[#allocation4 + $0xa8] sm:$0xff] }
 0x4a0   : > { %v2073_v48 = vadd.f32 %v2009_v49, %v1945_v32  ;;  %4110 = vrcp.f32 %v2810_v4  ;;  %v2818_v6 = vld [vmem:[#allocation4 + $0x80] sm:$0xff]  ;;  %v1951_v32 = vmul.f32 %v5425_v63, %v1919_v12 }
 0x4a1   : > { %v4105_v14 = vpop.eup %4104  ;;  %v2821_v40 = vld [vmem:[#allocation4 + $0x98] sm:$0xff]  ;;  %2105 = vst.msk [vmem:[#allocation4 + $0x70] sm:$0xff] %vm536_vm3, %v2072_v35 }
 0x4a2   : > { %2918 = vperm.xlu0 %3907, %v4105_v14   ;;  %4112 = vrcp.f32 %v2821_v40  ;;  %2106 = vst.msk [vmem:[#allocation4 + $0x78] sm:$0xff] %vm536_vm3, %v2073_v48  ;;  %v2030_v5 = vpop.xlane.xlu1 %2029  ;;  %v1925_v48 = vld [vmem:[#allocation4 + $0xd8] sm:$0xff] }
 0x4a3   : > { %v2080_v30 = vadd.f32 %v2030_v5, %v1952_v23  ;;  %v2033_v20 = vpop.xlane.xlu0 %2032  ;;  %4114 = vrcp.f32 %v2818_v6  ;;  %v1957_v63 = vmul.f32 %v5267_v51, %v1925_v48  ;;  %v1955_v51 = vmul.f32 %v5275_v38, %v1923_v26 }
 0x4a4   : > { %v2811_v33 = vld [vmem:[#allocation4 + $0x48] sm:$0xff]  ;;  %v2081_v59 = vadd.f32 %v2033_v20, %v1953_v19  ;;  %v1922_v19 = vld [vmem:[#allocation4 + $0xc0] sm:$0xff] }
 0x4a5   : > { %4116 = vrcp.f32 %v2811_v33  ;;  %2113 = vst.msk [vmem:[#allocation4 + $0xb0] sm:$0xff] %vm536_vm3, %v2080_v30  ;;  %v2819_v39 = vld [vmem:[#allocation4 + $0x88] sm:$0xff]  ;;  %v1954_v31 = vmul.f32 %v5270_v8, %v1922_v19  ;;  %v2138_v19 = vld [vmem:[#allocation5 + $0x78] sm:$0xff] }
 0x4a6   : > { %2114 = vst.msk [vmem:[#allocation4 + $0xb8] sm:$0xff] %vm536_vm3, %v2081_v59  ;;  %v2000_v21 = vpop.xlane.xlu1 %1999 }
 0x4a7   : > { %v4107_v24 = vpop.eup %4106  ;;  %v2070_v11 = vadd.f32 %v2000_v21, %v1942_v15  ;;  %v2003_v17 = vpop.xlane.xlu0 %2002 }
 0x4a8   : > { %v2816_v4 = vld [vmem:[#allocation4 + $0x70] sm:$0xff]  ;;  %v2071_v44 = vadd.f32 %v2003_v17, %v1943_v22  ;;  %2958 = vperm.xlu0 %3907, %v4107_v24  }
 0x4a9   : > { %v4109_v56 = vpop.eup %4108  ;;  %4118 = vrcp.f32 %v2816_v4  ;;  %2103 = vst.msk [vmem:[#allocation4 + $0x60] sm:$0xff] %vm536_vm3, %v2070_v11  ;;  %v2817_v49 = vld [vmem:[#allocation4 + $0x78] sm:$0xff]  ;;  %v1928_v22 = vld [vmem:[#allocation4 + $0xf0] sm:$0xff] }
 0x4aa   : > { %2923 = vperm.xlu1 %3906, %v4109_v56   ;;  %4120 = vrcp.f32 %v2819_v39  ;;  %2104 = vst.msk [vmem:[#allocation4 + $0x68] sm:$0xff] %vm536_vm3, %v2071_v44  ;;  %v2024_v43 = vpop.xlane.xlu1 %2023  ;;  %v4111_v35 = vpop.eup %4110  ;;  %v1929_v11 = vld [vmem:[#allocation4 + $0xf8] sm:$0xff]  ;;  %v1960_v8 = vmul.f32 %v5459_v29, %v1928_v22 }
 0x4ab   : > { %v2078_v50 = vadd.f32 %v2024_v43, %v1950_v7  ;;  %v2027_v14 = vpop.xlane.xlu0 %2026  ;;  %4122 = vrcp.f32 %v2817_v49  ;;  %v1961_v44 = vmul.f32 %v5453_v3, %v1929_v11  ;;  %v1926_v7 = vld [vmem:[#allocation4 + $0xe0] sm:$0xff]  ;;  %v1959_v3 = vmul.f32 %v5447_v62, %v1927_v61 }
 0x4ac   : > { %v4113_v6 = vpop.eup %4112  ;;  %v2079_v40 = vadd.f32 %v2027_v14, %v1951_v32  ;;  %2908 = vperm.xlu0 %3907, %v4111_v35   ;;  %v1958_v29 = vmul.f32 %v5456_v45, %v1926_v7  ;;  %v2824_v45 = vld [vmem:[#allocation4 + $0xb0] sm:$0xff] }
 0x4ad   : > { %2111 = vst.msk [vmem:[#allocation4 + $0xa0] sm:$0xff] %vm536_vm3, %v2078_v50  ;;  %v4115_v23 = vpop.eup %4114  ;;  %v2825_v62 = vld [vmem:[#allocation4 + $0xb8] sm:$0xff] }
 0x4ae   : > { %2963 = vperm.xlu1 %3906, %v4113_v6   ;;  %2112 = vst.msk [vmem:[#allocation4 + $0xa8] sm:$0xff] %vm536_vm3, %v2079_v40  ;;  %v2042_v5 = vpop.xlane.xlu1 %2041 }
 0x4af   : > { %v4117_v2 = vpop.eup %4116  ;;  %v2084_v30 = vadd.f32 %v2042_v5, %v1956_v9  ;;  %v2045_v20 = vpop.xlane.xlu0 %2044 }
 0x4b0   : > { %v2814_v33 = vld [vmem:[#allocation4 + $0x60] sm:$0xff]  ;;  %v2085_v59 = vadd.f32 %v2045_v20, %v1957_v63  ;;  %2948 = vperm.xlu0 %3907, %v4115_v23  }
 0x4b1   : > { %4124 = vrcp.f32 %v2814_v33  ;;  %v2815_v15 = vld [vmem:[#allocation4 + $0x68] sm:$0xff]  ;;  %2117 = vst.msk [vmem:[#allocation4 + $0xd0] sm:$0xff] %vm536_vm3, %v2084_v30 }
 0x4b2   : > { %2913 = vperm.xlu1 %3906, %v4117_v2   ;;  %4126 = vrcp.f32 %v2815_v15  ;;  %2118 = vst.msk [vmem:[#allocation4 + $0xd8] sm:$0xff] %vm536_vm3, %v2085_v59  ;;  %v2036_v21 = vpop.xlane.xlu1 %2035  ;;  %v2144_v59 = vld [vmem:[#allocation5 + $0xa8] sm:$0xff] }
 0x4b3   : > { %v4119_v27 = vpop.eup %4118  ;;  %v2082_v24 = vadd.f32 %v2036_v21, %v1954_v31  ;;  %v2039_v39 = vpop.xlane.xlu0 %2038  ;;  %v2137_v31 = vld [vmem:[#allocation5 + $0x70] sm:$0xff] }
 0x4b4   : > { %v4121_v17 = vpop.eup %4120  ;;  %v2822_v12 = vld [vmem:[#allocation4 + $0xa0] sm:$0xff]  ;;  %v2083_v56 = vadd.f32 %v2039_v39, %v1955_v51  ;;  %2938 = vperm.xlu0 %3907, %v4119_v27  }
 0x4b5   : > { %4128 = vrcp.f32 %v2822_v12  ;;  %v2823_v4 = vld [vmem:[#allocation4 + $0xa8] sm:$0xff]  ;;  %2115 = vst.msk [vmem:[#allocation4 + $0xc0] sm:$0xff] %vm536_vm3, %v2082_v24  ;;  %v4123_v35 = vpop.eup %4122 }
 0x4b6   : > { %2953 = vperm.xlu1 %3906, %v4121_v17   ;;  %4130 = vrcp.f32 %v2823_v4  ;;  %2116 = vst.msk [vmem:[#allocation4 + $0xc8] sm:$0xff] %vm536_vm3, %v2083_v56  ;;  %v2054_v38 = vpop.xlane.xlu1 %2053  ;;  %v2146_v17 = vld [vmem:[#allocation5 + $0xb8] sm:$0xff] }
 0x4b7   : > { %v2088_v43 = vadd.f32 %v2054_v38, %v1960_v8  ;;  %v2057_v32 = vpop.xlane.xlu0 %2056 }
 0x4b8   : > { %v2828_v49 = vld [vmem:[#allocation4 + $0xd0] sm:$0xff]  ;;  %v2089_v50 = vadd.f32 %v2057_v32, %v1961_v44 }
 0x4b9   : > { %4132 = vrcp.f32 %v2828_v49  ;;  %v2829_v14 = vld [vmem:[#allocation4 + $0xd8] sm:$0xff]  ;;  %2121 = vst.msk [vmem:[#allocation4 + $0xf0] sm:$0xff] %vm536_vm3, %v2088_v43  ;;  %v2145_v49 = vld [vmem:[#allocation5 + $0xb0] sm:$0xff] }
 0x4ba   : > { %2943 = vperm.xlu1 %3906, %v4123_v35   ;;  %4134 = vrcp.f32 %v2829_v14  ;;  %2122 = vst.msk [vmem:[#allocation4 + $0xf8] sm:$0xff] %vm536_vm3, %v2089_v50  ;;  %v2048_v48 = vpop.xlane.xlu1 %2047 }
 0x4bb   : > { %v4125_v6 = vpop.eup %4124  ;;  %v2086_v40 = vadd.f32 %v2048_v48, %v1958_v29  ;;  %v2051_v9 = vpop.xlane.xlu0 %2050 }
 0x4bc   : > { %v4127_v23 = vpop.eup %4126  ;;  %v2826_v5 = vld [vmem:[#allocation4 + $0xc0] sm:$0xff]  ;;  %v2087_v63 = vadd.f32 %v2051_v9, %v1959_v3  ;;  %2928 = vperm.xlu0 %3907, %v4125_v6   ;;  %v2149_v3 = vld [vmem:[#allocation5 + $0xd0] sm:$0xff] }
 0x4bd   : > { %4136 = vrcp.f32 %v2826_v5  ;;  %v2827_v2 = vld [vmem:[#allocation4 + $0xc8] sm:$0xff]  ;;  %2119 = vst.msk [vmem:[#allocation4 + $0xe0] sm:$0xff] %vm536_vm3, %v2086_v40 }
 0x4be   : > { %2933 = vperm.xlu1 %3906, %v4127_v23   ;;  %4138 = vrcp.f32 %v2827_v2  ;;  %2120 = vst.msk [vmem:[#allocation4 + $0xe8] sm:$0xff] %vm536_vm3, %v2087_v63  ;;  %v2233_v30 = vpop.permute.xlu1 %2232  ;;  %v2150_v23 = vld [vmem:[#allocation5 + $0xd8] sm:$0xff]  ;;  %v2148_v5 = vld [vmem:[#allocation5 + $0xc8] sm:$0xff] }
 0x4bf   : > { %v4129_v20 = vpop.eup %4128  ;;  %v2330_v26 = vmul.f32 %v2233_v30, %v2138_v19  ;;  %4140 = vrcp.f32 %v2824_v45  ;;  %v2342_v45 = vmul.f32 %v5470_v0, %v2150_v23  ;;  %v2802_v0 = vld [vmem:[#allocation4] sm:$0xff] }
 0x4c0   : > { %v4131_v33 = vpop.eup %4130  ;;  %2968 = vperm.xlu0 %3907, %v4129_v20   ;;  %4142 = vrcp.f32 %v2825_v62  ;;  %v2832_v4 = vld [vmem:[#allocation4 + $0xf0] sm:$0xff]  ;;  %v2340_v62 = vmul.f32 %v5475_v28, %v2148_v5  ;;  %v2803_v28 = vld [vmem:[#allocation4 + $0x8] sm:$0xff]  ;;  %v2789_v5 = vld [vmem:[#allocation5 + $0x98] sm:$0xff] }
 0x4c1   : > { %v2686_v15 = vadd.f32 %v5486_v57, %v2330_v26  ;;  %v2143_v57 = vld [vmem:[#allocation5 + $0xa0] sm:$0xff]  ;;  %v2833_v7 = vld [vmem:[#allocation4 + $0xf8] sm:$0xff] }
 0x4c2   : > { %2973 = vperm.xlu1 %3906, %v4131_v33   ;;  %v2263_v21 = vpop.permute.xlu1 %2262 }
 0x4c3   : > { %v4133_v51 = vpop.eup %4132  ;;  %2718 = vst.msk [vmem:[#allocation5 + $0x78] sm:$0xff] %vm476_vm1, %v2686_v15  ;;  %v2336_v22 = vmul.f32 %v2263_v21, %v2144_v59  ;;  %v2228_v27 = vpop.permute.xlu0 %2227  ;;  %v2804_v15 = vld [vmem:[#allocation4 + $0x10] sm:$0xff]  ;;  %v2806_v21 = vld [vmem:[#allocation4 + $0x20] sm:$0xff] }
 0x4c4   : > { %v4135_v24 = vpop.eup %4134  ;;  %v2830_v39 = vld [vmem:[#allocation4 + $0xe0] sm:$0xff]  ;;  %v2329_v11 = vmul.f32 %v2228_v27, %v2137_v31  ;;  %2998 = vperm.xlu0 %3907, %v4133_v51   ;;  %v2805_v31 = vld [vmem:[#allocation4 + $0x18] sm:$0xff] }
 0x4c5   : > { %4144 = vrcp.f32 %v2830_v39  ;;  %v2831_v12 = vld [vmem:[#allocation4 + $0xe8] sm:$0xff]  ;;  %v2692_v56 = vadd.f32 %v5504_v1, %v2336_v22 }
 0x4c6   : > { %3003 = vperm.xlu1 %3906, %v4135_v24   ;;  %4146 = vrcp.f32 %v2831_v12  ;;  %v2685_v8 = vadd.f32 %v5481_v25, %v2329_v11  ;;  %v2273_v38 = vpop.permute.xlu1 %2272 }
 0x4c7   : > { %v4137_v44 = vpop.eup %4136  ;;  %2724 = vst.msk [vmem:[#allocation5 + $0xa8] sm:$0xff] %vm476_vm1, %v2692_v56  ;;  %v2338_v43 = vmul.f32 %v2273_v38, %v2146_v17  ;;  %v2258_v32 = vpop.permute.xlu0 %2257  ;;  %4148 = vrcp.f32 %v2832_v4  ;;  %v2154_v17 = vld [vmem:[#allocation5 + $0xf8] sm:$0xff]  ;;  %v2152_v56 = vld [vmem:[#allocation5 + $0xe8] sm:$0xff] }
 0x4c8   : > { %v4139_v61 = vpop.eup %4138  ;;  %2717 = vst.msk [vmem:[#allocation5 + $0x70] sm:$0xff] %vm476_vm1, %v2685_v8  ;;  %v2335_v35 = vmul.f32 %v2258_v32, %v2143_v57  ;;  %2988 = vperm.xlu0 %3907, %v4137_v44   ;;  %4150 = vrcp.f32 %v2833_v7 }
 0x4c9   : > { %v2694_v1 = vadd.f32 %v5502_v46, %v2338_v43  ;;  %v4141_v50 = vpop.eup %4140  ;;  %v2147_v46 = vld [vmem:[#allocation5 + $0xc0] sm:$0xff]  ;;  %4152 = vrcp.f32 %v2802_v0 }
 0x4ca   : > { %2993 = vperm.xlu1 %3906, %v4139_v61   ;;  %v2691_v25 = vadd.f32 %v5499_v34, %v2335_v35  ;;  %v4143_v29 = vpop.eup %4142  ;;  %v2341_v34 = vmul.f32 %v5462_v53, %v2149_v3  ;;  %v2339_v63 = vmul.f32 %v5467_v10, %v2147_v46  ;;  %4154 = vrcp.f32 %v2803_v28  ;;  %v2781_v3 = vld [vmem:[#allocation5 + $0x58] sm:$0xff] }
 0x4cb   : > { %2726 = vst.msk [vmem:[#allocation5 + $0xb8] sm:$0xff] %vm476_vm1, %v2694_v1  ;;  %v2268_v14 = vpop.permute.xlu0 %2267  ;;  %4156 = vrcp.f32 %v2804_v15 }
 0x4cc   : > { %2723 = vst.msk [vmem:[#allocation5 + $0xa0] sm:$0xff] %vm476_vm1, %v2691_v25  ;;  %v2337_v48 = vmul.f32 %v2268_v14, %v2145_v49  ;;  %2978 = vperm.xlu0 %3907, %v4141_v50   ;;  %4158 = vrcp.f32 %v2805_v31 }
 0x4cd   : > { %4160 = vrcp.f32 %v2806_v21  ;;  %v3974_v21 = vld [vmem:[%s5673_s5] sm:$0xff]  }
 0x4ce   : > { %2983 = vperm.xlu1 %3906, %v4143_v29   ;;  %v2693_v6 = vadd.f32 %v5495_v47, %v2337_v48  ;;  %v2780_v48 = vld [vmem:[#allocation5 + $0x50] sm:$0xff]  ;;  %3725 = vmatprep.subr.bf16.mxu1 %v3974_v21 }
 0x4cf   : > { %v4145_v40 = vpop.eup %4144  ;;  %v2298_v22 = vpop.permute.xlu0 %2297  ;;  %3726 = vmatpush3.bf16.msra.mxu1 %v3974_v21 }
 0x4d0   : > { %v4147_v9 = vpop.eup %4146  ;;  %2725 = vst.msk [vmem:[#allocation5 + $0xb0] sm:$0xff] %vm476_vm1, %v2693_v6  ;;  %3008 = vperm.xlu0 %3907, %v4145_v40  }
 0x4d1   : > { %v4149_v2 = vpop.eup %4148 }
 0x4d2   : > { %3013 = vperm.xlu1 %3906, %v4147_v9   ;;  %v3719_v19 = vpop.f32.mrb[40].mxu0  ;;  %v4151_v47 = vpop.eup %4150 }
 0x4d3   : > { %v2697_v30 = vadd.f32 %v3719_v19, %v2341_v34  ;;  %v2640_v20 = vpop.f32.mrb[41].mxu0  ;;  %v2308_v39 = vpop.permute.xlu0 %2307  ;;  %v2788_v34 = vld [vmem:[#allocation5 + $0x90] sm:$0xff] }
 0x4d4   : > { %v2695_v26 = vadd.f32 %v2640_v20, %v2339_v63  ;;  %v3720_v33 = vpop.f32.mrb[42].mxu0  ;;  %3018 = vperm.xlu0 %3907, %v4149_v2  }
 0x4d5   : > { %2729 = vst.msk [vmem:[#allocation5 + $0xd0] sm:$0xff] %vm476_vm1, %v2697_v30  ;;  %v2698_v59 = vadd.f32 %v3720_v33, %v2342_v45  ;;  %v2643_v53 = vpop.f32.mrb[43].mxu0  ;;  %v2778_v30 = vld [vmem:[#allocation5 + $0x40] sm:$0xff] }
 0x4d6   : > { %3023 = vperm.xlu1 %3906, %v4151_v47   ;;  %2727 = vst.msk [vmem:[#allocation5 + $0xc0] sm:$0xff] %vm476_vm1, %v2695_v26  ;;  %v2696_v10 = vadd.f32 %v2643_v53, %v2340_v62  ;;  %v2779_v47 = vld [vmem:[#allocation5 + $0x48] sm:$0xff]  ;;  %v2786_v53 = vld [vmem:[#allocation5 + $0x80] sm:$0xff] }
 0x4d7   : > { %2730 = vst.msk [vmem:[#allocation5 + $0xd8] sm:$0xff] %vm476_vm1, %v2698_v59 }
 0x4d8   : > { %2728 = vst.msk [vmem:[#allocation5 + $0xc8] sm:$0xff] %vm476_vm1, %v2696_v10  ;;  %2157 = vperm.xlu0 %3907, %v5272_v58   ;;  %v2807_v58 = vld [vmem:[#allocation4 + $0x28] sm:$0xff] }
 0x4d9   : > { %4162 = vrcp.f32 %v2807_v58  ;;  %v2787_v10 = vld [vmem:[#allocation5 + $0x88] sm:$0xff] }
 0x4da   : > { %2162 = vperm.xlu1 %3906, %v5217_v41   ;;  %v2808_v41 = vld [vmem:[#allocation4 + $0x30] sm:$0xff] }
 0x4db   : > { %4164 = vrcp.f32 %v2808_v41  ;;  %v2784_v41 = vld [vmem:[#allocation5 + $0x70] sm:$0xff] }
 0x4dc   : > { %2167 = vperm.xlu0 %3907, %v5376_v16   ;;  %v4153_v16 = vpop.eup %4152 }
 0x4dd   : > { %v4155_v51 = vpop.eup %4154 }
 0x4de   : > { %2172 = vperm.xlu1 %3906, %v5381_v13   ;;  %v2809_v13 = vld [vmem:[#allocation4 + $0x38] sm:$0xff] }
 0x4df   : > { %4166 = vrcp.f32 %v2809_v13 }
 0x4e0   : > { %2177 = vperm.xlu0 %3907, %v5387_v54   ;;  %v4157_v54 = vpop.eup %4156 }
 0x4e1   : > { %v4159_v27 = vpop.eup %4158 }
 0x4e2   : > { %2182 = vperm.xlu1 %3906, %v5393_v18   ;;  %v2303_v18 = vpop.permute.xlu1 %2302  ;;  %v4161_v24 = vpop.eup %4160 }
 0x4e3   : > { %v4163_v11 = vpop.eup %4162  ;;  %v2344_v61 = vmul.f32 %v2303_v18, %v2152_v56  ;;  %v2782_v18 = vld [vmem:[#allocation5 + $0x60] sm:$0xff]  ;;  %v3975_v56 = vld [vmem:[%s5673_s5 + $0x8] sm:$0xff]  }
 0x4e4   : > { %2187 = vperm.xlu0 %3907, %v5398_v37   ;;  %v2153_v37 = vld [vmem:[#allocation5 + $0xf0] sm:$0xff]  ;;  %3727 = vmatprep.subr.bf16.mxu1 %v3975_v56 }
 0x4e5   : > { %v2345_v57 = vmul.f32 %v2308_v39, %v2153_v37  ;;  %v4165_v4 = vpop.eup %4164  ;;  %v2783_v37 = vld [vmem:[#allocation5 + $0x68] sm:$0xff]  ;;  %3728 = vmatpush3.bf16.msra.mxu1 %v3975_v56 }
 0x4e6   : > { %2192 = vperm.xlu1 %3906, %v5413_v42   ;;  %v2151_v42 = vld [vmem:[#allocation5 + $0xe0] sm:$0xff]  ;;  %v2313_v12 = vpop.permute.xlu1 %2312 }
 0x4e7   : > { %v2343_v8 = vmul.f32 %v2298_v22, %v2151_v42  ;;  %v2346_v7 = vmul.f32 %v2313_v12, %v2154_v17 }
 0x4e8   : > { %2868 = vperm.xlu0 %3907, %v4153_v16   ;;  %v2785_v16 = vld [vmem:[#allocation5 + $0x78] sm:$0xff] }
 0x4e9   : > { %v4167_v44 = vpop.eup %4166 }
 0x4ea   : > { %2873 = vperm.xlu1 %3906, %v4155_v51  }
 0x4ec   : > { %2878 = vperm.xlu0 %3907, %v4157_v54  }
 0x4ee   : > { %2883 = vperm.xlu1 %3906, %v4159_v27  }
 0x4f0   : > { %2888 = vperm.xlu0 %3907, %v4161_v24  }
 0x4f2   : > { %2893 = vperm.xlu1 %3906, %v4163_v11  }
 0x4f3   : > { %v3723_v38 = vpop.f32.mrb[44].mxu0 }
 0x4f4   : > { %v2701_v43 = vadd.f32 %v3723_v38, %v2345_v57  ;;  %v2656_v32 = vpop.f32.mrb[45].mxu0  ;;  %2898 = vperm.xlu0 %3907, %v4165_v4   ;;  %v2796_v57 = vld [vmem:[#allocation5 + $0xd0] sm:$0xff]  ;;  %v2797_v38 = vld [vmem:[#allocation5 + $0xd8] sm:$0xff] }
 0x4f5   : > { %v2699_v35 = vadd.f32 %v2656_v32, %v2343_v8  ;;  %v3724_v1 = vpop.f32.mrb[46].mxu0  ;;  %v2794_v32 = vld [vmem:[#allocation5 + $0xc0] sm:$0xff] }
 0x4f6   : > { %2903 = vperm.xlu1 %3906, %v4167_v44   ;;  %2733 = vst.msk [vmem:[#allocation5 + $0xf0] sm:$0xff] %vm476_vm1, %v2701_v43  ;;  %v2702_v49 = vadd.f32 %v3724_v1, %v2346_v7  ;;  %v2659_v25 = vpop.f32.mrb[47].mxu0  ;;  %v2795_v1 = vld [vmem:[#allocation5 + $0xc8] sm:$0xff] }
 0x4f7   : > { %2731 = vst.msk [vmem:[#allocation5 + $0xe0] sm:$0xff] %vm476_vm1, %v2699_v35  ;;  %v2700_v50 = vadd.f32 %v2659_v25, %v2344_v61 }
 0x4f8   : > { %2734 = vst.msk [vmem:[#allocation5 + $0xf8] sm:$0xff] %vm476_vm1, %v2702_v49 }
 0x4f9   : > { %2732 = vst.msk [vmem:[#allocation5 + $0xe8] sm:$0xff] %vm476_vm1, %v2700_v50  ;;  %v2790_v50 = vld [vmem:[#allocation5 + $0xa0] sm:$0xff] }
 0x521   : > { %v2919_v14 = vpop.permute.xlu0 %2918 }
 0x522   : > { %v3036_v40 = vmul.f32 %v2919_v14, %v2780_v48  ;;  %v2791_v14 = vld [vmem:[#allocation5 + $0xa8] sm:$0xff] }
 0x527   : > { %v2959_v29 = vpop.permute.xlu0 %2958 }
 0x528   : > { %v3044_v19 = vmul.f32 %v2959_v29, %v2788_v34 }
 0x529   : > { %v2924_v6 = vpop.permute.xlu1 %2923 }
 0x52a   : > { %v3037_v46 = vmul.f32 %v2924_v6, %v2781_v3  ;;  %v2792_v6 = vld [vmem:[#allocation5 + $0xb0] sm:$0xff] }
 0x52b   : > { %v2909_v23 = vpop.permute.xlu0 %2908 }
 0x52c   : > { %v3908_v9 = vpack.i.bf16 %v3037_v46, %v3036_v40  ;;  %v3034_v26 = vmul.f32 %v2909_v23, %v2778_v30  ;;  %v2799_v30 = vld [vmem:[#allocation5 + $0xe8] sm:$0xff] }
 0x52d   : > { %v2964_v63 = vpop.permute.xlu1 %2963 }
 0x52e   : > { %v3045_v2 = vmul.f32 %v2964_v63, %v2789_v5  ;;  %3909 = vrot.lane.b32.xlu1 %v3908_v9, %s4198_s30  ;;  %v2793_v9 = vld [vmem:[#allocation5 + $0xb8] sm:$0xff] }
 0x52f   : > { %v2949_v20 = vpop.permute.xlu0 %2948 }
 0x530   : > { %v3913_v45 = vpack.i.bf16 %v3045_v2, %v3044_v19  ;;  %v3042_v28 = vmul.f32 %v2949_v20, %v2786_v53  ;;  %v2798_v19 = vld [vmem:[#allocation5 + $0xe0] sm:$0xff]  ;;  %v2801_v53 = vld [vmem:[#allocation5 + $0xf8] sm:$0xff] }
 0x531   : > { %v2914_v62 = vpop.permute.xlu1 %2913 }
 0x532   : > { %v3035_v33 = vmul.f32 %v2914_v62, %v2779_v47  ;;  %3914 = vrot.lane.b32.xlu1 %v3913_v45, %s4199_s8 }
 0x533   : > { %v2939_v31 = vpop.permute.xlu0 %2938 }
 0x534   : > { %v3918_v59 = vpack.i.bf16 %v3035_v33, %v3034_v26  ;;  %v3040_v51 = vmul.f32 %v2939_v31, %v2784_v41  ;;  %v2800_v26 = vld [vmem:[#allocation5 + $0xf0] sm:$0xff] }
 0x535   : > { %v2954_v0 = vpop.permute.xlu1 %2953 }
 0x536   : > { %v3043_v15 = vmul.f32 %v2954_v0, %v2787_v10  ;;  %3919 = vrot.lane.b32.xlu0 %v3918_v59, %s4198_s30 }
 0x538   : > { %v3923_v58 = vpack.i.bf16 %v3043_v15, %v3042_v28  ;;  %v2123_v28 = vld [vmem:[#allocation5] sm:$0xff]  ;;  %v2124_v15 = vld [vmem:[#allocation5 + $0x8] sm:$0xff] }
 0x539   : > { %v2944_v13 = vpop.permute.xlu1 %2943 }
 0x53a   : > { %v3041_v22 = vmul.f32 %v2944_v13, %v2785_v16  ;;  %3924 = vrot.lane.b32.xlu0 %v3923_v58, %s4199_s8  ;;  %v2125_v13 = vld [vmem:[#allocation5 + $0x10] sm:$0xff] }
 0x53b   : > { %v2929_v27 = vpop.permute.xlu0 %2928 }
 0x53c   : > { %v3928_v54 = vpack.i.bf16 %v3041_v22, %v3040_v51  ;;  %v3038_v24 = vmul.f32 %v2929_v27, %v2782_v18  ;;  %v2126_v22 = vld [vmem:[#allocation5 + $0x18] sm:$0xff] }
 0x53d   : > { %v2934_v39 = vpop.permute.xlu1 %2933 }
 0x53e   : > { %v3039_v11 = vmul.f32 %v2934_v39, %v2783_v37  ;;  %3929 = vrot.lane.b32.xlu1 %v3928_v54, %s4198_s30  ;;  %v2127_v39 = vld [vmem:[#allocation5 + $0x20] sm:$0xff] }
 0x53f   : > { %v2969_v17 = vpop.permute.xlu0 %2968 }
 0x540   : > { %v3933_v42 = vpack.i.bf16 %v3039_v11, %v3038_v24  ;;  %v3046_v29 = vmul.f32 %v2969_v17, %v2790_v50 }
 0x541   : > { %v2974_v12 = vpop.permute.xlu1 %2973 }
 0x542   : > { %3934 = vrot.lane.b32.xlu0 %v3933_v42, %s4198_s30  ;;  %v3047_v48 = vmul.f32 %v2974_v12, %v2791_v14  ;;  %v2128_v42 = vld [vmem:[#allocation5 + $0x28] sm:$0xff] }
 0x543   : > { %v2999_v4 = vpop.permute.xlu0 %2998 }
 0x544   : > { %v3052_v8 = vmul.f32 %v2999_v4, %v2796_v57  ;;  %v3948_v5 = vpack.i.bf16 %v3047_v48, %v3046_v29  ;;  %v2129_v57 = vld [vmem:[#allocation5 + $0x30] sm:$0xff]  ;;  %v5858_v4 = vld [vmem:[#allocation33_spill] sm:$0xff] }
 0x545   : > { %v3004_v44 = vpop.permute.xlu1 %3003 }
 0x546   : > { %v3053_v7 = vmul.f32 %v3004_v44, %v2797_v38  ;;  %v2130_v38 = vld [vmem:[#allocation5 + $0x38] sm:$0xff] }
 0x547   : > { %v2989_v61 = vpop.permute.xlu0 %2988  ;;  %v5859_v44 = vld [vmem:[#allocation29_spill] sm:$0xff] }
 0x548   : > { %v3938_v43 = vpack.i.bf16 %v3053_v7, %v3052_v8  ;;  %v3050_v35 = vmul.f32 %v2989_v61, %v2794_v32  ;;  %v5860_v61 = vld [vmem:[#allocation31_spill] sm:$0xff] }
 0x549   : > { %v2994_v49 = vpop.permute.xlu1 %2993 }
 0x54a   : > { %v3051_v25 = vmul.f32 %v2994_v49, %v2795_v1  ;;  %3939 = vrot.lane.b32.xlu1 %v3938_v43, %s4200_s14  ;;  %v5861_v1 = vld [vmem:[#allocation28_spill] sm:$0xff] }
 0x54b   : > { %v2979_v40 = vpop.permute.xlu0 %2978 }
 0x54c   : > { %v3943_v3 = vpack.i.bf16 %v3051_v25, %v3050_v35  ;;  %v3048_v46 = vmul.f32 %v2979_v40, %v2792_v6 }
 0x54d   : > { %v2984_v23 = vpop.permute.xlu1 %2983 }
 0x54e   : > { %v3049_v34 = vmul.f32 %v2984_v23, %v2793_v9  ;;  %3944 = vrot.lane.b32.xlu0 %v3943_v3, %s4200_s14 }
 0x54f   : > { %v3009_v2 = vpop.permute.xlu0 %3008 }
 0x550   : > { %v3953_v63 = vpack.i.bf16 %v3049_v34, %v3048_v46  ;;  %v3054_v45 = vmul.f32 %v3009_v2, %v2798_v19 }
 0x551   : > { %v3014_v20 = vpop.permute.xlu1 %3013 }
 0x552   : > { %v3055_v47 = vmul.f32 %v3014_v20, %v2799_v30  ;;  %3949 = vrot.lane.b32.xlu0 %v3948_v5, %s4199_s8  ;;  %3954 = vrot.lane.b32.xlu1 %v3953_v63, %s4199_s8 }
 0x553   : > { %v3019_v33 = vpop.permute.xlu0 %3018 }
 0x554   : > { %v3958_v62 = vpack.i.bf16 %v3055_v47, %v3054_v45  ;;  %v3056_v59 = vmul.f32 %v3019_v33, %v2800_v26 }
 0x555   : > { %v3024_v10 = vpop.permute.xlu1 %3023 }
 0x556   : > { %v3057_v0 = vmul.f32 %v3024_v10, %v2801_v53  ;;  %3959 = vrot.lane.b32.xlu0 %v3958_v62, %s4200_s14 }
 0x557   : > { %v2158_v21 = vpop.permute.xlu0 %2157 }
 0x558   : > { %v3963_v31 = vpack.i.bf16 %v3057_v0, %v3056_v59  ;;  %v2315_v58 = vmul.f32 %v2158_v21, %v2123_v28 }
 0x559   : > { %v2163_v41 = vpop.permute.xlu1 %2162 }
 0x55a   : > { %v2316_v16 = vmul.f32 %v2163_v41, %v2124_v15  ;;  %3964 = vrot.lane.b32.xlu1 %v3963_v31, %s4200_s14  ;;  %v2671_v51 = vadd.f32 %v5301_v60, %v2315_v58 }
 0x55b   : > { %v2168_v18 = vpop.permute.xlu0 %2167 }
 0x55c   : > { %v2672_v54 = vadd.f32 %v5306_v52, %v2316_v16  ;;  %2703 = vst.msk [vmem:[#allocation5] sm:$0xff] %vm476_vm1, %v2671_v51  ;;  %v2317_v27 = vmul.f32 %v2168_v18, %v2125_v13 }
 0x55d   : > { %v2173_v24 = vpop.permute.xlu1 %2172 }
 0x55e   : > { %2704 = vst.msk [vmem:[#allocation5 + $0x8] sm:$0xff] %vm476_vm1, %v2672_v54  ;;  %v2318_v37 = vmul.f32 %v2173_v24, %v2126_v22  ;;  %v2673_v11 = vadd.f32 %v5298_v55, %v2317_v27 }
 0x55f   : > { %v2178_v12 = vpop.permute.xlu0 %2177 }
 0x560   : > { %v2674_v17 = vadd.f32 %v5304_v36, %v2318_v37  ;;  %2705 = vst.msk [vmem:[#allocation5 + $0x10] sm:$0xff] %vm476_vm1, %v2673_v11  ;;  %v2319_v60 = vmul.f32 %v2178_v12, %v2127_v39 }
 0x561   : > { %v2183_v56 = vpop.permute.xlu1 %2182 }
 0x562   : > { %2706 = vst.msk [vmem:[#allocation5 + $0x18] sm:$0xff] %vm476_vm1, %v2674_v17  ;;  %v2320_v52 = vmul.f32 %v2183_v56, %v2128_v42  ;;  %v2675_v8 = vadd.f32 %v5858_v4, %v2319_v60 }
 0x563   : > { %v2188_v43 = vpop.permute.xlu0 %2187  ;;  %v2770_v10 = vld [vmem:[#allocation5] sm:$0xff] }
 0x564   : > { %v2676_v7 = vadd.f32 %v5859_v44, %v2320_v52  ;;  %2707 = vst.msk [vmem:[#allocation5 + $0x20] sm:$0xff] %vm476_vm1, %v2675_v8  ;;  %v2321_v55 = vmul.f32 %v2188_v43, %v2129_v57 }
 0x565   : > { %v2193_v32 = vpop.permute.xlu1 %2192  ;;  %v2771_v0 = vld [vmem:[#allocation5 + $0x8] sm:$0xff] }
 0x566   : > { %2708 = vst.msk [vmem:[#allocation5 + $0x28] sm:$0xff] %vm476_vm1, %v2676_v7  ;;  %v2322_v36 = vmul.f32 %v2193_v32, %v2130_v38  ;;  %v2677_v35 = vadd.f32 %v5860_v61, %v2321_v55 }
 0x567   : > { %v2869_v50 = vpop.permute.xlu0 %2868  ;;  %v2772_v2 = vld [vmem:[#allocation5 + $0x10] sm:$0xff] }
 0x568   : > { %v2678_v49 = vadd.f32 %v5861_v1, %v2322_v36  ;;  %2709 = vst.msk [vmem:[#allocation5 + $0x30] sm:$0xff] %vm476_vm1, %v2677_v35  ;;  %v3026_v58 = vmul.f32 %v2869_v50, %v2770_v10 }
 0x569   : > { %v2874_v25 = vpop.permute.xlu1 %2873  ;;  %v2773_v45 = vld [vmem:[#allocation5 + $0x18] sm:$0xff] }
 0x56a   : > { %2710 = vst.msk [vmem:[#allocation5 + $0x38] sm:$0xff] %vm476_vm1, %v2678_v49  ;;  %v3027_v41 = vmul.f32 %v2874_v25, %v2771_v0 }
 0x56b   : > { %v2879_v29 = vpop.permute.xlu0 %2878  ;;  %v2774_v38 = vld [vmem:[#allocation5 + $0x20] sm:$0xff] }
 0x56c   : > { %v3028_v26 = vmul.f32 %v2879_v29, %v2772_v2 }
 0x56d   : > { %v2884_v14 = vpop.permute.xlu1 %2883  ;;  %v2775_v44 = vld [vmem:[#allocation5 + $0x28] sm:$0xff] }
 0x56e   : > { %v3029_v33 = vmul.f32 %v2884_v14, %v2773_v45 }
 0x56f   : > { %v2889_v3 = vpop.permute.xlu0 %2888  ;;  %v2776_v29 = vld [vmem:[#allocation5 + $0x30] sm:$0xff] }
 0x570   : > { %v3030_v55 = vmul.f32 %v2889_v3, %v2774_v38 }
 0x571   : > { %v2894_v48 = vpop.permute.xlu1 %2893 }
 0x572   : > { %v3031_v32 = vmul.f32 %v2894_v48, %v2775_v44 }
 0x573   : > { %v5608_v40 = vpop.permute.xlu0 %2898 }
 0x575   : > { %v5606_v6 = vpop.permute.xlu1 %2903 }
 0x5a0   : > { %v3910_v46 = vpop.permute.xlu1 %3909 }
 0x5a1   : > { %v3912_v63 = vunpack.i.h.bf16 %v3910_v46  ;;  %v3911_v19 = vunpack.i.l.bf16 %v3910_v46  ;;  %v2777_v46 = vld [vmem:[#allocation5 + $0x38] sm:$0xff] }
 0x5a3   : > { %v3157_v16 = vsel %vm476_vm1, %v3029_v33, %v3912_v63  ;;  %v3156_v13 = vsel %vm476_vm1, %v3028_v26, %v3911_v19  ;;  %v3033_v63 = vmul.f32 %v5606_v6, %v2777_v46 }
 0x5a4   : > { %v3915_v23 = vpop.permute.xlu1 %3914 }
 0x5a5   : > { %v3917_v30 = vunpack.i.h.bf16 %v3915_v23  ;;  %v3916_v20 = vunpack.i.l.bf16 %v3915_v23 }
 0x5a7   : > { %v3166_v51 = vsel %vm3162_vm4, %v3157_v16, %v3917_v30  ;;  %v3165_v22 = vsel %vm3162_vm4, %v3156_v13, %v3916_v20 }
 0x5a8   : > { %v3920_v9 = vpop.permute.xlu0 %3919 }
 0x5a9   : > { %v3922_v59 = vunpack.i.h.bf16 %v3920_v9  ;;  %v3921_v53 = vunpack.i.l.bf16 %v3920_v9 }
 0x5ab   : > { %v3155_v18 = vsel %vm476_vm1, %v3027_v41, %v3922_v59  ;;  %v3154_v27 = vsel %vm476_vm1, %v3026_v58, %v3921_v53  ;;  %v3461_v53 = vld [vmem:[%s5674_s6] ss:$0 sm:$0xff] }
 0x5ac   : > { %v3925_v34 = vpop.permute.xlu0 %3924 }
 0x5ad   : > { %v3927_v28 = vunpack.i.h.bf16 %v3925_v34  ;;  %v3926_v15 = vunpack.i.l.bf16 %v3925_v34  ;;  %v3032_v34 = vmul.f32 %v5608_v40, %v2776_v29 }
 0x5af   : > { %v3163_v39 = vsel %vm3162_vm4, %v3154_v27, %v3926_v15  ;;  %v3164_v11 = vsel %vm3162_vm4, %v3155_v18, %v3927_v28 }
 0x5b0   : > { %v5610_v5 = vpop.permute.xlu1 %3929 }
 0x5b1   : > { %v3932_v61 = vunpack.i.h.bf16 %v5610_v5  ;;  %v3931_v35 = vunpack.i.l.bf16 %v5610_v5 }
 0x5b3   : > { %v3161_v30 = vsel %vm476_vm1, %v3033_v63, %v3932_v61  ;;  %v3160_v20 = vsel %vm476_vm1, %v3032_v34, %v3931_v35 }
 0x5b4   : > { %v3935_v47 = vpop.permute.xlu0 %3934 }
 0x5b5   : > { %v3937_v57 = vunpack.i.h.bf16 %v3935_v47  ;;  %v3936_v4 = vunpack.i.l.bf16 %v3935_v47 }
 0x5b7   : > { %v3159_v49 = vsel %vm476_vm1, %v3031_v32, %v3937_v57  ;;  %v3158_v25 = vsel %vm476_vm1, %v3030_v55, %v3936_v4 }
 0x5bc   : > { %v3940_v62 = vpop.permute.xlu1 %3939 }
 0x5bd   : > { %v3942_v31 = vunpack.i.h.bf16 %v3940_v62  ;;  %v3941_v21 = vunpack.i.l.bf16 %v3940_v62 }
 0x5bf   : > { %v3175_v42 = vsel %vm3171_vm5, %v3166_v51, %v3942_v31  ;;  %v3174_v17 = vsel %vm3171_vm5, %v3165_v22, %v3941_v21 }
 0x5c0   : > { %v3945_v54 = vpop.permute.xlu0 %3944  ;;  %v3181_v8 = vpack.c.bf16 %v3175_v42, %v3174_v17 }
 0x5c1   : > { %v3947_v24 = vunpack.i.h.bf16 %v3945_v54  ;;  %v3946_v37 = vunpack.i.l.bf16 %v3945_v54 }
 0x5c3   : > { %v3172_v12 = vsel %vm3171_vm5, %v3163_v39, %v3946_v37  ;;  %v3173_v60 = vsel %vm3171_vm5, %v3164_v11, %v3947_v24 }
 0x5c4   : > { %v3180_v56 = vpack.c.bf16 %v3173_v60, %v3172_v12  ;;  %v3950_v52 = vpop.permute.xlu0 %3949  ;;  %v3955_v36 = vpop.permute.xlu1 %3954 }
 0x5c5   : > { %v3952_v7 = vunpack.i.h.bf16 %v3950_v52  ;;  %v3951_v43 = vunpack.i.l.bf16 %v3950_v52  ;;  %v3957_v9 = vunpack.i.h.bf16 %v3955_v36  ;;  %v3956_v23 = vunpack.i.l.bf16 %v3955_v36 }
 0x5c6   : > { %3729 = vmatprep.mubr.msk.bf16.mxu1 %vm394_vm0, %v3180_v56 }
 0x5c7   : > { %3730 = vmatmul.mubr.msk.bf16.vlgmr.msra.gmra.mrb[40].mxu1 %vm394_vm0, %v3181_v8  ;;  %v3167_v48 = vsel %vm3162_vm4, %v3158_v25, %v3951_v43  ;;  %v3168_v3 = vsel %vm3162_vm4, %v3159_v49, %v3952_v7  ;;  %v3170_v26 = vsel %vm3162_vm4, %v3161_v30, %v3957_v9  ;;  %v3169_v33 = vsel %vm3162_vm4, %v3160_v20, %v3956_v23 }
 0x5c8   : > { %v3960_v1 = vpop.permute.xlu0 %3959 }
 0x5c9   : > { %v3962_v50 = vunpack.i.h.bf16 %v3960_v1  ;;  %v3961_v14 = vunpack.i.l.bf16 %v3960_v1 }
 0x5cb   : > { %v3176_v5 = vsel %vm3171_vm5, %v3167_v48, %v3961_v14  ;;  %v3177_v19 = vsel %vm3171_vm5, %v3168_v3, %v3962_v50 }
 0x5cc   : > { %v3182_v2 = vpack.c.bf16 %v3177_v19, %v3176_v5  ;;  %v3965_v45 = vpop.permute.xlu1 %3964 }
 0x5cd   : > { %v3967_v47 = vunpack.i.h.bf16 %v3965_v45  ;;  %v3966_v62 = vunpack.i.l.bf16 %v3965_v45 }
 0x5ce   : > { %3733 = vmatprep.mubr.msk.bf16.mxu1 %vm394_vm0, %v3182_v2 }
 0x5cf   : > { %v3179_v6 = vsel %vm3171_vm5, %v3170_v26, %v3967_v47  ;;  %v3178_v40 = vsel %vm3171_vm5, %v3169_v33, %v3966_v62 }
 0x5d0   : > { %v3183_v59 = vpack.c.bf16 %v3179_v6, %v3178_v40 }
 0x5d2   : > { %3734 = vmatmul.mubr.msk.bf16.gmra.mrb[44].mxu1 %vm394_vm0, %v3183_v59 }
 0x69a   : > { %v3731_v10 = vpop.f32.mrb[40].mxu1 }
 0x69b   : > { %v3262_v0 = vadd.f32 %v3731_v10, %v3461_v53  ;;  %v3253_v28 = vpop.f32.mrb[41].mxu1 }
 0x69c   : > { %v3254_v15 = vadd.f32 %v3461_v53, %v3253_v28  ;;  %v3732_v31 = vpop.f32.mrb[42].mxu1 }
 0x69d   : > { %3286 = vst.msk [vmem:[%s359_s19 + $0x10] sm:$0xff] %vm394_vm0, %v3262_v0  ;;  %v3265_v21 = vadd.f32 %v3732_v31, %v3461_v53  ;;  %v3256_v58 = vpop.f32.mrb[43].mxu1 }
 0x69e   : > { %3284 = vst.msk [vmem:[%s359_s19] sm:$0xff] %vm394_vm0, %v3254_v15  ;;  %v3257_v41 = vadd.f32 %v3461_v53, %v3256_v58 }
 0x69f   : > { %3287 = vst.msk [vmem:[%s359_s19 + $0x18] sm:$0xff] %vm394_vm0, %v3265_v21 }
 0x6a0   : > { %3285 = vst.msk [vmem:[%s359_s19 + $0x8] sm:$0xff] %vm394_vm0, %v3257_v41 }
 0x6a5   : > { %v3735_v16 = vpop.f32.mrb[44].mxu1 }
 0x6a6   : > { %v3278_v13 = vadd.f32 %v3735_v16, %v3461_v53  ;;  %v3269_v51 = vpop.f32.mrb[45].mxu1 }
 0x6a7   : > { %v3270_v22 = vadd.f32 %v3461_v53, %v3269_v51  ;;  %v3736_v54 = vpop.f32.mrb[46].mxu1 }
 0x6a8   : > { %3290 = vst.msk [vmem:[%s359_s19 + $0x30] sm:$0xff] %vm394_vm0, %v3278_v13  ;;  %v3281_v18 = vadd.f32 %v3736_v54, %v3461_v53  ;;  %v3272_v27 = vpop.f32.mrb[47].mxu1 }
 0x6a9   : > { %3288 = vst.msk [vmem:[%s359_s19 + $0x20] sm:$0xff] %vm394_vm0, %v3270_v22  ;;  %v3273_v24 = vadd.f32 %v3461_v53, %v3272_v27 }
 0x6aa   : > { %3291 = vst.msk [vmem:[%s359_s19 + $0x38] sm:$0xff] %vm394_vm0, %v3281_v18 }
 0x6ab   : > { %3289 = vst.msk [vmem:[%s359_s19 + $0x28] sm:$0xff] %vm394_vm0, %v3273_v24 }
 0x6ac PF: > { %s17_s26 = sadd.s32 1, %s4190_s26   ;;  %s5862_s24 = smov %s4186_s25 }
 0x6ad   : > { %p14_p5 = scmp.ge.s32.totalorder %s17_s26, 4   ;;  %s5863_s25 = smov %s5865_s27 }
 0x6af   :  { %16 = sbr.rel (!%p14_p5) target bundleno = 2 (0x2), region = 92 }

</bundles_post_ra>
